<compile_context>
chip_gen: v6e
topology: v6e:2x2x1
jax: 0.10.0
libtpu: 0.0.40
codegen_flags: <defaults>
</compile_context>

<pallas_src>
import functools

import jax
import jax.numpy as jnp
import numpy as np
from jax.experimental import pallas as pl
from jax.experimental.pallas import tpu as pltpu

KSIZE = 5      # Conv1d kernel_size=5, stride=1, padding=2 -> 'same'
PADL = KSIZE // 2
TB_MAX = 128   # max samples per grid step (per-core tile; review: 128 for v5e/v7x)
NPAD = 128     # lane-padded width of the fused policy+value head output


def _round_up(n, m):
    return ((n + m - 1) // m) * m


# ---------------------------------------------------------------------------
# Kernel
# ---------------------------------------------------------------------------
def actor_critic_kernel(
    x_ref,                      # (1, L*tb, 5*Cin) f32  -- im2col'd conv1 input
    w1_ref, b1_ref,             # (5*Cin, 64) bf16, (1, 64) f32
    w2_ref, b2_ref,             # (5, 64, 128) bf16, (1, 128) f32
    w3_ref, b3_ref,             # (5, 128, 256) bf16, (1, 256) f32
    wfc_ref, bfc_ref,           # (L, 256, 512) bf16, (1, 512) f32
    wat_ref, bat_ref,           # (512, 512) bf16, (1, 512) f32
    whd_ref, bhd_ref,           # (512, NPAD) bf16, (1, NPAD) f32
    out_ref,                    # (tb, NPAD) f32
    h1_ref,                     # ((L+4)*tb, 64) bf16 scratch  (zero-padded conv2 input)
    h2_ref,                     # ((L+4)*tb, 128) bf16 scratch (zero-padded conv3 input)
    h3_ref,                     # (L*tb, 256) bf16 scratch     (FC input)
    acc_ref,                    # (tb, 512) f32 scratch        (FC accumulator)
    *, tb, length,
):
    rows = length * tb
    pad = 2 * tb

    # ---- conv1 + BN + ReLU: tap-fused single GEMM (K = 5*Cin) -----------------
    x = x_ref[0].astype(jnp.bfloat16)                       # (rows, 5*Cin)
    c1 = jnp.dot(x, w1_ref[...], preferred_element_type=jnp.float32)
    h1 = jnp.maximum(c1 + b1_ref[...], 0.0).astype(jnp.bfloat16)
    # Stage into padded scratch: 2*tb zero rows at each end implement 'same' padding.
    h1_ref[pl.ds(0, pad), :] = jnp.zeros((pad, h1_ref.shape[1]), jnp.bfloat16)
    h1_ref[pl.ds(pad + rows, pad), :] = jnp.zeros((pad, h1_ref.shape[1]), jnp.bfloat16)
    h1_ref[pl.ds(pad, rows), :] = h1

    # ---- conv2 / conv3: 5 taps as static VMEM-slice GEMMs (no shift copies) ----
    def conv_taps(src_ref, w_ref, b_ref):
        acc = jnp.dot(src_ref[pl.ds(0, rows), :], w_ref[0],
                      preferred_element_type=jnp.float32)
        for t in range(1, KSIZE):
            acc = acc + jnp.dot(src_ref[pl.ds(t * tb, rows), :], w_ref[t],
                                preferred_element_type=jnp.float32)
        return jnp.maximum(acc + b_ref[...], 0.0).astype(jnp.bfloat16)

    h2 = conv_taps(h1_ref, w2_ref, b2_ref)                   # (rows, 128)
    h2_ref[pl.ds(0, pad), :] = jnp.zeros((pad, h2_ref.shape[1]), jnp.bfloat16)
    h2_ref[pl.ds(pad + rows, pad), :] = jnp.zeros((pad, h2_ref.shape[1]), jnp.bfloat16)
    h2_ref[pl.ds(pad, rows), :] = h2

    h3_ref[...] = conv_taps(h2_ref, w3_ref, b3_ref)          # (rows, 256)

    # ---- Flatten(256*L) + Linear(512) + ReLU: L GEMMs into an f32 VMEM scratch --
    acc_ref[...] = jnp.dot(h3_ref[pl.ds(0, tb), :], wfc_ref[0],
                           preferred_element_type=jnp.float32)
    for l in range(1, length):
        acc_ref[...] += jnp.dot(h3_ref[pl.ds(l * tb, tb), :], wfc_ref[l],
                                preferred_element_type=jnp.float32)
    feat = jnp.maximum(acc_ref[...] + bfc_ref[...], 0.0).astype(jnp.bfloat16)

    # ---- attention on a length-1 sequence == out_proj(V); folded host-side -----
    a = jnp.maximum(
        jnp.dot(feat, wat_ref[...], preferred_element_type=jnp.float32) + bat_ref[...],
        0.0,
    ).astype(jnp.bfloat16)                                   # (tb, 512)

    # ---- fused policy+value head, lane-padded to NPAD: one lane-dense store ----
    out_ref[...] = (jnp.dot(a, whd_ref[...], preferred_element_type=jnp.float32)
                    + bhd_ref[...])


# ---------------------------------------------------------------------------
# Parameter construction (deterministic, synthetic) + layout / folding prep
# ---------------------------------------------------------------------------
def build_params(key, cin, L, adim):
    assert adim + 1 <= NPAD, "fused head requires action_dim + 1 <= 128"
    keys = iter(jax.random.split(key, 64))
    hi = jax.lax.Precision.HIGHEST

    def nrm(shape, scale=0.05):
        return scale * jax.random.normal(next(keys), shape, dtype=jnp.float32)

    params = {}

    # Conv + BN stacks: fold BN scale into weights, conv-bias + BN shift into bias.
    convs = []
    in_c = cin
    for li, out_c in enumerate((64, 128, 256)):
        w = nrm((out_c, in_c, KSIZE))              # PyTorch Conv1d weight (Cout, Cin, K)
        cb = nrm((out_c,))
        gamma = 1.0 + nrm((out_c,))
        beta = nrm((out_c,))
        rmean = nrm((out_c,))
        rvar = 1.0 + jnp.abs(nrm((out_c,)))
        s = gamma / jnp.sqrt(rvar + 1e-5)
        bias = s * (cb - rmean) + beta
        wk = jnp.transpose(w, (2, 1, 0)) * s[None, None, :]    # (K, Cin, Cout), BN folded
        if li == 0:
            wk = wk.reshape(KSIZE * in_c, out_c)               # tap-fused conv1 weight
        convs.append((wk.astype(jnp.bfloat16), bias.reshape(1, -1)))
        in_c = out_c
    params["convs"] = convs

    # CNN fc: Linear(256*L, 512).  PyTorch flatten index = c*L + l.
    wfc = nrm((512, 256 * L))
    bfc = nrm((512,))
    params["wfc"] = jnp.transpose(wfc.reshape(512, 256, L), (2, 1, 0)).astype(jnp.bfloat16)
    params["bfc"] = bfc.reshape(1, 512)

    # MultiheadAttention(512, 8) on a length-1 sequence: only V-proj + out_proj matter.
    # Fold Wv -> Wo -> attention.fc into one matrix + bias.
    in_proj_w = nrm((3 * 512, 512))
    in_proj_b = nrm((3 * 512,))
    wv, bv = in_proj_w[2 * 512:], in_proj_b[2 * 512:]
    wo, bo = nrm((512, 512)), nrm((512,))
    wafc, bafc = nrm((512, 512)), nrm((512,))
    wv_t, wo_t, wafc_t = wv.T, wo.T, wafc.T
    w_fused = jnp.matmul(jnp.matmul(wv_t, wo_t, precision=hi), wafc_t, precision=hi)
    b_fused = jnp.matmul(jnp.matmul(bv, wo_t, precision=hi) + bo, wafc_t, precision=hi) + bafc
    params["wat"] = w_fused.astype(jnp.bfloat16)
    params["bat"] = b_fused.reshape(1, 512)

    # Heads: concat policy (adim) + value (1), zero-pad to NPAD lanes.
    wpol, bpol = nrm((adim, 512)), nrm((adim,))
    wval, bval = nrm((1, 512)), nrm((1,))
    whd = jnp.zeros((512, NPAD), jnp.float32)
    whd = whd.at[:, :adim].set(wpol.T).at[:, adim:adim + 1].set(wval.T)
    bhd = jnp.zeros((NPAD,), jnp.float32).at[:adim].set(bpol).at[adim].set(bval[0])
    params["whd"] = whd.astype(jnp.bfloat16)
    params["bhd"] = bhd.reshape(1, NPAD)
    return params


# ---------------------------------------------------------------------------
# Pallas wrapper
# ---------------------------------------------------------------------------
@functools.partial(jax.jit, static_argnames=("adim",))
def actor_critic_forward(x_ncl, params, *, adim):
    """x_ncl: (B, C, L) float32 — same layout PyTorch Conv1d expects."""
    assert adim + 1 <= NPAD
    B, C, L = x_ncl.shape
    tb = min(TB_MAX, _round_up(max(B, 1), 8))       # adaptive batch tile, cap 128
    Bpad = _round_up(B, tb)
    T = Bpad // tb

    x = x_ncl.astype(jnp.float32)
    if Bpad != B:
        x = jnp.pad(x, ((0, Bpad - B), (0, 0), (0, 0)))

    # Host-side im2col for conv1 (tap fusion): xt[t_grid, l*tb + b, t*C + c]
    #   = x[t_grid*tb + b, c, l + t - 2]   (zero padded along L).
    xp = jnp.pad(x, ((0, 0), (0, 0), (PADL, PADL)))                    # (Bpad, C, L+4)
    taps = jnp.stack([xp[:, :, t:t + L] for t in range(KSIZE)], axis=0)  # (K, Bpad, C, L)
    xt = jnp.transpose(taps, (3, 1, 0, 2))                             # (L, Bpad, K, C)
    xt = xt.reshape(L, T, tb, KSIZE * C)
    xt = jnp.transpose(xt, (1, 0, 2, 3)).reshape(T, L * tb, KSIZE * C)

    (w1, b1), (w2, b2), (w3, b3) = params["convs"]
    args = (xt, w1, b1, w2, b2, w3, b3,
            params["wfc"], params["bfc"],
            params["wat"], params["bat"],
            params["whd"], params["bhd"])

    def full(a):
        nd = a.ndim
        return pl.BlockSpec(a.shape, lambda t, _nd=nd: (0,) * _nd)

    in_specs = [pl.BlockSpec((1, L * tb, KSIZE * C), lambda t: (t, 0, 0))] + \
               [full(a) for a in args[1:]]
    out_shape = jax.ShapeDtypeStruct((Bpad, NPAD), jnp.float32)
    out_specs = pl.BlockSpec((tb, NPAD), lambda t: (t, 0))

    kernel = functools.partial(actor_critic_kernel, tb=tb, length=L)
    # NOTE: weight inputs are grid-invariant; if VMEM gets tight at larger tb/L,
    # single-buffer them via pipeline_mode=pl.Buffered(1) on their BlockSpecs.
    out = pl.pallas_call(
        kernel,
        out_shape=out_shape,
        grid=(T,),
        in_specs=in_specs,
        out_specs=out_specs,
        scratch_shapes=[
            pltpu.VMEM(((L + 4) * tb, 64), jnp.bfloat16),    # padded conv2 input
            pltpu.VMEM(((L + 4) * tb, 128), jnp.bfloat16),   # padded conv3 input
            pltpu.VMEM((L * tb, 256), jnp.bfloat16),         # FC input staging
            pltpu.VMEM((tb, 512), jnp.float32),              # FC accumulator
        ],
        compiler_params=pltpu.CompilerParams(
            dimension_semantics=("parallel",),
            vmem_limit_bytes=32 << 20,
        ),
    )(*args)

    return out[:B, :adim], out[:B, adim:adim + 1]


# ---------------------------------------------------------------------------
# Pure-JAX reference (same prepared/folded params, same bf16 rounding points)
# ---------------------------------------------------------------------------
def reference_forward(x_ncl, params, adim):
    hi = jax.lax.Precision.HIGHEST
    f32 = jnp.float32

    def bf(v):  # round to bf16 at the same points as the kernel
        return v.astype(jnp.bfloat16).astype(f32)

    B, C, L = x_ncl.shape
    x = jnp.transpose(x_ncl, (0, 2, 1)).astype(f32)   # (B, L, C)
    (w1f, b1), (w2, b2), (w3, b3) = params["convs"]
    w1 = w1f.astype(f32).reshape(KSIZE, C, 64)

    def conv(h, w, b):
        w = w.astype(f32)
        _, L_, _ = h.shape
        hp = jnp.pad(bf(h), ((0, 0), (PADL, PADL), (0, 0)))
        y = None
        for t in range(KSIZE):
            p = jnp.einsum("blc,co->blo", hp[:, t:t + L_, :], w[t], precision=hi)
            y = p if y is None else y + p
        return jnp.maximum(y + b[None], 0.0)

    h = conv(x, w1, b1)
    h = conv(h, w2, b2)
    h = conv(h, w3, b3)
    feat = jnp.einsum("blc,lco->bo", bf(h), params["wfc"].astype(f32),
                      precision=hi) + params["bfc"]
    feat = jnp.maximum(feat, 0.0)
    a = jnp.maximum(jnp.dot(bf(feat), params["wat"].astype(f32), precision=hi)
                    + params["bat"], 0.0)
    out = jnp.dot(bf(a), params["whd"].astype(f32), precision=hi) + params["bhd"]
    return out[:, :adim], out[:, adim:adim + 1]


# ---------------------------------------------------------------------------
if __name__ == "__main__":
    B, CIN, L, ADIM = 2, 4, 16, 8          # batch, input_channels, input_dim, action_dim
    key = jax.random.PRNGKey(0)
    kp, kx = jax.random.split(key)

    params = build_params(kp, CIN, L, ADIM)
    x = jax.random.normal(kx, (B, CIN, L), dtype=jnp.float32)   # PyTorch NCL input

    logits, value = actor_critic_forward(x, params, adim=ADIM)
    jax.block_until_ready((logits, value))

    ref_logits, ref_value = reference_forward(x, params, ADIM)
    assert logits.shape == (B, ADIM) and value.shape == (B, 1)
    np.testing.assert_allclose(np.asarray(logits), np.asarray(ref_logits),
                               rtol=1e-2, atol=2e-3)
    np.testing.assert_allclose(np.asarray(value), np.asarray(ref_value),
                               rtol=1e-2, atol=2e-3)
    print("KERNEL_OK")
</pallas_src>

<mosaic_0001>
module attributes {stable_mosaic.version = 11 : i64} {
  func.func @actor_critic_kernel(%arg0: i32, %arg1: memref<1x128x20xf32, #tpu.memory_space<vmem>>, %arg2: memref<20x64xbf16, #tpu.memory_space<vmem>>, %arg3: memref<1x64xf32, #tpu.memory_space<vmem>>, %arg4: memref<5x64x128xbf16, #tpu.memory_space<vmem>>, %arg5: memref<1x128xf32, #tpu.memory_space<vmem>>, %arg6: memref<5x128x256xbf16, #tpu.memory_space<vmem>>, %arg7: memref<1x256xf32, #tpu.memory_space<vmem>>, %arg8: memref<16x256x512xbf16, #tpu.memory_space<vmem>>, %arg9: memref<1x512xf32, #tpu.memory_space<vmem>>, %arg10: memref<512x512xbf16, #tpu.memory_space<vmem>>, %arg11: memref<1x512xf32, #tpu.memory_space<vmem>>, %arg12: memref<512x128xbf16, #tpu.memory_space<vmem>>, %arg13: memref<1x128xf32, #tpu.memory_space<vmem>>, %arg14: memref<8x128xf32, #tpu.memory_space<vmem>>, %arg15: memref<160x64xbf16, #tpu.memory_space<vmem>>, %arg16: memref<160x128xbf16, #tpu.memory_space<vmem>>, %arg17: memref<128x256xbf16, #tpu.memory_space<vmem>>, %arg18: memref<8x512xf32, #tpu.memory_space<vmem>>) attributes {dimension_semantics = [#tpu.dimension_semantics<parallel>], iteration_bounds = array<i64: 1>, scalar_prefetch = 0 : i64, scratch_operands = 4 : i64, tpu.core_type = #tpu.core_type<tc>, window_params = [{transform_indices = @transform_0, window_bounds = array<i64: 1, 128, 20>}, {pipeline_mode = #tpu.pipeline_mode<synchronous>, transform_indices = @transform_1, window_bounds = array<i64: 20, 64>}, {pipeline_mode = #tpu.pipeline_mode<synchronous>, transform_indices = @transform_2, window_bounds = array<i64: 1, 64>}, {pipeline_mode = #tpu.pipeline_mode<synchronous>, transform_indices = @transform_3, window_bounds = array<i64: 5, 64, 128>}, {pipeline_mode = #tpu.pipeline_mode<synchronous>, transform_indices = @transform_4, window_bounds = array<i64: 1, 128>}, {pipeline_mode = #tpu.pipeline_mode<synchronous>, transform_indices = @transform_5, window_bounds = array<i64: 5, 128, 256>}, {pipeline_mode = #tpu.pipeline_mode<synchronous>, transform_indices = @transform_6, window_bounds = array<i64: 1, 256>}, {pipeline_mode = #tpu.pipeline_mode<synchronous>, transform_indices = @transform_7, window_bounds = array<i64: 16, 256, 512>}, {pipeline_mode = #tpu.pipeline_mode<synchronous>, transform_indices = @transform_8, window_bounds = array<i64: 1, 512>}, {pipeline_mode = #tpu.pipeline_mode<synchronous>, transform_indices = @transform_9, window_bounds = array<i64: 512, 512>}, {pipeline_mode = #tpu.pipeline_mode<synchronous>, transform_indices = @transform_10, window_bounds = array<i64: 1, 512>}, {pipeline_mode = #tpu.pipeline_mode<synchronous>, transform_indices = @transform_11, window_bounds = array<i64: 512, 128>}, {pipeline_mode = #tpu.pipeline_mode<synchronous>, transform_indices = @transform_12, window_bounds = array<i64: 1, 128>}, {transform_indices = @transform_13, window_bounds = array<i64: 8, 128>}]} {
    %c0 = arith.constant 0 : index
    %c0_0 = arith.constant 0 : index
    %c0_1 = arith.constant 0 : index
    %0 = vector.load %arg1[%c0, %c0_0, %c0_1] : memref<1x128x20xf32, #tpu.memory_space<vmem>>, vector<1x128x20xf32>
    %1 = vector.shape_cast %0 : vector<1x128x20xf32> to vector<128x20xf32>
    %2 = arith.truncf %1 : vector<128x20xf32> to vector<128x20xbf16>
    %c0_2 = arith.constant 0 : index
    %c0_3 = arith.constant 0 : index
    %3 = vector.load %arg2[%c0_2, %c0_3] : memref<20x64xbf16, #tpu.memory_space<vmem>>, vector<20x64xbf16>
    %cst = arith.constant dense<0.000000e+00> : vector<128x64xf32>
    %4 = tpu.matmul %2, %3, %cst {dimension_numbers = #tpu.dot_dimension_numbers<[1], [0], [0], [1], [0, 0, 1, 1], [], []>} : vector<128x20xbf16>, vector<20x64xbf16>, vector<128x64xf32> -> vector<128x64xf32>
    %c0_4 = arith.constant 0 : index
    %c0_5 = arith.constant 0 : index
    %5 = vector.load %arg3[%c0_4, %c0_5] : memref<1x64xf32, #tpu.memory_space<vmem>>, vector<1x64xf32>
    %6 = vector.broadcast %5 : vector<1x64xf32> to vector<128x64xf32>
    %7 = arith.addf %4, %6 : vector<128x64xf32>
    %cst_6 = arith.constant 0.000000e+00 : f32
    %8 = vector.broadcast %cst_6 : f32 to vector<128x64xf32>
    %9 = arith.maximumf %7, %8 : vector<128x64xf32>
    %10 = arith.truncf %9 : vector<128x64xf32> to vector<128x64xbf16>
    %cst_7 = arith.constant 0.000000e+00 : bf16
    %11 = vector.broadcast %cst_7 : bf16 to vector<16x64xbf16>
    %c0_8 = arith.constant 0 : index
    %c0_9 = arith.constant 0 : index
    %12 = vector.load %arg15[%c0_8, %c0_9] : memref<160x64xbf16, #tpu.memory_space<vmem>>, vector<16x64xbf16>
    tpu.vector_store %arg15[%c0_8, %c0_9], %11 {strides = array<i32>} : memref<160x64xbf16, #tpu.memory_space<vmem>>, vector<16x64xbf16>,
    %cst_10 = arith.constant 0.000000e+00 : bf16
    %13 = vector.broadcast %cst_10 : bf16 to vector<16x64xbf16>
    %c144 = arith.constant 144 : index
    %c0_11 = arith.constant 0 : index
    %14 = vector.load %arg15[%c144, %c0_11] : memref<160x64xbf16, #tpu.memory_space<vmem>>, vector<16x64xbf16>
    tpu.vector_store %arg15[%c144, %c0_11], %13 {strides = array<i32>} : memref<160x64xbf16, #tpu.memory_space<vmem>>, vector<16x64xbf16>,
    %c16 = arith.constant 16 : index
    %c0_12 = arith.constant 0 : index
    %15 = vector.load %arg15[%c16, %c0_12] : memref<160x64xbf16, #tpu.memory_space<vmem>>, vector<128x64xbf16>
    tpu.vector_store %arg15[%c16, %c0_12], %10 {strides = array<i32>} : memref<160x64xbf16, #tpu.memory_space<vmem>>, vector<128x64xbf16>,
    %c0_13 = arith.constant 0 : index
    %c0_14 = arith.constant 0 : index
    %16 = vector.load %arg15[%c0_13, %c0_14] : memref<160x64xbf16, #tpu.memory_space<vmem>>, vector<128x64xbf16>
    %c0_15 = arith.constant 0 : index
    %c0_16 = arith.constant 0 : index
    %c0_17 = arith.constant 0 : index
    %17 = vector.load %arg4[%c0_15, %c0_16, %c0_17] : memref<5x64x128xbf16, #tpu.memory_space<vmem>>, vector<1x64x128xbf16>
    %18 = vector.shape_cast %17 : vector<1x64x128xbf16> to vector<64x128xbf16>
    %cst_18 = arith.constant dense<0.000000e+00> : vector<128x128xf32>
    %19 = tpu.matmul %16, %18, %cst_18 {dimension_numbers = #tpu.dot_dimension_numbers<[1], [0], [0], [1], [0, 0, 1, 1], [], []>} : vector<128x64xbf16>, vector<64x128xbf16>, vector<128x128xf32> -> vector<128x128xf32>
    %c8 = arith.constant 8 : index
    %c0_19 = arith.constant 0 : index
    %20 = vector.load %arg15[%c8, %c0_19] : memref<160x64xbf16, #tpu.memory_space<vmem>>, vector<128x64xbf16>
    %c1 = arith.constant 1 : index
    %c0_20 = arith.constant 0 : index
    %c0_21 = arith.constant 0 : index
    %21 = vector.load %arg4[%c1, %c0_20, %c0_21] : memref<5x64x128xbf16, #tpu.memory_space<vmem>>, vector<1x64x128xbf16>
    %22 = vector.shape_cast %21 : vector<1x64x128xbf16> to vector<64x128xbf16>
    %cst_22 = arith.constant dense<0.000000e+00> : vector<128x128xf32>
    %23 = tpu.matmul %20, %22, %cst_22 {dimension_numbers = #tpu.dot_dimension_numbers<[1], [0], [0], [1], [0, 0, 1, 1], [], []>} : vector<128x64xbf16>, vector<64x128xbf16>, vector<128x128xf32> -> vector<128x128xf32>
    %24 = arith.addf %19, %23 : vector<128x128xf32>
    %c16_23 = arith.constant 16 : index
    %c0_24 = arith.constant 0 : index
    %25 = vector.load %arg15[%c16_23, %c0_24] : memref<160x64xbf16, #tpu.memory_space<vmem>>, vector<128x64xbf16>
    %c2 = arith.constant 2 : index
    %c0_25 = arith.constant 0 : index
    %c0_26 = arith.constant 0 : index
    %26 = vector.load %arg4[%c2, %c0_25, %c0_26] : memref<5x64x128xbf16, #tpu.memory_space<vmem>>, vector<1x64x128xbf16>
    %27 = vector.shape_cast %26 : vector<1x64x128xbf16> to vector<64x128xbf16>
    %cst_27 = arith.constant dense<0.000000e+00> : vector<128x128xf32>
    %28 = tpu.matmul %25, %27, %cst_27 {dimension_numbers = #tpu.dot_dimension_numbers<[1], [0], [0], [1], [0, 0, 1, 1], [], []>} : vector<128x64xbf16>, vector<64x128xbf16>, vector<128x128xf32> -> vector<128x128xf32>
    %29 = arith.addf %24, %28 : vector<128x128xf32>
    %c24 = arith.constant 24 : index
    %c0_28 = arith.constant 0 : index
    %30 = vector.load %arg15[%c24, %c0_28] : memref<160x64xbf16, #tpu.memory_space<vmem>>, vector<128x64xbf16>
    %c3 = arith.constant 3 : index
    %c0_29 = arith.constant 0 : index
    %c0_30 = arith.constant 0 : index
    %31 = vector.load %arg4[%c3, %c0_29, %c0_30] : memref<5x64x128xbf16, #tpu.memory_space<vmem>>, vector<1x64x128xbf16>
    %32 = vector.shape_cast %31 : vector<1x64x128xbf16> to vector<64x128xbf16>
    %cst_31 = arith.constant dense<0.000000e+00> : vector<128x128xf32>
    %33 = tpu.matmul %30, %32, %cst_31 {dimension_numbers = #tpu.dot_dimension_numbers<[1], [0], [0], [1], [0, 0, 1, 1], [], []>} : vector<128x64xbf16>, vector<64x128xbf16>, vector<128x128xf32> -> vector<128x128xf32>
    %34 = arith.addf %29, %33 : vector<128x128xf32>
    %c32 = arith.constant 32 : index
    %c0_32 = arith.constant 0 : index
    %35 = vector.load %arg15[%c32, %c0_32] : memref<160x64xbf16, #tpu.memory_space<vmem>>, vector<128x64xbf16>
    %c4 = arith.constant 4 : index
    %c0_33 = arith.constant 0 : index
    %c0_34 = arith.constant 0 : index
    %36 = vector.load %arg4[%c4, %c0_33, %c0_34] : memref<5x64x128xbf16, #tpu.memory_space<vmem>>, vector<1x64x128xbf16>
    %37 = vector.shape_cast %36 : vector<1x64x128xbf16> to vector<64x128xbf16>
    %cst_35 = arith.constant dense<0.000000e+00> : vector<128x128xf32>
    %38 = tpu.matmul %35, %37, %cst_35 {dimension_numbers = #tpu.dot_dimension_numbers<[1], [0], [0], [1], [0, 0, 1, 1], [], []>} : vector<128x64xbf16>, vector<64x128xbf16>, vector<128x128xf32> -> vector<128x128xf32>
    %39 = arith.addf %34, %38 : vector<128x128xf32>
    %c0_36 = arith.constant 0 : index
    %c0_37 = arith.constant 0 : index
    %40 = vector.load %arg5[%c0_36, %c0_37] : memref<1x128xf32, #tpu.memory_space<vmem>>, vector<1x128xf32>
    %41 = vector.broadcast %40 : vector<1x128xf32> to vector<128x128xf32>
    %42 = arith.addf %39, %41 : vector<128x128xf32>
    %cst_38 = arith.constant 0.000000e+00 : f32
    %43 = vector.broadcast %cst_38 : f32 to vector<128x128xf32>
    %44 = arith.maximumf %42, %43 : vector<128x128xf32>
    %45 = arith.truncf %44 : vector<128x128xf32> to vector<128x128xbf16>
    %cst_39 = arith.constant 0.000000e+00 : bf16
    %46 = vector.broadcast %cst_39 : bf16 to vector<16x128xbf16>
    %c0_40 = arith.constant 0 : index
    %c0_41 = arith.constant 0 : index
    %47 = vector.load %arg16[%c0_40, %c0_41] : memref<160x128xbf16, #tpu.memory_space<vmem>>, vector<16x128xbf16>
    tpu.vector_store %arg16[%c0_40, %c0_41], %46 {strides = array<i32>} : memref<160x128xbf16, #tpu.memory_space<vmem>>, vector<16x128xbf16>,
    %cst_42 = arith.constant 0.000000e+00 : bf16
    %48 = vector.broadcast %cst_42 : bf16 to vector<16x128xbf16>
    %c144_43 = arith.constant 144 : index
    %c0_44 = arith.constant 0 : index
    %49 = vector.load %arg16[%c144_43, %c0_44] : memref<160x128xbf16, #tpu.memory_space<vmem>>, vector<16x128xbf16>
    tpu.vector_store %arg16[%c144_43, %c0_44], %48 {strides = array<i32>} : memref<160x128xbf16, #tpu.memory_space<vmem>>, vector<16x128xbf16>,
    %c16_45 = arith.constant 16 : index
    %c0_46 = arith.constant 0 : index
    %50 = vector.load %arg16[%c16_45, %c0_46] : memref<160x128xbf16, #tpu.memory_space<vmem>>, vector<128x128xbf16>
    tpu.vector_store %arg16[%c16_45, %c0_46], %45 {strides = array<i32>} : memref<160x128xbf16, #tpu.memory_space<vmem>>, vector<128x128xbf16>,
    %c0_47 = arith.constant 0 : index
    %c0_48 = arith.constant 0 : index
    %51 = vector.load %arg16[%c0_47, %c0_48] : memref<160x128xbf16, #tpu.memory_space<vmem>>, vector<128x128xbf16>
    %c0_49 = arith.constant 0 : index
    %c0_50 = arith.constant 0 : index
    %c0_51 = arith.constant 0 : index
    %52 = vector.load %arg6[%c0_49, %c0_50, %c0_51] : memref<5x128x256xbf16, #tpu.memory_space<vmem>>, vector<1x128x256xbf16>
    %53 = vector.shape_cast %52 : vector<1x128x256xbf16> to vector<128x256xbf16>
    %cst_52 = arith.constant dense<0.000000e+00> : vector<128x256xf32>
    %54 = tpu.matmul %51, %53, %cst_52 {dimension_numbers = #tpu.dot_dimension_numbers<[1], [0], [0], [1], [0, 0, 1, 1], [], []>} : vector<128x128xbf16>, vector<128x256xbf16>, vector<128x256xf32> -> vector<128x256xf32>
    %c8_53 = arith.constant 8 : index
    %c0_54 = arith.constant 0 : index
    %55 = vector.load %arg16[%c8_53, %c0_54] : memref<160x128xbf16, #tpu.memory_space<vmem>>, vector<128x128xbf16>
    %c1_55 = arith.constant 1 : index
    %c0_56 = arith.constant 0 : index
    %c0_57 = arith.constant 0 : index
    %56 = vector.load %arg6[%c1_55, %c0_56, %c0_57] : memref<5x128x256xbf16, #tpu.memory_space<vmem>>, vector<1x128x256xbf16>
    %57 = vector.shape_cast %56 : vector<1x128x256xbf16> to vector<128x256xbf16>
    %cst_58 = arith.constant dense<0.000000e+00> : vector<128x256xf32>
    %58 = tpu.matmul %55, %57, %cst_58 {dimension_numbers = #tpu.dot_dimension_numbers<[1], [0], [0], [1], [0, 0, 1, 1], [], []>} : vector<128x128xbf16>, vector<128x256xbf16>, vector<128x256xf32> -> vector<128x256xf32>
    %59 = arith.addf %54, %58 : vector<128x256xf32>
    %c16_59 = arith.constant 16 : index
    %c0_60 = arith.constant 0 : index
    %60 = vector.load %arg16[%c16_59, %c0_60] : memref<160x128xbf16, #tpu.memory_space<vmem>>, vector<128x128xbf16>
    %c2_61 = arith.constant 2 : index
    %c0_62 = arith.constant 0 : index
    %c0_63 = arith.constant 0 : index
    %61 = vector.load %arg6[%c2_61, %c0_62, %c0_63] : memref<5x128x256xbf16, #tpu.memory_space<vmem>>, vector<1x128x256xbf16>
    %62 = vector.shape_cast %61 : vector<1x128x256xbf16> to vector<128x256xbf16>
    %cst_64 = arith.constant dense<0.000000e+00> : vector<128x256xf32>
    %63 = tpu.matmul %60, %62, %cst_64 {dimension_numbers = #tpu.dot_dimension_numbers<[1], [0], [0], [1], [0, 0, 1, 1], [], []>} : vector<128x128xbf16>, vector<128x256xbf16>, vector<128x256xf32> -> vector<128x256xf32>
    %64 = arith.addf %59, %63 : vector<128x256xf32>
    %c24_65 = arith.constant 24 : index
    %c0_66 = arith.constant 0 : index
    %65 = vector.load %arg16[%c24_65, %c0_66] : memref<160x128xbf16, #tpu.memory_space<vmem>>, vector<128x128xbf16>
    %c3_67 = arith.constant 3 : index
    %c0_68 = arith.constant 0 : index
    %c0_69 = arith.constant 0 : index
    %66 = vector.load %arg6[%c3_67, %c0_68, %c0_69] : memref<5x128x256xbf16, #tpu.memory_space<vmem>>, vector<1x128x256xbf16>
    %67 = vector.shape_cast %66 : vector<1x128x256xbf16> to vector<128x256xbf16>
    %cst_70 = arith.constant dense<0.000000e+00> : vector<128x256xf32>
    %68 = tpu.matmul %65, %67, %cst_70 {dimension_numbers = #tpu.dot_dimension_numbers<[1], [0], [0], [1], [0, 0, 1, 1], [], []>} : vector<128x128xbf16>, vector<128x256xbf16>, vector<128x256xf32> -> vector<128x256xf32>
    %69 = arith.addf %64, %68 : vector<128x256xf32>
    %c32_71 = arith.constant 32 : index
    %c0_72 = arith.constant 0 : index
    %70 = vector.load %arg16[%c32_71, %c0_72] : memref<160x128xbf16, #tpu.memory_space<vmem>>, vector<128x128xbf16>
    %c4_73 = arith.constant 4 : index
    %c0_74 = arith.constant 0 : index
    %c0_75 = arith.constant 0 : index
    %71 = vector.load %arg6[%c4_73, %c0_74, %c0_75] : memref<5x128x256xbf16, #tpu.memory_space<vmem>>, vector<1x128x256xbf16>
    %72 = vector.shape_cast %71 : vector<1x128x256xbf16> to vector<128x256xbf16>
    %cst_76 = arith.constant dense<0.000000e+00> : vector<128x256xf32>
    %73 = tpu.matmul %70, %72, %cst_76 {dimension_numbers = #tpu.dot_dimension_numbers<[1], [0], [0], [1], [0, 0, 1, 1], [], []>} : vector<128x128xbf16>, vector<128x256xbf16>, vector<128x256xf32> -> vector<128x256xf32>
    %74 = arith.addf %69, %73 : vector<128x256xf32>
    %c0_77 = arith.constant 0 : index
    %c0_78 = arith.constant 0 : index
    %75 = vector.load %arg7[%c0_77, %c0_78] : memref<1x256xf32, #tpu.memory_space<vmem>>, vector<1x256xf32>
    %76 = vector.broadcast %75 : vector<1x256xf32> to vector<128x256xf32>
    %77 = arith.addf %74, %76 : vector<128x256xf32>
    %cst_79 = arith.constant 0.000000e+00 : f32
    %78 = vector.broadcast %cst_79 : f32 to vector<128x256xf32>
    %79 = arith.maximumf %77, %78 : vector<128x256xf32>
    %80 = arith.truncf %79 : vector<128x256xf32> to vector<128x256xbf16>
    %c0_80 = arith.constant 0 : index
    %c0_81 = arith.constant 0 : index
    %81 = vector.load %arg17[%c0_80, %c0_81] : memref<128x256xbf16, #tpu.memory_space<vmem>>, vector<128x256xbf16>
    tpu.vector_store %arg17[%c0_80, %c0_81], %80 {strides = array<i32>} : memref<128x256xbf16, #tpu.memory_space<vmem>>, vector<128x256xbf16>,
    %c0_82 = arith.constant 0 : index
    %c0_83 = arith.constant 0 : index
    %82 = vector.load %arg17[%c0_82, %c0_83] : memref<128x256xbf16, #tpu.memory_space<vmem>>, vector<8x256xbf16>
    %c0_84 = arith.constant 0 : index
    %c0_85 = arith.constant 0 : index
    %c0_86 = arith.constant 0 : index
    %83 = vector.load %arg8[%c0_84, %c0_85, %c0_86] : memref<16x256x512xbf16, #tpu.memory_space<vmem>>, vector<1x256x512xbf16>
    %84 = vector.shape_cast %83 : vector<1x256x512xbf16> to vector<256x512xbf16>
    %cst_87 = arith.constant dense<0.000000e+00> : vector<8x512xf32>
    %85 = tpu.matmul %82, %84, %cst_87 {dimension_numbers = #tpu.dot_dimension_numbers<[1], [0], [0], [1], [0, 0, 1, 1], [], []>} : vector<8x256xbf16>, vector<256x512xbf16>, vector<8x512xf32> -> vector<8x512xf32>
    %c0_88 = arith.constant 0 : index
    %c0_89 = arith.constant 0 : index
    %86 = vector.load %arg18[%c0_88, %c0_89] : memref<8x512xf32, #tpu.memory_space<vmem>>, vector<8x512xf32>
    tpu.vector_store %arg18[%c0_88, %c0_89], %85 {strides = array<i32>} : memref<8x512xf32, #tpu.memory_space<vmem>>, vector<8x512xf32>,
    %c0_90 = arith.constant 0 : index
    %c0_91 = arith.constant 0 : index
    %87 = vector.load %arg18[%c0_90, %c0_91] : memref<8x512xf32, #tpu.memory_space<vmem>>, vector<8x512xf32>
    %c8_92 = arith.constant 8 : index
    %c0_93 = arith.constant 0 : index
    %88 = vector.load %arg17[%c8_92, %c0_93] : memref<128x256xbf16, #tpu.memory_space<vmem>>, vector<8x256xbf16>
    %c1_94 = arith.constant 1 : index
    %c0_95 = arith.constant 0 : index
    %c0_96 = arith.constant 0 : index
    %89 = vector.load %arg8[%c1_94, %c0_95, %c0_96] : memref<16x256x512xbf16, #tpu.memory_space<vmem>>, vector<1x256x512xbf16>
    %90 = vector.shape_cast %89 : vector<1x256x512xbf16> to vector<256x512xbf16>
    %cst_97 = arith.constant dense<0.000000e+00> : vector<8x512xf32>
    %91 = tpu.matmul %88, %90, %cst_97 {dimension_numbers = #tpu.dot_dimension_numbers<[1], [0], [0], [1], [0, 0, 1, 1], [], []>} : vector<8x256xbf16>, vector<256x512xbf16>, vector<8x512xf32> -> vector<8x512xf32>
    %92 = arith.addf %87, %91 : vector<8x512xf32>
    %c0_98 = arith.constant 0 : index
    %c0_99 = arith.constant 0 : index
    %93 = vector.load %arg18[%c0_98, %c0_99] : memref<8x512xf32, #tpu.memory_space<vmem>>, vector<8x512xf32>
    tpu.vector_store %arg18[%c0_98, %c0_99], %92 {strides = array<i32>} : memref<8x512xf32, #tpu.memory_space<vmem>>, vector<8x512xf32>,
    %c0_100 = arith.constant 0 : index
    %c0_101 = arith.constant 0 : index
    %94 = vector.load %arg18[%c0_100, %c0_101] : memref<8x512xf32, #tpu.memory_space<vmem>>, vector<8x512xf32>
    %c16_102 = arith.constant 16 : index
    %c0_103 = arith.constant 0 : index
    %95 = vector.load %arg17[%c16_102, %c0_103] : memref<128x256xbf16, #tpu.memory_space<vmem>>, vector<8x256xbf16>
    %c2_104 = arith.constant 2 : index
    %c0_105 = arith.constant 0 : index
    %c0_106 = arith.constant 0 : index
    %96 = vector.load %arg8[%c2_104, %c0_105, %c0_106] : memref<16x256x512xbf16, #tpu.memory_space<vmem>>, vector<1x256x512xbf16>
    %97 = vector.shape_cast %96 : vector<1x256x512xbf16> to vector<256x512xbf16>
    %cst_107 = arith.constant dense<0.000000e+00> : vector<8x512xf32>
    %98 = tpu.matmul %95, %97, %cst_107 {dimension_numbers = #tpu.dot_dimension_numbers<[1], [0], [0], [1], [0, 0, 1, 1], [], []>} : vector<8x256xbf16>, vector<256x512xbf16>, vector<8x512xf32> -> vector<8x512xf32>
    %99 = arith.addf %94, %98 : vector<8x512xf32>
    %c0_108 = arith.constant 0 : index
    %c0_109 = arith.constant 0 : index
    %100 = vector.load %arg18[%c0_108, %c0_109] : memref<8x512xf32, #tpu.memory_space<vmem>>, vector<8x512xf32>
    tpu.vector_store %arg18[%c0_108, %c0_109], %99 {strides = array<i32>} : memref<8x512xf32, #tpu.memory_space<vmem>>, vector<8x512xf32>,
    %c0_110 = arith.constant 0 : index
    %c0_111 = arith.constant 0 : index
    %101 = vector.load %arg18[%c0_110, %c0_111] : memref<8x512xf32, #tpu.memory_space<vmem>>, vector<8x512xf32>
    %c24_112 = arith.constant 24 : index
    %c0_113 = arith.constant 0 : index
    %102 = vector.load %arg17[%c24_112, %c0_113] : memref<128x256xbf16, #tpu.memory_space<vmem>>, vector<8x256xbf16>
    %c3_114 = arith.constant 3 : index
    %c0_115 = arith.constant 0 : index
    %c0_116 = arith.constant 0 : index
    %103 = vector.load %arg8[%c3_114, %c0_115, %c0_116] : memref<16x256x512xbf16, #tpu.memory_space<vmem>>, vector<1x256x512xbf16>
    %104 = vector.shape_cast %103 : vector<1x256x512xbf16> to vector<256x512xbf16>
    %cst_117 = arith.constant dense<0.000000e+00> : vector<8x512xf32>
    %105 = tpu.matmul %102, %104, %cst_117 {dimension_numbers = #tpu.dot_dimension_numbers<[1], [0], [0], [1], [0, 0, 1, 1], [], []>} : vector<8x256xbf16>, vector<256x512xbf16>, vector<8x512xf32> -> vector<8x512xf32>
    %106 = arith.addf %101, %105 : vector<8x512xf32>
    %c0_118 = arith.constant 0 : index
    %c0_119 = arith.constant 0 : index
    %107 = vector.load %arg18[%c0_118, %c0_119] : memref<8x512xf32, #tpu.memory_space<vmem>>, vector<8x512xf32>
    tpu.vector_store %arg18[%c0_118, %c0_119], %106 {strides = array<i32>} : memref<8x512xf32, #tpu.memory_space<vmem>>, vector<8x512xf32>,
    %c0_120 = arith.constant 0 : index
    %c0_121 = arith.constant 0 : index
    %108 = vector.load %arg18[%c0_120, %c0_121] : memref<8x512xf32, #tpu.memory_space<vmem>>, vector<8x512xf32>
    %c32_122 = arith.constant 32 : index
    %c0_123 = arith.constant 0 : index
    %109 = vector.load %arg17[%c32_122, %c0_123] : memref<128x256xbf16, #tpu.memory_space<vmem>>, vector<8x256xbf16>
    %c4_124 = arith.constant 4 : index
    %c0_125 = arith.constant 0 : index
    %c0_126 = arith.constant 0 : index
    %110 = vector.load %arg8[%c4_124, %c0_125, %c0_126] : memref<16x256x512xbf16, #tpu.memory_space<vmem>>, vector<1x256x512xbf16>
    %111 = vector.shape_cast %110 : vector<1x256x512xbf16> to vector<256x512xbf16>
    %cst_127 = arith.constant dense<0.000000e+00> : vector<8x512xf32>
    %112 = tpu.matmul %109, %111, %cst_127 {dimension_numbers = #tpu.dot_dimension_numbers<[1], [0], [0], [1], [0, 0, 1, 1], [], []>} : vector<8x256xbf16>, vector<256x512xbf16>, vector<8x512xf32> -> vector<8x512xf32>
    %113 = arith.addf %108, %112 : vector<8x512xf32>
    %c0_128 = arith.constant 0 : index
    %c0_129 = arith.constant 0 : index
    %114 = vector.load %arg18[%c0_128, %c0_129] : memref<8x512xf32, #tpu.memory_space<vmem>>, vector<8x512xf32>
    tpu.vector_store %arg18[%c0_128, %c0_129], %113 {strides = array<i32>} : memref<8x512xf32, #tpu.memory_space<vmem>>, vector<8x512xf32>,
    %c0_130 = arith.constant 0 : index
    %c0_131 = arith.constant 0 : index
    %115 = vector.load %arg18[%c0_130, %c0_131] : memref<8x512xf32, #tpu.memory_space<vmem>>, vector<8x512xf32>
    %c40 = arith.constant 40 : index
    %c0_132 = arith.constant 0 : index
    %116 = vector.load %arg17[%c40, %c0_132] : memref<128x256xbf16, #tpu.memory_space<vmem>>, vector<8x256xbf16>
    %c5 = arith.constant 5 : index
    %c0_133 = arith.constant 0 : index
    %c0_134 = arith.constant 0 : index
    %117 = vector.load %arg8[%c5, %c0_133, %c0_134] : memref<16x256x512xbf16, #tpu.memory_space<vmem>>, vector<1x256x512xbf16>
    %118 = vector.shape_cast %117 : vector<1x256x512xbf16> to vector<256x512xbf16>
    %cst_135 = arith.constant dense<0.000000e+00> : vector<8x512xf32>
    %119 = tpu.matmul %116, %118, %cst_135 {dimension_numbers = #tpu.dot_dimension_numbers<[1], [0], [0], [1], [0, 0, 1, 1], [], []>} : vector<8x256xbf16>, vector<256x512xbf16>, vector<8x512xf32> -> vector<8x512xf32>
    %120 = arith.addf %115, %119 : vector<8x512xf32>
    %c0_136 = arith.constant 0 : index
    %c0_137 = arith.constant 0 : index
    %121 = vector.load %arg18[%c0_136, %c0_137] : memref<8x512xf32, #tpu.memory_space<vmem>>, vector<8x512xf32>
    tpu.vector_store %arg18[%c0_136, %c0_137], %120 {strides = array<i32>} : memref<8x512xf32, #tpu.memory_space<vmem>>, vector<8x512xf32>,
    %c0_138 = arith.constant 0 : index
    %c0_139 = arith.constant 0 : index
    %122 = vector.load %arg18[%c0_138, %c0_139] : memref<8x512xf32, #tpu.memory_space<vmem>>, vector<8x512xf32>
    %c48 = arith.constant 48 : index
    %c0_140 = arith.constant 0 : index
    %123 = vector.load %arg17[%c48, %c0_140] : memref<128x256xbf16, #tpu.memory_space<vmem>>, vector<8x256xbf16>
    %c6 = arith.constant 6 : index
    %c0_141 = arith.constant 0 : index
    %c0_142 = arith.constant 0 : index
    %124 = vector.load %arg8[%c6, %c0_141, %c0_142] : memref<16x256x512xbf16, #tpu.memory_space<vmem>>, vector<1x256x512xbf16>
    %125 = vector.shape_cast %124 : vector<1x256x512xbf16> to vector<256x512xbf16>
    %cst_143 = arith.constant dense<0.000000e+00> : vector<8x512xf32>
    %126 = tpu.matmul %123, %125, %cst_143 {dimension_numbers = #tpu.dot_dimension_numbers<[1], [0], [0], [1], [0, 0, 1, 1], [], []>} : vector<8x256xbf16>, vector<256x512xbf16>, vector<8x512xf32> -> vector<8x512xf32>
    %127 = arith.addf %122, %126 : vector<8x512xf32>
    %c0_144 = arith.constant 0 : index
    %c0_145 = arith.constant 0 : index
    %128 = vector.load %arg18[%c0_144, %c0_145] : memref<8x512xf32, #tpu.memory_space<vmem>>, vector<8x512xf32>
    tpu.vector_store %arg18[%c0_144, %c0_145], %127 {strides = array<i32>} : memref<8x512xf32, #tpu.memory_space<vmem>>, vector<8x512xf32>,
    %c0_146 = arith.constant 0 : index
    %c0_147 = arith.constant 0 : index
    %129 = vector.load %arg18[%c0_146, %c0_147] : memref<8x512xf32, #tpu.memory_space<vmem>>, vector<8x512xf32>
    %c56 = arith.constant 56 : index
    %c0_148 = arith.constant 0 : index
    %130 = vector.load %arg17[%c56, %c0_148] : memref<128x256xbf16, #tpu.memory_space<vmem>>, vector<8x256xbf16>
    %c7 = arith.constant 7 : index
    %c0_149 = arith.constant 0 : index
    %c0_150 = arith.constant 0 : index
    %131 = vector.load %arg8[%c7, %c0_149, %c0_150] : memref<16x256x512xbf16, #tpu.memory_space<vmem>>, vector<1x256x512xbf16>
    %132 = vector.shape_cast %131 : vector<1x256x512xbf16> to vector<256x512xbf16>
    %cst_151 = arith.constant dense<0.000000e+00> : vector<8x512xf32>
    %133 = tpu.matmul %130, %132, %cst_151 {dimension_numbers = #tpu.dot_dimension_numbers<[1], [0], [0], [1], [0, 0, 1, 1], [], []>} : vector<8x256xbf16>, vector<256x512xbf16>, vector<8x512xf32> -> vector<8x512xf32>
    %134 = arith.addf %129, %133 : vector<8x512xf32>
    %c0_152 = arith.constant 0 : index
    %c0_153 = arith.constant 0 : index
    %135 = vector.load %arg18[%c0_152, %c0_153] : memref<8x512xf32, #tpu.memory_space<vmem>>, vector<8x512xf32>
    tpu.vector_store %arg18[%c0_152, %c0_153], %134 {strides = array<i32>} : memref<8x512xf32, #tpu.memory_space<vmem>>, vector<8x512xf32>,
    %c0_154 = arith.constant 0 : index
    %c0_155 = arith.constant 0 : index
    %136 = vector.load %arg18[%c0_154, %c0_155] : memref<8x512xf32, #tpu.memory_space<vmem>>, vector<8x512xf32>
    %c64 = arith.constant 64 : index
    %c0_156 = arith.constant 0 : index
    %137 = vector.load %arg17[%c64, %c0_156] : memref<128x256xbf16, #tpu.memory_space<vmem>>, vector<8x256xbf16>
    %c8_157 = arith.constant 8 : index
    %c0_158 = arith.constant 0 : index
    %c0_159 = arith.constant 0 : index
    %138 = vector.load %arg8[%c8_157, %c0_158, %c0_159] : memref<16x256x512xbf16, #tpu.memory_space<vmem>>, vector<1x256x512xbf16>
    %139 = vector.shape_cast %138 : vector<1x256x512xbf16> to vector<256x512xbf16>
    %cst_160 = arith.constant dense<0.000000e+00> : vector<8x512xf32>
    %140 = tpu.matmul %137, %139, %cst_160 {dimension_numbers = #tpu.dot_dimension_numbers<[1], [0], [0], [1], [0, 0, 1, 1], [], []>} : vector<8x256xbf16>, vector<256x512xbf16>, vector<8x512xf32> -> vector<8x512xf32>
    %141 = arith.addf %136, %140 : vector<8x512xf32>
    %c0_161 = arith.constant 0 : index
    %c0_162 = arith.constant 0 : index
    %142 = vector.load %arg18[%c0_161, %c0_162] : memref<8x512xf32, #tpu.memory_space<vmem>>, vector<8x512xf32>
    tpu.vector_store %arg18[%c0_161, %c0_162], %141 {strides = array<i32>} : memref<8x512xf32, #tpu.memory_space<vmem>>, vector<8x512xf32>,
    %c0_163 = arith.constant 0 : index
    %c0_164 = arith.constant 0 : index
    %143 = vector.load %arg18[%c0_163, %c0_164] : memref<8x512xf32, #tpu.memory_space<vmem>>, vector<8x512xf32>
    %c72 = arith.constant 72 : index
    %c0_165 = arith.constant 0 : index
    %144 = vector.load %arg17[%c72, %c0_165] : memref<128x256xbf16, #tpu.memory_space<vmem>>, vector<8x256xbf16>
    %c9 = arith.constant 9 : index
    %c0_166 = arith.constant 0 : index
    %c0_167 = arith.constant 0 : index
    %145 = vector.load %arg8[%c9, %c0_166, %c0_167] : memref<16x256x512xbf16, #tpu.memory_space<vmem>>, vector<1x256x512xbf16>
    %146 = vector.shape_cast %145 : vector<1x256x512xbf16> to vector<256x512xbf16>
    %cst_168 = arith.constant dense<0.000000e+00> : vector<8x512xf32>
    %147 = tpu.matmul %144, %146, %cst_168 {dimension_numbers = #tpu.dot_dimension_numbers<[1], [0], [0], [1], [0, 0, 1, 1], [], []>} : vector<8x256xbf16>, vector<256x512xbf16>, vector<8x512xf32> -> vector<8x512xf32>
    %148 = arith.addf %143, %147 : vector<8x512xf32>
    %c0_169 = arith.constant 0 : index
    %c0_170 = arith.constant 0 : index
    %149 = vector.load %arg18[%c0_169, %c0_170] : memref<8x512xf32, #tpu.memory_space<vmem>>, vector<8x512xf32>
    tpu.vector_store %arg18[%c0_169, %c0_170], %148 {strides = array<i32>} : memref<8x512xf32, #tpu.memory_space<vmem>>, vector<8x512xf32>,
    %c0_171 = arith.constant 0 : index
    %c0_172 = arith.constant 0 : index
    %150 = vector.load %arg18[%c0_171, %c0_172] : memref<8x512xf32, #tpu.memory_space<vmem>>, vector<8x512xf32>
    %c80 = arith.constant 80 : index
    %c0_173 = arith.constant 0 : index
    %151 = vector.load %arg17[%c80, %c0_173] : memref<128x256xbf16, #tpu.memory_space<vmem>>, vector<8x256xbf16>
    %c10 = arith.constant 10 : index
    %c0_174 = arith.constant 0 : index
    %c0_175 = arith.constant 0 : index
    %152 = vector.load %arg8[%c10, %c0_174, %c0_175] : memref<16x256x512xbf16, #tpu.memory_space<vmem>>, vector<1x256x512xbf16>
    %153 = vector.shape_cast %152 : vector<1x256x512xbf16> to vector<256x512xbf16>
    %cst_176 = arith.constant dense<0.000000e+00> : vector<8x512xf32>
    %154 = tpu.matmul %151, %153, %cst_176 {dimension_numbers = #tpu.dot_dimension_numbers<[1], [0], [0], [1], [0, 0, 1, 1], [], []>} : vector<8x256xbf16>, vector<256x512xbf16>, vector<8x512xf32> -> vector<8x512xf32>
    %155 = arith.addf %150, %154 : vector<8x512xf32>
    %c0_177 = arith.constant 0 : index
    %c0_178 = arith.constant 0 : index
    %156 = vector.load %arg18[%c0_177, %c0_178] : memref<8x512xf32, #tpu.memory_space<vmem>>, vector<8x512xf32>
    tpu.vector_store %arg18[%c0_177, %c0_178], %155 {strides = array<i32>} : memref<8x512xf32, #tpu.memory_space<vmem>>, vector<8x512xf32>,
    %c0_179 = arith.constant 0 : index
    %c0_180 = arith.constant 0 : index
    %157 = vector.load %arg18[%c0_179, %c0_180] : memref<8x512xf32, #tpu.memory_space<vmem>>, vector<8x512xf32>
    %c88 = arith.constant 88 : index
    %c0_181 = arith.constant 0 : index
    %158 = vector.load %arg17[%c88, %c0_181] : memref<128x256xbf16, #tpu.memory_space<vmem>>, vector<8x256xbf16>
    %c11 = arith.constant 11 : index
    %c0_182 = arith.constant 0 : index
    %c0_183 = arith.constant 0 : index
    %159 = vector.load %arg8[%c11, %c0_182, %c0_183] : memref<16x256x512xbf16, #tpu.memory_space<vmem>>, vector<1x256x512xbf16>
    %160 = vector.shape_cast %159 : vector<1x256x512xbf16> to vector<256x512xbf16>
    %cst_184 = arith.constant dense<0.000000e+00> : vector<8x512xf32>
    %161 = tpu.matmul %158, %160, %cst_184 {dimension_numbers = #tpu.dot_dimension_numbers<[1], [0], [0], [1], [0, 0, 1, 1], [], []>} : vector<8x256xbf16>, vector<256x512xbf16>, vector<8x512xf32> -> vector<8x512xf32>
    %162 = arith.addf %157, %161 : vector<8x512xf32>
    %c0_185 = arith.constant 0 : index
    %c0_186 = arith.constant 0 : index
    %163 = vector.load %arg18[%c0_185, %c0_186] : memref<8x512xf32, #tpu.memory_space<vmem>>, vector<8x512xf32>
    tpu.vector_store %arg18[%c0_185, %c0_186], %162 {strides = array<i32>} : memref<8x512xf32, #tpu.memory_space<vmem>>, vector<8x512xf32>,
    %c0_187 = arith.constant 0 : index
    %c0_188 = arith.constant 0 : index
    %164 = vector.load %arg18[%c0_187, %c0_188] : memref<8x512xf32, #tpu.memory_space<vmem>>, vector<8x512xf32>
    %c96 = arith.constant 96 : index
    %c0_189 = arith.constant 0 : index
    %165 = vector.load %arg17[%c96, %c0_189] : memref<128x256xbf16, #tpu.memory_space<vmem>>, vector<8x256xbf16>
    %c12 = arith.constant 12 : index
    %c0_190 = arith.constant 0 : index
    %c0_191 = arith.constant 0 : index
    %166 = vector.load %arg8[%c12, %c0_190, %c0_191] : memref<16x256x512xbf16, #tpu.memory_space<vmem>>, vector<1x256x512xbf16>
    %167 = vector.shape_cast %166 : vector<1x256x512xbf16> to vector<256x512xbf16>
    %cst_192 = arith.constant dense<0.000000e+00> : vector<8x512xf32>
    %168 = tpu.matmul %165, %167, %cst_192 {dimension_numbers = #tpu.dot_dimension_numbers<[1], [0], [0], [1], [0, 0, 1, 1], [], []>} : vector<8x256xbf16>, vector<256x512xbf16>, vector<8x512xf32> -> vector<8x512xf32>
    %169 = arith.addf %164, %168 : vector<8x512xf32>
    %c0_193 = arith.constant 0 : index
    %c0_194 = arith.constant 0 : index
    %170 = vector.load %arg18[%c0_193, %c0_194] : memref<8x512xf32, #tpu.memory_space<vmem>>, vector<8x512xf32>
    tpu.vector_store %arg18[%c0_193, %c0_194], %169 {strides = array<i32>} : memref<8x512xf32, #tpu.memory_space<vmem>>, vector<8x512xf32>,
    %c0_195 = arith.constant 0 : index
    %c0_196 = arith.constant 0 : index
    %171 = vector.load %arg18[%c0_195, %c0_196] : memref<8x512xf32, #tpu.memory_space<vmem>>, vector<8x512xf32>
    %c104 = arith.constant 104 : index
    %c0_197 = arith.constant 0 : index
    %172 = vector.load %arg17[%c104, %c0_197] : memref<128x256xbf16, #tpu.memory_space<vmem>>, vector<8x256xbf16>
    %c13 = arith.constant 13 : index
    %c0_198 = arith.constant 0 : index
    %c0_199 = arith.constant 0 : index
    %173 = vector.load %arg8[%c13, %c0_198, %c0_199] : memref<16x256x512xbf16, #tpu.memory_space<vmem>>, vector<1x256x512xbf16>
    %174 = vector.shape_cast %173 : vector<1x256x512xbf16> to vector<256x512xbf16>
    %cst_200 = arith.constant dense<0.000000e+00> : vector<8x512xf32>
    %175 = tpu.matmul %172, %174, %cst_200 {dimension_numbers = #tpu.dot_dimension_numbers<[1], [0], [0], [1], [0, 0, 1, 1], [], []>} : vector<8x256xbf16>, vector<256x512xbf16>, vector<8x512xf32> -> vector<8x512xf32>
    %176 = arith.addf %171, %175 : vector<8x512xf32>
    %c0_201 = arith.constant 0 : index
    %c0_202 = arith.constant 0 : index
    %177 = vector.load %arg18[%c0_201, %c0_202] : memref<8x512xf32, #tpu.memory_space<vmem>>, vector<8x512xf32>
    tpu.vector_store %arg18[%c0_201, %c0_202], %176 {strides = array<i32>} : memref<8x512xf32, #tpu.memory_space<vmem>>, vector<8x512xf32>,
    %c0_203 = arith.constant 0 : index
    %c0_204 = arith.constant 0 : index
    %178 = vector.load %arg18[%c0_203, %c0_204] : memref<8x512xf32, #tpu.memory_space<vmem>>, vector<8x512xf32>
    %c112 = arith.constant 112 : index
    %c0_205 = arith.constant 0 : index
    %179 = vector.load %arg17[%c112, %c0_205] : memref<128x256xbf16, #tpu.memory_space<vmem>>, vector<8x256xbf16>
    %c14 = arith.constant 14 : index
    %c0_206 = arith.constant 0 : index
    %c0_207 = arith.constant 0 : index
    %180 = vector.load %arg8[%c14, %c0_206, %c0_207] : memref<16x256x512xbf16, #tpu.memory_space<vmem>>, vector<1x256x512xbf16>
    %181 = vector.shape_cast %180 : vector<1x256x512xbf16> to vector<256x512xbf16>
    %cst_208 = arith.constant dense<0.000000e+00> : vector<8x512xf32>
    %182 = tpu.matmul %179, %181, %cst_208 {dimension_numbers = #tpu.dot_dimension_numbers<[1], [0], [0], [1], [0, 0, 1, 1], [], []>} : vector<8x256xbf16>, vector<256x512xbf16>, vector<8x512xf32> -> vector<8x512xf32>
    %183 = arith.addf %178, %182 : vector<8x512xf32>
    %c0_209 = arith.constant 0 : index
    %c0_210 = arith.constant 0 : index
    %184 = vector.load %arg18[%c0_209, %c0_210] : memref<8x512xf32, #tpu.memory_space<vmem>>, vector<8x512xf32>
    tpu.vector_store %arg18[%c0_209, %c0_210], %183 {strides = array<i32>} : memref<8x512xf32, #tpu.memory_space<vmem>>, vector<8x512xf32>,
    %c0_211 = arith.constant 0 : index
    %c0_212 = arith.constant 0 : index
    %185 = vector.load %arg18[%c0_211, %c0_212] : memref<8x512xf32, #tpu.memory_space<vmem>>, vector<8x512xf32>
    %c120 = arith.constant 120 : index
    %c0_213 = arith.constant 0 : index
    %186 = vector.load %arg17[%c120, %c0_213] : memref<128x256xbf16, #tpu.memory_space<vmem>>, vector<8x256xbf16>
    %c15 = arith.constant 15 : index
    %c0_214 = arith.constant 0 : index
    %c0_215 = arith.constant 0 : index
    %187 = vector.load %arg8[%c15, %c0_214, %c0_215] : memref<16x256x512xbf16, #tpu.memory_space<vmem>>, vector<1x256x512xbf16>
    %188 = vector.shape_cast %187 : vector<1x256x512xbf16> to vector<256x512xbf16>
    %cst_216 = arith.constant dense<0.000000e+00> : vector<8x512xf32>
    %189 = tpu.matmul %186, %188, %cst_216 {dimension_numbers = #tpu.dot_dimension_numbers<[1], [0], [0], [1], [0, 0, 1, 1], [], []>} : vector<8x256xbf16>, vector<256x512xbf16>, vector<8x512xf32> -> vector<8x512xf32>
    %190 = arith.addf %185, %189 : vector<8x512xf32>
    %c0_217 = arith.constant 0 : index
    %c0_218 = arith.constant 0 : index
    %191 = vector.load %arg18[%c0_217, %c0_218] : memref<8x512xf32, #tpu.memory_space<vmem>>, vector<8x512xf32>
    tpu.vector_store %arg18[%c0_217, %c0_218], %190 {strides = array<i32>} : memref<8x512xf32, #tpu.memory_space<vmem>>, vector<8x512xf32>,
    %c0_219 = arith.constant 0 : index
    %c0_220 = arith.constant 0 : index
    %192 = vector.load %arg18[%c0_219, %c0_220] : memref<8x512xf32, #tpu.memory_space<vmem>>, vector<8x512xf32>
    %c0_221 = arith.constant 0 : index
    %c0_222 = arith.constant 0 : index
    %193 = vector.load %arg9[%c0_221, %c0_222] : memref<1x512xf32, #tpu.memory_space<vmem>>, vector<1x512xf32>
    %194 = vector.broadcast %193 : vector<1x512xf32> to vector<8x512xf32>
    %195 = arith.addf %192, %194 : vector<8x512xf32>
    %cst_223 = arith.constant 0.000000e+00 : f32
    %196 = vector.broadcast %cst_223 : f32 to vector<8x512xf32>
    %197 = arith.maximumf %195, %196 : vector<8x512xf32>
    %198 = arith.truncf %197 : vector<8x512xf32> to vector<8x512xbf16>
    %c0_224 = arith.constant 0 : index
    %c0_225 = arith.constant 0 : index
    %199 = vector.load %arg10[%c0_224, %c0_225] : memref<512x512xbf16, #tpu.memory_space<vmem>>, vector<512x512xbf16>
    %cst_226 = arith.constant dense<0.000000e+00> : vector<8x512xf32>
    %200 = tpu.matmul %198, %199, %cst_226 {dimension_numbers = #tpu.dot_dimension_numbers<[1], [0], [0], [1], [0, 0, 1, 1], [], []>} : vector<8x512xbf16>, vector<512x512xbf16>, vector<8x512xf32> -> vector<8x512xf32>
    %c0_227 = arith.constant 0 : index
    %c0_228 = arith.constant 0 : index
    %201 = vector.load %arg11[%c0_227, %c0_228] : memref<1x512xf32, #tpu.memory_space<vmem>>, vector<1x512xf32>
    %202 = vector.broadcast %201 : vector<1x512xf32> to vector<8x512xf32>
    %203 = arith.addf %200, %202 : vector<8x512xf32>
    %cst_229 = arith.constant 0.000000e+00 : f32
    %204 = vector.broadcast %cst_229 : f32 to vector<8x512xf32>
    %205 = arith.maximumf %203, %204 : vector<8x512xf32>
    %206 = arith.truncf %205 : vector<8x512xf32> to vector<8x512xbf16>
    %c0_230 = arith.constant 0 : index
    %c0_231 = arith.constant 0 : index
    %207 = vector.load %arg12[%c0_230, %c0_231] : memref<512x128xbf16, #tpu.memory_space<vmem>>, vector<512x128xbf16>
    %cst_232 = arith.constant dense<0.000000e+00> : vector<8x128xf32>
    %208 = tpu.matmul %206, %207, %cst_232 {dimension_numbers = #tpu.dot_dimension_numbers<[1], [0], [0], [1], [0, 0, 1, 1], [], []>} : vector<8x512xbf16>, vector<512x128xbf16>, vector<8x128xf32> -> vector<8x128xf32>
    %c0_233 = arith.constant 0 : index
    %c0_234 = arith.constant 0 : index
    %209 = vector.load %arg13[%c0_233, %c0_234] : memref<1x128xf32, #tpu.memory_space<vmem>>, vector<1x128xf32>
    %210 = vector.broadcast %209 : vector<1x128xf32> to vector<8x128xf32>
    %211 = arith.addf %208, %210 : vector<8x128xf32>
    %c0_235 = arith.constant 0 : index
    %c0_236 = arith.constant 0 : index
    %212 = vector.load %arg14[%c0_235, %c0_236] : memref<8x128xf32, #tpu.memory_space<vmem>>, vector<8x128xf32>
    tpu.vector_store %arg14[%c0_235, %c0_236], %211 {strides = array<i32>} : memref<8x128xf32, #tpu.memory_space<vmem>>, vector<8x128xf32>,
    return
  }
  func.func @transform_0(%arg0: i32) -> (i32, i32, i32) {
    %c0_i32 = arith.constant 0 : i32
    %c0_i32_0 = arith.constant 0 : i32
    %c0_i32_1 = arith.constant 0 : i32
    return %arg0, %c0_i32, %c0_i32_0 : i32, i32, i32
  }
  func.func @transform_1(%arg0: i32) -> (i32, i32) {
    %c0_i32 = arith.constant 0 : i32
    %c0_i32_0 = arith.constant 0 : i32
    %c0_i32_1 = arith.constant 0 : i32
    return %c0_i32, %c0_i32_0 : i32, i32
  }
  func.func @transform_2(%arg0: i32) -> (i32, i32) {
    %c0_i32 = arith.constant 0 : i32
    %c0_i32_0 = arith.constant 0 : i32
    %c0_i32_1 = arith.constant 0 : i32
    return %c0_i32, %c0_i32_0 : i32, i32
  }
  func.func @transform_3(%arg0: i32) -> (i32, i32, i32) {
    %c0_i32 = arith.constant 0 : i32
    %c0_i32_0 = arith.constant 0 : i32
    %c0_i32_1 = arith.constant 0 : i32
    %c0_i32_2 = arith.constant 0 : i32
    return %c0_i32, %c0_i32_0, %c0_i32_1 : i32, i32, i32
  }
  func.func @transform_4(%arg0: i32) -> (i32, i32) {
    %c0_i32 = arith.constant 0 : i32
    %c0_i32_0 = arith.constant 0 : i32
    %c0_i32_1 = arith.constant 0 : i32
    return %c0_i32, %c0_i32_0 : i32, i32
  }
  func.func @transform_5(%arg0: i32) -> (i32, i32, i32) {
    %c0_i32 = arith.constant 0 : i32
    %c0_i32_0 = arith.constant 0 : i32
    %c0_i32_1 = arith.constant 0 : i32
    %c0_i32_2 = arith.constant 0 : i32
    return %c0_i32, %c0_i32_0, %c0_i32_1 : i32, i32, i32
  }
  func.func @transform_6(%arg0: i32) -> (i32, i32) {
    %c0_i32 = arith.constant 0 : i32
    %c0_i32_0 = arith.constant 0 : i32
    %c0_i32_1 = arith.constant 0 : i32
    return %c0_i32, %c0_i32_0 : i32, i32
  }
  func.func @transform_7(%arg0: i32) -> (i32, i32, i32) {
    %c0_i32 = arith.constant 0 : i32
    %c0_i32_0 = arith.constant 0 : i32
    %c0_i32_1 = arith.constant 0 : i32
    %c0_i32_2 = arith.constant 0 : i32
    return %c0_i32, %c0_i32_0, %c0_i32_1 : i32, i32, i32
  }
  func.func @transform_8(%arg0: i32) -> (i32, i32) {
    %c0_i32 = arith.constant 0 : i32
    %c0_i32_0 = arith.constant 0 : i32
    %c0_i32_1 = arith.constant 0 : i32
    return %c0_i32, %c0_i32_0 : i32, i32
  }
  func.func @transform_9(%arg0: i32) -> (i32, i32) {
    %c0_i32 = arith.constant 0 : i32
    %c0_i32_0 = arith.constant 0 : i32
    %c0_i32_1 = arith.constant 0 : i32
    return %c0_i32, %c0_i32_0 : i32, i32
  }
  func.func @transform_10(%arg0: i32) -> (i32, i32) {
    %c0_i32 = arith.constant 0 : i32
    %c0_i32_0 = arith.constant 0 : i32
    %c0_i32_1 = arith.constant 0 : i32
    return %c0_i32, %c0_i32_0 : i32, i32
  }
  func.func @transform_11(%arg0: i32) -> (i32, i32) {
    %c0_i32 = arith.constant 0 : i32
    %c0_i32_0 = arith.constant 0 : i32
    %c0_i32_1 = arith.constant 0 : i32
    return %c0_i32, %c0_i32_0 : i32, i32
  }
  func.func @transform_12(%arg0: i32) -> (i32, i32) {
    %c0_i32 = arith.constant 0 : i32
    %c0_i32_0 = arith.constant 0 : i32
    %c0_i32_1 = arith.constant 0 : i32
    return %c0_i32, %c0_i32_0 : i32, i32
  }
  func.func @transform_13(%arg0: i32) -> (i32, i32) {
    %c0_i32 = arith.constant 0 : i32
    %c0_i32_0 = arith.constant 0 : i32
    return %arg0, %c0_i32 : i32, i32
  }
}

</mosaic_0001>

<bundles_post_ra>
// kernel: actor_critic_forward.1
= control target key start
LH: loop header
LB: loop body
LE: loop exit
PB: predicated region body
PF: predicated region fallthrough
CT: control target
= control target key end

     0   :  { %18 = vsyncpa [#allocation7], 0  ;;  %s17553_s0 = inlined_call_operand.vmem [shape: f32[1,128,20], index: 0, kind: input, shape index: {}]   ;;  %s17554_s1 = inlined_call_operand.hbm [shape: bf16[20,64], index: 1, kind: input, shape index: {}]   ;;  %s17555_s2 = inlined_call_operand.hbm [shape: f32[1,64], index: 2, kind: input, shape index: {}]   ;;  %s17556_s3 = inlined_call_operand.hbm [shape: bf16[5,64,128], index: 3, kind: input, shape index: {}]   ;;  %s17557_s4 = inlined_call_operand.hbm [shape: f32[1,128], index: 4, kind: input, shape index: {}]   ;;  %s17558_s5 = inlined_call_operand.hbm [shape: bf16[5,128,256], index: 5, kind: input, shape index: {}]   ;;  %s17559_s6 = inlined_call_operand.hbm [shape: f32[1,256], index: 6, kind: input, shape index: {}]   ;;  %s17560_s7 = inlined_call_operand.hbm [shape: bf16[16,256,512], index: 7, kind: input, shape index: {}]   ;;  %s17561_s8 = inlined_call_operand.hbm [shape: f32[1,512], index: 8, kind: input, shape index: {}]   ;;  %s17562_s9 = inlined_call_operand.hbm [shape: bf16[512,512], index: 9, kind: input, shape index: {}]   ;;  %s17563_s10 = inlined_call_operand.hbm [shape: f32[1,512], index: 10, kind: input, shape index: {}]   ;;  %s17564_s11 = inlined_call_operand.hbm [shape: bf16[512,128], index: 11, kind: input, shape index: {}]   ;;  %s17565_s12 = inlined_call_operand.hbm [shape: f32[1,128], index: 12, kind: input, shape index: {}]   ;;  %s17566_s13 = inlined_call_operand.vmem [shape: f32[8,128], index: 13, kind: output, shape index: {}]  }
   0x1   :  { %19 = vsyncpa [#allocation9], 0 }
   0x2   :  { %20 = vsyncpa [#allocation12], 0 }
   0x3   :  { %21 = vsyncpa [#allocation15], 0 }
   0x4   :  { %22 = vsyncpa [#allocation18], 0 }
   0x5   :  { %23 = vsyncpa [#allocation21], 0 }
   0x6   :  { %24 = vsyncpa [#allocation24], 0  ;;  %s16521_s25 = smov [#allocation8]   ;;  %s16522_s27 = smov [#allocation11]  }
   0x7   :  { %s45_s26 = sshll.u32 %s16521_s25, 4  ;;  %s67_s28 = sshll.u32 %s16522_s27, 4  ;;  %s46_s26 = int_to_ptr.vmem [resolvable:$true] %s45_s26  ;;  %s68_s28 = int_to_ptr.vmem [resolvable:$true] %s67_s28 }
   0x8   :  { %s16275_s29 = scalar_lea.vmem %s46_s26, 16  ;;  %s16279_s30 = scalar_lea.vmem %s46_s26, 32 }
   0x9   :  { %p16276_p0 = scmp.ne.s32.totalorder %s46_s26, %s16275_s29  ;;  %p16280_p1 = scmp.lt.s32.totalorder %s46_s26, %s46_s26 }
   0xa   :  { %p16281_p2 = scmp.lt.s32.totalorder %s16279_s30, %s16275_s29 }
   0xc   :  { %p16282_p3 = por %p16281_p2, %p16280_p1 }
   0xe   :  { %p16283_p4 = pnand %p16282_p3, %p16276_p0 }
  0x10   :  { %16286 = shalt.err (!%p16283_p4)
}
  0x11   :  { %48 = dma.hbm_to_vmem [thread:$0]  %s17555_s2, 16, %s46_s26, [#allocation9]  }
  0x12   :  { %s16295_s16 = scalar_lea.vmem %s68_s28, 16  ;;  %s16299_s17 = scalar_lea.vmem %s68_s28, 32 }
  0x13   :  { %p16296_p5 = scmp.ne.s32.totalorder %s68_s28, %s16295_s16  ;;  %p16300_p6 = scmp.lt.s32.totalorder %s68_s28, %s68_s28 }
  0x14   :  { %p16301_p7 = scmp.lt.s32.totalorder %s16299_s17, %s16295_s16 }
  0x16   :  { %p16302_p8 = por %p16301_p7, %p16300_p6 }
  0x18   :  { %p16303_p9 = pnand %p16302_p8, %p16296_p5 }
  0x1a   :  { %16306 = shalt.err (!%p16303_p9)
}
  0x1b   :  { %70 = dma.hbm_to_vmem [thread:$0]  %s17557_s4, 16, %s68_s28, [#allocation12]  }
  0x1c   :  { %s16523_s20 = smov [#allocation14]   ;;  %s16524_s22 = smov [#allocation17]  }
  0x1d   :  { %s89_s21 = sshll.u32 %s16523_s20, 4  ;;  %s111_s23 = sshll.u32 %s16524_s22, 4  ;;  %s90_s21 = int_to_ptr.vmem [resolvable:$true] %s89_s21  ;;  %s112_s23 = int_to_ptr.vmem [resolvable:$true] %s111_s23 }
  0x1e   :  { %s16315_s24 = scalar_lea.vmem %s90_s21, 32  ;;  %p16320_p11 = scmp.lt.s32.totalorder %s90_s21, %s90_s21 }
  0x1f   :  { %p16316_p10 = scmp.ne.s32.totalorder %s90_s21, %s16315_s24  ;;  %p16321_p12 = scmp.lt.s32.totalorder %s16315_s24, %s16315_s24 }
  0x21   :  { %p16322_p13 = por %p16321_p12, %p16320_p11 }
  0x23   :  { %p16323_p0 = pnand %p16322_p13, %p16316_p10 }
  0x25   :  { %16326 = shalt.err (!%p16323_p0)
}
  0x26   :  { %92 = dma.hbm_to_vmem [thread:$0]  %s17559_s6, 32, %s90_s21, [#allocation15]  }
  0x27   :  { %s16335_s26 = scalar_lea.vmem %s112_s23, 64  ;;  %p16340_p2 = scmp.lt.s32.totalorder %s112_s23, %s112_s23 }
  0x28   :  { %p16336_p1 = scmp.ne.s32.totalorder %s112_s23, %s16335_s26  ;;  %p16341_p3 = scmp.lt.s32.totalorder %s16335_s26, %s16335_s26 }
  0x2a   :  { %p16342_p4 = por %p16341_p3, %p16340_p2 }
  0x2c   :  { %p16343_p5 = pnand %p16342_p4, %p16336_p1 }
  0x2e   :  { %16346 = shalt.err (!%p16343_p5)
}
  0x2f   :  { %114 = dma.hbm_to_vmem [thread:$0]  %s17561_s8, 64, %s112_s23, [#allocation18]  }
  0x30   :  { %s16525_s28 = smov [#allocation20]   ;;  %s16526_s30 = smov [#allocation6]  }
  0x31   :  { %s133_s29 = sshll.u32 %s16525_s28, 4  ;;  %s32_s14 = sshll.u32 %s16526_s30, 4  ;;  %s134_s29 = int_to_ptr.vmem [resolvable:$true] %s133_s29  ;;  %s33_s14 = int_to_ptr.vmem [resolvable:$true] %s32_s14 }
  0x32   :  { %s16355_s15 = scalar_lea.vmem %s134_s29, 64  ;;  %p16360_p7 = scmp.lt.s32.totalorder %s134_s29, %s134_s29 }
  0x33   :  { %p16356_p6 = scmp.ne.s32.totalorder %s134_s29, %s16355_s15  ;;  %p16361_p8 = scmp.lt.s32.totalorder %s16355_s15, %s16355_s15 }
  0x35   :  { %p16362_p9 = por %p16361_p8, %p16360_p7 }
  0x37   :  { %p16363_p10 = pnand %p16362_p9, %p16356_p6 }
  0x39   :  { %16366 = shalt.err (!%p16363_p10)
}
  0x3a   :  { %136 = dma.hbm_to_vmem [thread:$0]  %s17563_s10, 64, %s134_s29, [#allocation21]  }
  0x3b   :  { %s16375_s17 = scalar_lea.vmem %s33_s14, 192  ;;  %p16380_p12 = scmp.lt.s32.totalorder %s33_s14, %s33_s14 }
  0x3c   :  { %p16376_p11 = scmp.ne.s32.totalorder %s33_s14, %s16375_s17  ;;  %p16381_p13 = scmp.lt.s32.totalorder %s16375_s17, %s16375_s17 }
  0x3e   :  { %p16382_p0 = por %p16381_p13, %p16380_p12 }
  0x40   :  { %p16383_p1 = pnand %p16382_p0, %p16376_p11 }
  0x42   :  { %16386 = shalt.err (!%p16383_p1)
}
  0x43   :  { %s16527_s8 = smov 64   ;;  %s16528_s18 = smov 4  }
  0x44   :  { %38 = dma.hbm_to_vmem [thread:$0]  %s17554_s1, 192, %s33_s14, [#allocation7], %s16527_s8, %s16527_s8, %s16528_s18  }
  0x45   :  { %s16529_s21 = smov [#allocation10]   ;;  %s16530_s23 = smov [#allocation13]  }
  0x46   :  { %s54_s22 = sshll.u32 %s16529_s21, 4  ;;  %s76_s10 = sshll.u32 %s16530_s23, 4  ;;  %s55_s22 = int_to_ptr.vmem [resolvable:$true] %s54_s22  ;;  %s77_s10 = int_to_ptr.vmem [resolvable:$true] %s76_s10 }
  0x47   :  { %s16395_s24 = scalar_lea.vmem %s55_s22, 2560  ;;  %p16400_p3 = scmp.lt.s32.totalorder %s55_s22, %s55_s22 }
  0x48   :  { %p16396_p2 = scmp.ne.s32.totalorder %s55_s22, %s16395_s24  ;;  %p16401_p4 = scmp.lt.s32.totalorder %s16395_s24, %s16395_s24 }
  0x4a   :  { %p16402_p5 = por %p16401_p4, %p16400_p3 }
  0x4c   :  { %p16403_p6 = pnand %p16402_p5, %p16396_p2 }
  0x4e   :  { %16406 = shalt.err (!%p16403_p6)
}
  0x4f   :  { %60 = dma.hbm_to_vmem [thread:$0]  %s17556_s3, 2560, %s55_s22, [#allocation9], %s16527_s8, %s16527_s8, %s16528_s18  }
  0x50   :  { %s16415_s1 = scalar_lea.vmem %s77_s10, 10240  ;;  %p16420_p8 = scmp.lt.s32.totalorder %s77_s10, %s77_s10 }
  0x51   :  { %p16416_p7 = scmp.ne.s32.totalorder %s77_s10, %s16415_s1  ;;  %p16421_p9 = scmp.lt.s32.totalorder %s16415_s1, %s16415_s1 }
  0x53   :  { %p16422_p10 = por %p16421_p9, %p16420_p8 }
  0x55   :  { %p16423_p11 = pnand %p16422_p10, %p16416_p7 }
  0x57   :  { %16426 = shalt.err (!%p16423_p11)
}
  0x58   :  { %s16531_s26 = smov 128   ;;  %s16532_s4 = smov 8  }
  0x59   :  { %82 = dma.hbm_to_vmem [thread:$0]  %s17558_s5, 10240, %s77_s10, [#allocation12], %s16531_s26, %s16531_s26, %s16532_s4  }
  0x5a   :  { %s16533_s29 = smov [#allocation16]  }
  0x5b   :  { %s98_s30 = sshll.u32 %s16533_s29, 4  ;;  %s99_s30 = int_to_ptr.vmem [resolvable:$true] %s98_s30 }
  0x5c   :  { %s16435_s14 = scalar_lea.vmem %s99_s30, 131072  ;;  %p16440_p13 = scmp.lt.s32.totalorder %s99_s30, %s99_s30 }
  0x5d   :  { %p16436_p12 = scmp.ne.s32.totalorder %s99_s30, %s16435_s14  ;;  %p16441_p0 = scmp.lt.s32.totalorder %s16435_s14, %s16435_s14 }
  0x5f   :  { %p16442_p1 = por %p16441_p0, %p16440_p13 }
  0x61   :  { %p16443_p2 = pnand %p16442_p1, %p16436_p12 }
  0x63   :  { %16446 = shalt.err (!%p16443_p2)
}
  0x64   :  { %s16534_s3 = smov 256   ;;  %s16535_s15 = smov 16  }
  0x65   :  { %104 = dma.hbm_to_vmem [thread:$0]  %s17560_s7, 131072, %s99_s30, [#allocation15], %s16534_s3, %s16534_s3, %s16535_s15  }
  0x66   :  { %s16536_s17 = smov [#allocation19]   ;;  %s16537_s5 = smov [#allocation22]  }
  0x67   :  { %s120_s19 = sshll.u32 %s16536_s17, 4  ;;  %s142_s20 = sshll.u32 %s16537_s5, 4  ;;  %s121_s19 = int_to_ptr.vmem [resolvable:$true] %s120_s19  ;;  %s143_s20 = int_to_ptr.vmem [resolvable:$true] %s142_s20 }
  0x68   :  { %s16455_s21 = scalar_lea.vmem %s121_s19, 16384  ;;  %p16460_p4 = scmp.lt.s32.totalorder %s121_s19, %s121_s19 }
  0x69   :  { %p16456_p3 = scmp.ne.s32.totalorder %s121_s19, %s16455_s21  ;;  %p16461_p5 = scmp.lt.s32.totalorder %s16455_s21, %s16455_s21 }
  0x6b   :  { %p16462_p6 = por %p16461_p5, %p16460_p4 }
  0x6d   :  { %p16463_p7 = pnand %p16462_p6, %p16456_p3 }
  0x6f   :  { %16466 = shalt.err (!%p16463_p7)
}
  0x70   :  { %126 = dma.hbm_to_vmem [thread:$0]  %s17562_s9, 16384, %s121_s19, [#allocation18], %s16534_s3, %s16534_s3, %s16535_s15  }
  0x71   :  { %s16475_s10 = scalar_lea.vmem %s143_s20, 4096  ;;  %p16480_p9 = scmp.lt.s32.totalorder %s143_s20, %s143_s20 }
  0x72   :  { %p16476_p8 = scmp.ne.s32.totalorder %s143_s20, %s16475_s10  ;;  %p16481_p10 = scmp.lt.s32.totalorder %s16475_s10, %s16475_s10 }
  0x74   :  { %p16482_p11 = por %p16481_p10, %p16480_p9 }
  0x76   :  { %p16483_p12 = pnand %p16482_p11, %p16476_p8 }
  0x78   :  { %16486 = shalt.err (!%p16483_p12)
}
  0x79   :  { %148 = dma.hbm_to_vmem [thread:$0]  %s17564_s11, 4096, %s143_s20, [#allocation21], %s16527_s8, %s16527_s8, %s16528_s18  }
  0x7a   :  { %s16538_s2 = smov [#allocation23]  }
  0x7b   :  { %s155_s25 = sshll.u32 %s16538_s2, 4  ;;  %s156_s25 = int_to_ptr.vmem [resolvable:$true] %s155_s25 }
  0x7c   :  { %s16495_s1 = scalar_lea.vmem %s156_s25, 16  ;;  %s16499_s9 = scalar_lea.vmem %s156_s25, 32 }
  0x7d   :  { %p16496_p13 = scmp.ne.s32.totalorder %s156_s25, %s16495_s1  ;;  %p16500_p0 = scmp.lt.s32.totalorder %s156_s25, %s156_s25 }
  0x7e   :  { %p16501_p1 = scmp.lt.s32.totalorder %s16499_s9, %s16495_s1 }
  0x80   :  { %p16502_p2 = por %p16501_p1, %p16500_p0 }
  0x82   :  { %p16503_p3 = pnand %p16502_p2, %p16496_p13 }
  0x84   :  { %16506 = shalt.err (!%p16503_p3)
}
  0x85   :  { %158 = dma.hbm_to_vmem [thread:$0]  %s17565_s12, 16, %s156_s25, [#allocation24]  }
  0x86   :  { %16507 = dma.done.wait [#allocation7], 192  }
  0x87   :  { %16508 = vsyncadd [#allocation7], 4294967104 }
  0x88   :  { %16509 = dma.done.wait [#allocation9], 2576  }
  0x89   :  { %16510 = vsyncadd [#allocation9], 4294964720 }
  0x8a   :  { %16511 = dma.done.wait [#allocation12], 10256  }
  0x8b   :  { %16512 = vsyncadd [#allocation12], 4294957040 }
  0x8c   :  { %16513 = dma.done.wait [#allocation15], 131104  }
  0x8d   :  { %16514 = vsyncadd [#allocation15], 4294836192 }
  0x8e   :  { %16515 = dma.done.wait [#allocation18], 16448  }
  0x8f   :  { %16516 = vsyncadd [#allocation18], 4294950848 }
  0x90   :  { %16517 = dma.done.wait [#allocation21], 4160  }
  0x91   :  { %16518 = vsyncadd [#allocation21], 4294963136 }
  0x92   :  { %16519 = dma.done.wait [#allocation24], 16  }
  0x93   :  { %16520 = vsyncadd [#allocation24], 4294967280  ;;  %vm264_vm0 = vcmask 1041408   ;;  %v14287_v0 = vld [vmem:[#allocation6 + $0x8] ss:$0 sps:$4 sm:$0x33]  }
  0x94   :  { %v14288_v1 = vld [vmem:[#allocation6] sm:$0xff]   ;;  %14267 = vmatprep.subr.msk.bf16.mxu0 %vm264_vm0, %v14287_v0  ;;  %v266_v3 = vsel %vm264_vm0, %v14287_v0, 0  ;;  %v197_v4 = vld [vmem:[%s17553_s0 + $0x8] sm:$0xff]  ;;  %vm239_vm1 = vcmask 162816   ;;  %v198_v6 = vld [vmem:[%s17553_s0 + $0x10] sm:$0xff]  ;;  %vm389_vm2 = vcmask 519168  }
  0x95   :  { %v196_v2 = vld [vmem:[%s17553_s0] sm:$0xff]  ;;  %14128 = vmatpush3.bf16.msra.mxu0 %v266_v3  ;;  %v199_v7 = vld [vmem:[%s17553_s0 + $0x18] sm:$0xff]  ;;  %v201_v9 = vld [vmem:[%s17553_s0 + $0x28] sm:$0xff]  ;;  %v17567_v31 = vmov 0   ;;  %vm564_vm3 = vcmask 523264  }
  0x96   :  { %v212_v5 = vpack.c.bf16 %v197_v4, %v196_v2  ;;  %14129 = vmatprep.subr.bf16.mxu0 %v14288_v1  ;;  %v200_v8 = vld [vmem:[%s17553_s0 + $0x20] sm:$0xff]  ;;  %v213_v10 = vpack.c.bf16 %v199_v7, %v198_v6  ;;  %v202_v12 = vld [vmem:[%s17553_s0 + $0x30] sm:$0xff]  ;;  %v203_v13 = vld [vmem:[%s17553_s0 + $0x38] sm:$0xff]  ;;  %390 = vst.msk [vmem:[#allocation2] sm:$0xf] %vm389_vm2, %v17567_v31 }
  0x97   :  { %v214_v11 = vpack.c.bf16 %v201_v9, %v200_v8  ;;  %v204_v14 = vld [vmem:[%s17553_s0 + $0x40] sm:$0xff]  ;;  %v205_v15 = vld [vmem:[%s17553_s0 + $0x48] sm:$0xff]  ;;  %v215_v16 = vpack.c.bf16 %v203_v13, %v202_v12  ;;  %v206_v18 = vld [vmem:[%s17553_s0 + $0x50] sm:$0xff]  ;;  %391 = vst.msk [vmem:[#allocation2 + $0x4] sm:$0xf] %vm389_vm2, %v17567_v31 }
  0x98   :  { %14131 = vmatprep.mubr.msk.bf16.mxu0 %vm239_vm1, %v212_v5  ;;  %v216_v17 = vpack.c.bf16 %v205_v15, %v204_v14  ;;  %v207_v19 = vld [vmem:[%s17553_s0 + $0x58] sm:$0xff]  ;;  %v208_v20 = vld [vmem:[%s17553_s0 + $0x60] sm:$0xff]  ;;  %v209_v21 = vld [vmem:[%s17553_s0 + $0x68] sm:$0xff]  ;;  %392 = vst.msk [vmem:[#allocation2 + $0x48] sm:$0xf] %vm389_vm2, %v17567_v31 }
  0x99   :  { %14130 = vmatpush3.bf16.msra.mxu0 %v14288_v1  ;;  %v217_v22 = vpack.c.bf16 %v207_v19, %v206_v18  ;;  %v218_v23 = vpack.c.bf16 %v209_v21, %v208_v20  ;;  %v210_v24 = vld [vmem:[%s17553_s0 + $0x70] sm:$0xff]  ;;  %v211_v25 = vld [vmem:[%s17553_s0 + $0x78] sm:$0xff]  ;;  %v14289_v27 = vld [vmem:[#allocation10 + $0x38] sm:$0xff]   ;;  %393 = vst.msk [vmem:[#allocation2 + $0x4c] sm:$0xf] %vm389_vm2, %v17567_v31 }
  0x9a   :  { %v219_v26 = vpack.c.bf16 %v211_v25, %v210_v24  ;;  %v14290_v28 = vld [vmem:[#allocation10 + $0x18] sm:$0xff]   ;;  %14147 = vmatprep.subr.bf16.mxu1 %v14289_v27  ;;  %v14291_v29 = vld [vmem:[#allocation10 + $0x30] sm:$0xff]   ;;  %1566 = vst [vmem:[#allocation3] sm:$0xf] %v17567_v31  ;;  %1567 = vst [vmem:[#allocation3 + $0x4] sm:$0xf] %v17567_v31 }
  0x9b   :  { %14171 = vmatprep.subr.bf16.mxu0 %v14290_v28  ;;  %14148 = vmatpush3.bf16.msra.mxu1 %v14289_v27  ;;  %v14292_v30 = vld [vmem:[#allocation10 + $0x10] sm:$0xff]   ;;  %1568 = vst [vmem:[#allocation3 + $0x48] sm:$0xf] %v17567_v31  ;;  %1569 = vst [vmem:[#allocation3 + $0x4c] sm:$0xf] %v17567_v31  ;;  %v14293_v32 = vld [vmem:[#allocation10 + $0x28] sm:$0xff]  }
  0x9c   :  { %14132 = vmatmul.mubr.msk.bf16.vlgmr.msra.gmra.mxu0 %vm239_vm1, %v213_v10  ;;  %14149 = vmatprep.subr.bf16.mxu1 %v14291_v29  ;;  %v14294_v33 = vld [vmem:[#allocation10 + $0x8] sm:$0xff]   ;;  %v14295_v34 = vld [vmem:[#allocation10 + $0x20] sm:$0xff]   ;;  %v16727_v39 = vld [vmem:[#allocation10 + $0x58] sm:$0xff]  }
  0x9d   :  { %14135 = vmatprep.mubr.msk.bf16.mxu0 %vm239_vm1, %v214_v11  ;;  %14172 = vmatpush3.bf16.msra.mxu0 %v14290_v28  ;;  %v14300_v36 = vld [vmem:[#allocation10] sm:$0xff]   ;;  %v466_v37 = vld [vmem:[#allocation2] sm:$0xf]  ;;  %v16730_v40 = vld [vmem:[#allocation10 + $0x78] sm:$0xff]  }
  0x9e   :  { %14173 = vmatprep.subr.bf16.mxu0 %v14292_v30  ;;  %v16723_v35 = vld [vmem:[#allocation2 + $0x4] sm:$0xf]  ;;  %v16733_v41 = vld [vmem:[#allocation8] ss:$0 sm:$0xff] }
  0x9f   :  { %14150 = vmatpush3.bf16.msra.mxu1 %v14291_v29  ;;  %v12435_v38 = vcombine.low %v466_v37, %v16723_v35  ;;  %v14302_v25 = vld [vmem:[#allocation10 + $0x50] sm:$0xff]  }
  0xa0   :  { %14151 = vmatprep.subr.bf16.mxu1 %v14293_v32  ;;  %v14312_v29 = vld [vmem:[#allocation10 + $0x70] sm:$0xff]  }
  0xa1   :  { %14174 = vmatpush3.bf16.msra.mxu0 %v14292_v30 }
  0xa2   :  { %14175 = vmatprep.subr.bf16.mxu0 %v14294_v33 }
  0xa3   :  { %14152 = vmatpush3.bf16.msra.mxu1 %v14293_v32 }
  0xa4   :  { %14136 = vmatmul.mubr.msk.bf16.gmra.mxu0 %vm239_vm1, %v215_v16  ;;  %14153 = vmatprep.subr.bf16.mxu1 %v14295_v34 }
  0xa5   :  { %14139 = vmatprep.mubr.msk.bf16.mxu0 %vm239_vm1, %v216_v17  ;;  %14176 = vmatpush3.bf16.msra.mxu0 %v14294_v33 }
  0xa6   :  { %14177 = vmatprep.subr.bf16.mxu0 %v14300_v36 }
  0xa7   :  { %14154 = vmatpush3.bf16.msra.mxu1 %v14295_v34 }
  0xa8   :  { %14195 = vmatprep.subr.bf16.mxu1 %v16727_v39 }
  0xa9   :  { %14178 = vmatpush3.bf16.msra.mxu0 %v14300_v36  ;;  %v14306_v36 = vld [vmem:[#allocation10 + $0x48] sm:$0xff]  }
  0xaa   :  { %14219 = vmatprep.subr.bf16.mxu0 %v16730_v40 }
  0xac   :  { %14140 = vmatmul.mubr.msk.bf16.gmra.mxu0 %vm239_vm1, %v217_v22 }
  0xad   :  { %14143 = vmatprep.mubr.msk.bf16.mxu0 %vm239_vm1, %v218_v23 }
  0xb4   :  { %14144 = vmatmul.mubr.msk.bf16.gmra.mxu0 %vm239_vm1, %v219_v26 }
  0xb5   :  { %14179 = vmatprep.mubr.msk.bf16.mxu0 %vm564_vm3, %v12435_v38 }
 0x15c   :  { %v14133_v42 = vpop.f32.mrf.mxu0 }
 0x15d   :  { %v311_v43 = vadd.f32 %v14133_v42, %v16733_v41 }
 0x15e   :  { %v302_v44 = vpop.f32.mrf.mxu0 }
 0x15f   :  { %v367_v45 = vmax.f32 %v311_v43, 0.0  ;;  %v303_v46 = vadd.f32 %v16733_v41, %v302_v44 }
 0x160   :  { %v14134_v47 = vpop.f32.mrf.mxu0 }
 0x161   :  { %v13887_v48 = vpack.c.bf16 %v367_v45, %v367_v45  ;;  %v365_v49 = vmax.f32 %v303_v46, 0.0  ;;  %v314_v50 = vadd.f32 %v14134_v47, %v16733_v41  ;;  %v14316_v46 = vld [vmem:[#allocation10 + $0x68] sm:$0xff]  }
 0x162   :  { %v305_v51 = vpop.f32.mrf.mxu0 }
 0x163   :  { %452 = vst.msk [vmem:[#allocation2 + $0x10] sm:$0xf] %vm389_vm2, %v13887_v48  ;;  %v13885_v52 = vpack.c.bf16 %v365_v49, %v365_v49  ;;  %v368_v53 = vmax.f32 %v314_v50, 0.0  ;;  %v306_v54 = vadd.f32 %v16733_v41, %v305_v51 }
 0x164   :  { %v14137_v55 = vpop.f32.mrf.mxu0 }
 0x165   :  { %450 = vst.msk [vmem:[#allocation2 + $0x8] sm:$0xf] %vm389_vm2, %v13885_v52  ;;  %v13888_v56 = vpack.c.bf16 %v368_v53, %v368_v53  ;;  %v366_v57 = vmax.f32 %v306_v54, 0.0  ;;  %v327_v58 = vadd.f32 %v14137_v55, %v16733_v41  ;;  %v14313_v55 = vld [vmem:[#allocation10 + $0x40] sm:$0xff]  }
 0x166   :  { %v318_v59 = vpop.f32.mrf.mxu0 }
 0x167   :  { %453 = vst.msk [vmem:[#allocation2 + $0x14] sm:$0xf] %vm389_vm2, %v13888_v56  ;;  %v13886_v60 = vpack.c.bf16 %v366_v57, %v366_v57  ;;  %v371_v61 = vmax.f32 %v327_v58, 0.0  ;;  %v319_v62 = vadd.f32 %v16733_v41, %v318_v59 }
 0x168   :  { %v14138_v63 = vpop.f32.mrf.mxu0 }
 0x169   :  { %451 = vst.msk [vmem:[#allocation2 + $0xc] sm:$0xf] %vm389_vm2, %v13886_v60  ;;  %v13891_v0 = vpack.c.bf16 %v371_v61, %v371_v61  ;;  %v369_v1 = vmax.f32 %v319_v62, 0.0  ;;  %v330_v2 = vadd.f32 %v14138_v63, %v16733_v41  ;;  %v14319_v62 = vld [vmem:[#allocation10 + $0x60] sm:$0xff]  }
 0x16a   :  { %v321_v3 = vpop.f32.mrf.mxu0  ;;  %v470_v19 = vld [vmem:[#allocation2 + $0x10] sm:$0xf] }
 0x16b   :  { %456 = vst.msk [vmem:[#allocation2 + $0x20] sm:$0xf] %vm389_vm2, %v13891_v0  ;;  %v13889_v4 = vpack.c.bf16 %v369_v1, %v369_v1  ;;  %v372_v5 = vmax.f32 %v330_v2, 0.0  ;;  %v322_v6 = vadd.f32 %v16733_v41, %v321_v3  ;;  %v14320_v0 = vld [vmem:[#allocation10 + $0x98] sm:$0xff]  }
 0x16c   :  { %v14141_v7 = vpop.f32.mrf.mxu0  ;;  %v468_v8 = vld [vmem:[#allocation2 + $0x8] sm:$0xf] }
 0x16d   :  { %454 = vst.msk [vmem:[#allocation2 + $0x18] sm:$0xf] %vm389_vm2, %v13889_v4  ;;  %v13892_v9 = vpack.c.bf16 %v372_v5, %v372_v5  ;;  %v370_v10 = vmax.f32 %v322_v6, 0.0  ;;  %v343_v11 = vadd.f32 %v14141_v7, %v16733_v41  ;;  %v12415_v12 = vcombine.low %v16723_v35, %v468_v8 }
 0x16e   :  { %v334_v13 = vpop.f32.mrf.mxu0  ;;  %v471_v14 = vld [vmem:[#allocation2 + $0x14] sm:$0xf] }
 0x16f   :  { %457 = vst.msk [vmem:[#allocation2 + $0x24] sm:$0xf] %vm389_vm2, %v13892_v9  ;;  %v13890_v15 = vpack.c.bf16 %v370_v10, %v370_v10  ;;  %v375_v16 = vmax.f32 %v343_v11, 0.0  ;;  %v335_v17 = vadd.f32 %v16733_v41, %v334_v13  ;;  %14155 = vmatprep.mubr.msk.bf16.mxu1 %vm564_vm3, %v12415_v12  ;;  %v12437_v28 = vcombine.low %v470_v19, %v471_v14 }
 0x170   :  { %v469_v18 = vld [vmem:[#allocation2 + $0xc] sm:$0xf]  ;;  %v14142_v20 = vpop.f32.mrf.mxu0 }
 0x171   :  { %455 = vst.msk [vmem:[#allocation2 + $0x1c] sm:$0xf] %vm389_vm2, %v13890_v15  ;;  %v13895_v21 = vpack.c.bf16 %v375_v16, %v375_v16  ;;  %v373_v22 = vmax.f32 %v335_v17, 0.0  ;;  %v12416_v23 = vcombine.low %v469_v18, %v470_v19  ;;  %v12436_v24 = vcombine.low %v468_v8, %v469_v18  ;;  %v14317_v16 = vld [vmem:[#allocation2 + $0x8] sm:$0xff]   ;;  %v14321_v18 = vld [vmem:[#allocation2 + $0x10] sm:$0xff]  }
 0x172   :  { %v346_v26 = vadd.f32 %v14142_v20, %v16733_v41  ;;  %v337_v27 = vpop.f32.mrf.mxu0  ;;  %v474_v45 = vld [vmem:[#allocation2 + $0x20] sm:$0xf]  ;;  %v14318_v17 = vld [vmem:[#allocation2 + $0xc] sm:$0xff]  }
 0x173   :  { %460 = vst.msk [vmem:[#allocation2 + $0x30] sm:$0xf] %vm389_vm2, %v13895_v21  ;;  %v13893_v30 = vpack.c.bf16 %v373_v22, %v373_v22  ;;  %v338_v32 = vadd.f32 %v16733_v41, %v337_v27  ;;  %14156 = vmatmul.mubr.msk.bf16.vlgmr.msra.gmra.mxu1 %vm564_vm3, %v12416_v23  ;;  %14180 = vmatmul.mubr.msk.bf16.vlgmr.msra.gmra.mxu0 %vm564_vm3, %v12436_v24  ;;  %v14325_v20 = vld [vmem:[#allocation10 + $0x90] sm:$0xff]   ;;  %v14330_v23 = vld [vmem:[#allocation10 + $0x88] sm:$0xff]   ;;  %v14335_v27 = vld [vmem:[#allocation10 + $0x80] sm:$0xff]  }
 0x174   :  { %v376_v33 = vmax.f32 %v346_v26, 0.0  ;;  %14196 = vmatpush3.bf16.msra.mxu1 %v16727_v39  ;;  %v14145_v34 = vpop.f32.mrf.mxu0  ;;  %14183 = vmatprep.mubr.msk.bf16.mxu0 %vm564_vm3, %v12437_v28  ;;  %v472_v35 = vld [vmem:[#allocation2 + $0x18] sm:$0xf] }
 0x175   :  { %458 = vst.msk [vmem:[#allocation2 + $0x28] sm:$0xf] %vm389_vm2, %v13893_v30  ;;  %v374_v37 = vmax.f32 %v338_v32, 0.0  ;;  %v359_v38 = vadd.f32 %v14145_v34, %v16733_v41  ;;  %v12417_v42 = vcombine.low %v471_v14, %v472_v35  ;;  %14197 = vmatprep.subr.bf16.mxu1 %v14302_v25  ;;  %14220 = vmatpush3.bf16.msra.mxu0 %v16730_v40  ;;  %v14322_v19 = vld [vmem:[#allocation2 + $0x14] sm:$0xff]  }
 0x176   :  { %v13896_v43 = vpack.c.bf16 %v376_v33, %v376_v33  ;;  %v350_v44 = vpop.f32.mrf.mxu0  ;;  %14221 = vmatprep.subr.bf16.mxu0 %v14312_v29  ;;  %v475_v51 = vld [vmem:[#allocation2 + $0x24] sm:$0xf] }
 0x177   :  { %v13894_v39 = vpack.c.bf16 %v374_v37, %v374_v37  ;;  %v379_v47 = vmax.f32 %v359_v38, 0.0  ;;  %v351_v48 = vadd.f32 %v16733_v41, %v350_v44  ;;  %14159 = vmatprep.mubr.msk.bf16.mxu1 %vm564_vm3, %v12417_v42  ;;  %v12439_v61 = vcombine.low %v474_v45, %v475_v51  ;;  %v14326_v24 = vld [vmem:[#allocation2 + $0x20] sm:$0xff]  }
 0x178   :  { %461 = vst.msk [vmem:[#allocation2 + $0x34] sm:$0xf] %vm389_vm2, %v13896_v43  ;;  %v14146_v49 = vpop.f32.mrf.mxu0  ;;  %v473_v50 = vld [vmem:[#allocation2 + $0x1c] sm:$0xf]  ;;  %14198 = vmatpush3.bf16.msra.mxu1 %v14302_v25  ;;  %v14340_v38 = vld [vmem:[#allocation2 + $0x20] sm:$0xff]  }
 0x179   :  { %459 = vst.msk [vmem:[#allocation2 + $0x2c] sm:$0xf] %vm389_vm2, %v13894_v39  ;;  %v13899_v40 = vpack.c.bf16 %v379_v47, %v379_v47  ;;  %v377_v52 = vmax.f32 %v351_v48, 0.0  ;;  %v362_v53 = vadd.f32 %v14146_v49, %v16733_v41  ;;  %v12418_v54 = vcombine.low %v473_v50, %v474_v45  ;;  %14199 = vmatprep.subr.bf16.mxu1 %v14306_v36  ;;  %v14323_v21 = vld [vmem:[#allocation2 + $0x18] sm:$0xff]   ;;  %v14346_v39 = vld [vmem:[#allocation13 + $0x70] ss:$8 sps:$4 sm:$0xff]  }
 0x17a   :  { %14222 = vmatpush3.bf16.msra.mxu0 %v14312_v29  ;;  %v353_v56 = vpop.f32.mrf.mxu0  ;;  %v12438_v57 = vcombine.low %v472_v35, %v473_v50  ;;  %v478_v4 = vld [vmem:[#allocation2 + $0x30] sm:$0xf]  ;;  %v14324_v22 = vld [vmem:[#allocation2 + $0x1c] sm:$0xff]   ;;  %v14348_v47 = vld [vmem:[#allocation13 + $0x74] ss:$8 sps:$4 sm:$0xff]  }
 0x17b   :  { %14223 = vmatprep.subr.bf16.mxu0 %v14316_v46  ;;  %464 = vst.msk [vmem:[#allocation2 + $0x40] sm:$0xf] %vm389_vm2, %v13899_v40  ;;  %v13897_v58 = vpack.c.bf16 %v377_v52, %v377_v52  ;;  %v380_v59 = vmax.f32 %v362_v53, 0.0  ;;  %v354_v60 = vadd.f32 %v16733_v41, %v353_v56  ;;  %14160 = vmatmul.mubr.msk.bf16.gmra.mxu1 %vm564_vm3, %v12418_v54  ;;  %v14339_v37 = vld [vmem:[#allocation2 + $0x18] sm:$0xff]   ;;  %v14352_v50 = vld [vmem:[#allocation13 + $0xf0] ss:$8 sps:$4 sm:$0xff]  }
 0x17c   :  { %14184 = vmatmul.mubr.msk.bf16.gmra.mxu0 %vm564_vm3, %v12438_v57  ;;  %v476_v63 = vld [vmem:[#allocation2 + $0x28] sm:$0xf]  ;;  %14200 = vmatpush3.bf16.msra.mxu1 %v14306_v36  ;;  %v14338_v36 = vld [vmem:[#allocation2 + $0x10] sm:$0xff]   ;;  %v14357_v52 = vld [vmem:[#allocation13 + $0x54] ss:$8 sps:$4 sm:$0xff]  }
 0x17d   :  { %462 = vst.msk [vmem:[#allocation2 + $0x38] sm:$0xf] %vm389_vm2, %v13897_v58  ;;  %v13900_v1 = vpack.c.bf16 %v380_v59, %v380_v59  ;;  %v378_v2 = vmax.f32 %v354_v60, 0.0  ;;  %14187 = vmatprep.mubr.msk.bf16.mxu0 %vm564_vm3, %v12439_v61  ;;  %v12419_v3 = vcombine.low %v475_v51, %v476_v63  ;;  %14201 = vmatprep.subr.bf16.mxu1 %v14313_v55  ;;  %v14327_v25 = vld [vmem:[#allocation2 + $0x24] sm:$0xff]   ;;  %v14349_v48 = vld [vmem:[#allocation13 + $0x60] ss:$8 sps:$4 sm:$0xff]  }
 0x17e   :  { %14224 = vmatpush3.bf16.msra.mxu0 %v14316_v46  ;;  %v14345_v46 = vld [vmem:[#allocation2 + $0x48] sm:$0xff]   ;;  %v14351_v49 = vld [vmem:[#allocation13 + $0x64] ss:$8 sps:$4 sm:$0xff]   ;;  %v14358_v53 = vld [vmem:[#allocation13 + $0xe0] ss:$8 sps:$4 sm:$0xff]  }
 0x17f   :  { %465 = vst.msk [vmem:[#allocation2 + $0x44] sm:$0xf] %vm389_vm2, %v13900_v1  ;;  %v13898_v41 = vpack.c.bf16 %v378_v2, %v378_v2  ;;  %14163 = vmatprep.mubr.msk.bf16.mxu1 %vm564_vm3, %v12419_v3  ;;  %14225 = vmatprep.subr.bf16.mxu0 %v14319_v62  ;;  %v479_v6 = vld [vmem:[#allocation2 + $0x34] sm:$0xf]  ;;  %v14354_v51 = vld [vmem:[#allocation13 + $0xf4] ss:$8 sps:$4 sm:$0xff]  }
 0x180   :  { %v477_v5 = vld [vmem:[#allocation2 + $0x2c] sm:$0xf]  ;;  %14202 = vmatpush3.bf16.msra.mxu1 %v14313_v55  ;;  %v12441_v9 = vcombine.low %v478_v4, %v479_v6  ;;  %v14331_v29 = vld [vmem:[#allocation2 + $0x30] sm:$0xff]   ;;  %v14355_v40 = vld [vmem:[#allocation13 + $0x50] ss:$8 sps:$4 sm:$0xff]  }
 0x181   :  { %463 = vst.msk [vmem:[#allocation2 + $0x3c] sm:$0xf] %vm389_vm2, %v13898_v41  ;;  %v12420_v7 = vcombine.low %v477_v5, %v478_v4  ;;  %v12440_v8 = vcombine.low %v476_v63, %v477_v5  ;;  %14243 = vmatprep.subr.bf16.mxu1 %v14320_v0  ;;  %v14328_v26 = vld [vmem:[#allocation2 + $0x28] sm:$0xff]   ;;  %v14342_v43 = vld [vmem:[#allocation2 + $0x30] sm:$0xff]  }
 0x182   :  { %14226 = vmatpush3.bf16.msra.mxu0 %v14319_v62  ;;  %v490_v13 = vld [vmem:[#allocation2 + $0x40] sm:$0xf]  ;;  %v14329_v28 = vld [vmem:[#allocation2 + $0x2c] sm:$0xff]   ;;  %v14360_v54 = vld [vmem:[#allocation13 + $0xe4] ss:$8 sps:$4 sm:$0xff]  }
 0x183   :  { %14164 = vmatmul.mubr.msk.bf16.gmra.mxu1 %vm564_vm3, %v12420_v7  ;;  %v14341_v42 = vld [vmem:[#allocation2 + $0x28] sm:$0xff]   ;;  %1820 = vmatprep.subr.bf16.mxu0 %v14354_v51  ;;  %v14361_v55 = vld [vmem:[#allocation13 + $0x40] ss:$8 sps:$4 sm:$0xff]   ;;  %v14363_v56 = vld [vmem:[#allocation13 + $0x44] ss:$8 sps:$4 sm:$0xff]  }
 0x184   :  { %14188 = vmatmul.mubr.msk.bf16.gmra.mxu0 %vm564_vm3, %v12440_v8  ;;  %v480_v10 = vld [vmem:[#allocation2 + $0x38] sm:$0xf]  ;;  %v14364_v57 = vld [vmem:[#allocation13 + $0xd0] ss:$8 sps:$4 sm:$0xff]   ;;  %v14366_v58 = vld [vmem:[#allocation13 + $0xd4] ss:$8 sps:$4 sm:$0xff]  }
 0x185   :  { %14191 = vmatprep.mubr.msk.bf16.mxu0 %vm564_vm3, %v12441_v9  ;;  %v12421_v11 = vcombine.low %v479_v6, %v480_v10  ;;  %v14332_v30 = vld [vmem:[#allocation2 + $0x34] sm:$0xff]   ;;  %v14367_v59 = vld [vmem:[#allocation13 + $0x30] ss:$8 sps:$4 sm:$0xff]   ;;  %v14369_v60 = vld [vmem:[#allocation13 + $0x34] ss:$8 sps:$4 sm:$0xff]  }
 0x186   :  { %v14336_v34 = vld [vmem:[#allocation2 + $0x40] sm:$0xff]   ;;  %v14372_v61 = vld [vmem:[#allocation13 + $0xc4] ss:$8 sps:$4 sm:$0xff]   ;;  %v14370_v63 = vld [vmem:[#allocation13 + $0xc0] ss:$8 sps:$4 sm:$0xff]  }
 0x187   :  { %14167 = vmatprep.mubr.msk.bf16.mxu1 %vm564_vm3, %v12421_v11  ;;  %v14337_v35 = vld [vmem:[#allocation2 + $0x44] sm:$0xff]   ;;  %v14375_v62 = vld [vmem:[#allocation13 + $0x24] ss:$8 sps:$4 sm:$0xff]   ;;  %v14382_v6 = vld [vmem:[#allocation13 + $0xa0] ss:$8 sps:$4 sm:$0xff]  }
 0x188   :  { %v481_v12 = vld [vmem:[#allocation2 + $0x3c] sm:$0xf]  ;;  %v14344_v45 = vld [vmem:[#allocation2 + $0x40] sm:$0xff]   ;;  %v14385_v7 = vld [vmem:[#allocation13] ss:$8 sps:$4 sm:$0xff]  }
 0x189   :  { %v12422_v14 = vcombine.low %v481_v12, %v490_v13  ;;  %v12442_v15 = vcombine.low %v480_v10, %v481_v12  ;;  %v14333_v32 = vld [vmem:[#allocation2 + $0x38] sm:$0xff]   ;;  %v14378_v1 = vld [vmem:[#allocation13 + $0xb4] ss:$8 sps:$4 sm:$0xff]   ;;  %v14376_v3 = vld [vmem:[#allocation13 + $0xb0] ss:$8 sps:$4 sm:$0xff]  }
 0x18a   :  { %v14334_v33 = vld [vmem:[#allocation2 + $0x3c] sm:$0xff]   ;;  %v14381_v2 = vld [vmem:[#allocation13 + $0x14] ss:$8 sps:$4 sm:$0xff]   ;;  %v1642_v8 = vld [vmem:[#allocation3] sm:$0xf] }
 0x18b   :  { %14168 = vmatmul.mubr.msk.bf16.gmra.mxu1 %vm564_vm3, %v12422_v14  ;;  %v14343_v44 = vld [vmem:[#allocation2 + $0x38] sm:$0xff]   ;;  %v14379_v41 = vld [vmem:[#allocation13 + $0x10] ss:$8 sps:$4 sm:$0xff]   ;;  %v1643_v9 = vld [vmem:[#allocation3 + $0x4] sm:$0xf] }
 0x18c   :  { %14192 = vmatmul.mubr.msk.bf16.gmra.mxu0 %vm564_vm3, %v12442_v15  ;;  %14203 = vmatprep.mubr.msk.bf16.mxu1 %vm564_vm3, %v14317_v16  ;;  %v14384_v4 = vld [vmem:[#allocation13 + $0xa4] ss:$8 sps:$4 sm:$0xff]   ;;  %v14390_v10 = vld [vmem:[#allocation13 + $0x94] ss:$8 sps:$4 sm:$0xff]   ;;  %v12556_v11 = vcombine.low %v1642_v8, %v1643_v9  ;;  %v14388_v12 = vld [vmem:[#allocation13 + $0x90] ss:$8 sps:$4 sm:$0xff]  }
 0x18d   :  { %14227 = vmatprep.mubr.msk.bf16.mxu0 %vm564_vm3, %v14318_v17  ;;  %v14387_v5 = vld [vmem:[#allocation13 + $0x4] ss:$8 sps:$4 sm:$0xff]   ;;  %v14392_v14 = vld [vmem:[#allocation13 + $0x80] ss:$8 sps:$4 sm:$0xff]   ;;  %v14397_v15 = vld [vmem:[#allocation13 + $0x174] ss:$8 sps:$4 sm:$0xff]  }
 0x18e   :  { %v14394_v13 = vld [vmem:[#allocation13 + $0x84] ss:$8 sps:$4 sm:$0xff]   ;;  %v14415_v16 = vld [vmem:[#allocation13 + $0x1f0] ss:$8 sps:$4 sm:$0xff]   ;;  %v14417_v17 = vld [vmem:[#allocation13 + $0x1f4] ss:$8 sps:$4 sm:$0xff]  }
 0x193   :  { %14204 = vmatmul.mubr.msk.bf16.vlgmr.msra.gmra.mxu1 %vm564_vm3, %v14321_v18  ;;  %v14418_v18 = vld [vmem:[#allocation13 + $0x1e0] ss:$8 sps:$4 sm:$0xff]  }
 0x194   :  { %14228 = vmatmul.mubr.msk.bf16.vlgmr.msra.gmra.mxu0 %vm564_vm3, %v14322_v19  ;;  %14244 = vmatpush3.bf16.msra.mxu1 %v14320_v0  ;;  %v14373_v0 = vld [vmem:[#allocation13 + $0x20] ss:$8 sps:$4 sm:$0xff]   ;;  %v14420_v19 = vld [vmem:[#allocation13 + $0x1e4] ss:$8 sps:$4 sm:$0xff]  }
 0x195   :  { %14207 = vmatprep.mubr.msk.bf16.mxu1 %vm564_vm3, %v14323_v21  ;;  %14231 = vmatprep.mubr.msk.bf16.mxu0 %vm564_vm3, %v14324_v22  ;;  %v14428_v21 = vld [vmem:[#allocation13 + $0x1d4] ss:$8 sps:$4 sm:$0xff]   ;;  %v14429_v22 = vld [vmem:[#allocation13 + $0x1c0] ss:$8 sps:$4 sm:$0xff]  }
 0x196   :  { %14245 = vmatprep.subr.bf16.mxu1 %v14325_v20  ;;  %1821 = vmatpush1.bf16.msra.mxu0 %v14352_v50 }
 0x197   :  { %1822 = vmatprep.subr.bf16.mxu0 %v14360_v54 }
 0x198   :  { %14246 = vmatpush3.bf16.msra.mxu1 %v14325_v20  ;;  %v14426_v20 = vld [vmem:[#allocation13 + $0x1d0] ss:$8 sps:$4 sm:$0xff]  }
 0x199   :  { %14247 = vmatprep.subr.bf16.mxu1 %v14330_v23 }
 0x19a   :  { %1823 = vmatpush1.bf16.msra.mxu0 %v14358_v53 }
 0x19b   :  { %14208 = vmatmul.mubr.msk.bf16.gmra.mxu1 %vm564_vm3, %v14326_v24  ;;  %1824 = vmatprep.subr.bf16.mxu0 %v14366_v58 }
 0x19c   :  { %14232 = vmatmul.mubr.msk.bf16.gmra.mxu0 %vm564_vm3, %v14327_v25  ;;  %14211 = vmatprep.mubr.msk.bf16.mxu1 %vm564_vm3, %v14328_v26 }
 0x19d   :  { %14235 = vmatprep.mubr.msk.bf16.mxu0 %vm564_vm3, %v14329_v28  ;;  %14248 = vmatpush3.bf16.msra.mxu1 %v14330_v23  ;;  %v14431_v23 = vld [vmem:[#allocation13 + $0x1c4] ss:$8 sps:$4 sm:$0xff]   ;;  %v14437_v28 = vld [vmem:[#allocation13 + $0x1b0] ss:$8 sps:$4 sm:$0xff]  }
 0x19e   :  { %14249 = vmatprep.subr.bf16.mxu1 %v14335_v27  ;;  %1825 = vmatpush1.bf16.msra.mxu0 %v14364_v57 }
 0x19f   :  { %1826 = vmatprep.subr.bf16.mxu0 %v14372_v61 }
 0x1a1   :  { %14250 = vmatpush3.bf16.msra.mxu1 %v14335_v27 }
 0x1a2   :  { %2031 = vmatprep.subr.bf16.mxu1 %v14348_v47  ;;  %1827 = vmatpush1.bf16.msra.mxu0 %v14370_v63 }
 0x1a3   :  { %14212 = vmatmul.mubr.msk.bf16.gmra.mxu1 %vm564_vm3, %v14331_v29  ;;  %1828 = vmatprep.subr.bf16.mxu0 %v14378_v1  ;;  %v14439_v29 = vld [vmem:[#allocation13 + $0x1b4] ss:$8 sps:$4 sm:$0xff]  }
 0x1a4   :  { %14236 = vmatmul.mubr.msk.bf16.gmra.mxu0 %vm564_vm3, %v14332_v30  ;;  %14215 = vmatprep.mubr.msk.bf16.mxu1 %vm564_vm3, %v14333_v32  ;;  %v14440_v30 = vld [vmem:[#allocation13 + $0x1a0] ss:$8 sps:$4 sm:$0xff]   ;;  %v14442_v32 = vld [vmem:[#allocation13 + $0x1a4] ss:$8 sps:$4 sm:$0xff]  }
 0x1a5   :  { %14239 = vmatprep.mubr.msk.bf16.mxu0 %vm564_vm3, %v14334_v33 }
 0x1a6   :  { %1829 = vmatpush1.bf16.msra.mxu0 %v14376_v3 }
 0x1a7   :  { %1830 = vmatprep.subr.bf16.mxu0 %v14384_v4 }
 0x1aa   :  { %1831 = vmatpush1.bf16.msra.mxu0 %v14382_v6 }
 0x1ab   :  { %14216 = vmatmul.mubr.msk.bf16.gmra.mxu1 %vm564_vm3, %v14336_v34  ;;  %1832 = vmatprep.subr.bf16.mxu0 %v14390_v10 }
 0x1ac   :  { %14240 = vmatmul.mubr.msk.bf16.gmra.mxu0 %vm564_vm3, %v14337_v35  ;;  %14251 = vmatprep.mubr.msk.bf16.mxu1 %vm564_vm3, %v14338_v36 }
 0x1ad   :  { %1852 = vmatprep.mubr.bf16.mxu0 %v17567_v31 }
 0x1ae   :  { %1833 = vmatpush1.bf16.msra.mxu0 %v14388_v12 }
 0x1af   :  { %1834 = vmatprep.subr.bf16.mxu0 %v14394_v13 }
 0x1b2   :  { %1835 = vmatpush1.bf16.msra.mxu0 %v14392_v14 }
 0x1b3   :  { %14252 = vmatmul.mubr.msk.bf16.vlgmr.msra.gmra.mxu1 %vm564_vm3, %v14339_v37  ;;  %2305 = vmatprep.subr.bf16.mxu0 %v14397_v15 }
 0x1b4   :  { %14255 = vmatprep.mubr.msk.bf16.mxu1 %vm564_vm3, %v14340_v38  ;;  %2032 = vmatpush1.bf16.msra.mxu1 %v14346_v39  ;;  %v14453_v39 = vld [vmem:[#allocation13 + $0x184] ss:$8 sps:$4 sm:$0xff]  }
 0x1b5   :  { %2033 = vmatprep.subr.bf16.mxu1 %v14351_v49 }
 0x1b8   :  { %2034 = vmatpush1.bf16.msra.mxu1 %v14349_v48 }
 0x1b9   :  { %2035 = vmatprep.subr.bf16.mxu1 %v14357_v52 }
 0x1bb   :  { %14256 = vmatmul.mubr.msk.bf16.gmra.mxu1 %vm564_vm3, %v14341_v42 }
 0x1bc   :  { %14259 = vmatprep.mubr.msk.bf16.mxu1 %vm564_vm3, %v14342_v43  ;;  %2036 = vmatpush1.bf16.msra.mxu1 %v14355_v40  ;;  %v14448_v43 = vld [vmem:[#allocation13 + $0x190] ss:$8 sps:$4 sm:$0xff]  }
 0x1bd   :  { %2037 = vmatprep.subr.bf16.mxu1 %v14363_v56 }
 0x1c0   :  { %2038 = vmatpush1.bf16.msra.mxu1 %v14361_v55 }
 0x1c1   :  { %2039 = vmatprep.subr.bf16.mxu1 %v14369_v60 }
 0x1c3   :  { %14260 = vmatmul.mubr.msk.bf16.gmra.mxu1 %vm564_vm3, %v14343_v44  ;;  %v14450_v44 = vld [vmem:[#allocation13 + $0x194] ss:$8 sps:$4 sm:$0xff]  }
 0x1c4   :  { %14263 = vmatprep.mubr.msk.bf16.mxu1 %vm564_vm3, %v14344_v45  ;;  %2040 = vmatpush1.bf16.msra.mxu1 %v14367_v59 }
 0x1c5   :  { %2041 = vmatprep.subr.bf16.mxu1 %v14375_v62 }
 0x1c8   :  { %2042 = vmatpush1.bf16.msra.mxu1 %v14373_v0 }
 0x1c9   :  { %2043 = vmatprep.subr.bf16.mxu1 %v14381_v2 }
 0x1cb   :  { %14264 = vmatmul.mubr.msk.bf16.gmra.mxu1 %vm564_vm3, %v14345_v46  ;;  %v14451_v46 = vld [vmem:[#allocation13 + $0x180] ss:$8 sps:$4 sm:$0xff]  }
 0x1cc   :  { %2063 = vmatprep.mubr.bf16.mxu1 %v17567_v31  ;;  %2044 = vmatpush1.bf16.msra.mxu1 %v14379_v41 }
 0x1cd   :  { %2045 = vmatprep.subr.bf16.mxu1 %v14387_v5 }
 0x1d0   :  { %2046 = vmatpush1.bf16.msra.mxu1 %v14385_v7 }
 0x1d1   :  { %2611 = vmatprep.subr.bf16.mxu1 %v14417_v17 }
 0x1d3   :  { %2064 = vmatmul.mubr.bf16.vlgmr.msra.gmra.mxu1 %v12556_v11 }
 0x1d4   :  { %2073 = vmatprep.mubr.bf16.mxu1 %v17567_v31  ;;  %2612 = vmatpush1.bf16.msra.mxu1 %v14415_v16 }
 0x1d5   :  { %2613 = vmatprep.subr.bf16.mxu1 %v14420_v19 }
 0x1d8   :  { %2614 = vmatpush1.bf16.msra.mxu1 %v14418_v18 }
 0x1d9   :  { %2615 = vmatprep.subr.bf16.mxu1 %v14428_v21 }
 0x1dc   :  { %2616 = vmatpush1.bf16.msra.mxu1 %v14426_v20 }
 0x1dd   :  { %2617 = vmatprep.subr.bf16.mxu1 %v14431_v23 }
 0x1e0   :  { %2618 = vmatpush1.bf16.msra.mxu1 %v14429_v22 }
 0x1e1   :  { %2619 = vmatprep.subr.bf16.mxu1 %v14439_v29 }
 0x1e4   :  { %2620 = vmatpush1.bf16.msra.mxu1 %v14437_v28 }
 0x1e5   :  { %2621 = vmatprep.subr.bf16.mxu1 %v14442_v32 }
 0x1e8   :  { %2622 = vmatpush1.bf16.msra.mxu1 %v14440_v30 }
 0x1e9   :  { %2623 = vmatprep.subr.bf16.mxu1 %v14450_v44 }
 0x1ec   :  { %2624 = vmatpush1.bf16.msra.mxu1 %v14448_v43 }
 0x1ed   :  { %2625 = vmatprep.subr.bf16.mxu1 %v14453_v39 }
 0x1f0   :  { %2626 = vmatpush1.bf16.msra.mxu1 %v14451_v46 }
 0x233   :  { %v16812_v24 = vpop.f32.mrf.mxu1  ;;  %v16814_v25 = vpop.f32.mrf.mxu0 }
 0x234   :  { %v787_v21 = vadd.f32 %v16814_v25, %v16812_v24 }
 0x235   :  { %v16816_v26 = vpop.f32.mrf.mxu1  ;;  %v16818_v27 = vpop.f32.mrf.mxu0 }
 0x236   :  { %v779_v23 = vadd.f32 %v16818_v27, %v16816_v26 }
 0x237   :  { %v16820_v33 = vpop.f32.mrf.mxu1  ;;  %v16822_v34 = vpop.f32.mrf.mxu0 }
 0x238   :  { %v790_v32 = vadd.f32 %v16822_v34, %v16820_v33 }
 0x239   :  { %v16824_v35 = vpop.f32.mrf.mxu1  ;;  %v16826_v36 = vpop.f32.mrf.mxu0 }
 0x23a   :  { %v782_v46 = vadd.f32 %v16826_v36, %v16824_v35 }
 0x23b   :  { %v16828_v37 = vpop.f32.mrf.mxu1 }
 0x23c   :  { %v16830_v38 = vpop.f32.mrf.mxu0 }
 0x23d   :  { %v16832_v42 = vpop.f32.mrf.mxu1  ;;  %v803_v26 = vadd.f32 %v16830_v38, %v16828_v37 }
 0x23e   :  { %v16834_v45 = vpop.f32.mrf.mxu0 }
 0x23f   :  { %v16836_v47 = vpop.f32.mrf.mxu1  ;;  %v795_v33 = vadd.f32 %v16834_v45, %v16832_v42 }
 0x240   :  { %v16838_v48 = vpop.f32.mrf.mxu0 }
 0x241   :  { %v16840_v49 = vpop.f32.mrf.mxu1  ;;  %v806_v35 = vadd.f32 %v16838_v48, %v16836_v47 }
 0x242   :  { %v16842_v50 = vpop.f32.mrf.mxu0 }
 0x243   :  { %v16844_v51 = vpop.f32.mrf.mxu1 }
 0x244   :  { %v16846_v40 = vpop.f32.mrf.mxu0 }
 0x245   :  { %v16848_v52 = vpop.f32.mrf.mxu1  ;;  %v819_v47 = vadd.f32 %v16846_v40, %v16844_v51 }
 0x246   :  { %v16850_v53 = vpop.f32.mrf.mxu0 }
 0x247   :  { %v16852_v54 = vpop.f32.mrf.mxu1 }
 0x248   :  { %v16854_v55 = vpop.f32.mrf.mxu0 }
 0x249   :  { %v16856_v56 = vpop.f32.mrf.mxu1  ;;  %v822_v51 = vadd.f32 %v16854_v55, %v16852_v54 }
 0x24a   :  { %v16858_v57 = vpop.f32.mrf.mxu0 }
 0x24b   :  { %v16860_v58 = vpop.f32.mrf.mxu1 }
 0x24c   :  { %v16862_v59 = vpop.f32.mrf.mxu0 }
 0x24d   :  { %v16864_v60 = vpop.f32.mrf.mxu1 }
 0x24e   :  { %v16866_v61 = vpop.f32.mrf.mxu0 }
 0x24f   :  { %v16868_v62 = vpop.f32.mrf.mxu1 }
 0x250   :  { %v16870_v63 = vpop.f32.mrf.mxu0 }
 0x251   :  { %v16872_v0 = vpop.f32.mrf.mxu1 }
 0x252   :  { %v16874_v1 = vpop.f32.mrf.mxu0 }
 0x253   :  { %17569 = vst [vmem:[#allocation32_spill] sm:$0xff] %v16874_v1  ;;  %v14205_v2 = vpop.f32.mrf.mxu1  ;;  %v16896_v1 = vld [vmem:[#allocation11] ss:$0 sm:$0xff] }
 0x254   :  { %v14229_v3 = vpop.f32.mrf.mxu0  ;;  %v1053_v28 = vadd.f32 %v14205_v2, %v787_v21 }
 0x255   :  { %v988_v41 = vpop.f32.mrf.mxu1 }
 0x256   :  { %v1214_v4 = vpop.f32.mrf.mxu0  ;;  %v1051_v43 = vadd.f32 %v988_v41, %v779_v23  ;;  %v1279_v39 = vadd.f32 %v14229_v3, %v1053_v28 }
 0x257   :  { %v14206_v5 = vpop.f32.mrf.mxu1 }
 0x258   :  { %v14230_v7 = vpop.f32.mrf.mxu0  ;;  %v1054_v24 = vadd.f32 %v14206_v5, %v790_v32  ;;  %v1277_v27 = vadd.f32 %v1214_v4, %v1051_v43 }
 0x259   :  { %v991_v6 = vpop.f32.mrf.mxu1 }
 0x25a   :  { %v1217_v10 = vpop.f32.mrf.mxu0  ;;  %v1052_v2 = vadd.f32 %v991_v6, %v782_v46  ;;  %v1280_v41 = vadd.f32 %v14230_v7, %v1054_v24 }
 0x25b   :  { %v14209_v8 = vpop.f32.mrf.mxu1 }
 0x25c   :  { %v14233_v13 = vpop.f32.mrf.mxu0  ;;  %v1057_v23 = vadd.f32 %v14209_v8, %v803_v26  ;;  %v1278_v28 = vadd.f32 %v1217_v10, %v1052_v2 }
 0x25d   :  { %v1004_v9 = vpop.f32.mrf.mxu1 }
 0x25e   :  { %v1230_v16 = vpop.f32.mrf.mxu0  ;;  %v1055_v36 = vadd.f32 %v1004_v9, %v795_v33  ;;  %v1283_v42 = vadd.f32 %v14233_v13, %v1057_v23 }
 0x25f   :  { %v14210_v11 = vpop.f32.mrf.mxu1 }
 0x260   :  { %v14234_v19 = vpop.f32.mrf.mxu0  ;;  %v1058_v38 = vadd.f32 %v14210_v11, %v806_v35  ;;  %v1281_v48 = vadd.f32 %v1230_v16, %v1055_v36 }
 0x261   :  { %v1007_v12 = vpop.f32.mrf.mxu1 }
 0x262   :  { %v1233_v29 = vpop.f32.mrf.mxu0  ;;  %v1284_v11 = vadd.f32 %v14234_v19, %v1058_v38 }
 0x263   :  { %v14213_v14 = vpop.f32.mrf.mxu1 }
 0x264   :  { %v14237_v25 = vpop.f32.mrf.mxu0  ;;  %v1061_v13 = vadd.f32 %v14213_v14, %v819_v47  ;;  %v14395_v47 = vld [vmem:[#allocation13 + $0x170] ss:$8 sps:$4 sm:$0xff]  }
 0x265   :  { %v1020_v15 = vpop.f32.mrf.mxu1 }
 0x266   :  { %v1246_v3 = vpop.f32.mrf.mxu0  ;;  %v1287_v19 = vadd.f32 %v14237_v25, %v1061_v13  ;;  %v827_v25 = vadd.f32 %v16866_v61, %v16864_v60 }
 0x267   :  { %v16876_v17 = vpop.f32.mrf.mxu1 }
 0x268   :  { %v14238_v9 = vpop.f32.mrf.mxu0 }
 0x269   :  { %v16878_v18 = vpop.f32.mrf.mxu1 }
 0x26b   :  { %v16880_v20 = vpop.f32.mrf.mxu1 }
 0x26d   :  { %v16884_v22 = vpop.f32.mrf.mxu1 }
 0x26f   :  { %v16888_v30 = vpop.f32.mrf.mxu1 }
 0x271   :  { %v16892_v44 = vpop.f32.mrf.mxu1 }
 0x272   :  { %17570 = vst [vmem:[#allocation33_spill] sm:$0xff] %v16892_v44 }
 0x273   :  { %v14253_v31 = vpop.f32.mrf.mxu1 }
 0x274   :  { %v1505_v21 = vadd.f32 %v14253_v31, %v1279_v39  ;;  %v798_v31 = vadd.f32 %v16842_v50, %v16840_v49  ;;  %v811_v50 = vadd.f32 %v16850_v53, %v16848_v52  ;;  %v814_v52 = vadd.f32 %v16858_v57, %v16856_v56 }
 0x275   :  { %v1440_v34 = vpop.f32.mrf.mxu1  ;;  %v1062_v53 = vadd.f32 %v16876_v17, %v822_v51 }
 0x276   :  { %v1503_v44 = vadd.f32 %v1440_v34, %v1277_v27  ;;  %v1528_v32 = vadd.f32 %v16896_v1, %v1505_v21  ;;  %v1056_v8 = vadd.f32 %v1007_v12, %v798_v31  ;;  %v1059_v40 = vadd.f32 %v1020_v15, %v811_v50  ;;  %v1249_v12 = vpop.f32.mrf.mxu0 }
 0x277   :  { %v14254_v5 = vpop.f32.mrf.mxu1  ;;  %v835_v15 = vadd.f32 %v16862_v59, %v16860_v58  ;;  %v1060_v35 = vadd.f32 %v16878_v18, %v814_v52  ;;  %v838_v18 = vadd.f32 %v16870_v63, %v16868_v62 }
 0x278   :  { %v1506_v37 = vadd.f32 %v14254_v5, %v1280_v41  ;;  %v1526_v45 = vadd.f32 %v16896_v1, %v1503_v44  ;;  %v1544_v43 = vmax.f32 %v1528_v32, 0.0  ;;  %v1282_v21 = vadd.f32 %v1233_v29, %v1056_v8  ;;  %v14241_v36 = vpop.f32.mrf.mxu0 }
 0x279   :  { %v1443_v4 = vpop.f32.mrf.mxu1  ;;  %v1285_v29 = vadd.f32 %v1246_v3, %v1059_v40  ;;  %v1288_v32 = vadd.f32 %v14238_v9, %v1062_v53  ;;  %v1063_v3 = vadd.f32 %v16884_v22, %v827_v25  ;;  %v1066_v9 = vadd.f32 %v16888_v30, %v838_v18  ;;  %v17572_v13 = vld [vmem:[#allocation33_spill] sm:$0xff] }
 0x27a   :  { %v1529_v6 = vadd.f32 %v16896_v1, %v1506_v37  ;;  %v1504_v7 = vadd.f32 %v1443_v4, %v1278_v28  ;;  %v1542_v24 = vmax.f32 %v1526_v45, 0.0  ;;  %v1065_v37 = vadd.f32 %v16880_v20, %v835_v15  ;;  %v17571_v20 = vld [vmem:[#allocation32_spill] sm:$0xff] }
 0x27b   :  { %v14257_v10 = vpop.f32.mrf.mxu1  ;;  %v17573_v53 = vmov 0  }
 0x27c   :  { %v1545_v46 = vmax.f32 %v1529_v6, 0.0  ;;  %v1527_v39 = vadd.f32 %v16896_v1, %v1504_v7  ;;  %v1509_v49 = vadd.f32 %v14257_v10, %v1283_v42  ;;  %v1262_v42 = vpop.f32.mrf.mxu0  ;;  %v1286_v6 = vadd.f32 %v1249_v12, %v1060_v35  ;;  %v14407_v12 = vld [vmem:[#allocation13 + $0x154] ss:$8 sps:$4 sm:$0xff]  }
 0x27d   :  { %v1456_v44 = vpop.f32.mrf.mxu1  ;;  %v1291_v8 = vadd.f32 %v14241_v36, %v1065_v37  ;;  %v1289_v50 = vadd.f32 %v1262_v42, %v1063_v3 }
 0x27e   :  { %v13941_v26 = vpack.c.bf16 %v1545_v46, %v1544_v43  ;;  %v1543_v27 = vmax.f32 %v1527_v39, 0.0  ;;  %v1507_v2 = vadd.f32 %v1456_v44, %v1281_v48  ;;  %v1532_v34 = vadd.f32 %v16896_v1, %v1509_v49  ;;  %v16266_v39 = vld [vmem:[#allocation3 + $0x4] sm:$0xf] }
 0x27f   :  { %v14258_v16 = vpop.f32.mrf.mxu1  ;;  %v830_v48 = vadd.f32 %v17571_v20, %v16872_v0  ;;  %v14445_v20 = vld [vmem:[#allocation13 + $0x114] ss:$8 sps:$4 sm:$0xff]  }
 0x280   :  { %13974 = vst [vmem:[#allocation3 + $0x10] sm:$0xff] %v13941_v26   ;;  %v13936_v33 = vpack.c.bf16 %v1543_v27, %v1542_v24  ;;  %v1510_v41 = vadd.f32 %v14258_v16, %v1284_v11  ;;  %v1530_v23 = vadd.f32 %v16896_v1, %v1507_v2  ;;  %v1548_v28 = vmax.f32 %v1532_v34, 0.0  ;;  %v14242_v11 = vpop.f32.mrf.mxu0  ;;  %v14400_v26 = vld [vmem:[#allocation13 + $0x160] ss:$8 sps:$4 sm:$0xff]   ;;  %v14402_v27 = vld [vmem:[#allocation13 + $0x164] ss:$8 sps:$4 sm:$0xff]  }
 0x281   :  { %v1459_v14 = vpop.f32.mrf.mxu1  ;;  %v1064_v44 = vadd.f32 %v17572_v13, %v830_v48  ;;  %v1292_v16 = vadd.f32 %v14242_v11, %v1066_v9 }
 0x282   :  { %13973 = vst [vmem:[#allocation3 + $0x8] sm:$0xff] %v13936_v33   ;;  %v1533_v54 = vadd.f32 %v16896_v1, %v1510_v41  ;;  %v1508_v55 = vadd.f32 %v1459_v14, %v1282_v21  ;;  %v1546_v38 = vmax.f32 %v1530_v23, 0.0  ;;  %v1265_v14 = vpop.f32.mrf.mxu0 }
 0x283   :  { %v14261_v5 = vpop.f32.mrf.mxu1 }
 0x284   :  { %v1549_v56 = vmax.f32 %v1533_v54, 0.0  ;;  %v1531_v57 = vadd.f32 %v16896_v1, %v1508_v55  ;;  %v1513_v17 = vadd.f32 %v14261_v5, %v1287_v19  ;;  %v1290_v54 = vadd.f32 %v1265_v14, %v1064_v44  ;;  %v14469_v14 = vld [vmem:[#allocation13 + $0x250] ss:$8 sps:$4 sm:$0xff]  }
 0x285   :  { %v1472_v31 = vpop.f32.mrf.mxu1 }
 0x286   :  { %v13951_v4 = vpack.c.bf16 %v1549_v56, %v1548_v28  ;;  %v1547_v58 = vmax.f32 %v1531_v57, 0.0  ;;  %v1511_v59 = vadd.f32 %v1472_v31, %v1285_v29  ;;  %v1536_v60 = vadd.f32 %v16896_v1, %v1513_v17  ;;  %v14405_v17 = vld [vmem:[#allocation13 + $0x150] ss:$8 sps:$4 sm:$0xff]  }
 0x287   :  { %v14262_v45 = vpop.f32.mrf.mxu1  ;;  %v1646_v23 = vld [vmem:[#allocation3 + $0x10] sm:$0xf]  ;;  %v1647_v35 = vld [vmem:[#allocation3 + $0x14] sm:$0xf] }
 0x288   :  { %13976 = vst [vmem:[#allocation3 + $0x20] sm:$0xff] %v13951_v4   ;;  %v13946_v7 = vpack.c.bf16 %v1547_v58, %v1546_v38  ;;  %v1514_v61 = vadd.f32 %v14262_v45, %v1288_v32  ;;  %v1534_v63 = vadd.f32 %v16896_v1, %v1511_v59  ;;  %v1552_v30 = vmax.f32 %v1536_v60, 0.0  ;;  %v14412_v32 = vld [vmem:[#allocation13 + $0x144] ss:$8 sps:$4 sm:$0xff]   ;;  %v14410_v4 = vld [vmem:[#allocation13 + $0x140] ss:$8 sps:$4 sm:$0xff]  }
 0x289   :  { %v1475_v10 = vpop.f32.mrf.mxu1  ;;  %v1644_v43 = vld [vmem:[#allocation3 + $0x8] sm:$0xf]  ;;  %v1645_v62 = vld [vmem:[#allocation3 + $0xc] sm:$0xf]  ;;  %v12558_v25 = vcombine.low %v1646_v23, %v1647_v35  ;;  %v14423_v58 = vld [vmem:[#allocation13 + $0x134] ss:$8 sps:$4 sm:$0xff]  }
 0x28a   :  { %13975 = vst [vmem:[#allocation3 + $0x18] sm:$0xff] %v13946_v7   ;;  %v1537_v22 = vadd.f32 %v16896_v1, %v1514_v61  ;;  %v1512_v46 = vadd.f32 %v1475_v10, %v1286_v6  ;;  %v12532_v49 = vcombine.low %v16266_v39, %v1644_v43  ;;  %v12557_v0 = vcombine.low %v1644_v43, %v1645_v62  ;;  %v14434_v61 = vld [vmem:[#allocation13 + $0x124] ss:$8 sps:$4 sm:$0xff]   ;;  %v14443_v10 = vld [vmem:[#allocation13 + $0x110] ss:$8 sps:$4 sm:$0xff]  }
 0x28b   :  { %v14265_v24 = vpop.f32.mrf.mxu1  ;;  %v1550_v33 = vmax.f32 %v1534_v63, 0.0  ;;  %v12533_v57 = vcombine.low %v1645_v62, %v1646_v23  ;;  %v14456_v62 = vld [vmem:[#allocation13 + $0x104] ss:$8 sps:$4 sm:$0xff]   ;;  %v14454_v63 = vld [vmem:[#allocation13 + $0x100] ss:$8 sps:$4 sm:$0xff]  }
 0x28c   :  { %v1553_v2 = vmax.f32 %v1537_v22, 0.0  ;;  %v1535_v51 = vadd.f32 %v16896_v1, %v1512_v46  ;;  %v1517_v40 = vadd.f32 %v14265_v24, %v1291_v8  ;;  %1853 = vmatmul.mubr.bf16.vlgmr.msra.gmra.mxu0 %v12532_v49  ;;  %2074 = vmatmul.mubr.bf16.gmra.mxu1 %v12557_v0  ;;  %v14461_v46 = vld [vmem:[#allocation13 + $0x274] ss:$8 sps:$4 sm:$0xff]   ;;  %v14476_v23 = vld [vmem:[#allocation13 + $0x244] ss:$8 sps:$4 sm:$0xff]  }
 0x28d   :  { %2306 = vmatpush1.bf16.msra.mxu0 %v14395_v47  ;;  %v1488_v21 = vpop.f32.mrf.mxu1  ;;  %1862 = vmatprep.mubr.bf16.mxu0 %v17573_v53  ;;  %v14432_v47 = vld [vmem:[#allocation13 + $0x120] ss:$8 sps:$4 sm:$0xff]  }
 0x28e   :  { %v13961_v34 = vpack.c.bf16 %v1553_v2, %v1552_v30  ;;  %v1551_v41 = vmax.f32 %v1535_v51, 0.0  ;;  %v1515_v52 = vadd.f32 %v1488_v21, %v1289_v50  ;;  %2083 = vmatprep.mubr.bf16.mxu1 %v17573_v53  ;;  %2307 = vmatprep.subr.bf16.mxu0 %v14402_v27  ;;  %v1540_v15 = vadd.f32 %v16896_v1, %v1517_v40  ;;  %v14458_v40 = vld [vmem:[#allocation3 + $0xc] sm:$0xff]  }
 0x28f   :  { %v14266_v19 = vpop.f32.mrf.mxu1  ;;  %v1650_v48 = vld [vmem:[#allocation3 + $0x20] sm:$0xf]  ;;  %v1651_v8 = vld [vmem:[#allocation3 + $0x24] sm:$0xf] }
 0x290   :  { %13978 = vst [vmem:[#allocation3 + $0x30] sm:$0xff] %v13961_v34   ;;  %v13956_v55 = vpack.c.bf16 %v1551_v41, %v1550_v33  ;;  %v1518_v29 = vadd.f32 %v14266_v19, %v1292_v16  ;;  %v1538_v5 = vadd.f32 %v16896_v1, %v1515_v52  ;;  %v1556_v37 = vmax.f32 %v1540_v15, 0.0  ;;  %v14462_v16 = vld [vmem:[#allocation3 + $0x8] sm:$0xff]   ;;  %v14471_v41 = vld [vmem:[#allocation13 + $0x254] ss:$8 sps:$4 sm:$0xff]  }
 0x291   :  { %v1491_v36 = vpop.f32.mrf.mxu1  ;;  %2308 = vmatpush1.bf16.msra.mxu0 %v14400_v26  ;;  %v1648_v42 = vld [vmem:[#allocation3 + $0x18] sm:$0xf]  ;;  %v1649_v45 = vld [vmem:[#allocation3 + $0x1c] sm:$0xf]  ;;  %v12560_v43 = vcombine.low %v1650_v48, %v1651_v8  ;;  %v14466_v33 = vld [vmem:[#allocation13 + $0x264] ss:$8 sps:$4 sm:$0xff]  }
 0x292   :  { %13977 = vst [vmem:[#allocation3 + $0x28] sm:$0xff] %v13956_v55   ;;  %v1541_v28 = vadd.f32 %v16896_v1, %v1518_v29  ;;  %v1516_v56 = vadd.f32 %v1491_v36, %v1290_v54  ;;  %2309 = vmatprep.subr.bf16.mxu0 %v14407_v12  ;;  %v1554_v59 = vmax.f32 %v1538_v5, 0.0  ;;  %v12534_v7 = vcombine.low %v1647_v35, %v1648_v42  ;;  %v14459_v12 = vld [vmem:[#allocation13 + $0x270] ss:$8 sps:$4 sm:$0xff]   ;;  %v14464_v34 = vld [vmem:[#allocation13 + $0x260] ss:$8 sps:$4 sm:$0xff]  }
 0x293   :  { %v12559_v60 = vcombine.low %v1648_v42, %v1649_v45  ;;  %v12535_v9 = vcombine.low %v1649_v45, %v1650_v48  ;;  %v14463_v21 = vld [vmem:[#allocation3 + $0x14] sm:$0xff]   ;;  %v14468_v19 = vld [vmem:[#allocation3 + $0x1c] sm:$0xff]   ;;  %v14486_v36 = vld [vmem:[#allocation13 + $0x224] ss:$8 sps:$4 sm:$0xff]  }
 0x294   :  { %v1557_v31 = vmax.f32 %v1541_v28, 0.0  ;;  %v1539_v38 = vadd.f32 %v16896_v1, %v1516_v56  ;;  %1863 = vmatmul.mubr.bf16.gmra.mxu0 %v12533_v57  ;;  %2084 = vmatmul.mubr.bf16.gmra.mxu1 %v12558_v25  ;;  %v14421_v1 = vld [vmem:[#allocation13 + $0x130] ss:$8 sps:$4 sm:$0xff]   ;;  %v14474_v54 = vld [vmem:[#allocation13 + $0x240] ss:$8 sps:$4 sm:$0xff]  }
 0x295   :  { %1872 = vmatprep.mubr.bf16.mxu0 %v17573_v53  ;;  %2093 = vmatprep.mubr.bf16.mxu1 %v17573_v53  ;;  %v14467_v52 = vld [vmem:[#allocation3 + $0x10] sm:$0xff]   ;;  %v14472_v15 = vld [vmem:[#allocation3 + $0x18] sm:$0xff]   ;;  %v14484_v5 = vld [vmem:[#allocation13 + $0x220] ss:$8 sps:$4 sm:$0xff]  }
 0x296   :  { %v13971_v18 = vpack.c.bf16 %v1557_v31, %v1556_v37  ;;  %v1555_v3 = vmax.f32 %v1539_v38, 0.0  ;;  %2310 = vmatpush1.bf16.msra.mxu0 %v14405_v17  ;;  %v14481_v55 = vld [vmem:[#allocation13 + $0x234] ss:$8 sps:$4 sm:$0xff]   ;;  %v14479_v29 = vld [vmem:[#allocation13 + $0x230] ss:$8 sps:$4 sm:$0xff]   ;;  %v14477_v56 = vld [vmem:[#allocation3 + $0x20] sm:$0xff]  }
 0x297   :  { %2311 = vmatprep.subr.bf16.mxu0 %v14412_v32  ;;  %v1654_v11 = vld [vmem:[#allocation3 + $0x30] sm:$0xf]  ;;  %v1655_v13 = vld [vmem:[#allocation3 + $0x34] sm:$0xf]  ;;  %v14496_v25 = vld [vmem:[#allocation13 + $0x204] ss:$8 sps:$4 sm:$0xff]  }
 0x298   :  { %13980 = vst [vmem:[#allocation3 + $0x40] sm:$0xff] %v13971_v18   ;;  %v13966_v6 = vpack.c.bf16 %v1555_v3, %v1554_v59  ;;  %v12562_v24 = vcombine.low %v1654_v11, %v1655_v13  ;;  %v14491_v28 = vld [vmem:[#allocation13 + $0x214] ss:$8 sps:$4 sm:$0xff]   ;;  %v14489_v57 = vld [vmem:[#allocation13 + $0x210] ss:$8 sps:$4 sm:$0xff]  }
 0x299   :  { %v1652_v22 = vld [vmem:[#allocation3 + $0x28] sm:$0xf]  ;;  %v1653_v39 = vld [vmem:[#allocation3 + $0x2c] sm:$0xf]  ;;  %v14487_v38 = vld [vmem:[#allocation3 + $0x30] sm:$0xff]  }
 0x29a   :  { %13979 = vst [vmem:[#allocation3 + $0x38] sm:$0xff] %v13966_v6   ;;  %2312 = vmatpush1.bf16.msra.mxu0 %v14410_v4  ;;  %v12536_v49 = vcombine.low %v1651_v8, %v1652_v22  ;;  %v12561_v50 = vcombine.low %v1652_v22, %v1653_v39  ;;  %v12537_v44 = vcombine.low %v1653_v39, %v1654_v11  ;;  %v14473_v35 = vld [vmem:[#allocation3 + $0x24] sm:$0xff]   ;;  %v14478_v17 = vld [vmem:[#allocation3 + $0x2c] sm:$0xff]   ;;  %v14499_v42 = vld [vmem:[#allocation3 + $0x18] sm:$0xff]  }
 0x29b   :  { %2313 = vmatprep.subr.bf16.mxu0 %v14423_v58  ;;  %v14494_v32 = vld [vmem:[#allocation13 + $0x200] ss:$8 sps:$4 sm:$0xff]   ;;  %v14498_v3 = vld [vmem:[#allocation3 + $0x10] sm:$0xff]  }
 0x29c   :  { %1873 = vmatmul.mubr.bf16.gmra.mxu0 %v12534_v7  ;;  %2094 = vmatmul.mubr.bf16.gmra.mxu1 %v12559_v60  ;;  %v14482_v37 = vld [vmem:[#allocation3 + $0x28] sm:$0xff]   ;;  %v14506_v45 = vld [vmem:[#allocation16 + $0xe0] ss:$16 sps:$4 sm:$0xff]  }
 0x29d   :  { %1882 = vmatprep.mubr.bf16.mxu0 %v17573_v53  ;;  %2103 = vmatprep.mubr.bf16.mxu1 %v17573_v53  ;;  %v14508_v6 = vld [vmem:[#allocation16 + $0xe4] ss:$16 sps:$4 sm:$0xff]   ;;  %v14509_v7 = vld [vmem:[#allocation16 + $0xe8] ss:$16 sps:$4 sm:$0xff]   ;;  %v14517_v48 = vld [vmem:[#allocation16 + $0xcc] ss:$16 sps:$4 sm:$0xff]  }
 0x29e   :  { %2314 = vmatpush1.bf16.msra.mxu0 %v14421_v1  ;;  %v14511_v1 = vld [vmem:[#allocation16 + $0xec] ss:$16 sps:$4 sm:$0xff]   ;;  %3642 = vmatprep.subr.bf16.mxu1 %v14508_v6  ;;  %v14518_v8 = vld [vmem:[#allocation16 + $0xa0] ss:$16 sps:$4 sm:$0xff]   ;;  %v14526_v22 = vld [vmem:[#allocation16 + $0x84] ss:$16 sps:$4 sm:$0xff]  }
 0x29f   :  { %2315 = vmatprep.subr.bf16.mxu0 %v14434_v61  ;;  %v1674_v2 = vld [vmem:[#allocation3 + $0x40] sm:$0xf]  ;;  %v14493_v59 = vld [vmem:[#allocation3 + $0x44] sm:$0xff]  }
 0x2a0   :  { %v14497_v18 = vld [vmem:[#allocation3 + $0x40] sm:$0xff]   ;;  %v14533_v11 = vld [vmem:[#allocation16 + $0x68] ss:$16 sps:$4 sm:$0xff]  }
 0x2a1   :  { %v1656_v0 = vld [vmem:[#allocation3 + $0x38] sm:$0xf]  ;;  %v1657_v26 = vld [vmem:[#allocation3 + $0x3c] sm:$0xf]  ;;  %v14500_v60 = vld [vmem:[#allocation3 + $0x20] sm:$0xff]  }
 0x2a2   :  { %2316 = vmatpush1.bf16.msra.mxu0 %v14432_v47  ;;  %v12538_v27 = vcombine.low %v1655_v13, %v1656_v0  ;;  %v12563_v30 = vcombine.low %v1656_v0, %v1657_v26  ;;  %v12539_v51 = vcombine.low %v1657_v26, %v1674_v2  ;;  %v14483_v31 = vld [vmem:[#allocation3 + $0x34] sm:$0xff]   ;;  %v14488_v4 = vld [vmem:[#allocation3 + $0x3c] sm:$0xff]  }
 0x2a3   :  { %2317 = vmatprep.subr.bf16.mxu0 %v14445_v20  ;;  %v14492_v58 = vld [vmem:[#allocation3 + $0x38] sm:$0xff]   ;;  %v14512_v61 = vld [vmem:[#allocation16 + $0xc0] ss:$16 sps:$4 sm:$0xff]  }
 0x2a4   :  { %1883 = vmatmul.mubr.bf16.gmra.mxu0 %v12535_v9  ;;  %2104 = vmatmul.mubr.bf16.gmra.mxu1 %v12560_v43  ;;  %v14514_v47 = vld [vmem:[#allocation16 + $0xc4] ss:$16 sps:$4 sm:$0xff]   ;;  %v14515_v20 = vld [vmem:[#allocation16 + $0xc8] ss:$16 sps:$4 sm:$0xff]   ;;  %v14523_v43 = vld [vmem:[#allocation16 + $0xac] ss:$16 sps:$4 sm:$0xff]  }
 0x2a5   :  { %1892 = vmatprep.mubr.bf16.mxu0 %v17573_v53  ;;  %2113 = vmatprep.mubr.bf16.mxu1 %v17573_v53  ;;  %v14520_v9 = vld [vmem:[#allocation16 + $0xa4] ss:$16 sps:$4 sm:$0xff]   ;;  %v14529_v39 = vld [vmem:[#allocation16 + $0x8c] ss:$16 sps:$4 sm:$0xff]   ;;  %v14539_v26 = vld [vmem:[#allocation16 + $0x48] ss:$16 sps:$4 sm:$0xff]  }
 0x2a6   :  { %2318 = vmatpush1.bf16.msra.mxu0 %v14443_v10  ;;  %v14521_v10 = vld [vmem:[#allocation16 + $0xa8] ss:$16 sps:$4 sm:$0xff]   ;;  %v14535_v13 = vld [vmem:[#allocation16 + $0x6c] ss:$16 sps:$4 sm:$0xff]   ;;  %v14538_v0 = vld [vmem:[#allocation16 + $0x44] ss:$16 sps:$4 sm:$0xff]  }
 0x2a7   :  { %2319 = vmatprep.subr.bf16.mxu0 %v14456_v62  ;;  %v14501_v62 = vld [vmem:[#allocation3 + $0x28] sm:$0xff]  }
 0x2a8   :  { %v14544_v2 = vld [vmem:[#allocation16 + $0x24] ss:$16 sps:$4 sm:$0xff]  }
 0x2aa   :  { %2320 = vmatpush1.bf16.msra.mxu0 %v14454_v63  ;;  %v14524_v63 = vld [vmem:[#allocation16 + $0x80] ss:$16 sps:$4 sm:$0xff]  }
 0x2ab   :  { %2917 = vmatprep.subr.bf16.mxu0 %v14461_v46  ;;  %v14527_v46 = vld [vmem:[#allocation16 + $0x88] ss:$16 sps:$4 sm:$0xff]  }
 0x2ac   :  { %1893 = vmatmul.mubr.bf16.gmra.mxu0 %v12536_v49  ;;  %2114 = vmatmul.mubr.bf16.gmra.mxu1 %v12561_v50  ;;  %v14530_v49 = vld [vmem:[#allocation16 + $0x60] ss:$16 sps:$4 sm:$0xff]   ;;  %v14532_v50 = vld [vmem:[#allocation16 + $0x64] ss:$16 sps:$4 sm:$0xff]  }
 0x2ad   :  { %1902 = vmatprep.mubr.bf16.mxu0 %v17573_v53  ;;  %2123 = vmatprep.mubr.bf16.mxu1 %v17573_v53 }
 0x2b4   :  { %1903 = vmatmul.mubr.bf16.gmra.mxu0 %v12537_v44  ;;  %2124 = vmatmul.mubr.bf16.gmra.mxu1 %v12562_v24  ;;  %v14502_v44 = vld [vmem:[#allocation3 + $0x30] sm:$0xff]  }
 0x2b5   :  { %1912 = vmatprep.mubr.bf16.mxu0 %v17573_v53  ;;  %2133 = vmatprep.mubr.bf16.mxu1 %v17573_v53  ;;  %v14536_v24 = vld [vmem:[#allocation16 + $0x40] ss:$16 sps:$4 sm:$0xff]  }
 0x2bc   :  { %1913 = vmatmul.mubr.bf16.gmra.mxu0 %v12538_v27  ;;  %2134 = vmatmul.mubr.bf16.gmra.mxu1 %v12563_v30  ;;  %v14541_v27 = vld [vmem:[#allocation16 + $0x4c] ss:$16 sps:$4 sm:$0xff]   ;;  %v14542_v30 = vld [vmem:[#allocation16 + $0x20] ss:$16 sps:$4 sm:$0xff]  }
 0x2bd   :  { %1922 = vmatprep.mubr.bf16.mxu0 %v17573_v53  ;;  %2643 = vmatprep.mubr.bf16.mxu1 %v17573_v53 }
 0x2c4   :  { %1923 = vmatmul.mubr.bf16.gmra.mxu0 %v12539_v51  ;;  %2644 = vmatmul.mubr.bf16.vlgmr.msra.gmra.mxu1 %v14458_v40  ;;  %v14545_v51 = vld [vmem:[#allocation16 + $0x28] ss:$16 sps:$4 sm:$0xff]   ;;  %v14547_v40 = vld [vmem:[#allocation16 + $0x2c] ss:$16 sps:$4 sm:$0xff]  }
 0x2c5   :  { %2337 = vmatprep.mubr.bf16.mxu0 %v17573_v53  ;;  %2653 = vmatprep.mubr.bf16.mxu1 %v17573_v53 }
 0x2c6   :  { %3643 = vmatpush1.bf16.msra.mxu1 %v14506_v45  ;;  %v14587_v45 = vld [vmem:[#allocation16 + $0x148] ss:$16 sps:$4 sm:$0xff]  }
 0x2c7   :  { %3644 = vmatprep.subr.bf16.mxu1 %v14514_v47 }
 0x2ca   :  { %3645 = vmatpush1.bf16.msra.mxu1 %v14512_v61 }
 0x2cb   :  { %3646 = vmatprep.subr.bf16.mxu1 %v14520_v9 }
 0x2cc   :  { %2338 = vmatmul.mubr.bf16.vlgmr.msra.gmra.mxu0 %v14462_v16  ;;  %2654 = vmatmul.mubr.bf16.gmra.mxu1 %v14463_v21  ;;  %v14548_v16 = vld [vmem:[#allocation16] ss:$16 sps:$4 sm:$0xff]   ;;  %v14550_v21 = vld [vmem:[#allocation16 + $0x4] ss:$16 sps:$4 sm:$0xff]  }
 0x2cd   :  { %2918 = vmatpush1.bf16.msra.mxu0 %v14459_v12  ;;  %2347 = vmatprep.mubr.bf16.mxu0 %v17573_v53  ;;  %v14503_v12 = vld [vmem:[#allocation3 + $0x38] sm:$0xff]  }
 0x2ce   :  { %2663 = vmatprep.mubr.bf16.mxu1 %v17573_v53  ;;  %2919 = vmatprep.subr.bf16.mxu0 %v14466_v33  ;;  %v14551_v33 = vld [vmem:[#allocation16 + $0x8] ss:$16 sps:$4 sm:$0xff]  }
 0x2cf   :  { %3647 = vmatpush1.bf16.msra.mxu1 %v14518_v8 }
 0x2d0   :  { %3648 = vmatprep.subr.bf16.mxu1 %v14526_v22  ;;  %v14590_v22 = vld [vmem:[#allocation16 + $0x120] ss:$16 sps:$4 sm:$0xff]  }
 0x2d1   :  { %2920 = vmatpush1.bf16.msra.mxu0 %v14464_v34  ;;  %v14553_v34 = vld [vmem:[#allocation16 + $0xc] ss:$16 sps:$4 sm:$0xff]  }
 0x2d2   :  { %2921 = vmatprep.subr.bf16.mxu0 %v14471_v41  ;;  %v14554_v41 = vld [vmem:[#allocation16 + $0x1e0] ss:$16 sps:$4 sm:$0xff]  }
 0x2d3   :  { %3649 = vmatpush1.bf16.msra.mxu1 %v14524_v63 }
 0x2d4   :  { %2348 = vmatmul.mubr.bf16.gmra.mxu0 %v14467_v52  ;;  %2664 = vmatmul.mubr.bf16.gmra.mxu1 %v14468_v19  ;;  %v14556_v52 = vld [vmem:[#allocation16 + $0x1e4] ss:$16 sps:$4 sm:$0xff]   ;;  %v14559_v19 = vld [vmem:[#allocation16 + $0x1ec] ss:$16 sps:$4 sm:$0xff]  }
 0x2d5   :  { %2357 = vmatprep.mubr.bf16.mxu0 %v17573_v53  ;;  %2673 = vmatprep.mubr.bf16.mxu1 %v17573_v53 }
 0x2d6   :  { %2922 = vmatpush1.bf16.msra.mxu0 %v14469_v14  ;;  %3650 = vmatprep.subr.bf16.mxu1 %v14532_v50  ;;  %v14557_v14 = vld [vmem:[#allocation16 + $0x1e8] ss:$16 sps:$4 sm:$0xff]  }
 0x2d7   :  { %2923 = vmatprep.subr.bf16.mxu0 %v14476_v23  ;;  %3651 = vmatpush1.bf16.msra.mxu1 %v14530_v49  ;;  %v14504_v23 = vld [vmem:[#allocation3 + $0x40] sm:$0xff]  }
 0x2d8   :  { %3652 = vmatprep.subr.bf16.mxu1 %v14538_v0 }
 0x2da   :  { %2924 = vmatpush1.bf16.msra.mxu0 %v14474_v54  ;;  %v14560_v54 = vld [vmem:[#allocation16 + $0x1c0] ss:$16 sps:$4 sm:$0xff]  }
 0x2db   :  { %2925 = vmatprep.subr.bf16.mxu0 %v14481_v55  ;;  %3653 = vmatpush1.bf16.msra.mxu1 %v14536_v24  ;;  %v14562_v55 = vld [vmem:[#allocation16 + $0x1c4] ss:$16 sps:$4 sm:$0xff]  }
 0x2dc   :  { %2358 = vmatmul.mubr.bf16.gmra.mxu0 %v14472_v15  ;;  %2674 = vmatmul.mubr.bf16.gmra.mxu1 %v14473_v35  ;;  %v14563_v15 = vld [vmem:[#allocation16 + $0x1c8] ss:$16 sps:$4 sm:$0xff]   ;;  %v16981_v35 = vpop.f32.mrf.mxu1 }
 0x2dd   :  { %2367 = vmatprep.mubr.bf16.mxu0 %v17573_v53  ;;  %2683 = vmatprep.mubr.bf16.mxu1 %v17573_v53 }
 0x2de   :  { %2926 = vmatpush1.bf16.msra.mxu0 %v14479_v29  ;;  %3654 = vmatprep.subr.bf16.mxu1 %v14544_v2  ;;  %v14565_v29 = vld [vmem:[#allocation16 + $0x1cc] ss:$16 sps:$4 sm:$0xff]  }
 0x2df   :  { %2927 = vmatprep.subr.bf16.mxu0 %v14486_v36  ;;  %3655 = vmatpush1.bf16.msra.mxu1 %v14542_v30  ;;  %v14566_v36 = vld [vmem:[#allocation16 + $0x1a0] ss:$16 sps:$4 sm:$0xff]  }
 0x2e0   :  { %3656 = vmatprep.subr.bf16.mxu1 %v14550_v21 }
 0x2e2   :  { %2928 = vmatpush1.bf16.msra.mxu0 %v14484_v5  ;;  %v14568_v5 = vld [vmem:[#allocation16 + $0x1a4] ss:$16 sps:$4 sm:$0xff]  }
 0x2e3   :  { %2929 = vmatprep.subr.bf16.mxu0 %v14491_v28  ;;  %3657 = vmatpush1.bf16.msra.mxu1 %v14548_v16  ;;  %v14569_v28 = vld [vmem:[#allocation16 + $0x1a8] ss:$16 sps:$4 sm:$0xff]  }
 0x2e4   :  { %2368 = vmatmul.mubr.bf16.gmra.mxu0 %v14477_v56  ;;  %2684 = vmatmul.mubr.bf16.gmra.mxu1 %v14478_v17  ;;  %v14505_v56 = vld [vmem:[#allocation3 + $0x48] sm:$0xff]   ;;  %v16983_v17 = vpop.f32.mrf.mxu1 }
 0x2e5   :  { %2377 = vmatprep.mubr.bf16.mxu0 %v17573_v53  ;;  %2693 = vmatprep.mubr.bf16.mxu1 %v17573_v53 }
 0x2e6   :  { %2930 = vmatpush1.bf16.msra.mxu0 %v14489_v57  ;;  %3658 = vmatprep.subr.bf16.mxu1 %v14556_v52  ;;  %v14571_v57 = vld [vmem:[#allocation16 + $0x1ac] ss:$16 sps:$4 sm:$0xff]  }
 0x2e7   :  { %2931 = vmatprep.subr.bf16.mxu0 %v14496_v25  ;;  %3659 = vmatpush2.bf16.msra.mxu1 %v14554_v41  ;;  %v14572_v25 = vld [vmem:[#allocation16 + $0x180] ss:$16 sps:$4 sm:$0xff]  }
 0x2e8   :  { %3660 = vmatprep.subr.bf16.mxu1 %v14562_v55 }
 0x2ea   :  { %2932 = vmatpush1.bf16.msra.mxu0 %v14494_v32  ;;  %v14574_v32 = vld [vmem:[#allocation16 + $0x184] ss:$16 sps:$4 sm:$0xff]  }
 0x2eb   :  { %3683 = vmatprep.subr.bf16.mxu0 %v14511_v1  ;;  %3661 = vmatpush2.bf16.msra.mxu1 %v14560_v54 }
 0x2ec   :  { %2378 = vmatmul.mubr.bf16.gmra.mxu0 %v14482_v37  ;;  %2694 = vmatmul.mubr.bf16.gmra.mxu1 %v14483_v31  ;;  %v14577_v37 = vld [vmem:[#allocation16 + $0x18c] ss:$16 sps:$4 sm:$0xff]   ;;  %v16985_v31 = vpop.f32.mrf.mxu1 }
 0x2ed   :  { %2387 = vmatprep.mubr.bf16.mxu0 %v17573_v53  ;;  %2703 = vmatprep.mubr.bf16.mxu1 %v17573_v53 }
 0x2ee   :  { %3662 = vmatprep.subr.bf16.mxu1 %v14568_v5 }
 0x2ef   :  { %3663 = vmatpush2.bf16.msra.mxu1 %v14566_v36 }
 0x2f0   :  { %3664 = vmatprep.subr.bf16.mxu1 %v14574_v32 }
 0x2f3   :  { %3665 = vmatpush2.bf16.msra.mxu1 %v14572_v25 }
 0x2f4   :  { %2388 = vmatmul.mubr.bf16.gmra.mxu0 %v14487_v38  ;;  %2704 = vmatmul.mubr.bf16.gmra.mxu1 %v14488_v4  ;;  %v14578_v38 = vld [vmem:[#allocation16 + $0x160] ss:$16 sps:$4 sm:$0xff]   ;;  %v14580_v4 = vld [vmem:[#allocation16 + $0x164] ss:$16 sps:$4 sm:$0xff]  }
 0x2f5   :  { %2397 = vmatprep.mubr.bf16.mxu0 %v17573_v53  ;;  %2713 = vmatprep.mubr.bf16.mxu1 %v17573_v53 }
 0x2f6   :  { %3666 = vmatprep.subr.bf16.mxu1 %v14580_v4 }
 0x2f7   :  { %3667 = vmatpush2.bf16.msra.mxu1 %v14578_v38 }
 0x2fc   :  { %2398 = vmatmul.mubr.bf16.gmra.mxu0 %v14492_v58  ;;  %2714 = vmatmul.mubr.bf16.gmra.mxu1 %v14493_v59  ;;  %v14581_v58 = vld [vmem:[#allocation16 + $0x168] ss:$16 sps:$4 sm:$0xff]   ;;  %v14583_v59 = vld [vmem:[#allocation16 + $0x16c] ss:$16 sps:$4 sm:$0xff]  }
 0x2fd   :  { %2407 = vmatprep.mubr.bf16.mxu0 %v17573_v53 }
 0x304   :  { %2408 = vmatmul.mubr.bf16.gmra.mxu0 %v14497_v18  ;;  %v16987_v18 = vpop.f32.mrf.mxu1 }
 0x305   :  { %2949 = vmatprep.mubr.bf16.mxu0 %v17573_v53 }
 0x30c   :  { %2950 = vmatmul.mubr.bf16.vlgmr.msra.gmra.mxu0 %v14498_v3  ;;  %v14584_v3 = vld [vmem:[#allocation16 + $0x140] ss:$16 sps:$4 sm:$0xff]  }
 0x30d   :  { %2959 = vmatprep.mubr.bf16.mxu0 %v17573_v53  ;;  %3684 = vmatpush1.bf16.msra.mxu0 %v14509_v7  ;;  %v14589_v7 = vld [vmem:[#allocation16 + $0x14c] ss:$16 sps:$4 sm:$0xff]  }
 0x30e   :  { %3685 = vmatprep.subr.bf16.mxu0 %v14517_v48 }
 0x311   :  { %3686 = vmatpush1.bf16.msra.mxu0 %v14515_v20 }
 0x312   :  { %3687 = vmatprep.subr.bf16.mxu0 %v14523_v43  ;;  %v14595_v43 = vld [vmem:[#allocation16 + $0x12c] ss:$16 sps:$4 sm:$0xff]  }
 0x314   :  { %2960 = vmatmul.mubr.bf16.gmra.mxu0 %v14499_v42  ;;  %v14586_v42 = vld [vmem:[#allocation16 + $0x144] ss:$16 sps:$4 sm:$0xff]  }
 0x315   :  { %2969 = vmatprep.mubr.bf16.mxu0 %v17573_v53  ;;  %3688 = vmatpush1.bf16.msra.mxu0 %v14521_v10  ;;  %v14592_v10 = vld [vmem:[#allocation16 + $0x124] ss:$16 sps:$4 sm:$0xff]  }
 0x316   :  { %3689 = vmatprep.subr.bf16.mxu0 %v14529_v39  ;;  %3668 = vmatprep.subr.bf16.mxu1 %v14586_v42 }
 0x317   :  { %3669 = vmatpush2.bf16.msra.mxu1 %v14584_v3 }
 0x318   :  { %3670 = vmatprep.subr.bf16.mxu1 %v14592_v10 }
 0x319   :  { %3690 = vmatpush1.bf16.msra.mxu0 %v14527_v46  ;;  %v14593_v46 = vld [vmem:[#allocation16 + $0x128] ss:$16 sps:$4 sm:$0xff]  }
 0x31a   :  { %3691 = vmatprep.subr.bf16.mxu0 %v14535_v13  ;;  %v14598_v13 = vld [vmem:[#allocation16 + $0x104] ss:$16 sps:$4 sm:$0xff]  }
 0x31b   :  { %3671 = vmatpush2.bf16.msra.mxu1 %v14590_v22 }
 0x31c   :  { %2970 = vmatmul.mubr.bf16.gmra.mxu0 %v14500_v60  ;;  %3672 = vmatprep.subr.bf16.mxu1 %v14598_v13 }
 0x31d   :  { %2979 = vmatprep.mubr.bf16.mxu0 %v17573_v53  ;;  %3692 = vmatpush1.bf16.msra.mxu0 %v14533_v11 }
 0x31e   :  { %3693 = vmatprep.subr.bf16.mxu0 %v14541_v27  ;;  %v14599_v27 = vld [vmem:[#allocation16 + $0x108] ss:$16 sps:$4 sm:$0xff]  }
 0x321   :  { %3694 = vmatpush1.bf16.msra.mxu0 %v14539_v26  ;;  %v14596_v26 = vld [vmem:[#allocation16 + $0x100] ss:$16 sps:$4 sm:$0xff]  }
 0x322   :  { %3695 = vmatprep.subr.bf16.mxu0 %v14547_v40  ;;  %3673 = vmatpush2.bf16.msra.mxu1 %v14596_v26  ;;  %v14604_v40 = vld [vmem:[#allocation16 + $0x2e4] ss:$16 sps:$4 sm:$0xff]  }
 0x323   :  { %4125 = vmatprep.subr.bf16.mxu1 %v14604_v40 }
 0x324   :  { %2980 = vmatmul.mubr.bf16.gmra.mxu0 %v14501_v62 }
 0x325   :  { %2989 = vmatprep.mubr.bf16.mxu0 %v17573_v53  ;;  %3696 = vmatpush1.bf16.msra.mxu0 %v14545_v51 }
 0x326   :  { %3697 = vmatprep.subr.bf16.mxu0 %v14553_v34 }
 0x329   :  { %3698 = vmatpush1.bf16.msra.mxu0 %v14551_v33 }
 0x32a   :  { %3699 = vmatprep.subr.bf16.mxu0 %v14559_v19 }
 0x32c   :  { %2990 = vmatmul.mubr.bf16.gmra.mxu0 %v14502_v44  ;;  %v14601_v44 = vld [vmem:[#allocation16 + $0x10c] ss:$16 sps:$4 sm:$0xff]  }
 0x32d   :  { %2999 = vmatprep.mubr.bf16.mxu0 %v17573_v53  ;;  %3700 = vmatpush2.bf16.msra.mxu0 %v14557_v14 }
 0x32e   :  { %3701 = vmatprep.subr.bf16.mxu0 %v14565_v29 }
 0x331   :  { %3702 = vmatpush2.bf16.msra.mxu0 %v14563_v15 }
 0x332   :  { %3703 = vmatprep.subr.bf16.mxu0 %v14571_v57 }
 0x334   :  { %3000 = vmatmul.mubr.bf16.gmra.mxu0 %v14503_v12  ;;  %v14607_v12 = vld [vmem:[#allocation16 + $0x2ec] ss:$16 sps:$4 sm:$0xff]  }
 0x335   :  { %3009 = vmatprep.mubr.bf16.mxu0 %v17573_v53  ;;  %3704 = vmatpush2.bf16.msra.mxu0 %v14569_v28 }
 0x336   :  { %3705 = vmatprep.subr.bf16.mxu0 %v14577_v37 }
 0x33c   :  { %3010 = vmatmul.mubr.bf16.gmra.mxu0 %v14504_v23 }
 0x33d   :  { %3019 = vmatprep.mubr.bf16.mxu0 %v17573_v53  ;;  %v14575_v53 = vld [vmem:[#allocation16 + $0x188] ss:$16 sps:$4 sm:$0xff]  }
 0x33e   :  { %3706 = vmatpush2.bf16.msra.mxu0 %v14575_v53 }
 0x33f   :  { %3707 = vmatprep.subr.bf16.mxu0 %v14583_v59 }
 0x342   :  { %3708 = vmatpush2.bf16.msra.mxu0 %v14581_v58 }
 0x343   :  { %3709 = vmatprep.subr.bf16.mxu0 %v14589_v7 }
 0x344   :  { %3020 = vmatmul.mubr.bf16.gmra.mxu0 %v14505_v56 }
 0x346   :  { %3710 = vmatpush2.bf16.msra.mxu0 %v14587_v45 }
 0x347   :  { %3711 = vmatprep.subr.bf16.mxu0 %v14595_v43 }
 0x34a   :  { %3712 = vmatpush2.bf16.msra.mxu0 %v14593_v46 }
 0x34b   :  { %3713 = vmatprep.subr.bf16.mxu0 %v14601_v44 }
 0x34c   :  { %v16989_v6 = vpop.f32.mrf.mxu0  ;;  %v2075_v1 = vpop.f32.mrf.mxu1 }
 0x34e   :  { %v16991_v60 = vpop.f32.mrf.mxu0  ;;  %v2077_v61 = vpop.f32.mrf.mxu1  ;;  %3714 = vmatpush2.bf16.msra.mxu0 %v14599_v27 }
 0x34f   :  { %4166 = vmatprep.subr.bf16.mxu0 %v14607_v12 }
 0x350   :  { %v16993_v47 = vpop.f32.mrf.mxu0  ;;  %v2079_v20 = vpop.f32.mrf.mxu1 }
 0x352   :  { %v16995_v48 = vpop.f32.mrf.mxu0  ;;  %v16997_v8 = vpop.f32.mrf.mxu1 }
 0x353   :  { %17574 = vst [vmem:[#allocation32_spill] sm:$0xff] %v16997_v8 }
 0x354   :  { %v1864_v9 = vpop.f32.mrf.mxu0  ;;  %v2085_v63 = vpop.f32.mrf.mxu1 }
 0x355   :  { %v16999_v62 = vadd.f32 %v2075_v1, %v1864_v9 }
 0x356   :  { %v1866_v39 = vpop.f32.mrf.mxu0  ;;  %v2087_v50 = vpop.f32.mrf.mxu1 }
 0x357   :  { %v17001_v49 = vadd.f32 %v2077_v61, %v1866_v39 }
 0x358   :  { %v1868_v11 = vpop.f32.mrf.mxu0  ;;  %v2089_v0 = vpop.f32.mrf.mxu1 }
 0x359   :  { %v17003_v24 = vadd.f32 %v2079_v20, %v1868_v11 }
 0x35a   :  { %v17005_v30 = vpop.f32.mrf.mxu0  ;;  %v17007_v2 = vpop.f32.mrf.mxu1 }
 0x35b   :  { %17575 = vst [vmem:[#allocation33_spill] sm:$0xff] %v17005_v30 }
 0x35c   :  { %v1874_v51 = vpop.f32.mrf.mxu0  ;;  %v2095_v21 = vpop.f32.mrf.mxu1 }
 0x35d   :  { %v17009_v16 = vadd.f32 %v2085_v63, %v1874_v51 }
 0x35e   :  { %v1876_v33 = vpop.f32.mrf.mxu0  ;;  %v2097_v41 = vpop.f32.mrf.mxu1 }
 0x35f   :  { %v17011_v34 = vadd.f32 %v2087_v50, %v1876_v33 }
 0x360   :  { %v1878_v52 = vpop.f32.mrf.mxu0  ;;  %v2099_v19 = vpop.f32.mrf.mxu1 }
 0x361   :  { %v17013_v14 = vadd.f32 %v2089_v0, %v1878_v52 }
 0x362   :  { %v17015_v23 = vpop.f32.mrf.mxu0  ;;  %v17017_v54 = vpop.f32.mrf.mxu1 }
 0x364   :  { %v1884_v55 = vpop.f32.mrf.mxu0  ;;  %v2105_v29 = vpop.f32.mrf.mxu1 }
 0x365   :  { %v17019_v15 = vadd.f32 %v2095_v21, %v1884_v55 }
 0x366   :  { %v1886_v36 = vpop.f32.mrf.mxu0  ;;  %v2107_v28 = vpop.f32.mrf.mxu1 }
 0x367   :  { %v17021_v5 = vadd.f32 %v2097_v41, %v1886_v36 }
 0x368   :  { %v1888_v56 = vpop.f32.mrf.mxu0  ;;  %v2109_v25 = vpop.f32.mrf.mxu1 }
 0x369   :  { %v17023_v57 = vadd.f32 %v2099_v19, %v1888_v56 }
 0x36a   :  { %v17025_v32 = vpop.f32.mrf.mxu0  ;;  %v17027_v53 = vpop.f32.mrf.mxu1 }
 0x36b   :  { %17576 = vst [vmem:[#allocation34_spill] sm:$0xff] %v17027_v53 }
 0x36c   :  { %v1894_v37 = vpop.f32.mrf.mxu0  ;;  %v2115_v4 = vpop.f32.mrf.mxu1 }
 0x36d   :  { %v17029_v38 = vadd.f32 %v2105_v29, %v1894_v37 }
 0x36e   :  { %v1896_v58 = vpop.f32.mrf.mxu0  ;;  %v2117_v3 = vpop.f32.mrf.mxu1 }
 0x36f   :  { %v17031_v59 = vadd.f32 %v2107_v28, %v1896_v58 }
 0x370   :  { %v1898_v42 = vpop.f32.mrf.mxu0  ;;  %v2119_v7 = vpop.f32.mrf.mxu1 }
 0x371   :  { %v17033_v45 = vadd.f32 %v2109_v25, %v1898_v42 }
 0x372   :  { %v17035_v1 = vpop.f32.mrf.mxu0  ;;  %v17037_v61 = vpop.f32.mrf.mxu1 }
 0x373   :  { %17577 = vst [vmem:[#allocation35_spill] sm:$0xff] %v17035_v1  ;;  %17578 = vst [vmem:[#allocation36_spill] sm:$0xff] %v17037_v61 }
 0x374   :  { %v1904_v20 = vpop.f32.mrf.mxu0  ;;  %v2125_v10 = vpop.f32.mrf.mxu1 }
 0x375   :  { %v17039_v9 = vadd.f32 %v2115_v4, %v1904_v20 }
 0x376   :  { %v1906_v43 = vpop.f32.mrf.mxu0  ;;  %v2127_v22 = vpop.f32.mrf.mxu1 }
 0x377   :  { %v17041_v63 = vadd.f32 %v2117_v3, %v1906_v43 }
 0x378   :  { %v1908_v46 = vpop.f32.mrf.mxu0  ;;  %v2129_v50 = vpop.f32.mrf.mxu1 }
 0x379   :  { %v17043_v39 = vadd.f32 %v2119_v7, %v1908_v46 }
 0x37a   :  { %v17045_v11 = vpop.f32.mrf.mxu0  ;;  %v17047_v13 = vpop.f32.mrf.mxu1 }
 0x37b   :  { %17579 = vst [vmem:[#allocation37_spill] sm:$0xff] %v17045_v11 }
 0x37c   :  { %v1914_v44 = vpop.f32.mrf.mxu0  ;;  %v2135_v26 = vpop.f32.mrf.mxu1 }
 0x37d   :  { %v17049_v0 = vadd.f32 %v2125_v10, %v1914_v44  ;;  %v2070_v10 = vadd.f32 %v16985_v31, %v16993_v47 }
 0x37e   :  { %v1916_v27 = vpop.f32.mrf.mxu0  ;;  %v2137_v40 = vpop.f32.mrf.mxu1 }
 0x37f   :  { %v17051_v51 = vadd.f32 %v2127_v22, %v1916_v27 }
 0x380   :  { %v1918_v12 = vpop.f32.mrf.mxu0  ;;  %v2139_v33 = vpop.f32.mrf.mxu1 }
 0x381   :  { %v17053_v21 = vadd.f32 %v2129_v50, %v1918_v12 }
 0x382   :  { %v17055_v41 = vpop.f32.mrf.mxu0  ;;  %v17057_v52 = vpop.f32.mrf.mxu1 }
 0x383   :  { %17580 = vst [vmem:[#allocation38_spill] sm:$0xff] %v17057_v52 }
 0x384   :  { %v1924_v19 = vpop.f32.mrf.mxu0  ;;  %v17061_v29 = vpop.f32.mrf.mxu1 }
 0x385   :  { %v17059_v55 = vadd.f32 %v2135_v26, %v1924_v19 }
 0x386   :  { %v1926_v36 = vpop.f32.mrf.mxu0  ;;  %v17065_v56 = vpop.f32.mrf.mxu1 }
 0x387   :  { %v17063_v28 = vadd.f32 %v2137_v40, %v1926_v36 }
 0x388   :  { %v1928_v25 = vpop.f32.mrf.mxu0  ;;  %v17069_v4 = vpop.f32.mrf.mxu1 }
 0x389   :  { %v17067_v37 = vadd.f32 %v2139_v33, %v1928_v25 }
 0x38a   :  { %v17071_v58 = vpop.f32.mrf.mxu0  ;;  %v17073_v3 = vpop.f32.mrf.mxu1 }
 0x38b   :  { %17581 = vst [vmem:[#allocation39_spill] sm:$0xff] %v17071_v58 }
 0x38c   :  { %v17075_v42 = vpop.f32.mrf.mxu0  ;;  %v2655_v7 = vpop.f32.mrf.mxu1 }
 0x38e   :  { %v17077_v20 = vpop.f32.mrf.mxu0  ;;  %v17081_v43 = vpop.f32.mrf.mxu1 }
 0x390   :  { %v2343_v22 = vpop.f32.mrf.mxu0  ;;  %v2659_v50 = vpop.f32.mrf.mxu1 }
 0x391   :  { %v17083_v46 = vadd.f32 %v2343_v22, %v2070_v10 }
 0x392   :  { %v17085_v44 = vpop.f32.mrf.mxu0  ;;  %v17087_v26 = vpop.f32.mrf.mxu1 }
 0x393   :  { %17582 = vst [vmem:[#allocation40_spill] sm:$0xff] %v17087_v26 }
 0x394   :  { %v2349_v27 = vpop.f32.mrf.mxu0  ;;  %v2665_v12 = vpop.f32.mrf.mxu1 }
 0x395   :  { %v2422_v40 = vadd.f32 %v2349_v27, %v16999_v62 }
 0x396   :  { %v2351_v33 = vpop.f32.mrf.mxu0  ;;  %v17093_v36 = vpop.f32.mrf.mxu1 }
 0x397   :  { %v17091_v19 = vadd.f32 %v2351_v33, %v17001_v49  ;;  %v17095_v31 = vadd.f32 %v2655_v7, %v2422_v40 }
 0x398   :  { %v2353_v47 = vpop.f32.mrf.mxu0  ;;  %v2669_v10 = vpop.f32.mrf.mxu1 }
 0x399   :  { %v2424_v25 = vadd.f32 %v2353_v47, %v17003_v24 }
 0x39a   :  { %v17098_v22 = vpop.f32.mrf.mxu0  ;;  %v17100_v8 = vpop.f32.mrf.mxu1 }
 0x39b   :  { %17583 = vst [vmem:[#allocation41_spill] sm:$0xff] %v17098_v22  ;;  %v17102_v26 = vadd.f32 %v2659_v50, %v2424_v25 }
 0x39c   :  { %v2359_v62 = vpop.f32.mrf.mxu0  ;;  %v2675_v30 = vpop.f32.mrf.mxu1 }
 0x39d   :  { %v2426_v27 = vadd.f32 %v2359_v62, %v17009_v16 }
 0x39e   :  { %v2361_v49 = vpop.f32.mrf.mxu0  ;;  %v2677_v7 = vpop.f32.mrf.mxu1 }
 0x39f   :  { %v17106_v33 = vadd.f32 %v2361_v49, %v17011_v34  ;;  %v17108_v40 = vadd.f32 %v2665_v12, %v2426_v27 }
 0x3a0   :  { %v2363_v52 = vpop.f32.mrf.mxu0  ;;  %v2679_v47 = vpop.f32.mrf.mxu1 }
 0x3a1   :  { %v2428_v24 = vadd.f32 %v2363_v52, %v17013_v14 }
 0x3a2   :  { %v17111_v22 = vpop.f32.mrf.mxu0  ;;  %v17113_v58 = vpop.f32.mrf.mxu1 }
 0x3a3   :  { %17584 = vst [vmem:[#allocation42_spill] sm:$0xff] %v17113_v58  ;;  %v17115_v50 = vadd.f32 %v2669_v10, %v2428_v24 }
 0x3a4   :  { %v2369_v25 = vpop.f32.mrf.mxu0  ;;  %v2685_v62 = vpop.f32.mrf.mxu1 }
 0x3a5   :  { %v2430_v16 = vadd.f32 %v2369_v25, %v17019_v15 }
 0x3a6   :  { %v2371_v61 = vpop.f32.mrf.mxu0  ;;  %v2687_v49 = vpop.f32.mrf.mxu1 }
 0x3a7   :  { %v2431_v34 = vadd.f32 %v2371_v61, %v17021_v5  ;;  %v17119_v12 = vadd.f32 %v2675_v30, %v2430_v16 }
 0x3a8   :  { %v2373_v27 = vpop.f32.mrf.mxu0  ;;  %v2689_v52 = vpop.f32.mrf.mxu1 }
 0x3a9   :  { %v2432_v14 = vadd.f32 %v2373_v27, %v17023_v57  ;;  %v17122_v11 = vadd.f32 %v2677_v7, %v2431_v34 }
 0x3aa   :  { %v17124_v53 = vpop.f32.mrf.mxu0  ;;  %v17126_v10 = vpop.f32.mrf.mxu1 }
 0x3ab   :  { %17585 = vst [vmem:[#allocation43_spill] sm:$0xff] %v17126_v10  ;;  %v17128_v24 = vadd.f32 %v2679_v47, %v2432_v14 }
 0x3ac   :  { %v2379_v15 = vpop.f32.mrf.mxu0  ;;  %v2695_v1 = vpop.f32.mrf.mxu1 }
 0x3ad   :  { %v2434_v25 = vadd.f32 %v2379_v15, %v17029_v38 }
 0x3ae   :  { %v2381_v5 = vpop.f32.mrf.mxu0  ;;  %v2697_v61 = vpop.f32.mrf.mxu1 }
 0x3af   :  { %v2435_v30 = vadd.f32 %v2381_v5, %v17031_v59  ;;  %v17132_v16 = vadd.f32 %v2685_v62, %v2434_v25 }
 0x3b0   :  { %v2383_v57 = vpop.f32.mrf.mxu0  ;;  %v2699_v34 = vpop.f32.mrf.mxu1 }
 0x3b1   :  { %v2436_v7 = vadd.f32 %v2383_v57, %v17033_v45  ;;  %v17135_v27 = vadd.f32 %v2687_v49, %v2435_v30 }
 0x3b2   :  { %v17137_v58 = vpop.f32.mrf.mxu0  ;;  %v17139_v47 = vpop.f32.mrf.mxu1 }
 0x3b3   :  { %17586 = vst [vmem:[#allocation44_spill] sm:$0xff] %v17135_v27  ;;  %17587 = vst [vmem:[#allocation45_spill] sm:$0xff] %v17139_v47  ;;  %v17141_v14 = vadd.f32 %v2689_v52, %v2436_v7 }
 0x3b4   :  { %v2389_v38 = vpop.f32.mrf.mxu0  ;;  %v2705_v10 = vpop.f32.mrf.mxu1 }
 0x3b5   :  { %v2438_v15 = vadd.f32 %v2389_v38, %v17039_v9 }
 0x3b6   :  { %v2391_v59 = vpop.f32.mrf.mxu0  ;;  %v2707_v25 = vpop.f32.mrf.mxu1 }
 0x3b7   :  { %v2439_v62 = vadd.f32 %v2391_v59, %v17041_v63  ;;  %v17145_v5 = vadd.f32 %v2695_v1, %v2438_v15  ;;  %v3064_v59 = vlaneseq }
 0x3b8   :  { %v2393_v45 = vpop.f32.mrf.mxu0  ;;  %v2709_v57 = vpop.f32.mrf.mxu1 }
 0x3b9   :  { %v2440_v49 = vadd.f32 %v2393_v45, %v17043_v39  ;;  %v17148_v30 = vadd.f32 %v2697_v61, %v2439_v62  ;;  %v2132_v39 = vadd.f32 %v17047_v13, %v17055_v41  ;;  %v2068_v13 = vadd.f32 %v16983_v17, %v16991_v60 }
 0x3ba   :  { %v17150_v27 = vpop.f32.mrf.mxu0  ;;  %v2711_v38 = vpop.f32.mrf.mxu1 }
 0x3bb   :  { %v17152_v52 = vadd.f32 %v2699_v34, %v2440_v49 }
 0x3bc   :  { %v2399_v7 = vpop.f32.mrf.mxu0  ;;  %v2715_v34 = vpop.f32.mrf.mxu1 }
 0x3bd   :  { %17588 = vst [vmem:[#allocation46_spill] sm:$0xff] %v17152_v52  ;;  %v2442_v9 = vadd.f32 %v2399_v7, %v17049_v0  ;;  %v17163_v52 = vshrl.u32 %v3064_v59, 7 }
 0x3be   :  { %v2401_v47 = vpop.f32.mrf.mxu0 }
 0x3bf   :  { %v2443_v63 = vadd.f32 %v2401_v47, %v17051_v51  ;;  %v17156_v1 = vadd.f32 %v2705_v10, %v2442_v9  ;;  %v2066_v51 = vadd.f32 %v16981_v35, %v16989_v6  ;;  %v3062_v35 = vld [vmem:[#allocation14] sm:$0x3]  ;;  %v2419_v6 = vadd.f32 %v17077_v20, %v2068_v13 }
 0x3c0   :  { %v2403_v15 = vpop.f32.mrf.mxu0 }
 0x3c1   :  { %v2444_v61 = vadd.f32 %v2403_v15, %v17053_v21  ;;  %v17161_v62 = vadd.f32 %v2707_v25, %v2443_v63  ;;  %v2717_v21 = vpop.f32.mrf.mxu1  ;;  %v2418_v25 = vadd.f32 %v17075_v42, %v2066_v51 }
 0x3c2   :  { %v2405_v45 = vpop.f32.mrf.mxu0 }
 0x3c3   :  { %v2445_v49 = vadd.f32 %v2405_v45, %v2132_v39  ;;  %v17165_v0 = vadd.f32 %v2709_v57, %v2444_v61  ;;  %v17177_v57 = vsub.s32 0, %v17163_v52  ;;  %v2719_v60 = vpop.f32.mrf.mxu1  ;;  %v2724_v15 = vadd.f32 %v17061_v29, %v2418_v25 }
 0x3c4   :  { %v2409_v7 = vpop.f32.mrf.mxu0  ;;  %v2725_v45 = vadd.f32 %v17065_v56, %v2419_v6 }
 0x3c5   :  { %v2446_v10 = vadd.f32 %v2409_v7, %v17059_v55  ;;  %v17170_v47 = vadd.f32 %v2711_v38, %v2445_v49  ;;  %v17184_v38 = vsub.s32 1, %v17163_v52  ;;  %v17194_v39 = vrot.slane %v3062_v35, %v17177_v57 }
 0x3c6   :  { %v2411_v41 = vpop.f32.mrf.mxu0 }
 0x3c7   :  { %v2447_v9 = vadd.f32 %v2411_v41, %v17063_v28  ;;  %v17179_v63 = vadd.f32 %v2715_v34, %v2446_v10  ;;  %v2072_v28 = vadd.f32 %v16987_v18, %v16995_v48  ;;  %v17201_v49 = vrot.slane %v3062_v35, %v17184_v38 }
 0x3c8   :  { %v2413_v59 = vpop.f32.mrf.mxu0  ;;  %v2726_v48 = vadd.f32 %v17069_v4, %v17083_v46  ;;  %v2729_v4 = vadd.f32 %v17081_v43, %v17091_v19  ;;  %v14602_v46 = vld [vmem:[#allocation16 + $0x2e0] ss:$16 sps:$4 sm:$0xff]  }
 0x3c9   :  { %v2448_v55 = vadd.f32 %v2413_v59, %v17067_v37  ;;  %v17186_v17 = vadd.f32 %v2717_v21, %v2447_v9  ;;  %v2421_v37 = vadd.f32 %v17085_v44, %v2072_v28  ;;  %v14608_v19 = vld [vmem:[#allocation16 + $0x2c0] ss:$16 sps:$4 sm:$0xff]  }
 0x3ca   :  { %v17188_v42 = vpop.f32.mrf.mxu0 }
 0x3cb   :  { %v17196_v61 = vadd.f32 %v2719_v60, %v2448_v55  ;;  %v2727_v21 = vadd.f32 %v17073_v3, %v2421_v37  ;;  %v14605_v60 = vld [vmem:[#allocation16 + $0x2e8] ss:$16 sps:$4 sm:$0xff]  }
 0x3cc   :  { %v2951_v20 = vpop.f32.mrf.mxu0 }
 0x3cd   :  { %v3030_v34 = vadd.f32 %v2951_v20, %v2724_v15  ;;  %v14610_v15 = vld [vmem:[#allocation16 + $0x2c4] ss:$16 sps:$4 sm:$0xff]   ;;  %v14613_v20 = vld [vmem:[#allocation16 + $0x2cc] ss:$16 sps:$4 sm:$0xff]  }
 0x3ce   :  { %v2953_v7 = vpop.f32.mrf.mxu0 }
 0x3cf   :  { %v3074_v51 = vadd.f32 %v17194_v39, %v3030_v34  ;;  %v3031_v18 = vadd.f32 %v2953_v7, %v2725_v45 }
 0x3d0   :  { %v2955_v29 = vpop.f32.mrf.mxu0 }
 0x3d1   :  { %v3075_v10 = vadd.f32 %v17201_v49, %v3031_v18  ;;  %v3032_v13 = vadd.f32 %v2955_v29, %v2726_v48  ;;  %v3106_v44 = vmax.f32 %v3074_v51, 0.0  ;;  %v14611_v18 = vld [vmem:[#allocation16 + $0x2c8] ss:$16 sps:$4 sm:$0xff]   ;;  %v14616_v29 = vld [vmem:[#allocation16 + $0x2a4] ss:$16 sps:$4 sm:$0xff]  }
 0x3d2   :  { %v2957_v41 = vpop.f32.mrf.mxu0 }
 0x3d3   :  { %v3107_v25 = vmax.f32 %v3075_v10, 0.0  ;;  %v17209_v56 = vadd.f32 %v17194_v39, %v3032_v13  ;;  %v3033_v9 = vadd.f32 %v2957_v41, %v2727_v21  ;;  %v13981_v28 = vpack.c.bf16 %v3106_v44, %v3106_v44  ;;  %v14619_v10 = vld [vmem:[#allocation16 + $0x2ac] ss:$16 sps:$4 sm:$0xff]  }
 0x3d4   :  { %v2961_v59 = vpop.f32.mrf.mxu0  ;;  %v2092_v13 = vadd.f32 %v17007_v2, %v17015_v23  ;;  %v14622_v2 = vld [vmem:[#allocation16 + $0x284] ss:$16 sps:$4 sm:$0xff]   ;;  %v14625_v23 = vld [vmem:[#allocation16 + $0x28c] ss:$16 sps:$4 sm:$0xff]  }
 0x3d5   :  { %v13982_v35 = vpack.c.bf16 %v3107_v25, %v3107_v25  ;;  %v3077_v6 = vadd.f32 %v17201_v49, %v3033_v9  ;;  %v3034_v55 = vadd.f32 %v2961_v59, %v17095_v31  ;;  %v2733_v25 = vadd.f32 %v17093_v36, %v17106_v33  ;;  %v14614_v9 = vld [vmem:[#allocation16 + $0x2a0] ss:$16 sps:$4 sm:$0xff]   ;;  %v14617_v59 = vld [vmem:[#allocation16 + $0x2a8] ss:$16 sps:$4 sm:$0xff]  }
 0x3d6   :  { %v2963_v3 = vpop.f32.mrf.mxu0  ;;  %v14620_v33 = vld [vmem:[#allocation16 + $0x280] ss:$16 sps:$4 sm:$0xff]  }
 0x3d7   :  { %v3109_v37 = vmax.f32 %v3077_v6, 0.0  ;;  %v17216_v34 = vadd.f32 %v17194_v39, %v3034_v55  ;;  %v3035_v45 = vadd.f32 %v2963_v3, %v2729_v4  ;;  %3674 = vmatprep.mubr.bf16.mxu1 %v13982_v35  ;;  %3715 = vmatprep.mubr.bf16.mxu0 %v13982_v35  ;;  %v14631_v3 = vld [vmem:[#allocation16 + $0x26c] ss:$16 sps:$4 sm:$0xff]  }
 0x3d8   :  { %v2965_v7 = vpop.f32.mrf.mxu0  ;;  %3675 = vmatmul.mubr.bf16.vlgmr.msra.gmra.mxu1 %v13981_v28  ;;  %3716 = vmatmul.mubr.bf16.vlgmr.msra.gmra.mxu0 %v13981_v28  ;;  %v14628_v28 = vld [vmem:[#allocation16 + $0x264] ss:$16 sps:$4 sm:$0xff]  }
 0x3d9   :  { %v13984_v31 = vpack.c.bf16 %v3109_v37, %v3109_v37  ;;  %v17219_v51 = vadd.f32 %v17201_v49, %v3035_v45  ;;  %v3036_v43 = vadd.f32 %v2965_v7, %v17102_v26  ;;  %4126 = vmatpush1.bf16.msra.mxu1 %v14602_v46  ;;  %4167 = vmatpush1.bf16.msra.mxu0 %v14605_v60  ;;  %v14623_v46 = vld [vmem:[#allocation16 + $0x288] ss:$16 sps:$4 sm:$0xff]  }
 0x3da   :  { %v17222_v48 = vpop.f32.mrf.mxu0  ;;  %4127 = vmatprep.subr.bf16.mxu1 %v14610_v15  ;;  %4168 = vmatprep.subr.bf16.mxu0 %v14613_v20  ;;  %v2429_v26 = vadd.f32 %v17111_v22, %v2092_v13  ;;  %v2102_v15 = vadd.f32 %v17017_v54, %v17025_v32  ;;  %v14634_v54 = vld [vmem:[#allocation16 + $0x244] ss:$16 sps:$4 sm:$0xff]   ;;  %v14637_v32 = vld [vmem:[#allocation16 + $0x24c] ss:$16 sps:$4 sm:$0xff]  }
 0x3db   :  { %v17227_v21 = vadd.f32 %v17194_v39, %v3036_v43  ;;  %4157 = vmatprep.mubr.bf16.mxu1 %v13984_v31  ;;  %4198 = vmatprep.mubr.bf16.mxu0 %v13984_v31  ;;  %v14626_v31 = vld [vmem:[#allocation16 + $0x260] ss:$16 sps:$4 sm:$0xff]   ;;  %v14629_v43 = vld [vmem:[#allocation16 + $0x268] ss:$16 sps:$4 sm:$0xff]  }
 0x3dc   :  { %v2971_v44 = vpop.f32.mrf.mxu0  ;;  %v2735_v36 = vadd.f32 %v17100_v8, %v2429_v26  ;;  %v17589_v13 = vld [vmem:[#allocation42_spill] sm:$0xff] }
 0x3dd   :  { %v3038_v41 = vadd.f32 %v2971_v44, %v17108_v40  ;;  %4128 = vmatpush1.bf16.msra.mxu1 %v14608_v19  ;;  %4169 = vmatpush1.bf16.msra.mxu0 %v14611_v18  ;;  %v14632_v26 = vld [vmem:[#allocation16 + $0x240] ss:$16 sps:$4 sm:$0xff]  }
 0x3de   :  { %v2973_v35 = vpop.f32.mrf.mxu0  ;;  %4129 = vmatprep.subr.bf16.mxu1 %v14616_v29  ;;  %4170 = vmatprep.subr.bf16.mxu0 %v14619_v10 }
 0x3df   :  { %v17234_v6 = vadd.f32 %v17194_v39, %v3038_v41  ;;  %v3039_v55 = vadd.f32 %v2973_v35, %v2733_v25  ;;  %v14635_v41 = vld [vmem:[#allocation16 + $0x248] ss:$16 sps:$4 sm:$0xff]  }
 0x3e0   :  { %v2975_v4 = vpop.f32.mrf.mxu0  ;;  %v17590_v35 = vld [vmem:[#allocation35_spill] sm:$0xff] }
 0x3e1   :  { %v17237_v22 = vadd.f32 %v17201_v49, %v3039_v55  ;;  %v3040_v40 = vadd.f32 %v2975_v4, %v17115_v50  ;;  %4130 = vmatpush1.bf16.msra.mxu1 %v14614_v9  ;;  %4171 = vmatpush1.bf16.msra.mxu0 %v14617_v59  ;;  %v2433_v50 = vadd.f32 %v17124_v53, %v2102_v15  ;;  %v14640_v9 = vld [vmem:[#allocation16 + $0x224] ss:$16 sps:$4 sm:$0xff]   ;;  %v14643_v59 = vld [vmem:[#allocation16 + $0x22c] ss:$16 sps:$4 sm:$0xff]  }
 0x3e2   :  { %v2977_v60 = vpop.f32.mrf.mxu0  ;;  %4131 = vmatprep.subr.bf16.mxu1 %v14622_v2  ;;  %4172 = vmatprep.subr.bf16.mxu0 %v14625_v23  ;;  %v17591_v2 = vld [vmem:[#allocation34_spill] sm:$0xff] }
 0x3e3   :  { %v17244_v20 = vadd.f32 %v17194_v39, %v3040_v40  ;;  %v3041_v37 = vadd.f32 %v2977_v60, %v2735_v36  ;;  %v2739_v44 = vadd.f32 %v17589_v13, %v2433_v50 }
 0x3e4   :  { %v2981_v45 = vpop.f32.mrf.mxu0 }
 0x3e5   :  { %v17248_v7 = vadd.f32 %v17201_v49, %v3041_v37  ;;  %v3042_v8 = vadd.f32 %v2981_v45, %v17119_v12  ;;  %4132 = vmatpush1.bf16.msra.mxu1 %v14620_v33  ;;  %4173 = vmatpush1.bf16.msra.mxu0 %v14623_v46  ;;  %v14638_v33 = vld [vmem:[#allocation16 + $0x220] ss:$16 sps:$4 sm:$0xff]   ;;  %v14641_v46 = vld [vmem:[#allocation16 + $0x228] ss:$16 sps:$4 sm:$0xff]  }
 0x3e6   :  { %v2983_v19 = vpop.f32.mrf.mxu0  ;;  %4133 = vmatprep.subr.bf16.mxu1 %v14628_v28  ;;  %4174 = vmatprep.subr.bf16.mxu0 %v14631_v3  ;;  %v14646_v28 = vld [vmem:[#allocation16 + $0x204] ss:$16 sps:$4 sm:$0xff]   ;;  %v14649_v3 = vld [vmem:[#allocation16 + $0x20c] ss:$16 sps:$4 sm:$0xff]  }
 0x3e7   :  { %v17252_v18 = vadd.f32 %v17194_v39, %v3042_v8  ;;  %v3043_v29 = vadd.f32 %v2983_v19, %v17122_v11  ;;  %v2112_v11 = vadd.f32 %v17591_v2, %v17590_v35  ;;  %v17592_v37 = vld [vmem:[#allocation44_spill] sm:$0xff]  ;;  %v17593_v8 = vld [vmem:[#allocation43_spill] sm:$0xff] }
 0x3e8   :  { %v2985_v53 = vpop.f32.mrf.mxu0  ;;  %v14647_v19 = vld [vmem:[#allocation16 + $0x208] ss:$16 sps:$4 sm:$0xff]  }
 0x3e9   :  { %v17256_v10 = vadd.f32 %v17201_v49, %v3043_v29  ;;  %v3044_v12 = vadd.f32 %v2985_v53, %v17128_v24  ;;  %4134 = vmatpush1.bf16.msra.mxu1 %v14626_v31  ;;  %4175 = vmatpush1.bf16.msra.mxu0 %v14629_v43  ;;  %v2437_v24 = vadd.f32 %v17137_v58, %v2112_v11  ;;  %v14644_v43 = vld [vmem:[#allocation16 + $0x200] ss:$16 sps:$4 sm:$0xff]   ;;  %v14655_v29 = vld [vmem:[#allocation16 + $0x3ec] ss:$16 sps:$4 sm:$0xff]   ;;  %v14653_v35 = vld [vmem:[#allocation16 + $0x3e8] ss:$16 sps:$4 sm:$0xff]  }
 0x3ea   :  { %v2987_v25 = vpop.f32.mrf.mxu0  ;;  %4135 = vmatprep.subr.bf16.mxu1 %v14634_v54  ;;  %4176 = vmatprep.subr.bf16.mxu0 %v14637_v32  ;;  %v14652_v32 = vld [vmem:[#allocation16 + $0x3e4] ss:$16 sps:$4 sm:$0xff]  }
 0x3eb   :  { %v17263_v23 = vadd.f32 %v17194_v39, %v3044_v12  ;;  %v3045_v55 = vadd.f32 %v2987_v25, %v2739_v44  ;;  %v2743_v31 = vadd.f32 %v17593_v8, %v2437_v24  ;;  %v17594_v53 = vld [vmem:[#allocation37_spill] sm:$0xff]  ;;  %v17595_v12 = vld [vmem:[#allocation36_spill] sm:$0xff] }
 0x3ec   :  { %v2991_v4 = vpop.f32.mrf.mxu0  ;;  %v2122_v13 = vadd.f32 %v17595_v12, %v17594_v53  ;;  %v14658_v11 = vld [vmem:[#allocation16 + $0x3c4] ss:$16 sps:$4 sm:$0xff]   ;;  %v14673_v53 = vld [vmem:[#allocation16 + $0x38c] ss:$16 sps:$4 sm:$0xff]  }
 0x3ed   :  { %v17267_v40 = vadd.f32 %v17201_v49, %v3045_v55  ;;  %v3046_v36 = vadd.f32 %v2991_v4, %v17132_v16  ;;  %4136 = vmatpush1.bf16.msra.mxu1 %v14632_v26  ;;  %4177 = vmatpush1.bf16.msra.mxu0 %v14635_v41  ;;  %v14661_v55 = vld [vmem:[#allocation16 + $0x3cc] ss:$16 sps:$4 sm:$0xff]  }
 0x3ee   :  { %v2993_v60 = vpop.f32.mrf.mxu0  ;;  %4137 = vmatprep.subr.bf16.mxu1 %v14640_v9  ;;  %4178 = vmatprep.subr.bf16.mxu0 %v14643_v59  ;;  %v14650_v59 = vld [vmem:[#allocation16 + $0x3e0] ss:$16 sps:$4 sm:$0xff]  }
 0x3ef   :  { %v17271_v15 = vadd.f32 %v17194_v39, %v3046_v36  ;;  %v3047_v45 = vadd.f32 %v2993_v60, %v17592_v37 }
 0x3f0   :  { %v2995_v58 = vpop.f32.mrf.mxu0 }
 0x3f1   :  { %v17275_v50 = vadd.f32 %v17201_v49, %v3047_v45  ;;  %v3048_v16 = vadd.f32 %v2995_v58, %v17141_v14  ;;  %4138 = vmatpush1.bf16.msra.mxu1 %v14638_v33  ;;  %4179 = vmatpush1.bf16.msra.mxu0 %v14641_v46  ;;  %v2441_v14 = vadd.f32 %v17150_v27, %v2122_v13  ;;  %v17596_v33 = vld [vmem:[#allocation46_spill] sm:$0xff]  ;;  %v17597_v46 = vld [vmem:[#allocation45_spill] sm:$0xff] }
 0x3f2   :  { %v2997_v54 = vpop.f32.mrf.mxu0  ;;  %4139 = vmatprep.subr.bf16.mxu1 %v14646_v28  ;;  %4180 = vmatprep.subr.bf16.mxu0 %v14649_v3  ;;  %v14656_v28 = vld [vmem:[#allocation16 + $0x3c0] ss:$16 sps:$4 sm:$0xff]   ;;  %v14659_v3 = vld [vmem:[#allocation16 + $0x3c8] ss:$16 sps:$4 sm:$0xff]   ;;  %v14664_v45 = vld [vmem:[#allocation16 + $0x3a4] ss:$16 sps:$4 sm:$0xff]  }
 0x3f3   :  { %v17282_v44 = vadd.f32 %v17194_v39, %v3048_v16  ;;  %v3049_v26 = vadd.f32 %v2997_v54, %v2743_v31  ;;  %v2747_v60 = vadd.f32 %v17597_v46, %v2441_v14  ;;  %v14667_v58 = vld [vmem:[#allocation16 + $0x3ac] ss:$16 sps:$4 sm:$0xff]   ;;  %v14665_v54 = vld [vmem:[#allocation16 + $0x3a8] ss:$16 sps:$4 sm:$0xff]   ;;  %v14668_v14 = vld [vmem:[#allocation16 + $0x380] ss:$16 sps:$4 sm:$0xff]  }
 0x3f4   :  { %v3001_v41 = vpop.f32.mrf.mxu0 }
 0x3f5   :  { %v17286_v25 = vadd.f32 %v17201_v49, %v3049_v26  ;;  %v3050_v9 = vadd.f32 %v3001_v41, %v17145_v5  ;;  %4140 = vmatpush1.bf16.msra.mxu1 %v14644_v43  ;;  %4181 = vmatpush1.bf16.msra.mxu0 %v14647_v19  ;;  %v14662_v19 = vld [vmem:[#allocation16 + $0x3a0] ss:$16 sps:$4 sm:$0xff]  }
 0x3f6   :  { %v3003_v2 = vpop.f32.mrf.mxu0  ;;  %4141 = vmatprep.subr.bf16.mxu1 %v14652_v32  ;;  %4182 = vmatprep.subr.bf16.mxu0 %v14655_v29  ;;  %v14670_v29 = vld [vmem:[#allocation16 + $0x384] ss:$16 sps:$4 sm:$0xff]  }
 0x3f7   :  { %v17290_v4 = vadd.f32 %v17194_v39, %v3050_v9  ;;  %v3051_v24 = vadd.f32 %v3003_v2, %v17148_v30  ;;  %v14671_v9 = vld [vmem:[#allocation16 + $0x388] ss:$16 sps:$4 sm:$0xff]   ;;  %v14679_v2 = vld [vmem:[#allocation16 + $0x36c] ss:$16 sps:$4 sm:$0xff]  }
 0x3f8   :  { %v3005_v27 = vpop.f32.mrf.mxu0 }
 0x3f9   :  { %v17294_v36 = vadd.f32 %v17201_v49, %v3051_v24  ;;  %v3052_v5 = vadd.f32 %v3005_v27, %v17596_v33  ;;  %4142 = vmatpush2.bf16.msra.mxu1 %v14650_v59  ;;  %4183 = vmatpush2.bf16.msra.mxu0 %v14653_v35  ;;  %v14676_v35 = vld [vmem:[#allocation16 + $0x364] ss:$16 sps:$4 sm:$0xff]  }
 0x3fa   :  { %v3007_v37 = vpop.f32.mrf.mxu0  ;;  %4143 = vmatprep.subr.bf16.mxu1 %v14658_v11  ;;  %4184 = vmatprep.subr.bf16.mxu0 %v14661_v55  ;;  %v17598_v11 = vld [vmem:[#allocation39_spill] sm:$0xff]  ;;  %v17599_v55 = vld [vmem:[#allocation38_spill] sm:$0xff] }
 0x3fb   :  { %v17299_v16 = vadd.f32 %v17194_v39, %v3052_v5  ;;  %v3053_v30 = vadd.f32 %v3007_v37, %v2747_v60  ;;  %v2142_v24 = vadd.f32 %v17599_v55, %v17598_v11  ;;  %v14674_v60 = vld [vmem:[#allocation16 + $0x360] ss:$16 sps:$4 sm:$0xff]   ;;  %v14682_v37 = vld [vmem:[#allocation16 + $0x344] ss:$16 sps:$4 sm:$0xff]   ;;  %v14703_v11 = vld [vmem:[#allocation16 + $0x4ec] ss:$16 sps:$4 sm:$0xff]  }
 0x3fc   :  { %v3011_v8 = vpop.f32.mrf.mxu0  ;;  %v3111_v55 = vmax.f32 %v17219_v51, 0.0  ;;  %v14715_v51 = vld [vmem:[#allocation16 + $0x4ac] ss:$16 sps:$4 sm:$0xff]  }
 0x3fd   :  { %v17302_v31 = vadd.f32 %v17201_v49, %v3053_v30  ;;  %v3054_v43 = vadd.f32 %v3011_v8, %v17156_v1  ;;  %4144 = vmatpush2.bf16.msra.mxu1 %v14656_v28  ;;  %4185 = vmatpush2.bf16.msra.mxu0 %v14659_v3  ;;  %v14677_v28 = vld [vmem:[#allocation16 + $0x368] ss:$16 sps:$4 sm:$0xff]  }
 0x3fe   :  { %v3013_v32 = vpop.f32.mrf.mxu0  ;;  %4145 = vmatprep.subr.bf16.mxu1 %v14664_v45  ;;  %4186 = vmatprep.subr.bf16.mxu0 %v14667_v58  ;;  %v14685_v45 = vld [vmem:[#allocation16 + $0x34c] ss:$16 sps:$4 sm:$0xff]  }
 0x3ff   :  { %v17306_v12 = vadd.f32 %v17194_v39, %v3054_v43  ;;  %v3055_v13 = vadd.f32 %v3013_v32, %v17161_v62 }
 0x400   :  { %v3015_v26 = vpop.f32.mrf.mxu0 }
 0x401   :  { %v17310_v41 = vadd.f32 %v17201_v49, %v3055_v13  ;;  %v3056_v1 = vadd.f32 %v3015_v26, %v17165_v0  ;;  %4146 = vmatpush2.bf16.msra.mxu1 %v14662_v19  ;;  %4187 = vmatpush2.bf16.msra.mxu0 %v14665_v54  ;;  %v2449_v0 = vadd.f32 %v17188_v42, %v2142_v24  ;;  %v2721_v42 = vpop.f32.mrf.mxu1  ;;  %v14680_v19 = vld [vmem:[#allocation16 + $0x340] ss:$16 sps:$4 sm:$0xff]   ;;  %v14683_v54 = vld [vmem:[#allocation16 + $0x348] ss:$16 sps:$4 sm:$0xff]  }
 0x402   :  { %v3017_v59 = vpop.f32.mrf.mxu0  ;;  %4147 = vmatprep.subr.bf16.mxu1 %v14670_v29  ;;  %4188 = vmatprep.subr.bf16.mxu0 %v14673_v53  ;;  %v14688_v29 = vld [vmem:[#allocation16 + $0x324] ss:$16 sps:$4 sm:$0xff]   ;;  %v14691_v53 = vld [vmem:[#allocation16 + $0x32c] ss:$16 sps:$4 sm:$0xff]   ;;  %v14698_v24 = vld [vmem:[#allocation16 + $0x4e0] ss:$16 sps:$4 sm:$0xff]  }
 0x403   :  { %v17316_v62 = vadd.f32 %v17194_v39, %v3056_v1  ;;  %v3057_v27 = vadd.f32 %v3017_v59, %v17170_v47  ;;  %v2755_v43 = vadd.f32 %v2721_v42, %v2449_v0  ;;  %v14689_v1 = vld [vmem:[#allocation16 + $0x328] ss:$16 sps:$4 sm:$0xff]   ;;  %v14692_v59 = vld [vmem:[#allocation16 + $0x300] ss:$16 sps:$4 sm:$0xff]   ;;  %v13986_v0 = vpack.c.bf16 %v3111_v55, %v3111_v55  ;;  %v14721_v42 = vld [vmem:[#allocation16 + $0x48c] ss:$16 sps:$4 sm:$0xff]  }
 0x404   :  { %v3021_v33 = vpop.f32.mrf.mxu0  ;;  %v14748_v55 = vld [vmem:[#allocation16 + $0x5e4] ss:$16 sps:$4 sm:$0xff]  }
 0x405   :  { %v17321_v5 = vadd.f32 %v17201_v49, %v3057_v27  ;;  %v3058_v46 = vadd.f32 %v3021_v33, %v17179_v63  ;;  %4148 = vmatpush2.bf16.msra.mxu1 %v14668_v14  ;;  %4189 = vmatpush2.bf16.msra.mxu0 %v14671_v9  ;;  %v14694_v14 = vld [vmem:[#allocation16 + $0x304] ss:$16 sps:$4 sm:$0xff]   ;;  %v14697_v9 = vld [vmem:[#allocation16 + $0x30c] ss:$16 sps:$4 sm:$0xff]   ;;  %v14701_v33 = vld [vmem:[#allocation16 + $0x4e8] ss:$16 sps:$4 sm:$0xff]  }
 0x406   :  { %v3023_v3 = vpop.f32.mrf.mxu0  ;;  %4149 = vmatprep.subr.bf16.mxu1 %v14676_v35  ;;  %4190 = vmatprep.subr.bf16.mxu0 %v14679_v2  ;;  %v14695_v35 = vld [vmem:[#allocation16 + $0x308] ss:$16 sps:$4 sm:$0xff]   ;;  %v3108_v2 = vmax.f32 %v17209_v56, 0.0  ;;  %v14704_v56 = vld [vmem:[#allocation16 + $0x4c0] ss:$16 sps:$4 sm:$0xff]  }
 0x407   :  { %v17325_v58 = vadd.f32 %v17194_v39, %v3058_v46  ;;  %v3059_v47 = vadd.f32 %v3023_v3, %v17186_v17  ;;  %v14706_v46 = vld [vmem:[#allocation16 + $0x4c4] ss:$16 sps:$4 sm:$0xff]  }
 0x408   :  { %v3025_v30 = vpop.f32.mrf.mxu0  ;;  %v13983_v27 = vpack.c.bf16 %v3108_v2, %v3108_v2  ;;  %v14712_v3 = vld [vmem:[#allocation16 + $0x4a4] ss:$16 sps:$4 sm:$0xff]   ;;  %v14745_v2 = vld [vmem:[#allocation16 + $0x40c] ss:$16 sps:$4 sm:$0xff]  }
 0x409   :  { %v17329_v8 = vadd.f32 %v17201_v49, %v3059_v47  ;;  %v3060_v63 = vadd.f32 %v3025_v30, %v17196_v61  ;;  %4150 = vmatpush2.bf16.msra.mxu1 %v14674_v60  ;;  %4191 = vmatpush2.bf16.msra.mxu0 %v14677_v28  ;;  %v14686_v61 = vld [vmem:[#allocation16 + $0x320] ss:$16 sps:$4 sm:$0xff]   ;;  %v14709_v60 = vld [vmem:[#allocation16 + $0x4cc] ss:$16 sps:$4 sm:$0xff]   ;;  %v14707_v28 = vld [vmem:[#allocation16 + $0x4c8] ss:$16 sps:$4 sm:$0xff]  }
 0x40a   :  { %v3027_v32 = vpop.f32.mrf.mxu0  ;;  %4151 = vmatprep.subr.bf16.mxu1 %v14682_v37  ;;  %4192 = vmatprep.subr.bf16.mxu0 %v14685_v45  ;;  %v14710_v37 = vld [vmem:[#allocation16 + $0x4a0] ss:$16 sps:$4 sm:$0xff]   ;;  %v14713_v45 = vld [vmem:[#allocation16 + $0x4a8] ss:$16 sps:$4 sm:$0xff]   ;;  %v14718_v47 = vld [vmem:[#allocation16 + $0x484] ss:$16 sps:$4 sm:$0xff]  }
 0x40b   :  { %v17333_v13 = vadd.f32 %v17194_v39, %v3060_v63  ;;  %v3061_v17 = vadd.f32 %v3027_v32, %v2755_v43  ;;  %v14700_v39 = vld [vmem:[#allocation16 + $0x4e4] ss:$16 sps:$4 sm:$0xff]   ;;  %v14716_v30 = vld [vmem:[#allocation16 + $0x480] ss:$16 sps:$4 sm:$0xff]   ;;  %v14719_v63 = vld [vmem:[#allocation16 + $0x488] ss:$16 sps:$4 sm:$0xff]  }
 0x40c   :  { %v14724_v43 = vld [vmem:[#allocation16 + $0x464] ss:$16 sps:$4 sm:$0xff]   ;;  %v14725_v32 = vld [vmem:[#allocation16 + $0x468] ss:$16 sps:$4 sm:$0xff]  }
 0x40d   :  { %v17336_v26 = vadd.f32 %v17201_v49, %v3061_v17  ;;  %4152 = vmatpush2.bf16.msra.mxu1 %v14680_v19  ;;  %4193 = vmatpush2.bf16.msra.mxu0 %v14683_v54  ;;  %v14727_v19 = vld [vmem:[#allocation16 + $0x46c] ss:$16 sps:$4 sm:$0xff]   ;;  %v14722_v54 = vld [vmem:[#allocation16 + $0x460] ss:$16 sps:$4 sm:$0xff]  }
 0x40e   :  { %4153 = vmatprep.subr.bf16.mxu1 %v14688_v29  ;;  %4194 = vmatprep.subr.bf16.mxu0 %v14691_v53  ;;  %v14730_v29 = vld [vmem:[#allocation16 + $0x444] ss:$16 sps:$4 sm:$0xff]   ;;  %v14733_v53 = vld [vmem:[#allocation16 + $0x44c] ss:$16 sps:$4 sm:$0xff]   ;;  %v14728_v17 = vld [vmem:[#allocation16 + $0x440] ss:$16 sps:$4 sm:$0xff]  }
 0x411   :  { %4154 = vmatpush2.bf16.msra.mxu1 %v14686_v61  ;;  %4195 = vmatpush2.bf16.msra.mxu0 %v14689_v1  ;;  %v14731_v61 = vld [vmem:[#allocation16 + $0x448] ss:$16 sps:$4 sm:$0xff]   ;;  %v14736_v1 = vld [vmem:[#allocation16 + $0x424] ss:$16 sps:$4 sm:$0xff]  }
 0x412   :  { %4155 = vmatprep.subr.bf16.mxu1 %v14694_v14  ;;  %4196 = vmatprep.subr.bf16.mxu0 %v14697_v9  ;;  %v14739_v14 = vld [vmem:[#allocation16 + $0x42c] ss:$16 sps:$4 sm:$0xff]   ;;  %v14734_v9 = vld [vmem:[#allocation16 + $0x420] ss:$16 sps:$4 sm:$0xff]  }
 0x415   :  { %4156 = vmatpush2.bf16.msra.mxu1 %v14692_v59  ;;  %4197 = vmatpush2.bf16.msra.mxu0 %v14695_v35  ;;  %v14737_v59 = vld [vmem:[#allocation16 + $0x428] ss:$16 sps:$4 sm:$0xff]   ;;  %v14742_v35 = vld [vmem:[#allocation16 + $0x404] ss:$16 sps:$4 sm:$0xff]  }
 0x416   :  { %4612 = vmatprep.subr.bf16.mxu1 %v14700_v39  ;;  %4653 = vmatprep.subr.bf16.mxu0 %v14703_v11  ;;  %v14740_v39 = vld [vmem:[#allocation16 + $0x400] ss:$16 sps:$4 sm:$0xff]   ;;  %v14743_v11 = vld [vmem:[#allocation16 + $0x408] ss:$16 sps:$4 sm:$0xff]  }
 0x418   :  { %4158 = vmatmul.mubr.bf16.vlgmr.msra.gmra.mxu1 %v13983_v27  ;;  %4199 = vmatmul.mubr.bf16.vlgmr.msra.gmra.mxu0 %v13983_v27  ;;  %v14746_v27 = vld [vmem:[#allocation16 + $0x5e0] ss:$16 sps:$4 sm:$0xff]  }
 0x419   :  { %4613 = vmatpush1.bf16.msra.mxu1 %v14698_v24  ;;  %4644 = vmatprep.mubr.bf16.mxu1 %v13986_v0  ;;  %v14751_v24 = vld [vmem:[#allocation16 + $0x5ec] ss:$16 sps:$4 sm:$0xff]  }
 0x41a   :  { %4654 = vmatpush1.bf16.msra.mxu0 %v14701_v33  ;;  %4685 = vmatprep.mubr.bf16.mxu0 %v13986_v0  ;;  %v14749_v33 = vld [vmem:[#allocation16 + $0x5e8] ss:$16 sps:$4 sm:$0xff]   ;;  %v14754_v0 = vld [vmem:[#allocation16 + $0x5c4] ss:$16 sps:$4 sm:$0xff]  }
 0x41b   :  { %4614 = vmatprep.subr.bf16.mxu1 %v14706_v46  ;;  %4655 = vmatprep.subr.bf16.mxu0 %v14709_v60  ;;  %v14757_v46 = vld [vmem:[#allocation16 + $0x5cc] ss:$16 sps:$4 sm:$0xff]   ;;  %v14752_v60 = vld [vmem:[#allocation16 + $0x5c0] ss:$16 sps:$4 sm:$0xff]  }
 0x41d   :  { %4615 = vmatpush1.bf16.msra.mxu1 %v14704_v56  ;;  %v14755_v56 = vld [vmem:[#allocation16 + $0x5c8] ss:$16 sps:$4 sm:$0xff]  }
 0x41e   :  { %4656 = vmatpush1.bf16.msra.mxu0 %v14707_v28  ;;  %4616 = vmatprep.subr.bf16.mxu1 %v14712_v3  ;;  %v14760_v28 = vld [vmem:[#allocation16 + $0x5a4] ss:$16 sps:$4 sm:$0xff]   ;;  %v14763_v3 = vld [vmem:[#allocation16 + $0x5ac] ss:$16 sps:$4 sm:$0xff]  }
 0x41f   :  { %4657 = vmatprep.subr.bf16.mxu0 %v14715_v51  ;;  %v14758_v51 = vld [vmem:[#allocation16 + $0x5a0] ss:$16 sps:$4 sm:$0xff]  }
 0x421   :  { %4617 = vmatpush1.bf16.msra.mxu1 %v14710_v37  ;;  %v14761_v37 = vld [vmem:[#allocation16 + $0x5a8] ss:$16 sps:$4 sm:$0xff]  }
 0x422   :  { %4658 = vmatpush1.bf16.msra.mxu0 %v14713_v45  ;;  %4618 = vmatprep.subr.bf16.mxu1 %v14718_v47  ;;  %v14766_v45 = vld [vmem:[#allocation16 + $0x584] ss:$16 sps:$4 sm:$0xff]   ;;  %v14769_v47 = vld [vmem:[#allocation16 + $0x58c] ss:$16 sps:$4 sm:$0xff]  }
 0x423   :  { %4659 = vmatprep.subr.bf16.mxu0 %v14721_v42  ;;  %v14764_v42 = vld [vmem:[#allocation16 + $0x580] ss:$16 sps:$4 sm:$0xff]  }
 0x425   :  { %4619 = vmatpush1.bf16.msra.mxu1 %v14716_v30  ;;  %v14767_v30 = vld [vmem:[#allocation16 + $0x588] ss:$16 sps:$4 sm:$0xff]  }
 0x426   :  { %4660 = vmatpush1.bf16.msra.mxu0 %v14719_v63  ;;  %4620 = vmatprep.subr.bf16.mxu1 %v14724_v43  ;;  %v14772_v63 = vld [vmem:[#allocation16 + $0x564] ss:$16 sps:$4 sm:$0xff]   ;;  %v14775_v43 = vld [vmem:[#allocation16 + $0x56c] ss:$16 sps:$4 sm:$0xff]  }
 0x427   :  { %4661 = vmatprep.subr.bf16.mxu0 %v14727_v19  ;;  %v17600_v19 = vld [vmem:[#allocation33_spill] sm:$0xff] }
 0x429   :  { %4621 = vmatpush1.bf16.msra.mxu1 %v14722_v54  ;;  %v17601_v54 = vld [vmem:[#allocation32_spill] sm:$0xff] }
 0x42a   :  { %4662 = vmatpush1.bf16.msra.mxu0 %v14725_v32  ;;  %4622 = vmatprep.subr.bf16.mxu1 %v14730_v29  ;;  %v2082_v32 = vadd.f32 %v17601_v54, %v17600_v19  ;;  %v14770_v29 = vld [vmem:[#allocation16 + $0x560] ss:$16 sps:$4 sm:$0xff]   ;;  %v14811_v19 = vld [vmem:[#allocation16 + $0x6ac] ss:$16 sps:$4 sm:$0xff]  }
 0x42b   :  { %4663 = vmatprep.subr.bf16.mxu0 %v14733_v53  ;;  %v17602_v53 = vld [vmem:[#allocation41_spill] sm:$0xff] }
 0x42c   :  { %v14806_v54 = vld [vmem:[#allocation16 + $0x6a0] ss:$16 sps:$4 sm:$0xff]  }
 0x42d   :  { %4623 = vmatpush1.bf16.msra.mxu1 %v14728_v17  ;;  %v2425_v17 = vadd.f32 %v17602_v53, %v2082_v32  ;;  %v14809_v32 = vld [vmem:[#allocation16 + $0x6a8] ss:$16 sps:$4 sm:$0xff]   ;;  %v14817_v53 = vld [vmem:[#allocation16 + $0x68c] ss:$16 sps:$4 sm:$0xff]  }
 0x42e   :  { %4664 = vmatpush1.bf16.msra.mxu0 %v14731_v61  ;;  %4624 = vmatprep.subr.bf16.mxu1 %v14736_v1  ;;  %v14773_v61 = vld [vmem:[#allocation16 + $0x568] ss:$16 sps:$4 sm:$0xff]   ;;  %v14778_v1 = vld [vmem:[#allocation16 + $0x544] ss:$16 sps:$4 sm:$0xff]  }
 0x42f   :  { %4665 = vmatprep.subr.bf16.mxu0 %v14739_v14  ;;  %v14781_v14 = vld [vmem:[#allocation16 + $0x54c] ss:$16 sps:$4 sm:$0xff]  }
 0x431   :  { %4625 = vmatpush1.bf16.msra.mxu1 %v14734_v9  ;;  %v14776_v9 = vld [vmem:[#allocation16 + $0x540] ss:$16 sps:$4 sm:$0xff]  }
 0x432   :  { %4666 = vmatpush1.bf16.msra.mxu0 %v14737_v59  ;;  %4626 = vmatprep.subr.bf16.mxu1 %v14742_v35  ;;  %v17603_v59 = vld [vmem:[#allocation40_spill] sm:$0xff] }
 0x433   :  { %4667 = vmatprep.subr.bf16.mxu0 %v14745_v2  ;;  %v2731_v35 = vadd.f32 %v17603_v59, %v2425_v17  ;;  %v14779_v2 = vld [vmem:[#allocation16 + $0x548] ss:$16 sps:$4 sm:$0xff]   ;;  %v14812_v17 = vld [vmem:[#allocation16 + $0x680] ss:$16 sps:$4 sm:$0xff]  }
 0x434   :  { %v14821_v59 = vld [vmem:[#allocation16 + $0x668] ss:$16 sps:$4 sm:$0xff]  }
 0x435   :  { %4627 = vmatpush1.bf16.msra.mxu1 %v14740_v39  ;;  %v14784_v39 = vld [vmem:[#allocation16 + $0x524] ss:$16 sps:$4 sm:$0xff]  }
 0x436   :  { %4668 = vmatpush1.bf16.msra.mxu0 %v14743_v11  ;;  %4628 = vmatprep.subr.bf16.mxu1 %v14748_v55  ;;  %v14787_v11 = vld [vmem:[#allocation16 + $0x52c] ss:$16 sps:$4 sm:$0xff]   ;;  %v3037_v55 = vadd.f32 %v17222_v48, %v2731_v35  ;;  %v14826_v35 = vld [vmem:[#allocation16 + $0x644] ss:$16 sps:$4 sm:$0xff]  }
 0x437   :  { %4669 = vmatprep.subr.bf16.mxu0 %v14751_v24  ;;  %v14782_v24 = vld [vmem:[#allocation16 + $0x520] ss:$16 sps:$4 sm:$0xff]   ;;  %v14799_v48 = vld [vmem:[#allocation16 + $0x6ec] ss:$16 sps:$4 sm:$0xff]  }
 0x439   :  { %4629 = vmatpush2.bf16.msra.mxu1 %v14746_v27  ;;  %v14785_v27 = vld [vmem:[#allocation16 + $0x528] ss:$16 sps:$4 sm:$0xff]  }
 0x43a   :  { %4670 = vmatpush2.bf16.msra.mxu0 %v14749_v33  ;;  %4630 = vmatprep.subr.bf16.mxu1 %v14754_v0  ;;  %v14790_v33 = vld [vmem:[#allocation16 + $0x504] ss:$16 sps:$4 sm:$0xff]   ;;  %v14793_v0 = vld [vmem:[#allocation16 + $0x50c] ss:$16 sps:$4 sm:$0xff]  }
 0x43b   :  { %4671 = vmatprep.subr.bf16.mxu0 %v14757_v46  ;;  %v3081_v46 = vadd.f32 %v17201_v49, %v3037_v55  ;;  %v14832_v55 = vld [vmem:[#allocation16 + $0x624] ss:$16 sps:$4 sm:$0xff]  }
 0x43d   :  { %4631 = vmatpush2.bf16.msra.mxu1 %v14752_v60  ;;  %v14788_v60 = vld [vmem:[#allocation16 + $0x500] ss:$16 sps:$4 sm:$0xff]  }
 0x43e   :  { %4672 = vmatpush2.bf16.msra.mxu0 %v14755_v56  ;;  %4632 = vmatprep.subr.bf16.mxu1 %v14760_v28  ;;  %v3110_v56 = vmax.f32 %v17216_v34, 0.0  ;;  %v14791_v28 = vld [vmem:[#allocation16 + $0x508] ss:$16 sps:$4 sm:$0xff]   ;;  %v14800_v34 = vld [vmem:[#allocation16 + $0x6c0] ss:$16 sps:$4 sm:$0xff]  }
 0x43f   :  { %4673 = vmatprep.subr.bf16.mxu0 %v14763_v3  ;;  %v14796_v3 = vld [vmem:[#allocation16 + $0x6e4] ss:$16 sps:$4 sm:$0xff]  }
 0x441   :  { %4633 = vmatpush2.bf16.msra.mxu1 %v14758_v51  ;;  %v3113_v51 = vmax.f32 %v3081_v46, 0.0  ;;  %v14841_v46 = vld [vmem:[#allocation16 + $0x60c] ss:$16 sps:$4 sm:$0xff]  }
 0x442   :  { %4674 = vmatpush2.bf16.msra.mxu0 %v14761_v37  ;;  %4634 = vmatprep.subr.bf16.mxu1 %v14766_v45  ;;  %v14794_v37 = vld [vmem:[#allocation16 + $0x6e0] ss:$16 sps:$4 sm:$0xff]   ;;  %v13985_v45 = vpack.c.bf16 %v3110_v56, %v3110_v56  ;;  %v14839_v56 = vld [vmem:[#allocation16 + $0x608] ss:$16 sps:$4 sm:$0xff]  }
 0x443   :  { %4675 = vmatprep.subr.bf16.mxu0 %v14769_v47  ;;  %v14797_v47 = vld [vmem:[#allocation16 + $0x6e8] ss:$16 sps:$4 sm:$0xff]   ;;  %v13988_v49 = vpack.c.bf16 %v3113_v51, %v3113_v51 }
 0x444   :  { %v14845_v51 = vld [vmem:[#allocation16 + $0x7e8] ss:$16 sps:$4 sm:$0xff]  }
 0x445   :  { %4635 = vmatpush2.bf16.msra.mxu1 %v14764_v42  ;;  %v14802_v42 = vld [vmem:[#allocation16 + $0x6c4] ss:$16 sps:$4 sm:$0xff]  }
 0x446   :  { %4676 = vmatpush2.bf16.msra.mxu0 %v14767_v30  ;;  %4636 = vmatprep.subr.bf16.mxu1 %v14772_v63  ;;  %v14805_v30 = vld [vmem:[#allocation16 + $0x6cc] ss:$16 sps:$4 sm:$0xff]   ;;  %v14803_v63 = vld [vmem:[#allocation16 + $0x6c8] ss:$16 sps:$4 sm:$0xff]  }
 0x447   :  { %4677 = vmatprep.subr.bf16.mxu0 %v14775_v43  ;;  %v14808_v43 = vld [vmem:[#allocation16 + $0x6a4] ss:$16 sps:$4 sm:$0xff]  }
 0x449   :  { %4637 = vmatpush2.bf16.msra.mxu1 %v14770_v29  ;;  %v14814_v29 = vld [vmem:[#allocation16 + $0x684] ss:$16 sps:$4 sm:$0xff]  }
 0x44a   :  { %4678 = vmatpush2.bf16.msra.mxu0 %v14773_v61  ;;  %4638 = vmatprep.subr.bf16.mxu1 %v14778_v1  ;;  %v14815_v61 = vld [vmem:[#allocation16 + $0x688] ss:$16 sps:$4 sm:$0xff]   ;;  %v14820_v1 = vld [vmem:[#allocation16 + $0x664] ss:$16 sps:$4 sm:$0xff]  }
 0x44b   :  { %4679 = vmatprep.subr.bf16.mxu0 %v14781_v14  ;;  %v14823_v14 = vld [vmem:[#allocation16 + $0x66c] ss:$16 sps:$4 sm:$0xff]  }
 0x44d   :  { %4639 = vmatpush2.bf16.msra.mxu1 %v14776_v9  ;;  %v14818_v9 = vld [vmem:[#allocation16 + $0x660] ss:$16 sps:$4 sm:$0xff]  }
 0x44e   :  { %4680 = vmatpush2.bf16.msra.mxu0 %v14779_v2  ;;  %4640 = vmatprep.subr.bf16.mxu1 %v14784_v39  ;;  %v14829_v2 = vld [vmem:[#allocation16 + $0x64c] ss:$16 sps:$4 sm:$0xff]   ;;  %v14824_v39 = vld [vmem:[#allocation16 + $0x640] ss:$16 sps:$4 sm:$0xff]  }
 0x44f   :  { %4681 = vmatprep.subr.bf16.mxu0 %v14787_v11  ;;  %v14827_v11 = vld [vmem:[#allocation16 + $0x648] ss:$16 sps:$4 sm:$0xff]  }
 0x451   :  { %4641 = vmatpush2.bf16.msra.mxu1 %v14782_v24  ;;  %v14835_v24 = vld [vmem:[#allocation16 + $0x62c] ss:$16 sps:$4 sm:$0xff]  }
 0x452   :  { %4682 = vmatpush2.bf16.msra.mxu0 %v14785_v27  ;;  %4642 = vmatprep.subr.bf16.mxu1 %v14790_v33  ;;  %v14830_v27 = vld [vmem:[#allocation16 + $0x620] ss:$16 sps:$4 sm:$0xff]   ;;  %v14833_v33 = vld [vmem:[#allocation16 + $0x628] ss:$16 sps:$4 sm:$0xff]  }
 0x453   :  { %4683 = vmatprep.subr.bf16.mxu0 %v14793_v0  ;;  %v14838_v0 = vld [vmem:[#allocation16 + $0x604] ss:$16 sps:$4 sm:$0xff]  }
 0x455   :  { %4643 = vmatpush2.bf16.msra.mxu1 %v14788_v60  ;;  %v14836_v60 = vld [vmem:[#allocation16 + $0x600] ss:$16 sps:$4 sm:$0xff]  }
 0x456   :  { %4684 = vmatpush2.bf16.msra.mxu0 %v14791_v28  ;;  %5099 = vmatprep.subr.bf16.mxu1 %v14796_v3  ;;  %v14844_v28 = vld [vmem:[#allocation16 + $0x7e4] ss:$16 sps:$4 sm:$0xff]   ;;  %v14847_v3 = vld [vmem:[#allocation16 + $0x7ec] ss:$16 sps:$4 sm:$0xff]  }
 0x457   :  { %5140 = vmatprep.subr.bf16.mxu0 %v14799_v48  ;;  %v14842_v48 = vld [vmem:[#allocation16 + $0x7e0] ss:$16 sps:$4 sm:$0xff]  }
 0x458   :  { %4645 = vmatmul.mubr.bf16.vlgmr.msra.gmra.mxu1 %v13985_v45 }
 0x459   :  { %4686 = vmatmul.mubr.bf16.vlgmr.msra.gmra.mxu0 %v13985_v45  ;;  %5100 = vmatpush1.bf16.msra.mxu1 %v14794_v37  ;;  %v14850_v37 = vld [vmem:[#allocation16 + $0x7c4] ss:$16 sps:$4 sm:$0xff]   ;;  %v14853_v45 = vld [vmem:[#allocation16 + $0x7cc] ss:$16 sps:$4 sm:$0xff]  }
 0x45a   :  { %5131 = vmatprep.mubr.bf16.mxu1 %v13988_v49  ;;  %5141 = vmatpush1.bf16.msra.mxu0 %v14797_v47  ;;  %v14848_v47 = vld [vmem:[#allocation16 + $0x7c0] ss:$16 sps:$4 sm:$0xff]  }
 0x45b   :  { %5172 = vmatprep.mubr.bf16.mxu0 %v13988_v49  ;;  %5101 = vmatprep.subr.bf16.mxu1 %v14802_v42  ;;  %v14851_v42 = vld [vmem:[#allocation16 + $0x7c8] ss:$16 sps:$4 sm:$0xff]   ;;  %v14856_v49 = vld [vmem:[#allocation16 + $0x7a4] ss:$16 sps:$4 sm:$0xff]  }
 0x45c   :  { %5142 = vmatprep.subr.bf16.mxu0 %v14805_v30  ;;  %v14859_v30 = vld [vmem:[#allocation16 + $0x7ac] ss:$16 sps:$4 sm:$0xff]  }
 0x45d   :  { %5102 = vmatpush1.bf16.msra.mxu1 %v14800_v34  ;;  %v14854_v34 = vld [vmem:[#allocation16 + $0x7a0] ss:$16 sps:$4 sm:$0xff]  }
 0x45e   :  { %5143 = vmatpush1.bf16.msra.mxu0 %v14803_v63  ;;  %5103 = vmatprep.subr.bf16.mxu1 %v14808_v43  ;;  %v14857_v63 = vld [vmem:[#allocation16 + $0x7a8] ss:$16 sps:$4 sm:$0xff]   ;;  %v14862_v43 = vld [vmem:[#allocation16 + $0x784] ss:$16 sps:$4 sm:$0xff]  }
 0x45f   :  { %5144 = vmatprep.subr.bf16.mxu0 %v14811_v19  ;;  %v14865_v19 = vld [vmem:[#allocation16 + $0x78c] ss:$16 sps:$4 sm:$0xff]  }
 0x461   :  { %5104 = vmatpush1.bf16.msra.mxu1 %v14806_v54  ;;  %v14860_v54 = vld [vmem:[#allocation16 + $0x780] ss:$16 sps:$4 sm:$0xff]  }
 0x462   :  { %5145 = vmatpush1.bf16.msra.mxu0 %v14809_v32  ;;  %5105 = vmatprep.subr.bf16.mxu1 %v14814_v29  ;;  %v14863_v32 = vld [vmem:[#allocation16 + $0x788] ss:$16 sps:$4 sm:$0xff]   ;;  %v14868_v29 = vld [vmem:[#allocation16 + $0x764] ss:$16 sps:$4 sm:$0xff]  }
 0x463   :  { %5146 = vmatprep.subr.bf16.mxu0 %v14817_v53  ;;  %v14871_v53 = vld [vmem:[#allocation16 + $0x76c] ss:$16 sps:$4 sm:$0xff]  }
 0x465   :  { %5106 = vmatpush1.bf16.msra.mxu1 %v14812_v17  ;;  %v14866_v17 = vld [vmem:[#allocation16 + $0x760] ss:$16 sps:$4 sm:$0xff]  }
 0x466   :  { %5147 = vmatpush1.bf16.msra.mxu0 %v14815_v61  ;;  %5107 = vmatprep.subr.bf16.mxu1 %v14820_v1  ;;  %v14869_v61 = vld [vmem:[#allocation16 + $0x768] ss:$16 sps:$4 sm:$0xff]   ;;  %v14874_v1 = vld [vmem:[#allocation16 + $0x744] ss:$16 sps:$4 sm:$0xff]  }
 0x467   :  { %5148 = vmatprep.subr.bf16.mxu0 %v14823_v14  ;;  %v14877_v14 = vld [vmem:[#allocation16 + $0x74c] ss:$16 sps:$4 sm:$0xff]  }
 0x469   :  { %5108 = vmatpush1.bf16.msra.mxu1 %v14818_v9  ;;  %v14872_v9 = vld [vmem:[#allocation16 + $0x740] ss:$16 sps:$4 sm:$0xff]  }
 0x46a   :  { %5149 = vmatpush1.bf16.msra.mxu0 %v14821_v59  ;;  %5109 = vmatprep.subr.bf16.mxu1 %v14826_v35  ;;  %v14875_v59 = vld [vmem:[#allocation16 + $0x748] ss:$16 sps:$4 sm:$0xff]   ;;  %v14880_v35 = vld [vmem:[#allocation16 + $0x724] ss:$16 sps:$4 sm:$0xff]  }
 0x46b   :  { %5150 = vmatprep.subr.bf16.mxu0 %v14829_v2  ;;  %v14883_v2 = vld [vmem:[#allocation16 + $0x72c] ss:$16 sps:$4 sm:$0xff]  }
 0x46d   :  { %5110 = vmatpush1.bf16.msra.mxu1 %v14824_v39  ;;  %v14878_v39 = vld [vmem:[#allocation16 + $0x720] ss:$16 sps:$4 sm:$0xff]  }
 0x46e   :  { %5151 = vmatpush1.bf16.msra.mxu0 %v14827_v11  ;;  %5111 = vmatprep.subr.bf16.mxu1 %v14832_v55  ;;  %v14881_v11 = vld [vmem:[#allocation16 + $0x728] ss:$16 sps:$4 sm:$0xff]   ;;  %v14886_v55 = vld [vmem:[#allocation16 + $0x704] ss:$16 sps:$4 sm:$0xff]  }
 0x46f   :  { %5152 = vmatprep.subr.bf16.mxu0 %v14835_v24  ;;  %v14889_v24 = vld [vmem:[#allocation16 + $0x70c] ss:$16 sps:$4 sm:$0xff]  }
 0x471   :  { %5112 = vmatpush1.bf16.msra.mxu1 %v14830_v27  ;;  %v14884_v27 = vld [vmem:[#allocation16 + $0x700] ss:$16 sps:$4 sm:$0xff]  }
 0x472   :  { %5153 = vmatpush1.bf16.msra.mxu0 %v14833_v33  ;;  %5113 = vmatprep.subr.bf16.mxu1 %v14838_v0  ;;  %v3112_v33 = vmax.f32 %v17227_v21, 0.0  ;;  %v14887_v0 = vld [vmem:[#allocation16 + $0x708] ss:$16 sps:$4 sm:$0xff]  }
 0x473   :  { %5154 = vmatprep.subr.bf16.mxu0 %v14841_v46  ;;  %v14892_v46 = vld [vmem:[#allocation16 + $0x8e4] ss:$16 sps:$4 sm:$0xff]  }
 0x475   :  { %5114 = vmatpush1.bf16.msra.mxu1 %v14836_v60  ;;  %v14895_v60 = vld [vmem:[#allocation16 + $0x8ec] ss:$16 sps:$4 sm:$0xff]  }
 0x476   :  { %5155 = vmatpush1.bf16.msra.mxu0 %v14839_v56  ;;  %5115 = vmatprep.subr.bf16.mxu1 %v14844_v28  ;;  %v3115_v56 = vmax.f32 %v17237_v22, 0.0  ;;  %v14890_v28 = vld [vmem:[#allocation16 + $0x8e0] ss:$16 sps:$4 sm:$0xff]  }
 0x477   :  { %5156 = vmatprep.subr.bf16.mxu0 %v14847_v3  ;;  %v13987_v3 = vpack.c.bf16 %v3112_v33, %v3112_v33  ;;  %v14931_v33 = vld [vmem:[#allocation16 + $0x82c] ss:$16 sps:$4 sm:$0xff]  }
 0x479   :  { %5116 = vmatpush2.bf16.msra.mxu1 %v14842_v48  ;;  %v14893_v48 = vld [vmem:[#allocation16 + $0x8e8] ss:$16 sps:$4 sm:$0xff]  }
 0x47a   :  { %5157 = vmatpush2.bf16.msra.mxu0 %v14845_v51  ;;  %5117 = vmatprep.subr.bf16.mxu1 %v14850_v37  ;;  %v14898_v51 = vld [vmem:[#allocation16 + $0x8c4] ss:$16 sps:$4 sm:$0xff]   ;;  %v13990_v37 = vpack.c.bf16 %v3115_v56, %v3115_v56  ;;  %v14937_v56 = vld [vmem:[#allocation16 + $0x80c] ss:$16 sps:$4 sm:$0xff]  }
 0x47b   :  { %5158 = vmatprep.subr.bf16.mxu0 %v14853_v45 }
 0x47d   :  { %5118 = vmatpush2.bf16.msra.mxu1 %v14848_v47  ;;  %v14901_v47 = vld [vmem:[#allocation16 + $0x8cc] ss:$16 sps:$4 sm:$0xff]  }
 0x47e   :  { %5159 = vmatpush2.bf16.msra.mxu0 %v14851_v42  ;;  %5119 = vmatprep.subr.bf16.mxu1 %v14856_v49  ;;  %v14896_v42 = vld [vmem:[#allocation16 + $0x8c0] ss:$16 sps:$4 sm:$0xff]  }
 0x47f   :  { %5160 = vmatprep.subr.bf16.mxu0 %v14859_v30  ;;  %v14899_v30 = vld [vmem:[#allocation16 + $0x8c8] ss:$16 sps:$4 sm:$0xff]  }
 0x481   :  { %5120 = vmatpush2.bf16.msra.mxu1 %v14854_v34  ;;  %v14904_v34 = vld [vmem:[#allocation16 + $0x8a4] ss:$16 sps:$4 sm:$0xff]  }
 0x482   :  { %5161 = vmatpush2.bf16.msra.mxu0 %v14857_v63  ;;  %5121 = vmatprep.subr.bf16.mxu1 %v14862_v43  ;;  %v14907_v63 = vld [vmem:[#allocation16 + $0x8ac] ss:$16 sps:$4 sm:$0xff]  }
 0x483   :  { %5162 = vmatprep.subr.bf16.mxu0 %v14865_v19 }
 0x485   :  { %5122 = vmatpush2.bf16.msra.mxu1 %v14860_v54  ;;  %v14902_v54 = vld [vmem:[#allocation16 + $0x8a0] ss:$16 sps:$4 sm:$0xff]  }
 0x486   :  { %5163 = vmatpush2.bf16.msra.mxu0 %v14863_v32  ;;  %5123 = vmatprep.subr.bf16.mxu1 %v14868_v29 }
 0x487   :  { %5164 = vmatprep.subr.bf16.mxu0 %v14871_v53  ;;  %v14905_v53 = vld [vmem:[#allocation16 + $0x8a8] ss:$16 sps:$4 sm:$0xff]  }
 0x489   :  { %5124 = vmatpush2.bf16.msra.mxu1 %v14866_v17  ;;  %v14910_v17 = vld [vmem:[#allocation16 + $0x884] ss:$16 sps:$4 sm:$0xff]  }
 0x48a   :  { %5165 = vmatpush2.bf16.msra.mxu0 %v14869_v61  ;;  %5125 = vmatprep.subr.bf16.mxu1 %v14874_v1  ;;  %v14913_v61 = vld [vmem:[#allocation16 + $0x88c] ss:$16 sps:$4 sm:$0xff]   ;;  %v14908_v1 = vld [vmem:[#allocation16 + $0x880] ss:$16 sps:$4 sm:$0xff]  }
 0x48b   :  { %5166 = vmatprep.subr.bf16.mxu0 %v14877_v14  ;;  %v14911_v14 = vld [vmem:[#allocation16 + $0x888] ss:$16 sps:$4 sm:$0xff]  }
 0x48d   :  { %5126 = vmatpush2.bf16.msra.mxu1 %v14872_v9  ;;  %v14916_v9 = vld [vmem:[#allocation16 + $0x864] ss:$16 sps:$4 sm:$0xff]  }
 0x48e   :  { %5167 = vmatpush2.bf16.msra.mxu0 %v14875_v59  ;;  %5127 = vmatprep.subr.bf16.mxu1 %v14880_v35  ;;  %v14919_v59 = vld [vmem:[#allocation16 + $0x86c] ss:$16 sps:$4 sm:$0xff]   ;;  %v14914_v35 = vld [vmem:[#allocation16 + $0x860] ss:$16 sps:$4 sm:$0xff]  }
 0x48f   :  { %5168 = vmatprep.subr.bf16.mxu0 %v14883_v2  ;;  %v14917_v2 = vld [vmem:[#allocation16 + $0x868] ss:$16 sps:$4 sm:$0xff]  }
 0x491   :  { %5128 = vmatpush2.bf16.msra.mxu1 %v14878_v39  ;;  %v14922_v39 = vld [vmem:[#allocation16 + $0x844] ss:$16 sps:$4 sm:$0xff]  }
 0x492   :  { %5169 = vmatpush2.bf16.msra.mxu0 %v14881_v11  ;;  %5129 = vmatprep.subr.bf16.mxu1 %v14886_v55  ;;  %v14925_v11 = vld [vmem:[#allocation16 + $0x84c] ss:$16 sps:$4 sm:$0xff]   ;;  %v14920_v55 = vld [vmem:[#allocation16 + $0x840] ss:$16 sps:$4 sm:$0xff]  }
 0x493   :  { %5170 = vmatprep.subr.bf16.mxu0 %v14889_v24  ;;  %v14923_v24 = vld [vmem:[#allocation16 + $0x848] ss:$16 sps:$4 sm:$0xff]  }
 0x495   :  { %5130 = vmatpush2.bf16.msra.mxu1 %v14884_v27  ;;  %v14928_v27 = vld [vmem:[#allocation16 + $0x824] ss:$16 sps:$4 sm:$0xff]  }
 0x496   :  { %5171 = vmatpush2.bf16.msra.mxu0 %v14887_v0  ;;  %5586 = vmatprep.subr.bf16.mxu1 %v14892_v46  ;;  %v14926_v0 = vld [vmem:[#allocation16 + $0x820] ss:$16 sps:$4 sm:$0xff]   ;;  %v14929_v46 = vld [vmem:[#allocation16 + $0x828] ss:$16 sps:$4 sm:$0xff]  }
 0x497   :  { %5627 = vmatprep.subr.bf16.mxu0 %v14895_v60  ;;  %v14934_v60 = vld [vmem:[#allocation16 + $0x804] ss:$16 sps:$4 sm:$0xff]  }
 0x498   :  { %5132 = vmatmul.mubr.bf16.vlgmr.msra.gmra.mxu1 %v13987_v3  ;;  %v17349_v45 = vpop.f32.mrf.mxu1  ;;  %v17351_v21 = vpop.f32.mrf.mxu0 }
 0x499   :  { %5173 = vmatmul.mubr.bf16.vlgmr.msra.gmra.mxu0 %v13987_v3  ;;  %5587 = vmatpush1.bf16.msra.mxu1 %v14890_v28  ;;  %v14932_v28 = vld [vmem:[#allocation16 + $0x800] ss:$16 sps:$4 sm:$0xff]   ;;  %v14935_v3 = vld [vmem:[#allocation16 + $0x808] ss:$16 sps:$4 sm:$0xff]  }
 0x49a   :  { %5618 = vmatprep.mubr.bf16.mxu1 %v13990_v37  ;;  %5628 = vmatpush1.bf16.msra.mxu0 %v14893_v48  ;;  %v17353_v22 = vpop.f32.mrf.mxu1  ;;  %v17355_v49 = vpop.f32.mrf.mxu0  ;;  %v14940_v48 = vld [vmem:[#allocation16 + $0x9e4] ss:$16 sps:$4 sm:$0xff]  }
 0x49b   :  { %5659 = vmatprep.mubr.bf16.mxu0 %v13990_v37  ;;  %5588 = vmatprep.subr.bf16.mxu1 %v14898_v51  ;;  %v14943_v51 = vld [vmem:[#allocation16 + $0x9ec] ss:$16 sps:$4 sm:$0xff]   ;;  %v14938_v37 = vld [vmem:[#allocation16 + $0x9e0] ss:$16 sps:$4 sm:$0xff]  }
 0x49c   :  { %5629 = vmatprep.subr.bf16.mxu0 %v14901_v47  ;;  %v3680_v43 = vpop.f32.mrf.mxu1  ;;  %v3721_v19 = vpop.f32.mrf.mxu0  ;;  %v14941_v47 = vld [vmem:[#allocation16 + $0x9e8] ss:$16 sps:$4 sm:$0xff]  }
 0x49d   :  { %5589 = vmatpush1.bf16.msra.mxu1 %v14896_v42  ;;  %v14946_v42 = vld [vmem:[#allocation16 + $0x9c4] ss:$16 sps:$4 sm:$0xff]   ;;  %v14955_v19 = vld [vmem:[#allocation16 + $0x9ac] ss:$16 sps:$4 sm:$0xff]  }
 0x49e   :  { %5630 = vmatpush1.bf16.msra.mxu0 %v14899_v30  ;;  %v3681_v32 = vpop.f32.mrf.mxu1  ;;  %v3722_v29 = vpop.f32.mrf.mxu0  ;;  %5590 = vmatprep.subr.bf16.mxu1 %v14904_v34  ;;  %v14949_v30 = vld [vmem:[#allocation16 + $0x9cc] ss:$16 sps:$4 sm:$0xff]   ;;  %v14944_v34 = vld [vmem:[#allocation16 + $0x9c0] ss:$16 sps:$4 sm:$0xff]   ;;  %v14952_v43 = vld [vmem:[#allocation16 + $0x9a4] ss:$16 sps:$4 sm:$0xff]  }
 0x49f   :  { %5631 = vmatprep.subr.bf16.mxu0 %v14907_v63  ;;  %v14947_v63 = vld [vmem:[#allocation16 + $0x9c8] ss:$16 sps:$4 sm:$0xff]   ;;  %v14958_v29 = vld [vmem:[#allocation16 + $0x984] ss:$16 sps:$4 sm:$0xff]  }
 0x4a0   :  { %v14953_v32 = vld [vmem:[#allocation16 + $0x9a8] ss:$16 sps:$4 sm:$0xff]  }
 0x4a1   :  { %5591 = vmatpush1.bf16.msra.mxu1 %v14902_v54  ;;  %v14950_v54 = vld [vmem:[#allocation16 + $0x9a0] ss:$16 sps:$4 sm:$0xff]  }
 0x4a2   :  { %5632 = vmatpush1.bf16.msra.mxu0 %v14905_v53  ;;  %5592 = vmatprep.subr.bf16.mxu1 %v14910_v17  ;;  %v14961_v53 = vld [vmem:[#allocation16 + $0x98c] ss:$16 sps:$4 sm:$0xff]   ;;  %v14956_v17 = vld [vmem:[#allocation16 + $0x980] ss:$16 sps:$4 sm:$0xff]  }
 0x4a3   :  { %5633 = vmatprep.subr.bf16.mxu0 %v14913_v61  ;;  %v14959_v61 = vld [vmem:[#allocation16 + $0x988] ss:$16 sps:$4 sm:$0xff]  }
 0x4a5   :  { %5593 = vmatpush1.bf16.msra.mxu1 %v14908_v1  ;;  %v14964_v1 = vld [vmem:[#allocation16 + $0x964] ss:$16 sps:$4 sm:$0xff]  }
 0x4a6   :  { %5634 = vmatpush1.bf16.msra.mxu0 %v14911_v14  ;;  %5594 = vmatprep.subr.bf16.mxu1 %v14916_v9  ;;  %v14967_v14 = vld [vmem:[#allocation16 + $0x96c] ss:$16 sps:$4 sm:$0xff]   ;;  %v14962_v9 = vld [vmem:[#allocation16 + $0x960] ss:$16 sps:$4 sm:$0xff]  }
 0x4a7   :  { %5635 = vmatprep.subr.bf16.mxu0 %v14919_v59  ;;  %v14965_v59 = vld [vmem:[#allocation16 + $0x968] ss:$16 sps:$4 sm:$0xff]  }
 0x4a9   :  { %5595 = vmatpush1.bf16.msra.mxu1 %v14914_v35  ;;  %v14970_v35 = vld [vmem:[#allocation16 + $0x944] ss:$16 sps:$4 sm:$0xff]  }
 0x4aa   :  { %5636 = vmatpush1.bf16.msra.mxu0 %v14917_v2  ;;  %5596 = vmatprep.subr.bf16.mxu1 %v14922_v39  ;;  %v14973_v2 = vld [vmem:[#allocation16 + $0x94c] ss:$16 sps:$4 sm:$0xff]   ;;  %v14968_v39 = vld [vmem:[#allocation16 + $0x940] ss:$16 sps:$4 sm:$0xff]  }
 0x4ab   :  { %5637 = vmatprep.subr.bf16.mxu0 %v14925_v11  ;;  %v14971_v11 = vld [vmem:[#allocation16 + $0x948] ss:$16 sps:$4 sm:$0xff]  }
 0x4ad   :  { %5597 = vmatpush1.bf16.msra.mxu1 %v14920_v55  ;;  %v14976_v55 = vld [vmem:[#allocation16 + $0x924] ss:$16 sps:$4 sm:$0xff]  }
 0x4ae   :  { %5638 = vmatpush1.bf16.msra.mxu0 %v14923_v24  ;;  %5598 = vmatprep.subr.bf16.mxu1 %v14928_v27  ;;  %v14979_v24 = vld [vmem:[#allocation16 + $0x92c] ss:$16 sps:$4 sm:$0xff]   ;;  %v14974_v27 = vld [vmem:[#allocation16 + $0x920] ss:$16 sps:$4 sm:$0xff]  }
 0x4af   :  { %5639 = vmatprep.subr.bf16.mxu0 %v14931_v33  ;;  %v14977_v33 = vld [vmem:[#allocation16 + $0x928] ss:$16 sps:$4 sm:$0xff]  }
 0x4b1   :  { %5599 = vmatpush1.bf16.msra.mxu1 %v14926_v0  ;;  %v14982_v0 = vld [vmem:[#allocation16 + $0x904] ss:$16 sps:$4 sm:$0xff]  }
 0x4b2   :  { %5640 = vmatpush1.bf16.msra.mxu0 %v14929_v46  ;;  %5600 = vmatprep.subr.bf16.mxu1 %v14934_v60  ;;  %v14985_v46 = vld [vmem:[#allocation16 + $0x90c] ss:$16 sps:$4 sm:$0xff]   ;;  %v14980_v60 = vld [vmem:[#allocation16 + $0x900] ss:$16 sps:$4 sm:$0xff]  }
 0x4b3   :  { %5641 = vmatprep.subr.bf16.mxu0 %v14937_v56  ;;  %v3114_v56 = vmax.f32 %v17234_v6, 0.0  ;;  %v14997_v6 = vld [vmem:[#allocation16 + $0xacc] ss:$16 sps:$4 sm:$0xff]  }
 0x4b5   :  { %5601 = vmatpush1.bf16.msra.mxu1 %v14932_v28  ;;  %v14983_v28 = vld [vmem:[#allocation16 + $0x908] ss:$16 sps:$4 sm:$0xff]  }
 0x4b6   :  { %5642 = vmatpush1.bf16.msra.mxu0 %v14935_v3  ;;  %5602 = vmatprep.subr.bf16.mxu1 %v14940_v48  ;;  %v14988_v3 = vld [vmem:[#allocation16 + $0xae4] ss:$16 sps:$4 sm:$0xff]   ;;  %v14991_v48 = vld [vmem:[#allocation16 + $0xaec] ss:$16 sps:$4 sm:$0xff]  }
 0x4b7   :  { %5643 = vmatprep.subr.bf16.mxu0 %v14943_v51  ;;  %v3117_v51 = vmax.f32 %v17248_v7, 0.0  ;;  %v14992_v7 = vld [vmem:[#allocation16 + $0xac0] ss:$16 sps:$4 sm:$0xff]  }
 0x4b9   :  { %5603 = vmatpush2.bf16.msra.mxu1 %v14938_v37  ;;  %v14986_v37 = vld [vmem:[#allocation16 + $0xae0] ss:$16 sps:$4 sm:$0xff]  }
 0x4ba   :  { %5644 = vmatpush2.bf16.msra.mxu0 %v14941_v47  ;;  %5604 = vmatprep.subr.bf16.mxu1 %v14946_v42  ;;  %v13989_v47 = vpack.c.bf16 %v3114_v56, %v3114_v56  ;;  %v14989_v42 = vld [vmem:[#allocation16 + $0xae8] ss:$16 sps:$4 sm:$0xff]  }
 0x4bb   :  { %5645 = vmatprep.subr.bf16.mxu0 %v14949_v30  ;;  %v14994_v30 = vld [vmem:[#allocation16 + $0xac4] ss:$16 sps:$4 sm:$0xff]   ;;  %v15019_v56 = vld [vmem:[#allocation16 + $0xa48] ss:$16 sps:$4 sm:$0xff]  }
 0x4bd   :  { %5605 = vmatpush2.bf16.msra.mxu1 %v14944_v34  ;;  %v13992_v34 = vpack.c.bf16 %v3117_v51, %v3117_v51  ;;  %v15025_v51 = vld [vmem:[#allocation16 + $0xa28] ss:$16 sps:$4 sm:$0xff]  }
 0x4be   :  { %5646 = vmatpush2.bf16.msra.mxu0 %v14947_v63  ;;  %5606 = vmatprep.subr.bf16.mxu1 %v14952_v43 }
 0x4bf   :  { %5647 = vmatprep.subr.bf16.mxu0 %v14955_v19 }
 0x4c1   :  { %5607 = vmatpush2.bf16.msra.mxu1 %v14950_v54 }
 0x4c2   :  { %5648 = vmatpush2.bf16.msra.mxu0 %v14953_v32  ;;  %5608 = vmatprep.subr.bf16.mxu1 %v14958_v29 }
 0x4c3   :  { %5649 = vmatprep.subr.bf16.mxu0 %v14961_v53  ;;  %v14995_v53 = vld [vmem:[#allocation16 + $0xac8] ss:$16 sps:$4 sm:$0xff]  }
 0x4c5   :  { %5609 = vmatpush2.bf16.msra.mxu1 %v14956_v17  ;;  %v15000_v17 = vld [vmem:[#allocation16 + $0xaa4] ss:$16 sps:$4 sm:$0xff]  }
 0x4c6   :  { %5650 = vmatpush2.bf16.msra.mxu0 %v14959_v61  ;;  %5610 = vmatprep.subr.bf16.mxu1 %v14964_v1 }
 0x4c7   :  { %5651 = vmatprep.subr.bf16.mxu0 %v14967_v14 }
 0x4c9   :  { %5611 = vmatpush2.bf16.msra.mxu1 %v14962_v9  ;;  %v14998_v9 = vld [vmem:[#allocation16 + $0xaa0] ss:$16 sps:$4 sm:$0xff]  }
 0x4ca   :  { %5652 = vmatpush2.bf16.msra.mxu0 %v14965_v59  ;;  %5612 = vmatprep.subr.bf16.mxu1 %v14970_v35 }
 0x4cb   :  { %5653 = vmatprep.subr.bf16.mxu0 %v14973_v2  ;;  %v15001_v2 = vld [vmem:[#allocation16 + $0xaa8] ss:$16 sps:$4 sm:$0xff]  }
 0x4cd   :  { %5613 = vmatpush2.bf16.msra.mxu1 %v14968_v39  ;;  %v15006_v39 = vld [vmem:[#allocation16 + $0xa84] ss:$16 sps:$4 sm:$0xff]  }
 0x4ce   :  { %5654 = vmatpush2.bf16.msra.mxu0 %v14971_v11  ;;  %5614 = vmatprep.subr.bf16.mxu1 %v14976_v55  ;;  %v15009_v11 = vld [vmem:[#allocation16 + $0xa8c] ss:$16 sps:$4 sm:$0xff]   ;;  %v15012_v55 = vld [vmem:[#allocation16 + $0xa64] ss:$16 sps:$4 sm:$0xff]  }
 0x4cf   :  { %5655 = vmatprep.subr.bf16.mxu0 %v14979_v24  ;;  %v15015_v24 = vld [vmem:[#allocation16 + $0xa6c] ss:$16 sps:$4 sm:$0xff]  }
 0x4d1   :  { %5615 = vmatpush2.bf16.msra.mxu1 %v14974_v27  ;;  %v15010_v27 = vld [vmem:[#allocation16 + $0xa60] ss:$16 sps:$4 sm:$0xff]  }
 0x4d2   :  { %5656 = vmatpush2.bf16.msra.mxu0 %v14977_v33  ;;  %5616 = vmatprep.subr.bf16.mxu1 %v14982_v0  ;;  %v15013_v33 = vld [vmem:[#allocation16 + $0xa68] ss:$16 sps:$4 sm:$0xff]   ;;  %v15018_v0 = vld [vmem:[#allocation16 + $0xa44] ss:$16 sps:$4 sm:$0xff]  }
 0x4d3   :  { %5657 = vmatprep.subr.bf16.mxu0 %v14985_v46  ;;  %v15021_v46 = vld [vmem:[#allocation16 + $0xa4c] ss:$16 sps:$4 sm:$0xff]  }
 0x4d5   :  { %5617 = vmatpush2.bf16.msra.mxu1 %v14980_v60  ;;  %v15016_v60 = vld [vmem:[#allocation16 + $0xa40] ss:$16 sps:$4 sm:$0xff]  }
 0x4d6   :  { %5658 = vmatpush2.bf16.msra.mxu0 %v14983_v28  ;;  %6073 = vmatprep.subr.bf16.mxu1 %v14988_v3  ;;  %v15024_v28 = vld [vmem:[#allocation16 + $0xa24] ss:$16 sps:$4 sm:$0xff]   ;;  %v15027_v3 = vld [vmem:[#allocation16 + $0xa2c] ss:$16 sps:$4 sm:$0xff]  }
 0x4d7   :  { %6114 = vmatprep.subr.bf16.mxu0 %v14991_v48  ;;  %v15022_v48 = vld [vmem:[#allocation16 + $0xa20] ss:$16 sps:$4 sm:$0xff]  }
 0x4d8   :  { %v4159_v63 = vpop.f32.mrf.mxu1  ;;  %v4200_v43 = vpop.f32.mrf.mxu0  ;;  %5619 = vmatmul.mubr.bf16.vlgmr.msra.gmra.mxu1 %v13989_v47 }
 0x4d9   :  { %v17360_v19 = vadd.f32 %v4159_v63, %v17349_v45  ;;  %v17363_v54 = vadd.f32 %v4200_v43, %v17351_v21  ;;  %5660 = vmatmul.mubr.bf16.vlgmr.msra.gmra.mxu0 %v13989_v47  ;;  %6074 = vmatpush1.bf16.msra.mxu1 %v14986_v37  ;;  %v15003_v45 = vld [vmem:[#allocation16 + $0xaac] ss:$16 sps:$4 sm:$0xff]   ;;  %v15030_v37 = vld [vmem:[#allocation16 + $0xa04] ss:$16 sps:$4 sm:$0xff]   ;;  %v15034_v43 = vld [vmem:[#allocation16 + $0xbe0] ss:$16 sps:$4 sm:$0xff]  }
 0x4da   :  { %6105 = vmatprep.mubr.bf16.mxu1 %v13992_v34  ;;  %6115 = vmatpush1.bf16.msra.mxu0 %v14989_v42  ;;  %v4161_v32 = vpop.f32.mrf.mxu1  ;;  %v4202_v29 = vpop.f32.mrf.mxu0  ;;  %v15033_v47 = vld [vmem:[#allocation16 + $0xa0c] ss:$16 sps:$4 sm:$0xff]   ;;  %v15028_v42 = vld [vmem:[#allocation16 + $0xa00] ss:$16 sps:$4 sm:$0xff]  }
 0x4db   :  { %6146 = vmatprep.mubr.bf16.mxu0 %v13992_v34  ;;  %v17366_v61 = vadd.f32 %v4161_v32, %v17353_v22  ;;  %v17369_v1 = vadd.f32 %v4202_v29, %v17355_v49  ;;  %6075 = vmatprep.subr.bf16.mxu1 %v14994_v30  ;;  %v15004_v22 = vld [vmem:[#allocation16 + $0xa80] ss:$16 sps:$4 sm:$0xff]   ;;  %v15007_v49 = vld [vmem:[#allocation16 + $0xa88] ss:$16 sps:$4 sm:$0xff]   ;;  %v15036_v34 = vld [vmem:[#allocation16 + $0xbe4] ss:$16 sps:$4 sm:$0xff]  }
 0x4dc   :  { %v4163_v21 = vpop.f32.mrf.mxu1  ;;  %v4204_v14 = vpop.f32.mrf.mxu0  ;;  %6116 = vmatprep.subr.bf16.mxu0 %v14997_v6  ;;  %v15031_v30 = vld [vmem:[#allocation16 + $0xa08] ss:$16 sps:$4 sm:$0xff]   ;;  %v15039_v63 = vld [vmem:[#allocation16 + $0xbec] ss:$16 sps:$4 sm:$0xff]   ;;  %v15040_v29 = vld [vmem:[#allocation16 + $0xbc0] ss:$16 sps:$4 sm:$0xff]  }
 0x4dd   :  { %6076 = vmatpush1.bf16.msra.mxu1 %v14992_v7  ;;  %v15037_v6 = vld [vmem:[#allocation16 + $0xbe8] ss:$16 sps:$4 sm:$0xff]   ;;  %v15042_v7 = vld [vmem:[#allocation16 + $0xbc4] ss:$16 sps:$4 sm:$0xff]   ;;  %v15045_v32 = vld [vmem:[#allocation16 + $0xbcc] ss:$16 sps:$4 sm:$0xff]  }
 0x4de   :  { %6117 = vmatpush1.bf16.msra.mxu0 %v14995_v53  ;;  %v4164_v59 = vpop.f32.mrf.mxu1  ;;  %v4205_v35 = vpop.f32.mrf.mxu0  ;;  %6077 = vmatprep.subr.bf16.mxu1 %v15000_v17  ;;  %v15043_v53 = vld [vmem:[#allocation16 + $0xbc8] ss:$16 sps:$4 sm:$0xff]   ;;  %v15048_v17 = vld [vmem:[#allocation16 + $0xba4] ss:$16 sps:$4 sm:$0xff]   ;;  %v15046_v21 = vld [vmem:[#allocation16 + $0xba0] ss:$16 sps:$4 sm:$0xff]  }
 0x4df   :  { %6118 = vmatprep.subr.bf16.mxu0 %v15003_v45  ;;  %v15051_v45 = vld [vmem:[#allocation16 + $0xbac] ss:$16 sps:$4 sm:$0xff]   ;;  %v15049_v14 = vld [vmem:[#allocation16 + $0xba8] ss:$16 sps:$4 sm:$0xff]   ;;  %v15052_v35 = vld [vmem:[#allocation16 + $0xb80] ss:$16 sps:$4 sm:$0xff]  }
 0x4e0   :  { %v15057_v59 = vld [vmem:[#allocation16 + $0xb8c] ss:$16 sps:$4 sm:$0xff]  }
 0x4e1   :  { %6078 = vmatpush1.bf16.msra.mxu1 %v14998_v9  ;;  %v15054_v9 = vld [vmem:[#allocation16 + $0xb84] ss:$16 sps:$4 sm:$0xff]  }
 0x4e2   :  { %6119 = vmatpush1.bf16.msra.mxu0 %v15001_v2  ;;  %6079 = vmatprep.subr.bf16.mxu1 %v15006_v39  ;;  %v15055_v2 = vld [vmem:[#allocation16 + $0xb88] ss:$16 sps:$4 sm:$0xff]   ;;  %v15060_v39 = vld [vmem:[#allocation16 + $0xb64] ss:$16 sps:$4 sm:$0xff]  }
 0x4e3   :  { %6120 = vmatprep.subr.bf16.mxu0 %v15009_v11  ;;  %v15063_v11 = vld [vmem:[#allocation16 + $0xb6c] ss:$16 sps:$4 sm:$0xff]  }
 0x4e5   :  { %6080 = vmatpush1.bf16.msra.mxu1 %v15004_v22  ;;  %v15058_v22 = vld [vmem:[#allocation16 + $0xb60] ss:$16 sps:$4 sm:$0xff]  }
 0x4e6   :  { %6121 = vmatpush1.bf16.msra.mxu0 %v15007_v49  ;;  %6081 = vmatprep.subr.bf16.mxu1 %v15012_v55  ;;  %v15061_v49 = vld [vmem:[#allocation16 + $0xb68] ss:$16 sps:$4 sm:$0xff]   ;;  %v15066_v55 = vld [vmem:[#allocation16 + $0xb44] ss:$16 sps:$4 sm:$0xff]  }
 0x4e7   :  { %6122 = vmatprep.subr.bf16.mxu0 %v15015_v24  ;;  %v15069_v24 = vld [vmem:[#allocation16 + $0xb4c] ss:$16 sps:$4 sm:$0xff]  }
 0x4e9   :  { %6082 = vmatpush1.bf16.msra.mxu1 %v15010_v27  ;;  %v15064_v27 = vld [vmem:[#allocation16 + $0xb40] ss:$16 sps:$4 sm:$0xff]  }
 0x4ea   :  { %6123 = vmatpush1.bf16.msra.mxu0 %v15013_v33  ;;  %6083 = vmatprep.subr.bf16.mxu1 %v15018_v0  ;;  %v15067_v33 = vld [vmem:[#allocation16 + $0xb48] ss:$16 sps:$4 sm:$0xff]   ;;  %v15072_v0 = vld [vmem:[#allocation16 + $0xb24] ss:$16 sps:$4 sm:$0xff]  }
 0x4eb   :  { %6124 = vmatprep.subr.bf16.mxu0 %v15021_v46  ;;  %v15075_v46 = vld [vmem:[#allocation16 + $0xb2c] ss:$16 sps:$4 sm:$0xff]  }
 0x4ed   :  { %6084 = vmatpush1.bf16.msra.mxu1 %v15016_v60  ;;  %v15070_v60 = vld [vmem:[#allocation16 + $0xb20] ss:$16 sps:$4 sm:$0xff]  }
 0x4ee   :  { %6125 = vmatpush1.bf16.msra.mxu0 %v15019_v56  ;;  %6085 = vmatprep.subr.bf16.mxu1 %v15024_v28  ;;  %v15073_v56 = vld [vmem:[#allocation16 + $0xb28] ss:$16 sps:$4 sm:$0xff]   ;;  %v15078_v28 = vld [vmem:[#allocation16 + $0xb04] ss:$16 sps:$4 sm:$0xff]  }
 0x4ef   :  { %6126 = vmatprep.subr.bf16.mxu0 %v15027_v3  ;;  %v15081_v3 = vld [vmem:[#allocation16 + $0xb0c] ss:$16 sps:$4 sm:$0xff]  }
 0x4f1   :  { %6086 = vmatpush1.bf16.msra.mxu1 %v15022_v48  ;;  %v15076_v48 = vld [vmem:[#allocation16 + $0xb00] ss:$16 sps:$4 sm:$0xff]  }
 0x4f2   :  { %6127 = vmatpush1.bf16.msra.mxu0 %v15025_v51  ;;  %6087 = vmatprep.subr.bf16.mxu1 %v15030_v37  ;;  %v3116_v51 = vmax.f32 %v17244_v20, 0.0  ;;  %v15079_v37 = vld [vmem:[#allocation16 + $0xb08] ss:$16 sps:$4 sm:$0xff]   ;;  %v15093_v20 = vld [vmem:[#allocation16 + $0xccc] ss:$16 sps:$4 sm:$0xff]  }
 0x4f3   :  { %6128 = vmatprep.subr.bf16.mxu0 %v15033_v47  ;;  %v15084_v47 = vld [vmem:[#allocation16 + $0xce4] ss:$16 sps:$4 sm:$0xff]  }
 0x4f5   :  { %6088 = vmatpush1.bf16.msra.mxu1 %v15028_v42  ;;  %v15087_v42 = vld [vmem:[#allocation16 + $0xcec] ss:$16 sps:$4 sm:$0xff]  }
 0x4f6   :  { %6129 = vmatpush1.bf16.msra.mxu0 %v15031_v30  ;;  %6089 = vmatprep.subr.bf16.mxu1 %v15036_v34  ;;  %v3119_v30 = vmax.f32 %v17256_v10, 0.0  ;;  %v15082_v34 = vld [vmem:[#allocation16 + $0xce0] ss:$16 sps:$4 sm:$0xff]  }
 0x4f7   :  { %6130 = vmatprep.subr.bf16.mxu0 %v15039_v63  ;;  %v13991_v63 = vpack.c.bf16 %v3116_v51, %v3116_v51  ;;  %v15123_v51 = vld [vmem:[#allocation16 + $0xc2c] ss:$16 sps:$4 sm:$0xff]  }
 0x4f9   :  { %6090 = vmatpush2.bf16.msra.mxu1 %v15034_v43  ;;  %v15085_v43 = vld [vmem:[#allocation16 + $0xce8] ss:$16 sps:$4 sm:$0xff]  }
 0x4fa   :  { %6131 = vmatpush2.bf16.msra.mxu0 %v15037_v6  ;;  %6091 = vmatprep.subr.bf16.mxu1 %v15042_v7  ;;  %v15090_v6 = vld [vmem:[#allocation16 + $0xcc4] ss:$16 sps:$4 sm:$0xff]   ;;  %v13994_v7 = vpack.c.bf16 %v3119_v30, %v3119_v30  ;;  %v15129_v30 = vld [vmem:[#allocation16 + $0xc0c] ss:$16 sps:$4 sm:$0xff]  }
 0x4fb   :  { %6132 = vmatprep.subr.bf16.mxu0 %v15045_v32 }
 0x4fd   :  { %6092 = vmatpush2.bf16.msra.mxu1 %v15040_v29 }
 0x4fe   :  { %6133 = vmatpush2.bf16.msra.mxu0 %v15043_v53  ;;  %6093 = vmatprep.subr.bf16.mxu1 %v15048_v17  ;;  %v15088_v17 = vld [vmem:[#allocation16 + $0xcc0] ss:$16 sps:$4 sm:$0xff]  }
 0x4ff   :  { %6134 = vmatprep.subr.bf16.mxu0 %v15051_v45 }
 0x501   :  { %6094 = vmatpush2.bf16.msra.mxu1 %v15046_v21  ;;  %v15091_v21 = vld [vmem:[#allocation16 + $0xcc8] ss:$16 sps:$4 sm:$0xff]  }
 0x502   :  { %6135 = vmatpush2.bf16.msra.mxu0 %v15049_v14  ;;  %6095 = vmatprep.subr.bf16.mxu1 %v15054_v9  ;;  %v15096_v14 = vld [vmem:[#allocation16 + $0xca4] ss:$16 sps:$4 sm:$0xff]  }
 0x503   :  { %6136 = vmatprep.subr.bf16.mxu0 %v15057_v59 }
 0x505   :  { %6096 = vmatpush2.bf16.msra.mxu1 %v15052_v35 }
 0x506   :  { %6137 = vmatpush2.bf16.msra.mxu0 %v15055_v2  ;;  %6097 = vmatprep.subr.bf16.mxu1 %v15060_v39 }
 0x507   :  { %6138 = vmatprep.subr.bf16.mxu0 %v15063_v11 }
 0x509   :  { %6098 = vmatpush2.bf16.msra.mxu1 %v15058_v22  ;;  %v15097_v22 = vld [vmem:[#allocation16 + $0xca8] ss:$16 sps:$4 sm:$0xff]  }
 0x50a   :  { %6139 = vmatpush2.bf16.msra.mxu0 %v15061_v49  ;;  %6099 = vmatprep.subr.bf16.mxu1 %v15066_v55  ;;  %v15102_v49 = vld [vmem:[#allocation16 + $0xc84] ss:$16 sps:$4 sm:$0xff]  }
 0x50b   :  { %6140 = vmatprep.subr.bf16.mxu0 %v15069_v24  ;;  %v15100_v24 = vld [vmem:[#allocation16 + $0xc80] ss:$16 sps:$4 sm:$0xff]  }
 0x50d   :  { %6100 = vmatpush2.bf16.msra.mxu1 %v15064_v27  ;;  %v15103_v27 = vld [vmem:[#allocation16 + $0xc88] ss:$16 sps:$4 sm:$0xff]  }
 0x50e   :  { %6141 = vmatpush2.bf16.msra.mxu0 %v15067_v33  ;;  %6101 = vmatprep.subr.bf16.mxu1 %v15072_v0  ;;  %v15111_v33 = vld [vmem:[#allocation16 + $0xc6c] ss:$16 sps:$4 sm:$0xff]   ;;  %v15106_v0 = vld [vmem:[#allocation16 + $0xc60] ss:$16 sps:$4 sm:$0xff]  }
 0x50f   :  { %6142 = vmatprep.subr.bf16.mxu0 %v15075_v46  ;;  %v15109_v46 = vld [vmem:[#allocation16 + $0xc68] ss:$16 sps:$4 sm:$0xff]  }
 0x511   :  { %6102 = vmatpush2.bf16.msra.mxu1 %v15070_v60  ;;  %v15114_v60 = vld [vmem:[#allocation16 + $0xc44] ss:$16 sps:$4 sm:$0xff]  }
 0x512   :  { %6143 = vmatpush2.bf16.msra.mxu0 %v15073_v56  ;;  %6103 = vmatprep.subr.bf16.mxu1 %v15078_v28  ;;  %v15117_v56 = vld [vmem:[#allocation16 + $0xc4c] ss:$16 sps:$4 sm:$0xff]   ;;  %v15112_v28 = vld [vmem:[#allocation16 + $0xc40] ss:$16 sps:$4 sm:$0xff]  }
 0x513   :  { %6144 = vmatprep.subr.bf16.mxu0 %v15081_v3  ;;  %v15115_v3 = vld [vmem:[#allocation16 + $0xc48] ss:$16 sps:$4 sm:$0xff]  }
 0x515   :  { %6104 = vmatpush2.bf16.msra.mxu1 %v15076_v48  ;;  %v15120_v48 = vld [vmem:[#allocation16 + $0xc24] ss:$16 sps:$4 sm:$0xff]  }
 0x516   :  { %6145 = vmatpush2.bf16.msra.mxu0 %v15079_v37  ;;  %6560 = vmatprep.subr.bf16.mxu1 %v15084_v47  ;;  %v15118_v37 = vld [vmem:[#allocation16 + $0xc20] ss:$16 sps:$4 sm:$0xff]   ;;  %v15121_v47 = vld [vmem:[#allocation16 + $0xc28] ss:$16 sps:$4 sm:$0xff]  }
 0x517   :  { %6601 = vmatprep.subr.bf16.mxu0 %v15087_v42  ;;  %v15126_v42 = vld [vmem:[#allocation16 + $0xc04] ss:$16 sps:$4 sm:$0xff]  }
 0x518   :  { %v4646_v32 = vpop.f32.mrf.mxu1  ;;  %6106 = vmatmul.mubr.bf16.vlgmr.msra.gmra.mxu1 %v13991_v63 }
 0x519   :  { %v17374_v29 = vadd.f32 %v4646_v32, %v17360_v19  ;;  %v4687_v53 = vpop.f32.mrf.mxu0  ;;  %6147 = vmatmul.mubr.bf16.vlgmr.msra.gmra.mxu0 %v13991_v63  ;;  %6561 = vmatpush1.bf16.msra.mxu1 %v15082_v34  ;;  %v15099_v19 = vld [vmem:[#allocation16 + $0xcac] ss:$16 sps:$4 sm:$0xff]   ;;  %v15124_v34 = vld [vmem:[#allocation16 + $0xc00] ss:$16 sps:$4 sm:$0xff]   ;;  %v15127_v63 = vld [vmem:[#allocation16 + $0xc08] ss:$16 sps:$4 sm:$0xff]  }
 0x51a   :  { %v17377_v10 = vadd.f32 %v4687_v53, %v17363_v54  ;;  %6592 = vmatprep.mubr.bf16.mxu1 %v13994_v7  ;;  %6602 = vmatpush1.bf16.msra.mxu0 %v15085_v43  ;;  %v4648_v45 = vpop.f32.mrf.mxu1  ;;  %v15094_v54 = vld [vmem:[#allocation16 + $0xca0] ss:$16 sps:$4 sm:$0xff]   ;;  %v15132_v43 = vld [vmem:[#allocation16 + $0xde4] ss:$16 sps:$4 sm:$0xff]   ;;  %v15133_v32 = vld [vmem:[#allocation16 + $0xde8] ss:$16 sps:$4 sm:$0xff]  }
 0x51b   :  { %6633 = vmatprep.mubr.bf16.mxu0 %v13994_v7  ;;  %v17380_v9 = vadd.f32 %v4648_v45, %v17366_v61  ;;  %v4689_v59 = vpop.f32.mrf.mxu0  ;;  %6562 = vmatprep.subr.bf16.mxu1 %v15090_v6  ;;  %v15105_v61 = vld [vmem:[#allocation16 + $0xc8c] ss:$16 sps:$4 sm:$0xff]   ;;  %v15130_v7 = vld [vmem:[#allocation16 + $0xde0] ss:$16 sps:$4 sm:$0xff]   ;;  %v15139_v45 = vld [vmem:[#allocation16 + $0xdc8] ss:$16 sps:$4 sm:$0xff]  }
 0x51c   :  { %v17383_v35 = vadd.f32 %v4689_v59, %v17369_v1  ;;  %v4650_v2 = vpop.f32.mrf.mxu1  ;;  %6603 = vmatprep.subr.bf16.mxu0 %v15093_v20  ;;  %v15108_v1 = vld [vmem:[#allocation16 + $0xc64] ss:$16 sps:$4 sm:$0xff]   ;;  %v15135_v6 = vld [vmem:[#allocation16 + $0xdec] ss:$16 sps:$4 sm:$0xff]   ;;  %v15142_v59 = vld [vmem:[#allocation16 + $0xda0] ss:$16 sps:$4 sm:$0xff]  }
 0x51d   :  { %v4691_v39 = vpop.f32.mrf.mxu0  ;;  %6563 = vmatpush1.bf16.msra.mxu1 %v15088_v17  ;;  %v15138_v20 = vld [vmem:[#allocation16 + $0xdc4] ss:$16 sps:$4 sm:$0xff]   ;;  %v15141_v53 = vld [vmem:[#allocation16 + $0xdcc] ss:$16 sps:$4 sm:$0xff]   ;;  %v15136_v17 = vld [vmem:[#allocation16 + $0xdc0] ss:$16 sps:$4 sm:$0xff]  }
 0x51e   :  { %6604 = vmatpush1.bf16.msra.mxu0 %v15091_v21  ;;  %v4651_v11 = vpop.f32.mrf.mxu1  ;;  %6564 = vmatprep.subr.bf16.mxu1 %v15096_v14  ;;  %v15144_v21 = vld [vmem:[#allocation16 + $0xda4] ss:$16 sps:$4 sm:$0xff]   ;;  %v15147_v14 = vld [vmem:[#allocation16 + $0xdac] ss:$16 sps:$4 sm:$0xff]  }
 0x51f   :  { %v4692_v55 = vpop.f32.mrf.mxu0  ;;  %6605 = vmatprep.subr.bf16.mxu0 %v15099_v19  ;;  %v15145_v19 = vld [vmem:[#allocation16 + $0xda8] ss:$16 sps:$4 sm:$0xff]   ;;  %v15150_v2 = vld [vmem:[#allocation16 + $0xd84] ss:$16 sps:$4 sm:$0xff]   ;;  %v15153_v39 = vld [vmem:[#allocation16 + $0xd8c] ss:$16 sps:$4 sm:$0xff]  }
 0x520   :  { %v15151_v11 = vld [vmem:[#allocation16 + $0xd88] ss:$16 sps:$4 sm:$0xff]   ;;  %v15154_v55 = vld [vmem:[#allocation16 + $0xd60] ss:$16 sps:$4 sm:$0xff]  }
 0x521   :  { %6565 = vmatpush1.bf16.msra.mxu1 %v15094_v54  ;;  %v15148_v54 = vld [vmem:[#allocation16 + $0xd80] ss:$16 sps:$4 sm:$0xff]  }
 0x522   :  { %6606 = vmatpush1.bf16.msra.mxu0 %v15097_v22  ;;  %6566 = vmatprep.subr.bf16.mxu1 %v15102_v49  ;;  %v15156_v22 = vld [vmem:[#allocation16 + $0xd64] ss:$16 sps:$4 sm:$0xff]   ;;  %v15159_v49 = vld [vmem:[#allocation16 + $0xd6c] ss:$16 sps:$4 sm:$0xff]  }
 0x523   :  { %6607 = vmatprep.subr.bf16.mxu0 %v15105_v61  ;;  %v15157_v61 = vld [vmem:[#allocation16 + $0xd68] ss:$16 sps:$4 sm:$0xff]  }
 0x525   :  { %6567 = vmatpush1.bf16.msra.mxu1 %v15100_v24  ;;  %v15162_v24 = vld [vmem:[#allocation16 + $0xd44] ss:$16 sps:$4 sm:$0xff]  }
 0x526   :  { %6608 = vmatpush1.bf16.msra.mxu0 %v15103_v27  ;;  %6568 = vmatprep.subr.bf16.mxu1 %v15108_v1  ;;  %v15165_v27 = vld [vmem:[#allocation16 + $0xd4c] ss:$16 sps:$4 sm:$0xff]   ;;  %v15160_v1 = vld [vmem:[#allocation16 + $0xd40] ss:$16 sps:$4 sm:$0xff]  }
 0x527   :  { %6609 = vmatprep.subr.bf16.mxu0 %v15111_v33  ;;  %v15163_v33 = vld [vmem:[#allocation16 + $0xd48] ss:$16 sps:$4 sm:$0xff]  }
 0x529   :  { %6569 = vmatpush1.bf16.msra.mxu1 %v15106_v0  ;;  %v15168_v0 = vld [vmem:[#allocation16 + $0xd24] ss:$16 sps:$4 sm:$0xff]  }
 0x52a   :  { %6610 = vmatpush1.bf16.msra.mxu0 %v15109_v46  ;;  %6570 = vmatprep.subr.bf16.mxu1 %v15114_v60  ;;  %v15171_v46 = vld [vmem:[#allocation16 + $0xd2c] ss:$16 sps:$4 sm:$0xff]   ;;  %v15166_v60 = vld [vmem:[#allocation16 + $0xd20] ss:$16 sps:$4 sm:$0xff]  }
 0x52b   :  { %6611 = vmatprep.subr.bf16.mxu0 %v15117_v56  ;;  %v15169_v56 = vld [vmem:[#allocation16 + $0xd28] ss:$16 sps:$4 sm:$0xff]  }
 0x52d   :  { %6571 = vmatpush1.bf16.msra.mxu1 %v15112_v28  ;;  %v15174_v28 = vld [vmem:[#allocation16 + $0xd04] ss:$16 sps:$4 sm:$0xff]  }
 0x52e   :  { %6612 = vmatpush1.bf16.msra.mxu0 %v15115_v3  ;;  %6572 = vmatprep.subr.bf16.mxu1 %v15120_v48  ;;  %v15177_v3 = vld [vmem:[#allocation16 + $0xd0c] ss:$16 sps:$4 sm:$0xff]   ;;  %v15172_v48 = vld [vmem:[#allocation16 + $0xd00] ss:$16 sps:$4 sm:$0xff]  }
 0x52f   :  { %6613 = vmatprep.subr.bf16.mxu0 %v15123_v51  ;;  %v3118_v51 = vmax.f32 %v17252_v18, 0.0  ;;  %v15189_v18 = vld [vmem:[#allocation16 + $0xecc] ss:$16 sps:$4 sm:$0xff]  }
 0x531   :  { %6573 = vmatpush1.bf16.msra.mxu1 %v15118_v37  ;;  %v15175_v37 = vld [vmem:[#allocation16 + $0xd08] ss:$16 sps:$4 sm:$0xff]  }
 0x532   :  { %6614 = vmatpush1.bf16.msra.mxu0 %v15121_v47  ;;  %6574 = vmatprep.subr.bf16.mxu1 %v15126_v42  ;;  %v15180_v47 = vld [vmem:[#allocation16 + $0xee4] ss:$16 sps:$4 sm:$0xff]   ;;  %v15183_v42 = vld [vmem:[#allocation16 + $0xeec] ss:$16 sps:$4 sm:$0xff]  }
 0x533   :  { %6615 = vmatprep.subr.bf16.mxu0 %v15129_v30  ;;  %v3121_v30 = vmax.f32 %v17267_v40, 0.0 }
 0x535   :  { %6575 = vmatpush1.bf16.msra.mxu1 %v15124_v34  ;;  %v15178_v34 = vld [vmem:[#allocation16 + $0xee0] ss:$16 sps:$4 sm:$0xff]  }
 0x536   :  { %6616 = vmatpush1.bf16.msra.mxu0 %v15127_v63  ;;  %6576 = vmatprep.subr.bf16.mxu1 %v15132_v43  ;;  %v13993_v63 = vpack.c.bf16 %v3118_v51, %v3118_v51  ;;  %v15181_v43 = vld [vmem:[#allocation16 + $0xee8] ss:$16 sps:$4 sm:$0xff]  }
 0x537   :  { %6617 = vmatprep.subr.bf16.mxu0 %v15135_v6  ;;  %v15186_v6 = vld [vmem:[#allocation16 + $0xec4] ss:$16 sps:$4 sm:$0xff]   ;;  %v15217_v51 = vld [vmem:[#allocation16 + $0xe28] ss:$16 sps:$4 sm:$0xff]  }
 0x539   :  { %6577 = vmatpush2.bf16.msra.mxu1 %v15130_v7  ;;  %v13996_v7 = vpack.c.bf16 %v3121_v30, %v3121_v30  ;;  %v15223_v30 = vld [vmem:[#allocation16 + $0xe08] ss:$16 sps:$4 sm:$0xff]  }
 0x53a   :  { %6618 = vmatpush2.bf16.msra.mxu0 %v15133_v32  ;;  %6578 = vmatprep.subr.bf16.mxu1 %v15138_v20 }
 0x53b   :  { %6619 = vmatprep.subr.bf16.mxu0 %v15141_v53 }
 0x53d   :  { %6579 = vmatpush2.bf16.msra.mxu1 %v15136_v17  ;;  %v15184_v17 = vld [vmem:[#allocation16 + $0xec0] ss:$16 sps:$4 sm:$0xff]  }
 0x53e   :  { %6620 = vmatpush2.bf16.msra.mxu0 %v15139_v45  ;;  %6580 = vmatprep.subr.bf16.mxu1 %v15144_v21  ;;  %v15187_v21 = vld [vmem:[#allocation16 + $0xec8] ss:$16 sps:$4 sm:$0xff]  }
 0x53f   :  { %6621 = vmatprep.subr.bf16.mxu0 %v15147_v14  ;;  %v15192_v14 = vld [vmem:[#allocation16 + $0xea4] ss:$16 sps:$4 sm:$0xff]  }
 0x541   :  { %6581 = vmatpush2.bf16.msra.mxu1 %v15142_v59 }
 0x542   :  { %6622 = vmatpush2.bf16.msra.mxu0 %v15145_v19  ;;  %6582 = vmatprep.subr.bf16.mxu1 %v15150_v2 }
 0x543   :  { %6623 = vmatprep.subr.bf16.mxu0 %v15153_v39 }
 0x545   :  { %6583 = vmatpush2.bf16.msra.mxu1 %v15148_v54 }
 0x546   :  { %6624 = vmatpush2.bf16.msra.mxu0 %v15151_v11  ;;  %6584 = vmatprep.subr.bf16.mxu1 %v15156_v22  ;;  %v15193_v22 = vld [vmem:[#allocation16 + $0xea8] ss:$16 sps:$4 sm:$0xff]  }
 0x547   :  { %6625 = vmatprep.subr.bf16.mxu0 %v15159_v49  ;;  %v15198_v49 = vld [vmem:[#allocation16 + $0xe84] ss:$16 sps:$4 sm:$0xff]  }
 0x549   :  { %6585 = vmatpush2.bf16.msra.mxu1 %v15154_v55 }
 0x54a   :  { %6626 = vmatpush2.bf16.msra.mxu0 %v15157_v61  ;;  %6586 = vmatprep.subr.bf16.mxu1 %v15162_v24  ;;  %v15196_v61 = vld [vmem:[#allocation16 + $0xe80] ss:$16 sps:$4 sm:$0xff]   ;;  %v15199_v24 = vld [vmem:[#allocation16 + $0xe88] ss:$16 sps:$4 sm:$0xff]  }
 0x54b   :  { %6627 = vmatprep.subr.bf16.mxu0 %v15165_v27  ;;  %v15207_v27 = vld [vmem:[#allocation16 + $0xe6c] ss:$16 sps:$4 sm:$0xff]  }
 0x54d   :  { %6587 = vmatpush2.bf16.msra.mxu1 %v15160_v1  ;;  %v15202_v1 = vld [vmem:[#allocation16 + $0xe60] ss:$16 sps:$4 sm:$0xff]  }
 0x54e   :  { %6628 = vmatpush2.bf16.msra.mxu0 %v15163_v33  ;;  %6588 = vmatprep.subr.bf16.mxu1 %v15168_v0  ;;  %v15205_v33 = vld [vmem:[#allocation16 + $0xe68] ss:$16 sps:$4 sm:$0xff]   ;;  %v15210_v0 = vld [vmem:[#allocation16 + $0xe44] ss:$16 sps:$4 sm:$0xff]  }
 0x54f   :  { %6629 = vmatprep.subr.bf16.mxu0 %v15171_v46  ;;  %v15213_v46 = vld [vmem:[#allocation16 + $0xe4c] ss:$16 sps:$4 sm:$0xff]  }
 0x551   :  { %6589 = vmatpush2.bf16.msra.mxu1 %v15166_v60  ;;  %v15208_v60 = vld [vmem:[#allocation16 + $0xe40] ss:$16 sps:$4 sm:$0xff]  }
 0x552   :  { %6630 = vmatpush2.bf16.msra.mxu0 %v15169_v56  ;;  %6590 = vmatprep.subr.bf16.mxu1 %v15174_v28  ;;  %v15211_v56 = vld [vmem:[#allocation16 + $0xe48] ss:$16 sps:$4 sm:$0xff]   ;;  %v15216_v28 = vld [vmem:[#allocation16 + $0xe24] ss:$16 sps:$4 sm:$0xff]  }
 0x553   :  { %6631 = vmatprep.subr.bf16.mxu0 %v15177_v3  ;;  %v15219_v3 = vld [vmem:[#allocation16 + $0xe2c] ss:$16 sps:$4 sm:$0xff]  }
 0x555   :  { %6591 = vmatpush2.bf16.msra.mxu1 %v15172_v48  ;;  %v15214_v48 = vld [vmem:[#allocation16 + $0xe20] ss:$16 sps:$4 sm:$0xff]  }
 0x556   :  { %6632 = vmatpush2.bf16.msra.mxu0 %v15175_v37  ;;  %7047 = vmatprep.subr.bf16.mxu1 %v15180_v47  ;;  %v15222_v37 = vld [vmem:[#allocation16 + $0xe04] ss:$16 sps:$4 sm:$0xff]   ;;  %v15225_v47 = vld [vmem:[#allocation16 + $0xe0c] ss:$16 sps:$4 sm:$0xff]  }
 0x557   :  { %7088 = vmatprep.subr.bf16.mxu0 %v15183_v42  ;;  %v15220_v42 = vld [vmem:[#allocation16 + $0xe00] ss:$16 sps:$4 sm:$0xff]  }
 0x558   :  { %v5133_v32 = vpop.f32.mrf.mxu1  ;;  %6593 = vmatmul.mubr.bf16.vlgmr.msra.gmra.mxu1 %v13993_v63 }
 0x559   :  { %v17388_v20 = vadd.f32 %v5133_v32, %v17374_v29  ;;  %v5174_v53 = vpop.f32.mrf.mxu0  ;;  %6634 = vmatmul.mubr.bf16.vlgmr.msra.gmra.mxu0 %v13993_v63  ;;  %7048 = vmatpush1.bf16.msra.mxu1 %v15178_v34  ;;  %v15195_v29 = vld [vmem:[#allocation16 + $0xeac] ss:$16 sps:$4 sm:$0xff]   ;;  %v15228_v34 = vld [vmem:[#allocation16 + $0xfe4] ss:$16 sps:$4 sm:$0xff]  }
 0x55a   :  { %v17391_v40 = vadd.f32 %v5174_v53, %v17377_v10  ;;  %7079 = vmatprep.mubr.bf16.mxu1 %v13996_v7  ;;  %7089 = vmatpush1.bf16.msra.mxu0 %v15181_v43  ;;  %v5135_v45 = vpop.f32.mrf.mxu1  ;;  %v15190_v10 = vld [vmem:[#allocation16 + $0xea0] ss:$16 sps:$4 sm:$0xff]   ;;  %v15231_v63 = vld [vmem:[#allocation16 + $0xfec] ss:$16 sps:$4 sm:$0xff]   ;;  %v15235_v53 = vld [vmem:[#allocation16 + $0xfc8] ss:$16 sps:$4 sm:$0xff]  }
 0x55b   :  { %7120 = vmatprep.mubr.bf16.mxu0 %v13996_v7  ;;  %v17394_v59 = vadd.f32 %v5135_v45, %v17380_v9  ;;  %v5176_v19 = vpop.f32.mrf.mxu0  ;;  %7049 = vmatprep.subr.bf16.mxu1 %v15186_v6  ;;  %v15201_v9 = vld [vmem:[#allocation16 + $0xe8c] ss:$16 sps:$4 sm:$0xff]   ;;  %v15226_v43 = vld [vmem:[#allocation16 + $0xfe0] ss:$16 sps:$4 sm:$0xff]   ;;  %v15229_v6 = vld [vmem:[#allocation16 + $0xfe8] ss:$16 sps:$4 sm:$0xff]  }
 0x55c   :  { %v17397_v2 = vadd.f32 %v5176_v19, %v17383_v35  ;;  %v5137_v39 = vpop.f32.mrf.mxu1  ;;  %7090 = vmatprep.subr.bf16.mxu0 %v15189_v18  ;;  %v15204_v35 = vld [vmem:[#allocation16 + $0xe64] ss:$16 sps:$4 sm:$0xff]   ;;  %v15237_v32 = vld [vmem:[#allocation16 + $0xfcc] ss:$16 sps:$4 sm:$0xff]   ;;  %v15232_v18 = vld [vmem:[#allocation16 + $0xfc0] ss:$16 sps:$4 sm:$0xff]  }
 0x55d   :  { %v5178_v54 = vpop.f32.mrf.mxu0  ;;  %7050 = vmatpush1.bf16.msra.mxu1 %v15184_v17  ;;  %v15234_v7 = vld [vmem:[#allocation16 + $0xfc4] ss:$16 sps:$4 sm:$0xff]   ;;  %v15243_v45 = vld [vmem:[#allocation16 + $0xfac] ss:$16 sps:$4 sm:$0xff]   ;;  %v15244_v39 = vld [vmem:[#allocation16 + $0xf80] ss:$16 sps:$4 sm:$0xff]  }
 0x55e   :  { %7091 = vmatpush1.bf16.msra.mxu0 %v15187_v21  ;;  %v5138_v11 = vpop.f32.mrf.mxu1  ;;  %7051 = vmatprep.subr.bf16.mxu1 %v15192_v14  ;;  %v15240_v17 = vld [vmem:[#allocation16 + $0xfa4] ss:$16 sps:$4 sm:$0xff]   ;;  %v15238_v21 = vld [vmem:[#allocation16 + $0xfa0] ss:$16 sps:$4 sm:$0xff]   ;;  %v15241_v14 = vld [vmem:[#allocation16 + $0xfa8] ss:$16 sps:$4 sm:$0xff]  }
 0x55f   :  { %v5179_v55 = vpop.f32.mrf.mxu0  ;;  %7092 = vmatprep.subr.bf16.mxu0 %v15195_v29  ;;  %v15246_v19 = vld [vmem:[#allocation16 + $0xf84] ss:$16 sps:$4 sm:$0xff]   ;;  %v15249_v29 = vld [vmem:[#allocation16 + $0xf8c] ss:$16 sps:$4 sm:$0xff]   ;;  %v15247_v54 = vld [vmem:[#allocation16 + $0xf88] ss:$16 sps:$4 sm:$0xff]  }
 0x560   :  { %v15255_v11 = vld [vmem:[#allocation16 + $0xf6c] ss:$16 sps:$4 sm:$0xff]   ;;  %v15258_v55 = vld [vmem:[#allocation16 + $0xf44] ss:$16 sps:$4 sm:$0xff]  }
 0x561   :  { %7052 = vmatpush1.bf16.msra.mxu1 %v15190_v10  ;;  %v15252_v10 = vld [vmem:[#allocation16 + $0xf64] ss:$16 sps:$4 sm:$0xff]  }
 0x562   :  { %7093 = vmatpush1.bf16.msra.mxu0 %v15193_v22  ;;  %7053 = vmatprep.subr.bf16.mxu1 %v15198_v49  ;;  %v15250_v22 = vld [vmem:[#allocation16 + $0xf60] ss:$16 sps:$4 sm:$0xff]   ;;  %v15253_v49 = vld [vmem:[#allocation16 + $0xf68] ss:$16 sps:$4 sm:$0xff]  }
 0x563   :  { %7094 = vmatprep.subr.bf16.mxu0 %v15201_v9  ;;  %v15261_v9 = vld [vmem:[#allocation16 + $0xf4c] ss:$16 sps:$4 sm:$0xff]  }
 0x565   :  { %7054 = vmatpush1.bf16.msra.mxu1 %v15196_v61  ;;  %v15256_v61 = vld [vmem:[#allocation16 + $0xf40] ss:$16 sps:$4 sm:$0xff]  }
 0x566   :  { %7095 = vmatpush1.bf16.msra.mxu0 %v15199_v24  ;;  %7055 = vmatprep.subr.bf16.mxu1 %v15204_v35  ;;  %v15259_v24 = vld [vmem:[#allocation16 + $0xf48] ss:$16 sps:$4 sm:$0xff]   ;;  %v15264_v35 = vld [vmem:[#allocation16 + $0xf24] ss:$16 sps:$4 sm:$0xff]  }
 0x567   :  { %7096 = vmatprep.subr.bf16.mxu0 %v15207_v27  ;;  %v15267_v27 = vld [vmem:[#allocation16 + $0xf2c] ss:$16 sps:$4 sm:$0xff]  }
 0x569   :  { %7056 = vmatpush1.bf16.msra.mxu1 %v15202_v1  ;;  %v15262_v1 = vld [vmem:[#allocation16 + $0xf20] ss:$16 sps:$4 sm:$0xff]  }
 0x56a   :  { %7097 = vmatpush1.bf16.msra.mxu0 %v15205_v33  ;;  %7057 = vmatprep.subr.bf16.mxu1 %v15210_v0  ;;  %v15265_v33 = vld [vmem:[#allocation16 + $0xf28] ss:$16 sps:$4 sm:$0xff]   ;;  %v15270_v0 = vld [vmem:[#allocation16 + $0xf04] ss:$16 sps:$4 sm:$0xff]  }
 0x56b   :  { %7098 = vmatprep.subr.bf16.mxu0 %v15213_v46  ;;  %v15273_v46 = vld [vmem:[#allocation16 + $0xf0c] ss:$16 sps:$4 sm:$0xff]  }
 0x56d   :  { %7058 = vmatpush1.bf16.msra.mxu1 %v15208_v60  ;;  %v15268_v60 = vld [vmem:[#allocation16 + $0xf00] ss:$16 sps:$4 sm:$0xff]  }
 0x56e   :  { %7099 = vmatpush1.bf16.msra.mxu0 %v15211_v56  ;;  %7059 = vmatprep.subr.bf16.mxu1 %v15216_v28  ;;  %v3120_v56 = vmax.f32 %v17263_v23, 0.0  ;;  %v15271_v28 = vld [vmem:[#allocation16 + $0xf08] ss:$16 sps:$4 sm:$0xff]   ;;  %v15285_v23 = vld [vmem:[#allocation16 + $0x10cc] ss:$16 sps:$4 sm:$0xff]  }
 0x56f   :  { %7100 = vmatprep.subr.bf16.mxu0 %v15219_v3  ;;  %v15276_v3 = vld [vmem:[#allocation16 + $0x10e4] ss:$16 sps:$4 sm:$0xff]  }
 0x571   :  { %7060 = vmatpush1.bf16.msra.mxu1 %v15214_v48  ;;  %v15279_v48 = vld [vmem:[#allocation16 + $0x10ec] ss:$16 sps:$4 sm:$0xff]  }
 0x572   :  { %7101 = vmatpush1.bf16.msra.mxu0 %v15217_v51  ;;  %7061 = vmatprep.subr.bf16.mxu1 %v15222_v37  ;;  %v3123_v51 = vmax.f32 %v17275_v50, 0.0  ;;  %v15274_v37 = vld [vmem:[#allocation16 + $0x10e0] ss:$16 sps:$4 sm:$0xff]  }
 0x573   :  { %7102 = vmatprep.subr.bf16.mxu0 %v15225_v47  ;;  %v13995_v47 = vpack.c.bf16 %v3120_v56, %v3120_v56  ;;  %v15321_v56 = vld [vmem:[#allocation16 + $0x100c] ss:$16 sps:$4 sm:$0xff]  }
 0x575   :  { %7062 = vmatpush1.bf16.msra.mxu1 %v15220_v42  ;;  %v15277_v42 = vld [vmem:[#allocation16 + $0x10e8] ss:$16 sps:$4 sm:$0xff]  }
 0x576   :  { %7103 = vmatpush1.bf16.msra.mxu0 %v15223_v30  ;;  %7063 = vmatprep.subr.bf16.mxu1 %v15228_v34  ;;  %v15282_v30 = vld [vmem:[#allocation16 + $0x10c4] ss:$16 sps:$4 sm:$0xff]   ;;  %v13998_v34 = vpack.c.bf16 %v3123_v51, %v3123_v51  ;;  %v15327_v51 = vld [vmem:[#allocation16 + $0x11ec] ss:$16 sps:$4 sm:$0xff]  }
 0x577   :  { %7104 = vmatprep.subr.bf16.mxu0 %v15231_v63 }
 0x579   :  { %7064 = vmatpush2.bf16.msra.mxu1 %v15226_v43 }
 0x57a   :  { %7105 = vmatpush2.bf16.msra.mxu0 %v15229_v6  ;;  %7065 = vmatprep.subr.bf16.mxu1 %v15234_v7  ;;  %v15280_v7 = vld [vmem:[#allocation16 + $0x10c0] ss:$16 sps:$4 sm:$0xff]  }
 0x57b   :  { %7106 = vmatprep.subr.bf16.mxu0 %v15237_v32 }
 0x57d   :  { %7066 = vmatpush2.bf16.msra.mxu1 %v15232_v18  ;;  %v15283_v18 = vld [vmem:[#allocation16 + $0x10c8] ss:$16 sps:$4 sm:$0xff]  }
 0x57e   :  { %7107 = vmatpush2.bf16.msra.mxu0 %v15235_v53  ;;  %7067 = vmatprep.subr.bf16.mxu1 %v15240_v17  ;;  %v15288_v53 = vld [vmem:[#allocation16 + $0x10a4] ss:$16 sps:$4 sm:$0xff]  }
 0x57f   :  { %7108 = vmatprep.subr.bf16.mxu0 %v15243_v45 }
 0x581   :  { %7068 = vmatpush2.bf16.msra.mxu1 %v15238_v21 }
 0x582   :  { %7109 = vmatpush2.bf16.msra.mxu0 %v15241_v14  ;;  %7069 = vmatprep.subr.bf16.mxu1 %v15246_v19 }
 0x583   :  { %7110 = vmatprep.subr.bf16.mxu0 %v15249_v29 }
 0x585   :  { %7070 = vmatpush2.bf16.msra.mxu1 %v15244_v39  ;;  %v15289_v39 = vld [vmem:[#allocation16 + $0x10a8] ss:$16 sps:$4 sm:$0xff]  }
 0x586   :  { %7111 = vmatpush2.bf16.msra.mxu0 %v15247_v54  ;;  %7071 = vmatprep.subr.bf16.mxu1 %v15252_v10  ;;  %v15294_v54 = vld [vmem:[#allocation16 + $0x1084] ss:$16 sps:$4 sm:$0xff]  }
 0x587   :  { %7112 = vmatprep.subr.bf16.mxu0 %v15255_v11  ;;  %v15292_v11 = vld [vmem:[#allocation16 + $0x1080] ss:$16 sps:$4 sm:$0xff]  }
 0x589   :  { %7072 = vmatpush2.bf16.msra.mxu1 %v15250_v22  ;;  %v15295_v22 = vld [vmem:[#allocation16 + $0x1088] ss:$16 sps:$4 sm:$0xff]  }
 0x58a   :  { %7113 = vmatpush2.bf16.msra.mxu0 %v15253_v49  ;;  %7073 = vmatprep.subr.bf16.mxu1 %v15258_v55  ;;  %v15303_v49 = vld [vmem:[#allocation16 + $0x106c] ss:$16 sps:$4 sm:$0xff]   ;;  %v15298_v55 = vld [vmem:[#allocation16 + $0x1060] ss:$16 sps:$4 sm:$0xff]  }
 0x58b   :  { %7114 = vmatprep.subr.bf16.mxu0 %v15261_v9  ;;  %v15301_v9 = vld [vmem:[#allocation16 + $0x1068] ss:$16 sps:$4 sm:$0xff]  }
 0x58d   :  { %7074 = vmatpush2.bf16.msra.mxu1 %v15256_v61  ;;  %v15306_v61 = vld [vmem:[#allocation16 + $0x1044] ss:$16 sps:$4 sm:$0xff]  }
 0x58e   :  { %7115 = vmatpush2.bf16.msra.mxu0 %v15259_v24  ;;  %7075 = vmatprep.subr.bf16.mxu1 %v15264_v35  ;;  %v15309_v24 = vld [vmem:[#allocation16 + $0x104c] ss:$16 sps:$4 sm:$0xff]   ;;  %v15304_v35 = vld [vmem:[#allocation16 + $0x1040] ss:$16 sps:$4 sm:$0xff]  }
 0x58f   :  { %7116 = vmatprep.subr.bf16.mxu0 %v15267_v27  ;;  %v15307_v27 = vld [vmem:[#allocation16 + $0x1048] ss:$16 sps:$4 sm:$0xff]  }
 0x591   :  { %7076 = vmatpush2.bf16.msra.mxu1 %v15262_v1  ;;  %v15312_v1 = vld [vmem:[#allocation16 + $0x1024] ss:$16 sps:$4 sm:$0xff]  }
 0x592   :  { %7117 = vmatpush2.bf16.msra.mxu0 %v15265_v33  ;;  %7077 = vmatprep.subr.bf16.mxu1 %v15270_v0  ;;  %v15315_v33 = vld [vmem:[#allocation16 + $0x102c] ss:$16 sps:$4 sm:$0xff]   ;;  %v15310_v0 = vld [vmem:[#allocation16 + $0x1020] ss:$16 sps:$4 sm:$0xff]  }
 0x593   :  { %7118 = vmatprep.subr.bf16.mxu0 %v15273_v46  ;;  %v15313_v46 = vld [vmem:[#allocation16 + $0x1028] ss:$16 sps:$4 sm:$0xff]  }
 0x595   :  { %7078 = vmatpush2.bf16.msra.mxu1 %v15268_v60  ;;  %v15318_v60 = vld [vmem:[#allocation16 + $0x1004] ss:$16 sps:$4 sm:$0xff]  }
 0x596   :  { %7119 = vmatpush2.bf16.msra.mxu0 %v15271_v28  ;;  %7534 = vmatprep.subr.bf16.mxu1 %v15276_v3  ;;  %v15316_v28 = vld [vmem:[#allocation16 + $0x1000] ss:$16 sps:$4 sm:$0xff]   ;;  %v15319_v3 = vld [vmem:[#allocation16 + $0x1008] ss:$16 sps:$4 sm:$0xff]  }
 0x597   :  { %7575 = vmatprep.subr.bf16.mxu0 %v15279_v48  ;;  %v15324_v48 = vld [vmem:[#allocation16 + $0x11e4] ss:$16 sps:$4 sm:$0xff]  }
 0x598   :  { %v5620_v63 = vpop.f32.mrf.mxu1  ;;  %7080 = vmatmul.mubr.bf16.vlgmr.msra.gmra.mxu1 %v13995_v47 }
 0x599   :  { %v17402_v43 = vadd.f32 %v5620_v63, %v17388_v20  ;;  %v5661_v6 = vpop.f32.mrf.mxu0  ;;  %7121 = vmatmul.mubr.bf16.vlgmr.msra.gmra.mxu0 %v13995_v47  ;;  %7535 = vmatpush1.bf16.msra.mxu1 %v15274_v37  ;;  %v15291_v20 = vld [vmem:[#allocation16 + $0x10ac] ss:$16 sps:$4 sm:$0xff]   ;;  %v15322_v37 = vld [vmem:[#allocation16 + $0x11e0] ss:$16 sps:$4 sm:$0xff]   ;;  %v15325_v47 = vld [vmem:[#allocation16 + $0x11e8] ss:$16 sps:$4 sm:$0xff]  }
 0x59a   :  { %v17405_v50 = vadd.f32 %v5661_v6, %v17391_v40  ;;  %7566 = vmatprep.mubr.bf16.mxu1 %v13998_v34  ;;  %7576 = vmatpush1.bf16.msra.mxu0 %v15277_v42  ;;  %v5622_v32 = vpop.f32.mrf.mxu1  ;;  %v15286_v40 = vld [vmem:[#allocation16 + $0x10a0] ss:$16 sps:$4 sm:$0xff]   ;;  %v15330_v42 = vld [vmem:[#allocation16 + $0x11c4] ss:$16 sps:$4 sm:$0xff]   ;;  %v15331_v63 = vld [vmem:[#allocation16 + $0x11c8] ss:$16 sps:$4 sm:$0xff]  }
 0x59b   :  { %7607 = vmatprep.mubr.bf16.mxu0 %v13998_v34  ;;  %v17408_v17 = vadd.f32 %v5622_v32, %v17394_v59  ;;  %v5663_v45 = vpop.f32.mrf.mxu0  ;;  %7536 = vmatprep.subr.bf16.mxu1 %v15282_v30  ;;  %v15297_v59 = vld [vmem:[#allocation16 + $0x108c] ss:$16 sps:$4 sm:$0xff]   ;;  %v15328_v34 = vld [vmem:[#allocation16 + $0x11c0] ss:$16 sps:$4 sm:$0xff]   ;;  %v15337_v32 = vld [vmem:[#allocation16 + $0x11a8] ss:$16 sps:$4 sm:$0xff]  }
 0x59c   :  { %v17411_v21 = vadd.f32 %v5663_v45, %v17397_v2  ;;  %v5624_v14 = vpop.f32.mrf.mxu1  ;;  %7577 = vmatprep.subr.bf16.mxu0 %v15285_v23  ;;  %v15300_v2 = vld [vmem:[#allocation16 + $0x1064] ss:$16 sps:$4 sm:$0xff]   ;;  %v15333_v30 = vld [vmem:[#allocation16 + $0x11cc] ss:$16 sps:$4 sm:$0xff]   ;;  %v15340_v45 = vld [vmem:[#allocation16 + $0x1180] ss:$16 sps:$4 sm:$0xff]  }
 0x59d   :  { %v5665_v19 = vpop.f32.mrf.mxu0  ;;  %7537 = vmatpush1.bf16.msra.mxu1 %v15280_v7  ;;  %v15336_v23 = vld [vmem:[#allocation16 + $0x11a4] ss:$16 sps:$4 sm:$0xff]   ;;  %v15339_v6 = vld [vmem:[#allocation16 + $0x11ac] ss:$16 sps:$4 sm:$0xff]   ;;  %v15334_v7 = vld [vmem:[#allocation16 + $0x11a0] ss:$16 sps:$4 sm:$0xff]  }
 0x59e   :  { %7578 = vmatpush1.bf16.msra.mxu0 %v15283_v18  ;;  %v5625_v29 = vpop.f32.mrf.mxu1  ;;  %7538 = vmatprep.subr.bf16.mxu1 %v15288_v53  ;;  %v15342_v18 = vld [vmem:[#allocation16 + $0x1184] ss:$16 sps:$4 sm:$0xff]   ;;  %v15345_v53 = vld [vmem:[#allocation16 + $0x118c] ss:$16 sps:$4 sm:$0xff]  }
 0x59f   :  { %v5666_v10 = vpop.f32.mrf.mxu0  ;;  %7579 = vmatprep.subr.bf16.mxu0 %v15291_v20  ;;  %v15343_v20 = vld [vmem:[#allocation16 + $0x1188] ss:$16 sps:$4 sm:$0xff]   ;;  %v15348_v14 = vld [vmem:[#allocation16 + $0x1164] ss:$16 sps:$4 sm:$0xff]   ;;  %v15351_v19 = vld [vmem:[#allocation16 + $0x116c] ss:$16 sps:$4 sm:$0xff]  }
 0x5a0   :  { %v15349_v29 = vld [vmem:[#allocation16 + $0x1168] ss:$16 sps:$4 sm:$0xff]   ;;  %v15352_v10 = vld [vmem:[#allocation16 + $0x1140] ss:$16 sps:$4 sm:$0xff]  }
 0x5a1   :  { %7539 = vmatpush1.bf16.msra.mxu1 %v15286_v40  ;;  %v15346_v40 = vld [vmem:[#allocation16 + $0x1160] ss:$16 sps:$4 sm:$0xff]  }
 0x5a2   :  { %7580 = vmatpush1.bf16.msra.mxu0 %v15289_v39  ;;  %7540 = vmatprep.subr.bf16.mxu1 %v15294_v54  ;;  %v15354_v39 = vld [vmem:[#allocation16 + $0x1144] ss:$16 sps:$4 sm:$0xff]   ;;  %v15357_v54 = vld [vmem:[#allocation16 + $0x114c] ss:$16 sps:$4 sm:$0xff]  }
 0x5a3   :  { %7581 = vmatprep.subr.bf16.mxu0 %v15297_v59  ;;  %v15355_v59 = vld [vmem:[#allocation16 + $0x1148] ss:$16 sps:$4 sm:$0xff]  }
 0x5a5   :  { %7541 = vmatpush1.bf16.msra.mxu1 %v15292_v11  ;;  %v15360_v11 = vld [vmem:[#allocation16 + $0x1124] ss:$16 sps:$4 sm:$0xff]  }
 0x5a6   :  { %7582 = vmatpush1.bf16.msra.mxu0 %v15295_v22  ;;  %7542 = vmatprep.subr.bf16.mxu1 %v15300_v2  ;;  %v15363_v22 = vld [vmem:[#allocation16 + $0x112c] ss:$16 sps:$4 sm:$0xff]   ;;  %v15358_v2 = vld [vmem:[#allocation16 + $0x1120] ss:$16 sps:$4 sm:$0xff]  }
 0x5a7   :  { %7583 = vmatprep.subr.bf16.mxu0 %v15303_v49  ;;  %v15361_v49 = vld [vmem:[#allocation16 + $0x1128] ss:$16 sps:$4 sm:$0xff]  }
 0x5a9   :  { %7543 = vmatpush1.bf16.msra.mxu1 %v15298_v55  ;;  %v15366_v55 = vld [vmem:[#allocation16 + $0x1104] ss:$16 sps:$4 sm:$0xff]  }
 0x5aa   :  { %7584 = vmatpush1.bf16.msra.mxu0 %v15301_v9  ;;  %7544 = vmatprep.subr.bf16.mxu1 %v15306_v61  ;;  %v15369_v9 = vld [vmem:[#allocation16 + $0x110c] ss:$16 sps:$4 sm:$0xff]   ;;  %v15364_v61 = vld [vmem:[#allocation16 + $0x1100] ss:$16 sps:$4 sm:$0xff]  }
 0x5ab   :  { %7585 = vmatprep.subr.bf16.mxu0 %v15309_v24  ;;  %v3122_v24 = vmax.f32 %v17271_v15, 0.0  ;;  %v15381_v15 = vld [vmem:[#allocation16 + $0x12cc] ss:$16 sps:$4 sm:$0xff]  }
 0x5ad   :  { %7545 = vmatpush1.bf16.msra.mxu1 %v15304_v35  ;;  %v15367_v35 = vld [vmem:[#allocation16 + $0x1108] ss:$16 sps:$4 sm:$0xff]  }
 0x5ae   :  { %7586 = vmatpush1.bf16.msra.mxu0 %v15307_v27  ;;  %7546 = vmatprep.subr.bf16.mxu1 %v15312_v1  ;;  %v15372_v27 = vld [vmem:[#allocation16 + $0x12e4] ss:$16 sps:$4 sm:$0xff]   ;;  %v15375_v1 = vld [vmem:[#allocation16 + $0x12ec] ss:$16 sps:$4 sm:$0xff]  }
 0x5af   :  { %7587 = vmatprep.subr.bf16.mxu0 %v15315_v33  ;;  %v3125_v33 = vmax.f32 %v17286_v25, 0.0 }
 0x5b1   :  { %7547 = vmatpush1.bf16.msra.mxu1 %v15310_v0  ;;  %v15370_v0 = vld [vmem:[#allocation16 + $0x12e0] ss:$16 sps:$4 sm:$0xff]  }
 0x5b2   :  { %7588 = vmatpush1.bf16.msra.mxu0 %v15313_v46  ;;  %7548 = vmatprep.subr.bf16.mxu1 %v15318_v60  ;;  %v13997_v46 = vpack.c.bf16 %v3122_v24, %v3122_v24  ;;  %v15373_v60 = vld [vmem:[#allocation16 + $0x12e8] ss:$16 sps:$4 sm:$0xff]  }
 0x5b3   :  { %7589 = vmatprep.subr.bf16.mxu0 %v15321_v56  ;;  %v15378_v56 = vld [vmem:[#allocation16 + $0x12c4] ss:$16 sps:$4 sm:$0xff]   ;;  %v15415_v24 = vld [vmem:[#allocation16 + $0x1208] ss:$16 sps:$4 sm:$0xff]  }
 0x5b5   :  { %7549 = vmatpush1.bf16.msra.mxu1 %v15316_v28  ;;  %v14000_v28 = vpack.c.bf16 %v3125_v33, %v3125_v33  ;;  %v15421_v33 = vld [vmem:[#allocation16 + $0x13e8] ss:$16 sps:$4 sm:$0xff]  }
 0x5b6   :  { %7590 = vmatpush1.bf16.msra.mxu0 %v15319_v3  ;;  %7550 = vmatprep.subr.bf16.mxu1 %v15324_v48 }
 0x5b7   :  { %7591 = vmatprep.subr.bf16.mxu0 %v15327_v51 }
 0x5b9   :  { %7551 = vmatpush2.bf16.msra.mxu1 %v15322_v37  ;;  %v15376_v37 = vld [vmem:[#allocation16 + $0x12c0] ss:$16 sps:$4 sm:$0xff]  }
 0x5ba   :  { %7592 = vmatpush2.bf16.msra.mxu0 %v15325_v47  ;;  %7552 = vmatprep.subr.bf16.mxu1 %v15330_v42  ;;  %v15379_v42 = vld [vmem:[#allocation16 + $0x12c8] ss:$16 sps:$4 sm:$0xff]  }
 0x5bb   :  { %7593 = vmatprep.subr.bf16.mxu0 %v15333_v30  ;;  %v15384_v30 = vld [vmem:[#allocation16 + $0x12a4] ss:$16 sps:$4 sm:$0xff]  }
 0x5bd   :  { %7553 = vmatpush2.bf16.msra.mxu1 %v15328_v34 }
 0x5be   :  { %7594 = vmatpush2.bf16.msra.mxu0 %v15331_v63  ;;  %7554 = vmatprep.subr.bf16.mxu1 %v15336_v23 }
 0x5bf   :  { %7595 = vmatprep.subr.bf16.mxu0 %v15339_v6 }
 0x5c1   :  { %7555 = vmatpush2.bf16.msra.mxu1 %v15334_v7 }
 0x5c2   :  { %7596 = vmatpush2.bf16.msra.mxu0 %v15337_v32  ;;  %7556 = vmatprep.subr.bf16.mxu1 %v15342_v18  ;;  %v15385_v18 = vld [vmem:[#allocation16 + $0x12a8] ss:$16 sps:$4 sm:$0xff]  }
 0x5c3   :  { %7597 = vmatprep.subr.bf16.mxu0 %v15345_v53  ;;  %v15390_v53 = vld [vmem:[#allocation16 + $0x1284] ss:$16 sps:$4 sm:$0xff]  }
 0x5c5   :  { %7557 = vmatpush2.bf16.msra.mxu1 %v15340_v45 }
 0x5c6   :  { %7598 = vmatpush2.bf16.msra.mxu0 %v15343_v20  ;;  %7558 = vmatprep.subr.bf16.mxu1 %v15348_v14  ;;  %v15388_v20 = vld [vmem:[#allocation16 + $0x1280] ss:$16 sps:$4 sm:$0xff]   ;;  %v15391_v14 = vld [vmem:[#allocation16 + $0x1288] ss:$16 sps:$4 sm:$0xff]  }
 0x5c7   :  { %7599 = vmatprep.subr.bf16.mxu0 %v15351_v19  ;;  %v15399_v19 = vld [vmem:[#allocation16 + $0x126c] ss:$16 sps:$4 sm:$0xff]  }
 0x5c9   :  { %7559 = vmatpush2.bf16.msra.mxu1 %v15346_v40  ;;  %v15394_v40 = vld [vmem:[#allocation16 + $0x1260] ss:$16 sps:$4 sm:$0xff]  }
 0x5ca   :  { %7600 = vmatpush2.bf16.msra.mxu0 %v15349_v29  ;;  %7560 = vmatprep.subr.bf16.mxu1 %v15354_v39  ;;  %v15397_v29 = vld [vmem:[#allocation16 + $0x1268] ss:$16 sps:$4 sm:$0xff]   ;;  %v15402_v39 = vld [vmem:[#allocation16 + $0x1244] ss:$16 sps:$4 sm:$0xff]  }
 0x5cb   :  { %7601 = vmatprep.subr.bf16.mxu0 %v15357_v54  ;;  %v15405_v54 = vld [vmem:[#allocation16 + $0x124c] ss:$16 sps:$4 sm:$0xff]  }
 0x5cd   :  { %7561 = vmatpush2.bf16.msra.mxu1 %v15352_v10  ;;  %v15400_v10 = vld [vmem:[#allocation16 + $0x1240] ss:$16 sps:$4 sm:$0xff]  }
 0x5ce   :  { %7602 = vmatpush2.bf16.msra.mxu0 %v15355_v59  ;;  %7562 = vmatprep.subr.bf16.mxu1 %v15360_v11  ;;  %v15403_v59 = vld [vmem:[#allocation16 + $0x1248] ss:$16 sps:$4 sm:$0xff]   ;;  %v15408_v11 = vld [vmem:[#allocation16 + $0x1224] ss:$16 sps:$4 sm:$0xff]  }
 0x5cf   :  { %7603 = vmatprep.subr.bf16.mxu0 %v15363_v22  ;;  %v15411_v22 = vld [vmem:[#allocation16 + $0x122c] ss:$16 sps:$4 sm:$0xff]  }
 0x5d1   :  { %7563 = vmatpush2.bf16.msra.mxu1 %v15358_v2  ;;  %v15406_v2 = vld [vmem:[#allocation16 + $0x1220] ss:$16 sps:$4 sm:$0xff]  }
 0x5d2   :  { %7604 = vmatpush2.bf16.msra.mxu0 %v15361_v49  ;;  %7564 = vmatprep.subr.bf16.mxu1 %v15366_v55  ;;  %v15409_v49 = vld [vmem:[#allocation16 + $0x1228] ss:$16 sps:$4 sm:$0xff]   ;;  %v15414_v55 = vld [vmem:[#allocation16 + $0x1204] ss:$16 sps:$4 sm:$0xff]  }
 0x5d3   :  { %7605 = vmatprep.subr.bf16.mxu0 %v15369_v9  ;;  %v15417_v9 = vld [vmem:[#allocation16 + $0x120c] ss:$16 sps:$4 sm:$0xff]  }
 0x5d5   :  { %7565 = vmatpush2.bf16.msra.mxu1 %v15364_v61  ;;  %v15412_v61 = vld [vmem:[#allocation16 + $0x1200] ss:$16 sps:$4 sm:$0xff]  }
 0x5d6   :  { %7606 = vmatpush2.bf16.msra.mxu0 %v15367_v35  ;;  %8021 = vmatprep.subr.bf16.mxu1 %v15372_v27  ;;  %v15420_v35 = vld [vmem:[#allocation16 + $0x13e4] ss:$16 sps:$4 sm:$0xff]   ;;  %v15423_v27 = vld [vmem:[#allocation16 + $0x13ec] ss:$16 sps:$4 sm:$0xff]  }
 0x5d7   :  { %8062 = vmatprep.subr.bf16.mxu0 %v15375_v1  ;;  %v15418_v1 = vld [vmem:[#allocation16 + $0x13e0] ss:$16 sps:$4 sm:$0xff]  }
 0x5d8   :  { %v6107_v3 = vpop.f32.mrf.mxu1  ;;  %7567 = vmatmul.mubr.bf16.vlgmr.msra.gmra.mxu1 %v13997_v46 }
 0x5d9   :  { %v17416_v48 = vadd.f32 %v6107_v3, %v17402_v43  ;;  %v6148_v51 = vpop.f32.mrf.mxu0  ;;  %7608 = vmatmul.mubr.bf16.vlgmr.msra.gmra.mxu0 %v13997_v46  ;;  %8022 = vmatpush1.bf16.msra.mxu1 %v15370_v0  ;;  %v15387_v43 = vld [vmem:[#allocation16 + $0x12ac] ss:$16 sps:$4 sm:$0xff]   ;;  %v15426_v0 = vld [vmem:[#allocation16 + $0x13c4] ss:$16 sps:$4 sm:$0xff]  }
 0x5da   :  { %v17419_v25 = vadd.f32 %v6148_v51, %v17405_v50  ;;  %8053 = vmatprep.mubr.bf16.mxu1 %v14000_v28  ;;  %8063 = vmatpush1.bf16.msra.mxu0 %v15373_v60  ;;  %v6109_v47 = vpop.f32.mrf.mxu1  ;;  %v15382_v50 = vld [vmem:[#allocation16 + $0x12a0] ss:$16 sps:$4 sm:$0xff]   ;;  %v15429_v46 = vld [vmem:[#allocation16 + $0x13cc] ss:$16 sps:$4 sm:$0xff]   ;;  %v15433_v51 = vld [vmem:[#allocation16 + $0x13a8] ss:$16 sps:$4 sm:$0xff]  }
 0x5db   :  { %8094 = vmatprep.mubr.bf16.mxu0 %v14000_v28  ;;  %v17422_v34 = vadd.f32 %v6109_v47, %v17408_v17  ;;  %v6150_v63 = vpop.f32.mrf.mxu0  ;;  %8023 = vmatprep.subr.bf16.mxu1 %v15378_v56  ;;  %v15393_v17 = vld [vmem:[#allocation16 + $0x128c] ss:$16 sps:$4 sm:$0xff]   ;;  %v15424_v60 = vld [vmem:[#allocation16 + $0x13c0] ss:$16 sps:$4 sm:$0xff]   ;;  %v15427_v56 = vld [vmem:[#allocation16 + $0x13c8] ss:$16 sps:$4 sm:$0xff]  }
 0x5dc   :  { %v17425_v23 = vadd.f32 %v6150_v63, %v17411_v21  ;;  %v6111_v6 = vpop.f32.mrf.mxu1  ;;  %8064 = vmatprep.subr.bf16.mxu0 %v15381_v15  ;;  %v15396_v21 = vld [vmem:[#allocation16 + $0x1264] ss:$16 sps:$4 sm:$0xff]   ;;  %v15435_v3 = vld [vmem:[#allocation16 + $0x13ac] ss:$16 sps:$4 sm:$0xff]   ;;  %v15430_v15 = vld [vmem:[#allocation16 + $0x13a0] ss:$16 sps:$4 sm:$0xff]  }
 0x5dd   :  { %v6152_v7 = vpop.f32.mrf.mxu0  ;;  %8024 = vmatpush1.bf16.msra.mxu1 %v15376_v37  ;;  %v15432_v28 = vld [vmem:[#allocation16 + $0x13a4] ss:$16 sps:$4 sm:$0xff]   ;;  %v15441_v47 = vld [vmem:[#allocation16 + $0x138c] ss:$16 sps:$4 sm:$0xff]   ;;  %v15442_v6 = vld [vmem:[#allocation16 + $0x1360] ss:$16 sps:$4 sm:$0xff]  }
 0x5de   :  { %8065 = vmatpush1.bf16.msra.mxu0 %v15379_v42  ;;  %v6112_v32 = vpop.f32.mrf.mxu1  ;;  %8025 = vmatprep.subr.bf16.mxu1 %v15384_v30  ;;  %v15438_v37 = vld [vmem:[#allocation16 + $0x1384] ss:$16 sps:$4 sm:$0xff]   ;;  %v15436_v42 = vld [vmem:[#allocation16 + $0x1380] ss:$16 sps:$4 sm:$0xff]   ;;  %v15439_v30 = vld [vmem:[#allocation16 + $0x1388] ss:$16 sps:$4 sm:$0xff]  }
 0x5df   :  { %v6153_v45 = vpop.f32.mrf.mxu0  ;;  %8066 = vmatprep.subr.bf16.mxu0 %v15387_v43  ;;  %v15444_v63 = vld [vmem:[#allocation16 + $0x1364] ss:$16 sps:$4 sm:$0xff]   ;;  %v15447_v43 = vld [vmem:[#allocation16 + $0x136c] ss:$16 sps:$4 sm:$0xff]   ;;  %v15445_v7 = vld [vmem:[#allocation16 + $0x1368] ss:$16 sps:$4 sm:$0xff]  }
 0x5e0   :  { %v15453_v32 = vld [vmem:[#allocation16 + $0x134c] ss:$16 sps:$4 sm:$0xff]   ;;  %v15456_v45 = vld [vmem:[#allocation16 + $0x1324] ss:$16 sps:$4 sm:$0xff]  }
 0x5e1   :  { %8026 = vmatpush1.bf16.msra.mxu1 %v15382_v50  ;;  %v15450_v50 = vld [vmem:[#allocation16 + $0x1344] ss:$16 sps:$4 sm:$0xff]  }
 0x5e2   :  { %8067 = vmatpush1.bf16.msra.mxu0 %v15385_v18  ;;  %8027 = vmatprep.subr.bf16.mxu1 %v15390_v53  ;;  %v15448_v18 = vld [vmem:[#allocation16 + $0x1340] ss:$16 sps:$4 sm:$0xff]   ;;  %v15451_v53 = vld [vmem:[#allocation16 + $0x1348] ss:$16 sps:$4 sm:$0xff]  }
 0x5e3   :  { %8068 = vmatprep.subr.bf16.mxu0 %v15393_v17  ;;  %v15459_v17 = vld [vmem:[#allocation16 + $0x132c] ss:$16 sps:$4 sm:$0xff]  }
 0x5e5   :  { %8028 = vmatpush1.bf16.msra.mxu1 %v15388_v20  ;;  %v15454_v20 = vld [vmem:[#allocation16 + $0x1320] ss:$16 sps:$4 sm:$0xff]  }
 0x5e6   :  { %8069 = vmatpush1.bf16.msra.mxu0 %v15391_v14  ;;  %8029 = vmatprep.subr.bf16.mxu1 %v15396_v21  ;;  %v15457_v14 = vld [vmem:[#allocation16 + $0x1328] ss:$16 sps:$4 sm:$0xff]   ;;  %v15462_v21 = vld [vmem:[#allocation16 + $0x1304] ss:$16 sps:$4 sm:$0xff]  }
 0x5e7   :  { %8070 = vmatprep.subr.bf16.mxu0 %v15399_v19  ;;  %v15465_v19 = vld [vmem:[#allocation16 + $0x130c] ss:$16 sps:$4 sm:$0xff]  }
 0x5e9   :  { %8030 = vmatpush1.bf16.msra.mxu1 %v15394_v40  ;;  %v15460_v40 = vld [vmem:[#allocation16 + $0x1300] ss:$16 sps:$4 sm:$0xff]  }
 0x5ea   :  { %8071 = vmatpush1.bf16.msra.mxu0 %v15397_v29  ;;  %8031 = vmatprep.subr.bf16.mxu1 %v15402_v39  ;;  %v3124_v29 = vmax.f32 %v17282_v44, 0.0  ;;  %v15463_v39 = vld [vmem:[#allocation16 + $0x1308] ss:$16 sps:$4 sm:$0xff]   ;;  %v15477_v44 = vld [vmem:[#allocation16 + $0x14cc] ss:$16 sps:$4 sm:$0xff]  }
 0x5eb   :  { %8072 = vmatprep.subr.bf16.mxu0 %v15405_v54  ;;  %v15468_v54 = vld [vmem:[#allocation16 + $0x14e4] ss:$16 sps:$4 sm:$0xff]  }
 0x5ed   :  { %8032 = vmatpush1.bf16.msra.mxu1 %v15400_v10  ;;  %v15471_v10 = vld [vmem:[#allocation16 + $0x14ec] ss:$16 sps:$4 sm:$0xff]  }
 0x5ee   :  { %8073 = vmatpush1.bf16.msra.mxu0 %v15403_v59  ;;  %8033 = vmatprep.subr.bf16.mxu1 %v15408_v11  ;;  %v3127_v59 = vmax.f32 %v17294_v36, 0.0  ;;  %v15466_v11 = vld [vmem:[#allocation16 + $0x14e0] ss:$16 sps:$4 sm:$0xff]  }
 0x5ef   :  { %8074 = vmatprep.subr.bf16.mxu0 %v15411_v22  ;;  %v13999_v22 = vpack.c.bf16 %v3124_v29, %v3124_v29  ;;  %v15519_v29 = vld [vmem:[#allocation16 + $0x15ec] ss:$16 sps:$4 sm:$0xff]  }
 0x5f1   :  { %8034 = vmatpush1.bf16.msra.mxu1 %v15406_v2  ;;  %v15469_v2 = vld [vmem:[#allocation16 + $0x14e8] ss:$16 sps:$4 sm:$0xff]  }
 0x5f2   :  { %8075 = vmatpush1.bf16.msra.mxu0 %v15409_v49  ;;  %8035 = vmatprep.subr.bf16.mxu1 %v15414_v55  ;;  %v15474_v49 = vld [vmem:[#allocation16 + $0x14c4] ss:$16 sps:$4 sm:$0xff]   ;;  %v14002_v55 = vpack.c.bf16 %v3127_v59, %v3127_v59  ;;  %v15525_v59 = vld [vmem:[#allocation16 + $0x15cc] ss:$16 sps:$4 sm:$0xff]  }
 0x5f3   :  { %8076 = vmatprep.subr.bf16.mxu0 %v15417_v9 }
 0x5f5   :  { %8036 = vmatpush1.bf16.msra.mxu1 %v15412_v61 }
 0x5f6   :  { %8077 = vmatpush1.bf16.msra.mxu0 %v15415_v24  ;;  %8037 = vmatprep.subr.bf16.mxu1 %v15420_v35  ;;  %v15472_v35 = vld [vmem:[#allocation16 + $0x14c0] ss:$16 sps:$4 sm:$0xff]  }
 0x5f7   :  { %8078 = vmatprep.subr.bf16.mxu0 %v15423_v27 }
 0x5f9   :  { %8038 = vmatpush2.bf16.msra.mxu1 %v15418_v1  ;;  %v15475_v1 = vld [vmem:[#allocation16 + $0x14c8] ss:$16 sps:$4 sm:$0xff]  }
 0x5fa   :  { %8079 = vmatpush2.bf16.msra.mxu0 %v15421_v33  ;;  %8039 = vmatprep.subr.bf16.mxu1 %v15426_v0  ;;  %v15480_v33 = vld [vmem:[#allocation16 + $0x14a4] ss:$16 sps:$4 sm:$0xff]  }
 0x5fb   :  { %8080 = vmatprep.subr.bf16.mxu0 %v15429_v46 }
 0x5fd   :  { %8040 = vmatpush2.bf16.msra.mxu1 %v15424_v60 }
 0x5fe   :  { %8081 = vmatpush2.bf16.msra.mxu0 %v15427_v56  ;;  %8041 = vmatprep.subr.bf16.mxu1 %v15432_v28 }
 0x5ff   :  { %8082 = vmatprep.subr.bf16.mxu0 %v15435_v3 }
 0x601   :  { %8042 = vmatpush2.bf16.msra.mxu1 %v15430_v15  ;;  %v15481_v15 = vld [vmem:[#allocation16 + $0x14a8] ss:$16 sps:$4 sm:$0xff]  }
 0x602   :  { %8083 = vmatpush2.bf16.msra.mxu0 %v15433_v51  ;;  %8043 = vmatprep.subr.bf16.mxu1 %v15438_v37  ;;  %v15486_v51 = vld [vmem:[#allocation16 + $0x1484] ss:$16 sps:$4 sm:$0xff]  }
 0x603   :  { %8084 = vmatprep.subr.bf16.mxu0 %v15441_v47  ;;  %v15484_v47 = vld [vmem:[#allocation16 + $0x1480] ss:$16 sps:$4 sm:$0xff]  }
 0x605   :  { %8044 = vmatpush2.bf16.msra.mxu1 %v15436_v42  ;;  %v15487_v42 = vld [vmem:[#allocation16 + $0x1488] ss:$16 sps:$4 sm:$0xff]  }
 0x606   :  { %8085 = vmatpush2.bf16.msra.mxu0 %v15439_v30  ;;  %8045 = vmatprep.subr.bf16.mxu1 %v15444_v63  ;;  %v15495_v30 = vld [vmem:[#allocation16 + $0x146c] ss:$16 sps:$4 sm:$0xff]   ;;  %v15490_v63 = vld [vmem:[#allocation16 + $0x1460] ss:$16 sps:$4 sm:$0xff]  }
 0x607   :  { %8086 = vmatprep.subr.bf16.mxu0 %v15447_v43  ;;  %v15493_v43 = vld [vmem:[#allocation16 + $0x1468] ss:$16 sps:$4 sm:$0xff]  }
 0x609   :  { %8046 = vmatpush2.bf16.msra.mxu1 %v15442_v6  ;;  %v15498_v6 = vld [vmem:[#allocation16 + $0x1444] ss:$16 sps:$4 sm:$0xff]  }
 0x60a   :  { %8087 = vmatpush2.bf16.msra.mxu0 %v15445_v7  ;;  %8047 = vmatprep.subr.bf16.mxu1 %v15450_v50  ;;  %v15501_v7 = vld [vmem:[#allocation16 + $0x144c] ss:$16 sps:$4 sm:$0xff]   ;;  %v15496_v50 = vld [vmem:[#allocation16 + $0x1440] ss:$16 sps:$4 sm:$0xff]  }
 0x60b   :  { %8088 = vmatprep.subr.bf16.mxu0 %v15453_v32  ;;  %v15499_v32 = vld [vmem:[#allocation16 + $0x1448] ss:$16 sps:$4 sm:$0xff]  }
 0x60d   :  { %8048 = vmatpush2.bf16.msra.mxu1 %v15448_v18  ;;  %v15504_v18 = vld [vmem:[#allocation16 + $0x1424] ss:$16 sps:$4 sm:$0xff]  }
 0x60e   :  { %8089 = vmatpush2.bf16.msra.mxu0 %v15451_v53  ;;  %8049 = vmatprep.subr.bf16.mxu1 %v15456_v45  ;;  %v15507_v53 = vld [vmem:[#allocation16 + $0x142c] ss:$16 sps:$4 sm:$0xff]   ;;  %v15502_v45 = vld [vmem:[#allocation16 + $0x1420] ss:$16 sps:$4 sm:$0xff]  }
 0x60f   :  { %8090 = vmatprep.subr.bf16.mxu0 %v15459_v17  ;;  %v15505_v17 = vld [vmem:[#allocation16 + $0x1428] ss:$16 sps:$4 sm:$0xff]  }
 0x611   :  { %8050 = vmatpush2.bf16.msra.mxu1 %v15454_v20  ;;  %v15510_v20 = vld [vmem:[#allocation16 + $0x1404] ss:$16 sps:$4 sm:$0xff]  }
 0x612   :  { %8091 = vmatpush2.bf16.msra.mxu0 %v15457_v14  ;;  %8051 = vmatprep.subr.bf16.mxu1 %v15462_v21  ;;  %v15513_v14 = vld [vmem:[#allocation16 + $0x140c] ss:$16 sps:$4 sm:$0xff]   ;;  %v15508_v21 = vld [vmem:[#allocation16 + $0x1400] ss:$16 sps:$4 sm:$0xff]  }
 0x613   :  { %8092 = vmatprep.subr.bf16.mxu0 %v15465_v19  ;;  %v15511_v19 = vld [vmem:[#allocation16 + $0x1408] ss:$16 sps:$4 sm:$0xff]  }
 0x615   :  { %8052 = vmatpush2.bf16.msra.mxu1 %v15460_v40  ;;  %v15516_v40 = vld [vmem:[#allocation16 + $0x15e4] ss:$16 sps:$4 sm:$0xff]  }
 0x616   :  { %8093 = vmatpush2.bf16.msra.mxu0 %v15463_v39  ;;  %8508 = vmatprep.subr.bf16.mxu1 %v15468_v54  ;;  %v15514_v39 = vld [vmem:[#allocation16 + $0x15e0] ss:$16 sps:$4 sm:$0xff]   ;;  %v15517_v54 = vld [vmem:[#allocation16 + $0x15e8] ss:$16 sps:$4 sm:$0xff]  }
 0x617   :  { %8549 = vmatprep.subr.bf16.mxu0 %v15471_v10  ;;  %v15522_v10 = vld [vmem:[#allocation16 + $0x15c4] ss:$16 sps:$4 sm:$0xff]  }
 0x618   :  { %v6594_v9 = vpop.f32.mrf.mxu1  ;;  %8054 = vmatmul.mubr.bf16.vlgmr.msra.gmra.mxu1 %v13999_v22 }
 0x619   :  { %v17430_v61 = vadd.f32 %v6594_v9, %v17416_v48  ;;  %v6635_v24 = vpop.f32.mrf.mxu0  ;;  %8095 = vmatmul.mubr.bf16.vlgmr.msra.gmra.mxu0 %v13999_v22  ;;  %8509 = vmatpush1.bf16.msra.mxu1 %v15466_v11  ;;  %v15483_v48 = vld [vmem:[#allocation16 + $0x14ac] ss:$16 sps:$4 sm:$0xff]   ;;  %v15520_v11 = vld [vmem:[#allocation16 + $0x15c0] ss:$16 sps:$4 sm:$0xff]   ;;  %v15523_v22 = vld [vmem:[#allocation16 + $0x15c8] ss:$16 sps:$4 sm:$0xff]  }
 0x61a   :  { %v17433_v36 = vadd.f32 %v6635_v24, %v17419_v25  ;;  %8540 = vmatprep.mubr.bf16.mxu1 %v14002_v55  ;;  %8550 = vmatpush1.bf16.msra.mxu0 %v15469_v2  ;;  %v6596_v27 = vpop.f32.mrf.mxu1  ;;  %v15478_v25 = vld [vmem:[#allocation16 + $0x14a0] ss:$16 sps:$4 sm:$0xff]   ;;  %v15528_v2 = vld [vmem:[#allocation16 + $0x15a4] ss:$16 sps:$4 sm:$0xff]   ;;  %v15529_v9 = vld [vmem:[#allocation16 + $0x15a8] ss:$16 sps:$4 sm:$0xff]  }
 0x61b   :  { %8581 = vmatprep.mubr.bf16.mxu0 %v14002_v55  ;;  %v17436_v0 = vadd.f32 %v6596_v27, %v17422_v34  ;;  %v6637_v46 = vpop.f32.mrf.mxu0  ;;  %8510 = vmatprep.subr.bf16.mxu1 %v15474_v49  ;;  %v15489_v34 = vld [vmem:[#allocation16 + $0x148c] ss:$16 sps:$4 sm:$0xff]   ;;  %v15526_v55 = vld [vmem:[#allocation16 + $0x15a0] ss:$16 sps:$4 sm:$0xff]   ;;  %v15535_v27 = vld [vmem:[#allocation16 + $0x1588] ss:$16 sps:$4 sm:$0xff]  }
 0x61c   :  { %v17439_v60 = vadd.f32 %v6637_v46, %v17425_v23  ;;  %v6598_v56 = vpop.f32.mrf.mxu1  ;;  %8551 = vmatprep.subr.bf16.mxu0 %v15477_v44  ;;  %v15492_v23 = vld [vmem:[#allocation16 + $0x1464] ss:$16 sps:$4 sm:$0xff]   ;;  %v15531_v49 = vld [vmem:[#allocation16 + $0x15ac] ss:$16 sps:$4 sm:$0xff]   ;;  %v15538_v46 = vld [vmem:[#allocation16 + $0x1560] ss:$16 sps:$4 sm:$0xff]  }
 0x61d   :  { %v6639_v28 = vpop.f32.mrf.mxu0  ;;  %8511 = vmatpush1.bf16.msra.mxu1 %v15472_v35  ;;  %v15534_v44 = vld [vmem:[#allocation16 + $0x1584] ss:$16 sps:$4 sm:$0xff]   ;;  %v15537_v24 = vld [vmem:[#allocation16 + $0x158c] ss:$16 sps:$4 sm:$0xff]   ;;  %v15532_v35 = vld [vmem:[#allocation16 + $0x1580] ss:$16 sps:$4 sm:$0xff]  }
 0x61e   :  { %8552 = vmatpush1.bf16.msra.mxu0 %v15475_v1  ;;  %v6599_v3 = vpop.f32.mrf.mxu1  ;;  %8512 = vmatprep.subr.bf16.mxu1 %v15480_v33  ;;  %v15540_v1 = vld [vmem:[#allocation16 + $0x1564] ss:$16 sps:$4 sm:$0xff]   ;;  %v15543_v33 = vld [vmem:[#allocation16 + $0x156c] ss:$16 sps:$4 sm:$0xff]  }
 0x61f   :  { %v6640_v37 = vpop.f32.mrf.mxu0  ;;  %8553 = vmatprep.subr.bf16.mxu0 %v15483_v48  ;;  %v15541_v48 = vld [vmem:[#allocation16 + $0x1568] ss:$16 sps:$4 sm:$0xff]   ;;  %v15546_v56 = vld [vmem:[#allocation16 + $0x1544] ss:$16 sps:$4 sm:$0xff]   ;;  %v15549_v28 = vld [vmem:[#allocation16 + $0x154c] ss:$16 sps:$4 sm:$0xff]  }
 0x620   :  { %v15547_v3 = vld [vmem:[#allocation16 + $0x1548] ss:$16 sps:$4 sm:$0xff]   ;;  %v15550_v37 = vld [vmem:[#allocation16 + $0x1520] ss:$16 sps:$4 sm:$0xff]  }
 0x621   :  { %8513 = vmatpush1.bf16.msra.mxu1 %v15478_v25  ;;  %v15544_v25 = vld [vmem:[#allocation16 + $0x1540] ss:$16 sps:$4 sm:$0xff]  }
 0x622   :  { %8554 = vmatpush1.bf16.msra.mxu0 %v15481_v15  ;;  %8514 = vmatprep.subr.bf16.mxu1 %v15486_v51  ;;  %v15552_v15 = vld [vmem:[#allocation16 + $0x1524] ss:$16 sps:$4 sm:$0xff]   ;;  %v15555_v51 = vld [vmem:[#allocation16 + $0x152c] ss:$16 sps:$4 sm:$0xff]  }
 0x623   :  { %8555 = vmatprep.subr.bf16.mxu0 %v15489_v34  ;;  %v15553_v34 = vld [vmem:[#allocation16 + $0x1528] ss:$16 sps:$4 sm:$0xff]  }
 0x625   :  { %8515 = vmatpush1.bf16.msra.mxu1 %v15484_v47  ;;  %v15558_v47 = vld [vmem:[#allocation16 + $0x1504] ss:$16 sps:$4 sm:$0xff]  }
 0x626   :  { %8556 = vmatpush1.bf16.msra.mxu0 %v15487_v42  ;;  %8516 = vmatprep.subr.bf16.mxu1 %v15492_v23  ;;  %v15561_v42 = vld [vmem:[#allocation16 + $0x150c] ss:$16 sps:$4 sm:$0xff]   ;;  %v15556_v23 = vld [vmem:[#allocation16 + $0x1500] ss:$16 sps:$4 sm:$0xff]  }
 0x627   :  { %8557 = vmatprep.subr.bf16.mxu0 %v15495_v30  ;;  %v3126_v30 = vmax.f32 %v17290_v4, 0.0  ;;  %v15573_v4 = vld [vmem:[#allocation16 + $0x16cc] ss:$16 sps:$4 sm:$0xff]  }
 0x629   :  { %8517 = vmatpush1.bf16.msra.mxu1 %v15490_v63  ;;  %v15559_v63 = vld [vmem:[#allocation16 + $0x1508] ss:$16 sps:$4 sm:$0xff]  }
 0x62a   :  { %8558 = vmatpush1.bf16.msra.mxu0 %v15493_v43  ;;  %8518 = vmatprep.subr.bf16.mxu1 %v15498_v6  ;;  %v15564_v43 = vld [vmem:[#allocation16 + $0x16e4] ss:$16 sps:$4 sm:$0xff]   ;;  %v15567_v6 = vld [vmem:[#allocation16 + $0x16ec] ss:$16 sps:$4 sm:$0xff]  }
 0x62b   :  { %8559 = vmatprep.subr.bf16.mxu0 %v15501_v7  ;;  %v3129_v7 = vmax.f32 %v17302_v31, 0.0 }
 0x62d   :  { %8519 = vmatpush1.bf16.msra.mxu1 %v15496_v50  ;;  %v15562_v50 = vld [vmem:[#allocation16 + $0x16e0] ss:$16 sps:$4 sm:$0xff]  }
 0x62e   :  { %8560 = vmatpush1.bf16.msra.mxu0 %v15499_v32  ;;  %8520 = vmatprep.subr.bf16.mxu1 %v15504_v18  ;;  %v14001_v32 = vpack.c.bf16 %v3126_v30, %v3126_v30  ;;  %v15565_v18 = vld [vmem:[#allocation16 + $0x16e8] ss:$16 sps:$4 sm:$0xff]  }
 0x62f   :  { %8561 = vmatprep.subr.bf16.mxu0 %v15507_v53  ;;  %v15570_v53 = vld [vmem:[#allocation16 + $0x16c4] ss:$16 sps:$4 sm:$0xff]   ;;  %v15613_v30 = vld [vmem:[#allocation16 + $0x17e8] ss:$16 sps:$4 sm:$0xff]  }
 0x631   :  { %8521 = vmatpush1.bf16.msra.mxu1 %v15502_v45  ;;  %v14004_v45 = vpack.c.bf16 %v3129_v7, %v3129_v7  ;;  %v15619_v7 = vld [vmem:[#allocation16 + $0x17c8] ss:$16 sps:$4 sm:$0xff]  }
 0x632   :  { %8562 = vmatpush1.bf16.msra.mxu0 %v15505_v17  ;;  %8522 = vmatprep.subr.bf16.mxu1 %v15510_v20 }
 0x633   :  { %8563 = vmatprep.subr.bf16.mxu0 %v15513_v14 }
 0x635   :  { %8523 = vmatpush1.bf16.msra.mxu1 %v15508_v21  ;;  %v15568_v21 = vld [vmem:[#allocation16 + $0x16c0] ss:$16 sps:$4 sm:$0xff]  }
 0x636   :  { %8564 = vmatpush1.bf16.msra.mxu0 %v15511_v19  ;;  %8524 = vmatprep.subr.bf16.mxu1 %v15516_v40  ;;  %v15571_v40 = vld [vmem:[#allocation16 + $0x16c8] ss:$16 sps:$4 sm:$0xff]  }
 0x637   :  { %8565 = vmatprep.subr.bf16.mxu0 %v15519_v29  ;;  %v15576_v29 = vld [vmem:[#allocation16 + $0x16a4] ss:$16 sps:$4 sm:$0xff]  }
 0x639   :  { %8525 = vmatpush2.bf16.msra.mxu1 %v15514_v39 }
 0x63a   :  { %8566 = vmatpush2.bf16.msra.mxu0 %v15517_v54  ;;  %8526 = vmatprep.subr.bf16.mxu1 %v15522_v10 }
 0x63b   :  { %8567 = vmatprep.subr.bf16.mxu0 %v15525_v59 }
 0x63d   :  { %8527 = vmatpush2.bf16.msra.mxu1 %v15520_v11 }
 0x63e   :  { %8568 = vmatpush2.bf16.msra.mxu0 %v15523_v22  ;;  %8528 = vmatprep.subr.bf16.mxu1 %v15528_v2  ;;  %v15577_v2 = vld [vmem:[#allocation16 + $0x16a8] ss:$16 sps:$4 sm:$0xff]  }
 0x63f   :  { %8569 = vmatprep.subr.bf16.mxu0 %v15531_v49  ;;  %v15582_v49 = vld [vmem:[#allocation16 + $0x1684] ss:$16 sps:$4 sm:$0xff]  }
 0x641   :  { %8529 = vmatpush2.bf16.msra.mxu1 %v15526_v55 }
 0x642   :  { %8570 = vmatpush2.bf16.msra.mxu0 %v15529_v9  ;;  %8530 = vmatprep.subr.bf16.mxu1 %v15534_v44  ;;  %v15580_v9 = vld [vmem:[#allocation16 + $0x1680] ss:$16 sps:$4 sm:$0xff]   ;;  %v15583_v44 = vld [vmem:[#allocation16 + $0x1688] ss:$16 sps:$4 sm:$0xff]  }
 0x643   :  { %8571 = vmatprep.subr.bf16.mxu0 %v15537_v24  ;;  %v15591_v24 = vld [vmem:[#allocation16 + $0x166c] ss:$16 sps:$4 sm:$0xff]  }
 0x645   :  { %8531 = vmatpush2.bf16.msra.mxu1 %v15532_v35  ;;  %v15586_v35 = vld [vmem:[#allocation16 + $0x1660] ss:$16 sps:$4 sm:$0xff]  }
 0x646   :  { %8572 = vmatpush2.bf16.msra.mxu0 %v15535_v27  ;;  %8532 = vmatprep.subr.bf16.mxu1 %v15540_v1  ;;  %v15589_v27 = vld [vmem:[#allocation16 + $0x1668] ss:$16 sps:$4 sm:$0xff]   ;;  %v15594_v1 = vld [vmem:[#allocation16 + $0x1644] ss:$16 sps:$4 sm:$0xff]  }
 0x647   :  { %8573 = vmatprep.subr.bf16.mxu0 %v15543_v33  ;;  %v15597_v33 = vld [vmem:[#allocation16 + $0x164c] ss:$16 sps:$4 sm:$0xff]  }
 0x649   :  { %8533 = vmatpush2.bf16.msra.mxu1 %v15538_v46  ;;  %v15592_v46 = vld [vmem:[#allocation16 + $0x1640] ss:$16 sps:$4 sm:$0xff]  }
 0x64a   :  { %8574 = vmatpush2.bf16.msra.mxu0 %v15541_v48  ;;  %8534 = vmatprep.subr.bf16.mxu1 %v15546_v56  ;;  %v15595_v48 = vld [vmem:[#allocation16 + $0x1648] ss:$16 sps:$4 sm:$0xff]   ;;  %v15600_v56 = vld [vmem:[#allocation16 + $0x1624] ss:$16 sps:$4 sm:$0xff]  }
 0x64b   :  { %8575 = vmatprep.subr.bf16.mxu0 %v15549_v28  ;;  %v15603_v28 = vld [vmem:[#allocation16 + $0x162c] ss:$16 sps:$4 sm:$0xff]  }
 0x64d   :  { %8535 = vmatpush2.bf16.msra.mxu1 %v15544_v25  ;;  %v15598_v25 = vld [vmem:[#allocation16 + $0x1620] ss:$16 sps:$4 sm:$0xff]  }
 0x64e   :  { %8576 = vmatpush2.bf16.msra.mxu0 %v15547_v3  ;;  %8536 = vmatprep.subr.bf16.mxu1 %v15552_v15  ;;  %v15601_v3 = vld [vmem:[#allocation16 + $0x1628] ss:$16 sps:$4 sm:$0xff]   ;;  %v15606_v15 = vld [vmem:[#allocation16 + $0x1604] ss:$16 sps:$4 sm:$0xff]  }
 0x64f   :  { %8577 = vmatprep.subr.bf16.mxu0 %v15555_v51  ;;  %v15609_v51 = vld [vmem:[#allocation16 + $0x160c] ss:$16 sps:$4 sm:$0xff]  }
 0x651   :  { %8537 = vmatpush2.bf16.msra.mxu1 %v15550_v37  ;;  %v15604_v37 = vld [vmem:[#allocation16 + $0x1600] ss:$16 sps:$4 sm:$0xff]  }
 0x652   :  { %8578 = vmatpush2.bf16.msra.mxu0 %v15553_v34  ;;  %8538 = vmatprep.subr.bf16.mxu1 %v15558_v47  ;;  %v15607_v34 = vld [vmem:[#allocation16 + $0x1608] ss:$16 sps:$4 sm:$0xff]   ;;  %v15612_v47 = vld [vmem:[#allocation16 + $0x17e4] ss:$16 sps:$4 sm:$0xff]  }
 0x653   :  { %8579 = vmatprep.subr.bf16.mxu0 %v15561_v42  ;;  %v15615_v42 = vld [vmem:[#allocation16 + $0x17ec] ss:$16 sps:$4 sm:$0xff]  }
 0x655   :  { %8539 = vmatpush2.bf16.msra.mxu1 %v15556_v23  ;;  %v15610_v23 = vld [vmem:[#allocation16 + $0x17e0] ss:$16 sps:$4 sm:$0xff]  }
 0x656   :  { %8580 = vmatpush2.bf16.msra.mxu0 %v15559_v63  ;;  %8995 = vmatprep.subr.bf16.mxu1 %v15564_v43  ;;  %v15618_v63 = vld [vmem:[#allocation16 + $0x17c4] ss:$16 sps:$4 sm:$0xff]   ;;  %v15621_v43 = vld [vmem:[#allocation16 + $0x17cc] ss:$16 sps:$4 sm:$0xff]  }
 0x657   :  { %9036 = vmatprep.subr.bf16.mxu0 %v15567_v6  ;;  %v15616_v6 = vld [vmem:[#allocation16 + $0x17c0] ss:$16 sps:$4 sm:$0xff]  }
 0x658   :  { %v7081_v17 = vpop.f32.mrf.mxu1  ;;  %8541 = vmatmul.mubr.bf16.vlgmr.msra.gmra.mxu1 %v14001_v32 }
 0x659   :  { %v17444_v20 = vadd.f32 %v7081_v17, %v17430_v61  ;;  %v7122_v14 = vpop.f32.mrf.mxu0  ;;  %8582 = vmatmul.mubr.bf16.vlgmr.msra.gmra.mxu0 %v14001_v32  ;;  %8996 = vmatpush1.bf16.msra.mxu1 %v15562_v50  ;;  %v15579_v61 = vld [vmem:[#allocation16 + $0x16ac] ss:$16 sps:$4 sm:$0xff]   ;;  %v15624_v50 = vld [vmem:[#allocation16 + $0x17a4] ss:$16 sps:$4 sm:$0xff]  }
 0x65a   :  { %v17447_v31 = vadd.f32 %v7122_v14, %v17433_v36  ;;  %9027 = vmatprep.mubr.bf16.mxu1 %v14004_v45  ;;  %9037 = vmatpush1.bf16.msra.mxu0 %v15565_v18  ;;  %v7083_v19 = vpop.f32.mrf.mxu1  ;;  %v15574_v36 = vld [vmem:[#allocation16 + $0x16a0] ss:$16 sps:$4 sm:$0xff]   ;;  %v15627_v32 = vld [vmem:[#allocation16 + $0x17ac] ss:$16 sps:$4 sm:$0xff]   ;;  %v15631_v14 = vld [vmem:[#allocation16 + $0x1788] ss:$16 sps:$4 sm:$0xff]  }
 0x65b   :  { %9068 = vmatprep.mubr.bf16.mxu0 %v14004_v45  ;;  %v17450_v39 = vadd.f32 %v7083_v19, %v17436_v0  ;;  %v7124_v54 = vpop.f32.mrf.mxu0  ;;  %8997 = vmatprep.subr.bf16.mxu1 %v15570_v53  ;;  %v15585_v0 = vld [vmem:[#allocation16 + $0x168c] ss:$16 sps:$4 sm:$0xff]   ;;  %v15622_v18 = vld [vmem:[#allocation16 + $0x17a0] ss:$16 sps:$4 sm:$0xff]   ;;  %v15625_v53 = vld [vmem:[#allocation16 + $0x17a8] ss:$16 sps:$4 sm:$0xff]  }
 0x65c   :  { %v17453_v10 = vadd.f32 %v7124_v54, %v17439_v60  ;;  %v7085_v59 = vpop.f32.mrf.mxu1  ;;  %9038 = vmatprep.subr.bf16.mxu0 %v15573_v4  ;;  %v15588_v60 = vld [vmem:[#allocation16 + $0x1664] ss:$16 sps:$4 sm:$0xff]   ;;  %v15633_v17 = vld [vmem:[#allocation16 + $0x178c] ss:$16 sps:$4 sm:$0xff]   ;;  %v15628_v4 = vld [vmem:[#allocation16 + $0x1780] ss:$16 sps:$4 sm:$0xff]  }
 0x65d   :  { %v7126_v11 = vpop.f32.mrf.mxu0  ;;  %8998 = vmatpush1.bf16.msra.mxu1 %v15568_v21  ;;  %v15630_v45 = vld [vmem:[#allocation16 + $0x1784] ss:$16 sps:$4 sm:$0xff]   ;;  %v15639_v19 = vld [vmem:[#allocation16 + $0x176c] ss:$16 sps:$4 sm:$0xff]   ;;  %v15640_v59 = vld [vmem:[#allocation16 + $0x1740] ss:$16 sps:$4 sm:$0xff]  }
 0x65e   :  { %9039 = vmatpush1.bf16.msra.mxu0 %v15571_v40  ;;  %v7086_v22 = vpop.f32.mrf.mxu1  ;;  %8999 = vmatprep.subr.bf16.mxu1 %v15576_v29  ;;  %v15636_v21 = vld [vmem:[#allocation16 + $0x1764] ss:$16 sps:$4 sm:$0xff]   ;;  %v15634_v40 = vld [vmem:[#allocation16 + $0x1760] ss:$16 sps:$4 sm:$0xff]   ;;  %v15637_v29 = vld [vmem:[#allocation16 + $0x1768] ss:$16 sps:$4 sm:$0xff]  }
 0x65f   :  { %v7127_v55 = vpop.f32.mrf.mxu0  ;;  %9040 = vmatprep.subr.bf16.mxu0 %v15579_v61  ;;  %v15642_v54 = vld [vmem:[#allocation16 + $0x1744] ss:$16 sps:$4 sm:$0xff]   ;;  %v15645_v61 = vld [vmem:[#allocation16 + $0x174c] ss:$16 sps:$4 sm:$0xff]   ;;  %v15643_v11 = vld [vmem:[#allocation16 + $0x1748] ss:$16 sps:$4 sm:$0xff]  }
 0x660   :  { %v15651_v22 = vld [vmem:[#allocation16 + $0x172c] ss:$16 sps:$4 sm:$0xff]   ;;  %v15654_v55 = vld [vmem:[#allocation16 + $0x1704] ss:$16 sps:$4 sm:$0xff]  }
 0x661   :  { %9000 = vmatpush1.bf16.msra.mxu1 %v15574_v36  ;;  %v15648_v36 = vld [vmem:[#allocation16 + $0x1724] ss:$16 sps:$4 sm:$0xff]  }
 0x662   :  { %9041 = vmatpush1.bf16.msra.mxu0 %v15577_v2  ;;  %9001 = vmatprep.subr.bf16.mxu1 %v15582_v49  ;;  %v15646_v2 = vld [vmem:[#allocation16 + $0x1720] ss:$16 sps:$4 sm:$0xff]   ;;  %v15649_v49 = vld [vmem:[#allocation16 + $0x1728] ss:$16 sps:$4 sm:$0xff]  }
 0x663   :  { %9042 = vmatprep.subr.bf16.mxu0 %v15585_v0  ;;  %v15657_v0 = vld [vmem:[#allocation16 + $0x170c] ss:$16 sps:$4 sm:$0xff]  }
 0x665   :  { %9002 = vmatpush1.bf16.msra.mxu1 %v15580_v9  ;;  %v15652_v9 = vld [vmem:[#allocation16 + $0x1700] ss:$16 sps:$4 sm:$0xff]  }
 0x666   :  { %9043 = vmatpush1.bf16.msra.mxu0 %v15583_v44  ;;  %9003 = vmatprep.subr.bf16.mxu1 %v15588_v60  ;;  %v3128_v44 = vmax.f32 %v17299_v16, 0.0  ;;  %v15655_v60 = vld [vmem:[#allocation16 + $0x1708] ss:$16 sps:$4 sm:$0xff]   ;;  %v15669_v16 = vld [vmem:[#allocation16 + $0x18cc] ss:$16 sps:$4 sm:$0xff]  }
 0x667   :  { %9044 = vmatprep.subr.bf16.mxu0 %v15591_v24  ;;  %v15660_v24 = vld [vmem:[#allocation16 + $0x18e4] ss:$16 sps:$4 sm:$0xff]  }
 0x669   :  { %9004 = vmatpush1.bf16.msra.mxu1 %v15586_v35  ;;  %v15663_v35 = vld [vmem:[#allocation16 + $0x18ec] ss:$16 sps:$4 sm:$0xff]  }
 0x66a   :  { %9045 = vmatpush1.bf16.msra.mxu0 %v15589_v27  ;;  %9005 = vmatprep.subr.bf16.mxu1 %v15594_v1  ;;  %v3131_v27 = vmax.f32 %v17310_v41, 0.0  ;;  %v15658_v1 = vld [vmem:[#allocation16 + $0x18e0] ss:$16 sps:$4 sm:$0xff]  }
 0x66b   :  { %9046 = vmatprep.subr.bf16.mxu0 %v15597_v33  ;;  %v14003_v33 = vpack.c.bf16 %v3128_v44, %v3128_v44  ;;  %v15717_v44 = vld [vmem:[#allocation16 + $0x19cc] ss:$16 sps:$4 sm:$0xff]  }
 0x66d   :  { %9006 = vmatpush1.bf16.msra.mxu1 %v15592_v46  ;;  %v15661_v46 = vld [vmem:[#allocation16 + $0x18e8] ss:$16 sps:$4 sm:$0xff]  }
 0x66e   :  { %9047 = vmatpush1.bf16.msra.mxu0 %v15595_v48  ;;  %9007 = vmatprep.subr.bf16.mxu1 %v15600_v56  ;;  %v15666_v48 = vld [vmem:[#allocation16 + $0x18c4] ss:$16 sps:$4 sm:$0xff]   ;;  %v14006_v56 = vpack.c.bf16 %v3131_v27, %v3131_v27  ;;  %v15723_v27 = vld [vmem:[#allocation16 + $0x19ac] ss:$16 sps:$4 sm:$0xff]  }
 0x66f   :  { %9048 = vmatprep.subr.bf16.mxu0 %v15603_v28 }
 0x671   :  { %9008 = vmatpush1.bf16.msra.mxu1 %v15598_v25 }
 0x672   :  { %9049 = vmatpush1.bf16.msra.mxu0 %v15601_v3  ;;  %9009 = vmatprep.subr.bf16.mxu1 %v15606_v15  ;;  %v15664_v15 = vld [vmem:[#allocation16 + $0x18c0] ss:$16 sps:$4 sm:$0xff]  }
 0x673   :  { %9050 = vmatprep.subr.bf16.mxu0 %v15609_v51 }
 0x675   :  { %9010 = vmatpush1.bf16.msra.mxu1 %v15604_v37  ;;  %v15667_v37 = vld [vmem:[#allocation16 + $0x18c8] ss:$16 sps:$4 sm:$0xff]  }
 0x676   :  { %9051 = vmatpush1.bf16.msra.mxu0 %v15607_v34  ;;  %9011 = vmatprep.subr.bf16.mxu1 %v15612_v47  ;;  %v15672_v34 = vld [vmem:[#allocation16 + $0x18a4] ss:$16 sps:$4 sm:$0xff]  }
 0x677   :  { %9052 = vmatprep.subr.bf16.mxu0 %v15615_v42 }
 0x679   :  { %9012 = vmatpush2.bf16.msra.mxu1 %v15610_v23 }
 0x67a   :  { %9053 = vmatpush2.bf16.msra.mxu0 %v15613_v30  ;;  %9013 = vmatprep.subr.bf16.mxu1 %v15618_v63 }
 0x67b   :  { %9054 = vmatprep.subr.bf16.mxu0 %v15621_v43 }
 0x67d   :  { %9014 = vmatpush2.bf16.msra.mxu1 %v15616_v6  ;;  %v15673_v6 = vld [vmem:[#allocation16 + $0x18a8] ss:$16 sps:$4 sm:$0xff]  }
 0x67e   :  { %9055 = vmatpush2.bf16.msra.mxu0 %v15619_v7  ;;  %9015 = vmatprep.subr.bf16.mxu1 %v15624_v50  ;;  %v15678_v7 = vld [vmem:[#allocation16 + $0x1884] ss:$16 sps:$4 sm:$0xff]  }
 0x67f   :  { %9056 = vmatprep.subr.bf16.mxu0 %v15627_v32  ;;  %v15676_v32 = vld [vmem:[#allocation16 + $0x1880] ss:$16 sps:$4 sm:$0xff]  }
 0x681   :  { %9016 = vmatpush2.bf16.msra.mxu1 %v15622_v18  ;;  %v15679_v18 = vld [vmem:[#allocation16 + $0x1888] ss:$16 sps:$4 sm:$0xff]  }
 0x682   :  { %9057 = vmatpush2.bf16.msra.mxu0 %v15625_v53  ;;  %9017 = vmatprep.subr.bf16.mxu1 %v15630_v45  ;;  %v15687_v53 = vld [vmem:[#allocation16 + $0x186c] ss:$16 sps:$4 sm:$0xff]   ;;  %v15682_v45 = vld [vmem:[#allocation16 + $0x1860] ss:$16 sps:$4 sm:$0xff]  }
 0x683   :  { %9058 = vmatprep.subr.bf16.mxu0 %v15633_v17  ;;  %v15685_v17 = vld [vmem:[#allocation16 + $0x1868] ss:$16 sps:$4 sm:$0xff]  }
 0x685   :  { %9018 = vmatpush2.bf16.msra.mxu1 %v15628_v4  ;;  %v15690_v4 = vld [vmem:[#allocation16 + $0x1844] ss:$16 sps:$4 sm:$0xff]  }
 0x686   :  { %9059 = vmatpush2.bf16.msra.mxu0 %v15631_v14  ;;  %9019 = vmatprep.subr.bf16.mxu1 %v15636_v21  ;;  %v15693_v14 = vld [vmem:[#allocation16 + $0x184c] ss:$16 sps:$4 sm:$0xff]   ;;  %v15688_v21 = vld [vmem:[#allocation16 + $0x1840] ss:$16 sps:$4 sm:$0xff]  }
 0x687   :  { %9060 = vmatprep.subr.bf16.mxu0 %v15639_v19  ;;  %v15691_v19 = vld [vmem:[#allocation16 + $0x1848] ss:$16 sps:$4 sm:$0xff]  }
 0x689   :  { %9020 = vmatpush2.bf16.msra.mxu1 %v15634_v40  ;;  %v15696_v40 = vld [vmem:[#allocation16 + $0x1824] ss:$16 sps:$4 sm:$0xff]  }
 0x68a   :  { %9061 = vmatpush2.bf16.msra.mxu0 %v15637_v29  ;;  %9021 = vmatprep.subr.bf16.mxu1 %v15642_v54  ;;  %v15699_v29 = vld [vmem:[#allocation16 + $0x182c] ss:$16 sps:$4 sm:$0xff]   ;;  %v15694_v54 = vld [vmem:[#allocation16 + $0x1820] ss:$16 sps:$4 sm:$0xff]  }
 0x68b   :  { %9062 = vmatprep.subr.bf16.mxu0 %v15645_v61  ;;  %v15697_v61 = vld [vmem:[#allocation16 + $0x1828] ss:$16 sps:$4 sm:$0xff]  }
 0x68d   :  { %9022 = vmatpush2.bf16.msra.mxu1 %v15640_v59  ;;  %v15702_v59 = vld [vmem:[#allocation16 + $0x1804] ss:$16 sps:$4 sm:$0xff]  }
 0x68e   :  { %9063 = vmatpush2.bf16.msra.mxu0 %v15643_v11  ;;  %9023 = vmatprep.subr.bf16.mxu1 %v15648_v36  ;;  %v15705_v11 = vld [vmem:[#allocation16 + $0x180c] ss:$16 sps:$4 sm:$0xff]   ;;  %v15700_v36 = vld [vmem:[#allocation16 + $0x1800] ss:$16 sps:$4 sm:$0xff]  }
 0x68f   :  { %9064 = vmatprep.subr.bf16.mxu0 %v15651_v22  ;;  %v15703_v22 = vld [vmem:[#allocation16 + $0x1808] ss:$16 sps:$4 sm:$0xff]  }
 0x691   :  { %9024 = vmatpush2.bf16.msra.mxu1 %v15646_v2  ;;  %v15708_v2 = vld [vmem:[#allocation16 + $0x19e4] ss:$16 sps:$4 sm:$0xff]  }
 0x692   :  { %9065 = vmatpush2.bf16.msra.mxu0 %v15649_v49  ;;  %9025 = vmatprep.subr.bf16.mxu1 %v15654_v55  ;;  %v15711_v49 = vld [vmem:[#allocation16 + $0x19ec] ss:$16 sps:$4 sm:$0xff]   ;;  %v15706_v55 = vld [vmem:[#allocation16 + $0x19e0] ss:$16 sps:$4 sm:$0xff]  }
 0x693   :  { %9066 = vmatprep.subr.bf16.mxu0 %v15657_v0  ;;  %v15709_v0 = vld [vmem:[#allocation16 + $0x19e8] ss:$16 sps:$4 sm:$0xff]  }
 0x695   :  { %9026 = vmatpush2.bf16.msra.mxu1 %v15652_v9  ;;  %v15714_v9 = vld [vmem:[#allocation16 + $0x19c4] ss:$16 sps:$4 sm:$0xff]  }
 0x696   :  { %9067 = vmatpush2.bf16.msra.mxu0 %v15655_v60  ;;  %9482 = vmatprep.subr.bf16.mxu1 %v15660_v24  ;;  %v15712_v60 = vld [vmem:[#allocation16 + $0x19c0] ss:$16 sps:$4 sm:$0xff]   ;;  %v15715_v24 = vld [vmem:[#allocation16 + $0x19c8] ss:$16 sps:$4 sm:$0xff]  }
 0x697   :  { %9523 = vmatprep.subr.bf16.mxu0 %v15663_v35  ;;  %v15720_v35 = vld [vmem:[#allocation16 + $0x19a4] ss:$16 sps:$4 sm:$0xff]  }
 0x698   :  { %v7568_v28 = vpop.f32.mrf.mxu1  ;;  %9028 = vmatmul.mubr.bf16.vlgmr.msra.gmra.mxu1 %v14003_v33 }
 0x699   :  { %v17458_v25 = vadd.f32 %v7568_v28, %v17444_v20  ;;  %v7609_v3 = vpop.f32.mrf.mxu0  ;;  %9069 = vmatmul.mubr.bf16.vlgmr.msra.gmra.mxu0 %v14003_v33  ;;  %9483 = vmatpush1.bf16.msra.mxu1 %v15658_v1  ;;  %v15675_v20 = vld [vmem:[#allocation16 + $0x18ac] ss:$16 sps:$4 sm:$0xff]   ;;  %v15718_v1 = vld [vmem:[#allocation16 + $0x19a0] ss:$16 sps:$4 sm:$0xff]   ;;  %v15721_v33 = vld [vmem:[#allocation16 + $0x19a8] ss:$16 sps:$4 sm:$0xff]  }
 0x69a   :  { %v17461_v41 = vadd.f32 %v7609_v3, %v17447_v31  ;;  %9514 = vmatprep.mubr.bf16.mxu1 %v14006_v56  ;;  %9524 = vmatpush1.bf16.msra.mxu0 %v15661_v46  ;;  %v7570_v51 = vpop.f32.mrf.mxu1  ;;  %v15670_v31 = vld [vmem:[#allocation16 + $0x18a0] ss:$16 sps:$4 sm:$0xff]   ;;  %v15726_v46 = vld [vmem:[#allocation16 + $0x1984] ss:$16 sps:$4 sm:$0xff]   ;;  %v15727_v28 = vld [vmem:[#allocation16 + $0x1988] ss:$16 sps:$4 sm:$0xff]  }
 0x69b   :  { %9555 = vmatprep.mubr.bf16.mxu0 %v14006_v56  ;;  %v17464_v47 = vadd.f32 %v7570_v51, %v17450_v39  ;;  %v7611_v42 = vpop.f32.mrf.mxu0  ;;  %9484 = vmatprep.subr.bf16.mxu1 %v15666_v48  ;;  %v15681_v39 = vld [vmem:[#allocation16 + $0x188c] ss:$16 sps:$4 sm:$0xff]   ;;  %v15724_v56 = vld [vmem:[#allocation16 + $0x1980] ss:$16 sps:$4 sm:$0xff]   ;;  %v15733_v51 = vld [vmem:[#allocation16 + $0x1968] ss:$16 sps:$4 sm:$0xff]  }
 0x69c   :  { %v17467_v23 = vadd.f32 %v7611_v42, %v17453_v10  ;;  %v7572_v30 = vpop.f32.mrf.mxu1  ;;  %9525 = vmatprep.subr.bf16.mxu0 %v15669_v16  ;;  %v15684_v10 = vld [vmem:[#allocation16 + $0x1864] ss:$16 sps:$4 sm:$0xff]   ;;  %v15729_v48 = vld [vmem:[#allocation16 + $0x198c] ss:$16 sps:$4 sm:$0xff]   ;;  %v15736_v42 = vld [vmem:[#allocation16 + $0x1940] ss:$16 sps:$4 sm:$0xff]  }
 0x69d   :  { %v7613_v63 = vpop.f32.mrf.mxu0  ;;  %9485 = vmatpush1.bf16.msra.mxu1 %v15664_v15  ;;  %v15732_v16 = vld [vmem:[#allocation16 + $0x1964] ss:$16 sps:$4 sm:$0xff]   ;;  %v15735_v3 = vld [vmem:[#allocation16 + $0x196c] ss:$16 sps:$4 sm:$0xff]   ;;  %v15730_v15 = vld [vmem:[#allocation16 + $0x1960] ss:$16 sps:$4 sm:$0xff]  }
 0x69e   :  { %9526 = vmatpush1.bf16.msra.mxu0 %v15667_v37  ;;  %v7573_v43 = vpop.f32.mrf.mxu1  ;;  %9486 = vmatprep.subr.bf16.mxu1 %v15672_v34  ;;  %v15738_v37 = vld [vmem:[#allocation16 + $0x1944] ss:$16 sps:$4 sm:$0xff]   ;;  %v15741_v34 = vld [vmem:[#allocation16 + $0x194c] ss:$16 sps:$4 sm:$0xff]  }
 0x69f   :  { %v7614_v50 = vpop.f32.mrf.mxu0  ;;  %9527 = vmatprep.subr.bf16.mxu0 %v15675_v20  ;;  %v15739_v20 = vld [vmem:[#allocation16 + $0x1948] ss:$16 sps:$4 sm:$0xff]   ;;  %v15744_v30 = vld [vmem:[#allocation16 + $0x1924] ss:$16 sps:$4 sm:$0xff]   ;;  %v15747_v63 = vld [vmem:[#allocation16 + $0x192c] ss:$16 sps:$4 sm:$0xff]  }
 0x6a0   :  { %v15745_v43 = vld [vmem:[#allocation16 + $0x1928] ss:$16 sps:$4 sm:$0xff]   ;;  %v15748_v50 = vld [vmem:[#allocation16 + $0x1900] ss:$16 sps:$4 sm:$0xff]  }
 0x6a1   :  { %9487 = vmatpush1.bf16.msra.mxu1 %v15670_v31  ;;  %v15742_v31 = vld [vmem:[#allocation16 + $0x1920] ss:$16 sps:$4 sm:$0xff]  }
 0x6a2   :  { %9528 = vmatpush1.bf16.msra.mxu0 %v15673_v6  ;;  %9488 = vmatprep.subr.bf16.mxu1 %v15678_v7  ;;  %v15750_v6 = vld [vmem:[#allocation16 + $0x1904] ss:$16 sps:$4 sm:$0xff]   ;;  %v15753_v7 = vld [vmem:[#allocation16 + $0x190c] ss:$16 sps:$4 sm:$0xff]  }
 0x6a3   :  { %9529 = vmatprep.subr.bf16.mxu0 %v15681_v39  ;;  %v3130_v39 = vmax.f32 %v17306_v12, 0.0  ;;  %v15765_v12 = vld [vmem:[#allocation16 + $0x1acc] ss:$16 sps:$4 sm:$0xff]  }
 0x6a5   :  { %9489 = vmatpush1.bf16.msra.mxu1 %v15676_v32  ;;  %v15751_v32 = vld [vmem:[#allocation16 + $0x1908] ss:$16 sps:$4 sm:$0xff]  }
 0x6a6   :  { %9530 = vmatpush1.bf16.msra.mxu0 %v15679_v18  ;;  %9490 = vmatprep.subr.bf16.mxu1 %v15684_v10  ;;  %v15756_v18 = vld [vmem:[#allocation16 + $0x1ae4] ss:$16 sps:$4 sm:$0xff]   ;;  %v15759_v10 = vld [vmem:[#allocation16 + $0x1aec] ss:$16 sps:$4 sm:$0xff]  }
 0x6a7   :  { %9531 = vmatprep.subr.bf16.mxu0 %v15687_v53  ;;  %v3133_v53 = vmax.f32 %v17321_v5, 0.0 }
 0x6a9   :  { %9491 = vmatpush1.bf16.msra.mxu1 %v15682_v45  ;;  %v15754_v45 = vld [vmem:[#allocation16 + $0x1ae0] ss:$16 sps:$4 sm:$0xff]  }
 0x6aa   :  { %9532 = vmatpush1.bf16.msra.mxu0 %v15685_v17  ;;  %9492 = vmatprep.subr.bf16.mxu1 %v15690_v4  ;;  %v14005_v17 = vpack.c.bf16 %v3130_v39, %v3130_v39  ;;  %v15757_v4 = vld [vmem:[#allocation16 + $0x1ae8] ss:$16 sps:$4 sm:$0xff]  }
 0x6ab   :  { %9533 = vmatprep.subr.bf16.mxu0 %v15693_v14  ;;  %v15762_v14 = vld [vmem:[#allocation16 + $0x1ac4] ss:$16 sps:$4 sm:$0xff]   ;;  %v15811_v39 = vld [vmem:[#allocation16 + $0x1bc8] ss:$16 sps:$4 sm:$0xff]  }
 0x6ad   :  { %9493 = vmatpush1.bf16.msra.mxu1 %v15688_v21  ;;  %v14008_v21 = vpack.c.bf16 %v3133_v53, %v3133_v53  ;;  %v15817_v53 = vld [vmem:[#allocation16 + $0x1ba8] ss:$16 sps:$4 sm:$0xff]  }
 0x6ae   :  { %9534 = vmatpush1.bf16.msra.mxu0 %v15691_v19  ;;  %9494 = vmatprep.subr.bf16.mxu1 %v15696_v40 }
 0x6af   :  { %9535 = vmatprep.subr.bf16.mxu0 %v15699_v29 }
 0x6b1   :  { %9495 = vmatpush1.bf16.msra.mxu1 %v15694_v54  ;;  %v15760_v54 = vld [vmem:[#allocation16 + $0x1ac0] ss:$16 sps:$4 sm:$0xff]  }
 0x6b2   :  { %9536 = vmatpush1.bf16.msra.mxu0 %v15697_v61  ;;  %9496 = vmatprep.subr.bf16.mxu1 %v15702_v59  ;;  %v15763_v59 = vld [vmem:[#allocation16 + $0x1ac8] ss:$16 sps:$4 sm:$0xff]  }
 0x6b3   :  { %9537 = vmatprep.subr.bf16.mxu0 %v15705_v11  ;;  %v15768_v11 = vld [vmem:[#allocation16 + $0x1aa4] ss:$16 sps:$4 sm:$0xff]  }
 0x6b5   :  { %9497 = vmatpush1.bf16.msra.mxu1 %v15700_v36 }
 0x6b6   :  { %9538 = vmatpush1.bf16.msra.mxu0 %v15703_v22  ;;  %9498 = vmatprep.subr.bf16.mxu1 %v15708_v2 }
 0x6b7   :  { %9539 = vmatprep.subr.bf16.mxu0 %v15711_v49 }
 0x6b9   :  { %9499 = vmatpush2.bf16.msra.mxu1 %v15706_v55 }
 0x6ba   :  { %9540 = vmatpush2.bf16.msra.mxu0 %v15709_v0  ;;  %9500 = vmatprep.subr.bf16.mxu1 %v15714_v9  ;;  %v15769_v9 = vld [vmem:[#allocation16 + $0x1aa8] ss:$16 sps:$4 sm:$0xff]  }
 0x6bb   :  { %9541 = vmatprep.subr.bf16.mxu0 %v15717_v44  ;;  %v15774_v44 = vld [vmem:[#allocation16 + $0x1a84] ss:$16 sps:$4 sm:$0xff]  }
 0x6bd   :  { %9501 = vmatpush2.bf16.msra.mxu1 %v15712_v60 }
 0x6be   :  { %9542 = vmatpush2.bf16.msra.mxu0 %v15715_v24  ;;  %9502 = vmatprep.subr.bf16.mxu1 %v15720_v35  ;;  %v15772_v24 = vld [vmem:[#allocation16 + $0x1a80] ss:$16 sps:$4 sm:$0xff]   ;;  %v15775_v35 = vld [vmem:[#allocation16 + $0x1a88] ss:$16 sps:$4 sm:$0xff]  }
 0x6bf   :  { %9543 = vmatprep.subr.bf16.mxu0 %v15723_v27  ;;  %v15783_v27 = vld [vmem:[#allocation16 + $0x1a6c] ss:$16 sps:$4 sm:$0xff]  }
 0x6c1   :  { %9503 = vmatpush2.bf16.msra.mxu1 %v15718_v1  ;;  %v15778_v1 = vld [vmem:[#allocation16 + $0x1a60] ss:$16 sps:$4 sm:$0xff]  }
 0x6c2   :  { %9544 = vmatpush2.bf16.msra.mxu0 %v15721_v33  ;;  %9504 = vmatprep.subr.bf16.mxu1 %v15726_v46  ;;  %v15781_v33 = vld [vmem:[#allocation16 + $0x1a68] ss:$16 sps:$4 sm:$0xff]   ;;  %v15786_v46 = vld [vmem:[#allocation16 + $0x1a44] ss:$16 sps:$4 sm:$0xff]  }
 0x6c3   :  { %9545 = vmatprep.subr.bf16.mxu0 %v15729_v48  ;;  %v15789_v48 = vld [vmem:[#allocation16 + $0x1a4c] ss:$16 sps:$4 sm:$0xff]  }
 0x6c5   :  { %9505 = vmatpush2.bf16.msra.mxu1 %v15724_v56  ;;  %v15784_v56 = vld [vmem:[#allocation16 + $0x1a40] ss:$16 sps:$4 sm:$0xff]  }
 0x6c6   :  { %9546 = vmatpush2.bf16.msra.mxu0 %v15727_v28  ;;  %9506 = vmatprep.subr.bf16.mxu1 %v15732_v16  ;;  %v15787_v28 = vld [vmem:[#allocation16 + $0x1a48] ss:$16 sps:$4 sm:$0xff]   ;;  %v15792_v16 = vld [vmem:[#allocation16 + $0x1a24] ss:$16 sps:$4 sm:$0xff]  }
 0x6c7   :  { %9547 = vmatprep.subr.bf16.mxu0 %v15735_v3  ;;  %v15795_v3 = vld [vmem:[#allocation16 + $0x1a2c] ss:$16 sps:$4 sm:$0xff]  }
 0x6c9   :  { %9507 = vmatpush2.bf16.msra.mxu1 %v15730_v15  ;;  %v15790_v15 = vld [vmem:[#allocation16 + $0x1a20] ss:$16 sps:$4 sm:$0xff]  }
 0x6ca   :  { %9548 = vmatpush2.bf16.msra.mxu0 %v15733_v51  ;;  %9508 = vmatprep.subr.bf16.mxu1 %v15738_v37  ;;  %v15793_v51 = vld [vmem:[#allocation16 + $0x1a28] ss:$16 sps:$4 sm:$0xff]   ;;  %v15798_v37 = vld [vmem:[#allocation16 + $0x1a04] ss:$16 sps:$4 sm:$0xff]  }
 0x6cb   :  { %9549 = vmatprep.subr.bf16.mxu0 %v15741_v34  ;;  %v15801_v34 = vld [vmem:[#allocation16 + $0x1a0c] ss:$16 sps:$4 sm:$0xff]  }
 0x6cd   :  { %9509 = vmatpush2.bf16.msra.mxu1 %v15736_v42  ;;  %v15796_v42 = vld [vmem:[#allocation16 + $0x1a00] ss:$16 sps:$4 sm:$0xff]  }
 0x6ce   :  { %9550 = vmatpush2.bf16.msra.mxu0 %v15739_v20  ;;  %9510 = vmatprep.subr.bf16.mxu1 %v15744_v30  ;;  %v15799_v20 = vld [vmem:[#allocation16 + $0x1a08] ss:$16 sps:$4 sm:$0xff]   ;;  %v15804_v30 = vld [vmem:[#allocation16 + $0x1be4] ss:$16 sps:$4 sm:$0xff]  }
 0x6cf   :  { %9551 = vmatprep.subr.bf16.mxu0 %v15747_v63  ;;  %v15807_v63 = vld [vmem:[#allocation16 + $0x1bec] ss:$16 sps:$4 sm:$0xff]  }
 0x6d1   :  { %9511 = vmatpush2.bf16.msra.mxu1 %v15742_v31  ;;  %v15802_v31 = vld [vmem:[#allocation16 + $0x1be0] ss:$16 sps:$4 sm:$0xff]  }
 0x6d2   :  { %9552 = vmatpush2.bf16.msra.mxu0 %v15745_v43  ;;  %9512 = vmatprep.subr.bf16.mxu1 %v15750_v6  ;;  %v15805_v43 = vld [vmem:[#allocation16 + $0x1be8] ss:$16 sps:$4 sm:$0xff]   ;;  %v15810_v6 = vld [vmem:[#allocation16 + $0x1bc4] ss:$16 sps:$4 sm:$0xff]  }
 0x6d3   :  { %9553 = vmatprep.subr.bf16.mxu0 %v15753_v7  ;;  %v15813_v7 = vld [vmem:[#allocation16 + $0x1bcc] ss:$16 sps:$4 sm:$0xff]  }
 0x6d5   :  { %9513 = vmatpush2.bf16.msra.mxu1 %v15748_v50  ;;  %v15808_v50 = vld [vmem:[#allocation16 + $0x1bc0] ss:$16 sps:$4 sm:$0xff]  }
 0x6d6   :  { %9554 = vmatpush2.bf16.msra.mxu0 %v15751_v32  ;;  %9969 = vmatprep.subr.bf16.mxu1 %v15756_v18  ;;  %v15816_v32 = vld [vmem:[#allocation16 + $0x1ba4] ss:$16 sps:$4 sm:$0xff]   ;;  %v15819_v18 = vld [vmem:[#allocation16 + $0x1bac] ss:$16 sps:$4 sm:$0xff]  }
 0x6d7   :  { %10010 = vmatprep.subr.bf16.mxu0 %v15759_v10  ;;  %v15814_v10 = vld [vmem:[#allocation16 + $0x1ba0] ss:$16 sps:$4 sm:$0xff]  }
 0x6d8   :  { %v8055_v19 = vpop.f32.mrf.mxu1  ;;  %9515 = vmatmul.mubr.bf16.vlgmr.msra.gmra.mxu1 %v14005_v17 }
 0x6d9   :  { %v17472_v40 = vadd.f32 %v8055_v19, %v17458_v25  ;;  %v8096_v29 = vpop.f32.mrf.mxu0  ;;  %9556 = vmatmul.mubr.bf16.vlgmr.msra.gmra.mxu0 %v14005_v17  ;;  %9970 = vmatpush1.bf16.msra.mxu1 %v15754_v45  ;;  %v15771_v25 = vld [vmem:[#allocation16 + $0x1aac] ss:$16 sps:$4 sm:$0xff]   ;;  %v15822_v45 = vld [vmem:[#allocation16 + $0x1b84] ss:$16 sps:$4 sm:$0xff]  }
 0x6da   :  { %v17475_v5 = vadd.f32 %v8096_v29, %v17461_v41  ;;  %10001 = vmatprep.mubr.bf16.mxu1 %v14008_v21  ;;  %10011 = vmatpush1.bf16.msra.mxu0 %v15757_v4  ;;  %v8057_v61 = vpop.f32.mrf.mxu1  ;;  %v15766_v41 = vld [vmem:[#allocation16 + $0x1aa0] ss:$16 sps:$4 sm:$0xff]   ;;  %v15825_v17 = vld [vmem:[#allocation16 + $0x1b8c] ss:$16 sps:$4 sm:$0xff]   ;;  %v15829_v29 = vld [vmem:[#allocation16 + $0x1b68] ss:$16 sps:$4 sm:$0xff]  }
 0x6db   :  { %10042 = vmatprep.mubr.bf16.mxu0 %v14008_v21  ;;  %v17478_v36 = vadd.f32 %v8057_v61, %v17464_v47  ;;  %v8098_v22 = vpop.f32.mrf.mxu0  ;;  %9971 = vmatprep.subr.bf16.mxu1 %v15762_v14  ;;  %v15777_v47 = vld [vmem:[#allocation16 + $0x1a8c] ss:$16 sps:$4 sm:$0xff]   ;;  %v15820_v4 = vld [vmem:[#allocation16 + $0x1b80] ss:$16 sps:$4 sm:$0xff]   ;;  %v15823_v14 = vld [vmem:[#allocation16 + $0x1b88] ss:$16 sps:$4 sm:$0xff]  }
 0x6dc   :  { %v17481_v2 = vadd.f32 %v8098_v22, %v17467_v23  ;;  %v8059_v49 = vpop.f32.mrf.mxu1  ;;  %10012 = vmatprep.subr.bf16.mxu0 %v15765_v12  ;;  %v15780_v23 = vld [vmem:[#allocation16 + $0x1a64] ss:$16 sps:$4 sm:$0xff]   ;;  %v15831_v19 = vld [vmem:[#allocation16 + $0x1b6c] ss:$16 sps:$4 sm:$0xff]   ;;  %v15826_v12 = vld [vmem:[#allocation16 + $0x1b60] ss:$16 sps:$4 sm:$0xff]  }
 0x6dd   :  { %v8100_v55 = vpop.f32.mrf.mxu0  ;;  %9972 = vmatpush1.bf16.msra.mxu1 %v15760_v54  ;;  %v15828_v21 = vld [vmem:[#allocation16 + $0x1b64] ss:$16 sps:$4 sm:$0xff]   ;;  %v15837_v61 = vld [vmem:[#allocation16 + $0x1b4c] ss:$16 sps:$4 sm:$0xff]   ;;  %v15838_v49 = vld [vmem:[#allocation16 + $0x1b20] ss:$16 sps:$4 sm:$0xff]  }
 0x6de   :  { %10013 = vmatpush1.bf16.msra.mxu0 %v15763_v59  ;;  %v8060_v0 = vpop.f32.mrf.mxu1  ;;  %9973 = vmatprep.subr.bf16.mxu1 %v15768_v11  ;;  %v15834_v54 = vld [vmem:[#allocation16 + $0x1b44] ss:$16 sps:$4 sm:$0xff]   ;;  %v15832_v59 = vld [vmem:[#allocation16 + $0x1b40] ss:$16 sps:$4 sm:$0xff]   ;;  %v15835_v11 = vld [vmem:[#allocation16 + $0x1b48] ss:$16 sps:$4 sm:$0xff]  }
 0x6df   :  { %v8101_v60 = vpop.f32.mrf.mxu0  ;;  %10014 = vmatprep.subr.bf16.mxu0 %v15771_v25  ;;  %v15840_v22 = vld [vmem:[#allocation16 + $0x1b24] ss:$16 sps:$4 sm:$0xff]   ;;  %v15843_v25 = vld [vmem:[#allocation16 + $0x1b2c] ss:$16 sps:$4 sm:$0xff]   ;;  %v15841_v55 = vld [vmem:[#allocation16 + $0x1b28] ss:$16 sps:$4 sm:$0xff]  }
 0x6e0   :  { %v15849_v0 = vld [vmem:[#allocation16 + $0x1b0c] ss:$16 sps:$4 sm:$0xff]   ;;  %v15847_v60 = vld [vmem:[#allocation16 + $0x1b08] ss:$16 sps:$4 sm:$0xff]  }
 0x6e1   :  { %9974 = vmatpush1.bf16.msra.mxu1 %v15766_v41  ;;  %v15846_v41 = vld [vmem:[#allocation16 + $0x1b04] ss:$16 sps:$4 sm:$0xff]  }
 0x6e2   :  { %10015 = vmatpush1.bf16.msra.mxu0 %v15769_v9  ;;  %9975 = vmatprep.subr.bf16.mxu1 %v15774_v44  ;;  %v15844_v9 = vld [vmem:[#allocation16 + $0x1b00] ss:$16 sps:$4 sm:$0xff]   ;;  %v3132_v44 = vmax.f32 %v17316_v62, 0.0  ;;  %v15861_v62 = vld [vmem:[#allocation16 + $0x1ccc] ss:$16 sps:$4 sm:$0xff]  }
 0x6e3   :  { %10016 = vmatprep.subr.bf16.mxu0 %v15777_v47  ;;  %v15852_v47 = vld [vmem:[#allocation16 + $0x1ce4] ss:$16 sps:$4 sm:$0xff]  }
 0x6e5   :  { %9976 = vmatpush1.bf16.msra.mxu1 %v15772_v24  ;;  %v15855_v24 = vld [vmem:[#allocation16 + $0x1cec] ss:$16 sps:$4 sm:$0xff]  }
 0x6e6   :  { %10017 = vmatpush1.bf16.msra.mxu0 %v15775_v35  ;;  %9977 = vmatprep.subr.bf16.mxu1 %v15780_v23  ;;  %v3135_v35 = vmax.f32 %v17329_v8, 0.0  ;;  %v15850_v23 = vld [vmem:[#allocation16 + $0x1ce0] ss:$16 sps:$4 sm:$0xff]  }
 0x6e7   :  { %10018 = vmatprep.subr.bf16.mxu0 %v15783_v27  ;;  %v14007_v27 = vpack.c.bf16 %v3132_v44, %v3132_v44  ;;  %v15915_v44 = vld [vmem:[#allocation16 + $0x1dac] ss:$16 sps:$4 sm:$0xff]  }
 0x6e9   :  { %9978 = vmatpush1.bf16.msra.mxu1 %v15778_v1  ;;  %v15853_v1 = vld [vmem:[#allocation16 + $0x1ce8] ss:$16 sps:$4 sm:$0xff]  }
 0x6ea   :  { %10019 = vmatpush1.bf16.msra.mxu0 %v15781_v33  ;;  %9979 = vmatprep.subr.bf16.mxu1 %v15786_v46  ;;  %v15858_v33 = vld [vmem:[#allocation16 + $0x1cc4] ss:$16 sps:$4 sm:$0xff]   ;;  %v14010_v46 = vpack.c.bf16 %v3135_v35, %v3135_v35  ;;  %v15921_v35 = vld [vmem:[#allocation16 + $0x1d8c] ss:$16 sps:$4 sm:$0xff]  }
 0x6eb   :  { %10020 = vmatprep.subr.bf16.mxu0 %v15789_v48 }
 0x6ed   :  { %9980 = vmatpush1.bf16.msra.mxu1 %v15784_v56 }
 0x6ee   :  { %10021 = vmatpush1.bf16.msra.mxu0 %v15787_v28  ;;  %9981 = vmatprep.subr.bf16.mxu1 %v15792_v16  ;;  %v15856_v16 = vld [vmem:[#allocation16 + $0x1cc0] ss:$16 sps:$4 sm:$0xff]  }
 0x6ef   :  { %10022 = vmatprep.subr.bf16.mxu0 %v15795_v3 }
 0x6f1   :  { %9982 = vmatpush1.bf16.msra.mxu1 %v15790_v15  ;;  %v15859_v15 = vld [vmem:[#allocation16 + $0x1cc8] ss:$16 sps:$4 sm:$0xff]  }
 0x6f2   :  { %10023 = vmatpush1.bf16.msra.mxu0 %v15793_v51  ;;  %9983 = vmatprep.subr.bf16.mxu1 %v15798_v37  ;;  %v15864_v51 = vld [vmem:[#allocation16 + $0x1ca4] ss:$16 sps:$4 sm:$0xff]  }
 0x6f3   :  { %10024 = vmatprep.subr.bf16.mxu0 %v15801_v34 }
 0x6f5   :  { %9984 = vmatpush1.bf16.msra.mxu1 %v15796_v42 }
 0x6f6   :  { %10025 = vmatpush1.bf16.msra.mxu0 %v15799_v20  ;;  %9985 = vmatprep.subr.bf16.mxu1 %v15804_v30 }
 0x6f7   :  { %10026 = vmatprep.subr.bf16.mxu0 %v15807_v63 }
 0x6f9   :  { %9986 = vmatpush2.bf16.msra.mxu1 %v15802_v31  ;;  %v15865_v31 = vld [vmem:[#allocation16 + $0x1ca8] ss:$16 sps:$4 sm:$0xff]  }
 0x6fa   :  { %10027 = vmatpush2.bf16.msra.mxu0 %v15805_v43  ;;  %9987 = vmatprep.subr.bf16.mxu1 %v15810_v6  ;;  %v15870_v43 = vld [vmem:[#allocation16 + $0x1c84] ss:$16 sps:$4 sm:$0xff]  }
 0x6fb   :  { %10028 = vmatprep.subr.bf16.mxu0 %v15813_v7  ;;  %v15868_v7 = vld [vmem:[#allocation16 + $0x1c80] ss:$16 sps:$4 sm:$0xff]  }
 0x6fd   :  { %9988 = vmatpush2.bf16.msra.mxu1 %v15808_v50  ;;  %v15871_v50 = vld [vmem:[#allocation16 + $0x1c88] ss:$16 sps:$4 sm:$0xff]  }
 0x6fe   :  { %10029 = vmatpush2.bf16.msra.mxu0 %v15811_v39  ;;  %9989 = vmatprep.subr.bf16.mxu1 %v15816_v32  ;;  %v15879_v39 = vld [vmem:[#allocation16 + $0x1c6c] ss:$16 sps:$4 sm:$0xff]   ;;  %v15874_v32 = vld [vmem:[#allocation16 + $0x1c60] ss:$16 sps:$4 sm:$0xff]  }
 0x6ff   :  { %10030 = vmatprep.subr.bf16.mxu0 %v15819_v18  ;;  %v15877_v18 = vld [vmem:[#allocation16 + $0x1c68] ss:$16 sps:$4 sm:$0xff]  }
 0x701   :  { %9990 = vmatpush2.bf16.msra.mxu1 %v15814_v10  ;;  %v15882_v10 = vld [vmem:[#allocation16 + $0x1c44] ss:$16 sps:$4 sm:$0xff]  }
 0x702   :  { %10031 = vmatpush2.bf16.msra.mxu0 %v15817_v53  ;;  %9991 = vmatprep.subr.bf16.mxu1 %v15822_v45  ;;  %v15885_v53 = vld [vmem:[#allocation16 + $0x1c4c] ss:$16 sps:$4 sm:$0xff]   ;;  %v15880_v45 = vld [vmem:[#allocation16 + $0x1c40] ss:$16 sps:$4 sm:$0xff]  }
 0x703   :  { %10032 = vmatprep.subr.bf16.mxu0 %v15825_v17  ;;  %v15883_v17 = vld [vmem:[#allocation16 + $0x1c48] ss:$16 sps:$4 sm:$0xff]  }
 0x705   :  { %9992 = vmatpush2.bf16.msra.mxu1 %v15820_v4  ;;  %v15888_v4 = vld [vmem:[#allocation16 + $0x1c24] ss:$16 sps:$4 sm:$0xff]  }
 0x706   :  { %10033 = vmatpush2.bf16.msra.mxu0 %v15823_v14  ;;  %9993 = vmatprep.subr.bf16.mxu1 %v15828_v21  ;;  %v15891_v14 = vld [vmem:[#allocation16 + $0x1c2c] ss:$16 sps:$4 sm:$0xff]   ;;  %v15886_v21 = vld [vmem:[#allocation16 + $0x1c20] ss:$16 sps:$4 sm:$0xff]  }
 0x707   :  { %10034 = vmatprep.subr.bf16.mxu0 %v15831_v19  ;;  %v15889_v19 = vld [vmem:[#allocation16 + $0x1c28] ss:$16 sps:$4 sm:$0xff]  }
 0x709   :  { %9994 = vmatpush2.bf16.msra.mxu1 %v15826_v12  ;;  %v15894_v12 = vld [vmem:[#allocation16 + $0x1c04] ss:$16 sps:$4 sm:$0xff]  }
 0x70a   :  { %10035 = vmatpush2.bf16.msra.mxu0 %v15829_v29  ;;  %9995 = vmatprep.subr.bf16.mxu1 %v15834_v54  ;;  %v15897_v29 = vld [vmem:[#allocation16 + $0x1c0c] ss:$16 sps:$4 sm:$0xff]   ;;  %v15892_v54 = vld [vmem:[#allocation16 + $0x1c00] ss:$16 sps:$4 sm:$0xff]  }
 0x70b   :  { %10036 = vmatprep.subr.bf16.mxu0 %v15837_v61  ;;  %v15895_v61 = vld [vmem:[#allocation16 + $0x1c08] ss:$16 sps:$4 sm:$0xff]  }
 0x70d   :  { %9996 = vmatpush2.bf16.msra.mxu1 %v15832_v59  ;;  %v15900_v59 = vld [vmem:[#allocation16 + $0x1de4] ss:$16 sps:$4 sm:$0xff]  }
 0x70e   :  { %10037 = vmatpush2.bf16.msra.mxu0 %v15835_v11  ;;  %9997 = vmatprep.subr.bf16.mxu1 %v15840_v22  ;;  %v15903_v11 = vld [vmem:[#allocation16 + $0x1dec] ss:$16 sps:$4 sm:$0xff]   ;;  %v15898_v22 = vld [vmem:[#allocation16 + $0x1de0] ss:$16 sps:$4 sm:$0xff]  }
 0x70f   :  { %10038 = vmatprep.subr.bf16.mxu0 %v15843_v25  ;;  %v15901_v25 = vld [vmem:[#allocation16 + $0x1de8] ss:$16 sps:$4 sm:$0xff]  }
 0x711   :  { %9998 = vmatpush2.bf16.msra.mxu1 %v15838_v49  ;;  %v15906_v49 = vld [vmem:[#allocation16 + $0x1dc4] ss:$16 sps:$4 sm:$0xff]  }
 0x712   :  { %10039 = vmatpush2.bf16.msra.mxu0 %v15841_v55  ;;  %9999 = vmatprep.subr.bf16.mxu1 %v15846_v41  ;;  %v15909_v55 = vld [vmem:[#allocation16 + $0x1dcc] ss:$16 sps:$4 sm:$0xff]   ;;  %v15904_v41 = vld [vmem:[#allocation16 + $0x1dc0] ss:$16 sps:$4 sm:$0xff]  }
 0x713   :  { %10040 = vmatprep.subr.bf16.mxu0 %v15849_v0  ;;  %v15907_v0 = vld [vmem:[#allocation16 + $0x1dc8] ss:$16 sps:$4 sm:$0xff]  }
 0x715   :  { %10000 = vmatpush2.bf16.msra.mxu1 %v15844_v9  ;;  %v15912_v9 = vld [vmem:[#allocation16 + $0x1da4] ss:$16 sps:$4 sm:$0xff]  }
 0x716   :  { %10041 = vmatpush2.bf16.msra.mxu0 %v15847_v60  ;;  %10456 = vmatprep.subr.bf16.mxu1 %v15852_v47  ;;  %v15910_v60 = vld [vmem:[#allocation16 + $0x1da0] ss:$16 sps:$4 sm:$0xff]   ;;  %v15913_v47 = vld [vmem:[#allocation16 + $0x1da8] ss:$16 sps:$4 sm:$0xff]  }
 0x717   :  { %10497 = vmatprep.subr.bf16.mxu0 %v15855_v24  ;;  %v15918_v24 = vld [vmem:[#allocation16 + $0x1d84] ss:$16 sps:$4 sm:$0xff]  }
 0x718   :  { %v8542_v48 = vpop.f32.mrf.mxu1  ;;  %10002 = vmatmul.mubr.bf16.vlgmr.msra.gmra.mxu1 %v14007_v27 }
 0x719   :  { %v17486_v56 = vadd.f32 %v8542_v48, %v17472_v40  ;;  %v8583_v28 = vpop.f32.mrf.mxu0  ;;  %10043 = vmatmul.mubr.bf16.vlgmr.msra.gmra.mxu0 %v14007_v27  ;;  %10457 = vmatpush1.bf16.msra.mxu1 %v15850_v23  ;;  %v15867_v40 = vld [vmem:[#allocation16 + $0x1cac] ss:$16 sps:$4 sm:$0xff]   ;;  %v15916_v23 = vld [vmem:[#allocation16 + $0x1d80] ss:$16 sps:$4 sm:$0xff]   ;;  %v15919_v27 = vld [vmem:[#allocation16 + $0x1d88] ss:$16 sps:$4 sm:$0xff]  }
 0x71a   :  { %v17489_v8 = vadd.f32 %v8583_v28, %v17475_v5  ;;  %10488 = vmatprep.mubr.bf16.mxu1 %v14010_v46  ;;  %10498 = vmatpush1.bf16.msra.mxu0 %v15853_v1  ;;  %v8544_v3 = vpop.f32.mrf.mxu1  ;;  %v15862_v5 = vld [vmem:[#allocation16 + $0x1ca0] ss:$16 sps:$4 sm:$0xff]   ;;  %v15924_v1 = vld [vmem:[#allocation16 + $0x1d64] ss:$16 sps:$4 sm:$0xff]   ;;  %v15925_v48 = vld [vmem:[#allocation16 + $0x1d68] ss:$16 sps:$4 sm:$0xff]  }
 0x71b   :  { %10529 = vmatprep.mubr.bf16.mxu0 %v14010_v46  ;;  %v17492_v37 = vadd.f32 %v8544_v3, %v17478_v36  ;;  %v8585_v34 = vpop.f32.mrf.mxu0  ;;  %10458 = vmatprep.subr.bf16.mxu1 %v15858_v33  ;;  %v15873_v36 = vld [vmem:[#allocation16 + $0x1c8c] ss:$16 sps:$4 sm:$0xff]   ;;  %v15922_v46 = vld [vmem:[#allocation16 + $0x1d60] ss:$16 sps:$4 sm:$0xff]   ;;  %v15931_v3 = vld [vmem:[#allocation16 + $0x1d48] ss:$16 sps:$4 sm:$0xff]  }
 0x71c   :  { %v17495_v42 = vadd.f32 %v8585_v34, %v17481_v2  ;;  %v8546_v20 = vpop.f32.mrf.mxu1  ;;  %10499 = vmatprep.subr.bf16.mxu0 %v15861_v62  ;;  %v15876_v2 = vld [vmem:[#allocation16 + $0x1c64] ss:$16 sps:$4 sm:$0xff]   ;;  %v15927_v33 = vld [vmem:[#allocation16 + $0x1d6c] ss:$16 sps:$4 sm:$0xff]   ;;  %v15934_v34 = vld [vmem:[#allocation16 + $0x1d20] ss:$16 sps:$4 sm:$0xff]  }
 0x71d   :  { %v8587_v30 = vpop.f32.mrf.mxu0  ;;  %10459 = vmatpush1.bf16.msra.mxu1 %v15856_v16  ;;  %v15930_v62 = vld [vmem:[#allocation16 + $0x1d44] ss:$16 sps:$4 sm:$0xff]   ;;  %v15933_v28 = vld [vmem:[#allocation16 + $0x1d4c] ss:$16 sps:$4 sm:$0xff]   ;;  %v15928_v16 = vld [vmem:[#allocation16 + $0x1d40] ss:$16 sps:$4 sm:$0xff]  }
 0x71e   :  { %10500 = vmatpush1.bf16.msra.mxu0 %v15859_v15  ;;  %v8547_v63 = vpop.f32.mrf.mxu1  ;;  %10460 = vmatprep.subr.bf16.mxu1 %v15864_v51  ;;  %v15936_v15 = vld [vmem:[#allocation16 + $0x1d24] ss:$16 sps:$4 sm:$0xff]   ;;  %v15939_v51 = vld [vmem:[#allocation16 + $0x1d2c] ss:$16 sps:$4 sm:$0xff]  }
 0x71f   :  { %v8588_v6 = vpop.f32.mrf.mxu0  ;;  %10501 = vmatprep.subr.bf16.mxu0 %v15867_v40  ;;  %v15937_v40 = vld [vmem:[#allocation16 + $0x1d28] ss:$16 sps:$4 sm:$0xff]   ;;  %v15942_v20 = vld [vmem:[#allocation16 + $0x1d04] ss:$16 sps:$4 sm:$0xff]   ;;  %v15945_v30 = vld [vmem:[#allocation16 + $0x1d0c] ss:$16 sps:$4 sm:$0xff]  }
 0x720   :  { %v3134_v63 = vmax.f32 %v17325_v58, 0.0  ;;  %v15951_v6 = vld [vmem:[#allocation16 + $0x1eec] ss:$16 sps:$4 sm:$0xff]  }
 0x721   :  { %10461 = vmatpush1.bf16.msra.mxu1 %v15862_v5  ;;  %v15940_v5 = vld [vmem:[#allocation16 + $0x1d00] ss:$16 sps:$4 sm:$0xff]   ;;  %v15957_v58 = vld [vmem:[#allocation16 + $0x1ecc] ss:$16 sps:$4 sm:$0xff]  }
 0x722   :  { %10502 = vmatpush1.bf16.msra.mxu0 %v15865_v31  ;;  %10462 = vmatprep.subr.bf16.mxu1 %v15870_v43  ;;  %v15943_v31 = vld [vmem:[#allocation16 + $0x1d08] ss:$16 sps:$4 sm:$0xff]   ;;  %v15948_v43 = vld [vmem:[#allocation16 + $0x1ee4] ss:$16 sps:$4 sm:$0xff]  }
 0x723   :  { %10503 = vmatprep.subr.bf16.mxu0 %v15873_v36  ;;  %v3137_v36 = vmax.f32 %v17336_v26, 0.0 }
 0x725   :  { %10463 = vmatpush1.bf16.msra.mxu1 %v15868_v7  ;;  %v15946_v7 = vld [vmem:[#allocation16 + $0x1ee0] ss:$16 sps:$4 sm:$0xff]  }
 0x726   :  { %10504 = vmatpush1.bf16.msra.mxu0 %v15871_v50  ;;  %10464 = vmatprep.subr.bf16.mxu1 %v15876_v2  ;;  %v14009_v50 = vpack.c.bf16 %v3134_v63, %v3134_v63  ;;  %v15949_v2 = vld [vmem:[#allocation16 + $0x1ee8] ss:$16 sps:$4 sm:$0xff]  }
 0x727   :  { %10505 = vmatprep.subr.bf16.mxu0 %v15879_v39  ;;  %v15954_v39 = vld [vmem:[#allocation16 + $0x1ec4] ss:$16 sps:$4 sm:$0xff]   ;;  %v16009_v63 = vld [vmem:[#allocation16 + $0x1fa8] ss:$16 sps:$4 sm:$0xff]  }
 0x729   :  { %10465 = vmatpush1.bf16.msra.mxu1 %v15874_v32  ;;  %v14012_v32 = vpack.c.bf16 %v3137_v36, %v3137_v36  ;;  %v16015_v36 = vld [vmem:[#allocation16 + $0x1f88] ss:$16 sps:$4 sm:$0xff]  }
 0x72a   :  { %10506 = vmatpush1.bf16.msra.mxu0 %v15877_v18  ;;  %10466 = vmatprep.subr.bf16.mxu1 %v15882_v10 }
 0x72b   :  { %10507 = vmatprep.subr.bf16.mxu0 %v15885_v53 }
 0x72d   :  { %10467 = vmatpush1.bf16.msra.mxu1 %v15880_v45  ;;  %v15952_v45 = vld [vmem:[#allocation16 + $0x1ec0] ss:$16 sps:$4 sm:$0xff]  }
 0x72e   :  { %10508 = vmatpush1.bf16.msra.mxu0 %v15883_v17  ;;  %10468 = vmatprep.subr.bf16.mxu1 %v15888_v4  ;;  %v15955_v4 = vld [vmem:[#allocation16 + $0x1ec8] ss:$16 sps:$4 sm:$0xff]  }
 0x72f   :  { %10509 = vmatprep.subr.bf16.mxu0 %v15891_v14  ;;  %v15960_v14 = vld [vmem:[#allocation16 + $0x1ea4] ss:$16 sps:$4 sm:$0xff]  }
 0x731   :  { %10469 = vmatpush1.bf16.msra.mxu1 %v15886_v21 }
 0x732   :  { %10510 = vmatpush1.bf16.msra.mxu0 %v15889_v19  ;;  %10470 = vmatprep.subr.bf16.mxu1 %v15894_v12 }
 0x733   :  { %10511 = vmatprep.subr.bf16.mxu0 %v15897_v29 }
 0x735   :  { %10471 = vmatpush1.bf16.msra.mxu1 %v15892_v54 }
 0x736   :  { %10512 = vmatpush1.bf16.msra.mxu0 %v15895_v61  ;;  %10472 = vmatprep.subr.bf16.mxu1 %v15900_v59  ;;  %v15961_v59 = vld [vmem:[#allocation16 + $0x1ea8] ss:$16 sps:$4 sm:$0xff]  }
 0x737   :  { %10513 = vmatprep.subr.bf16.mxu0 %v15903_v11  ;;  %v15966_v11 = vld [vmem:[#allocation16 + $0x1e84] ss:$16 sps:$4 sm:$0xff]  }
 0x739   :  { %10473 = vmatpush2.bf16.msra.mxu1 %v15898_v22 }
 0x73a   :  { %10514 = vmatpush2.bf16.msra.mxu0 %v15901_v25  ;;  %10474 = vmatprep.subr.bf16.mxu1 %v15906_v49  ;;  %v15964_v25 = vld [vmem:[#allocation16 + $0x1e80] ss:$16 sps:$4 sm:$0xff]   ;;  %v15967_v49 = vld [vmem:[#allocation16 + $0x1e88] ss:$16 sps:$4 sm:$0xff]  }
 0x73b   :  { %10515 = vmatprep.subr.bf16.mxu0 %v15909_v55  ;;  %v15975_v55 = vld [vmem:[#allocation16 + $0x1e6c] ss:$16 sps:$4 sm:$0xff]  }
 0x73d   :  { %10475 = vmatpush2.bf16.msra.mxu1 %v15904_v41  ;;  %v15970_v41 = vld [vmem:[#allocation16 + $0x1e60] ss:$16 sps:$4 sm:$0xff]  }
 0x73e   :  { %10516 = vmatpush2.bf16.msra.mxu0 %v15907_v0  ;;  %10476 = vmatprep.subr.bf16.mxu1 %v15912_v9  ;;  %v15973_v0 = vld [vmem:[#allocation16 + $0x1e68] ss:$16 sps:$4 sm:$0xff]   ;;  %v15978_v9 = vld [vmem:[#allocation16 + $0x1e44] ss:$16 sps:$4 sm:$0xff]  }
 0x73f   :  { %10517 = vmatprep.subr.bf16.mxu0 %v15915_v44  ;;  %v15981_v44 = vld [vmem:[#allocation16 + $0x1e4c] ss:$16 sps:$4 sm:$0xff]  }
 0x741   :  { %10477 = vmatpush2.bf16.msra.mxu1 %v15910_v60  ;;  %v15976_v60 = vld [vmem:[#allocation16 + $0x1e40] ss:$16 sps:$4 sm:$0xff]  }
 0x742   :  { %10518 = vmatpush2.bf16.msra.mxu0 %v15913_v47  ;;  %10478 = vmatprep.subr.bf16.mxu1 %v15918_v24  ;;  %v15979_v47 = vld [vmem:[#allocation16 + $0x1e48] ss:$16 sps:$4 sm:$0xff]   ;;  %v15984_v24 = vld [vmem:[#allocation16 + $0x1e24] ss:$16 sps:$4 sm:$0xff]  }
 0x743   :  { %10519 = vmatprep.subr.bf16.mxu0 %v15921_v35  ;;  %v15987_v35 = vld [vmem:[#allocation16 + $0x1e2c] ss:$16 sps:$4 sm:$0xff]  }
 0x745   :  { %10479 = vmatpush2.bf16.msra.mxu1 %v15916_v23  ;;  %v15982_v23 = vld [vmem:[#allocation16 + $0x1e20] ss:$16 sps:$4 sm:$0xff]  }
 0x746   :  { %10520 = vmatpush2.bf16.msra.mxu0 %v15919_v27  ;;  %10480 = vmatprep.subr.bf16.mxu1 %v15924_v1  ;;  %v15985_v27 = vld [vmem:[#allocation16 + $0x1e28] ss:$16 sps:$4 sm:$0xff]   ;;  %v15990_v1 = vld [vmem:[#allocation16 + $0x1e04] ss:$16 sps:$4 sm:$0xff]  }
 0x747   :  { %10521 = vmatprep.subr.bf16.mxu0 %v15927_v33  ;;  %v15993_v33 = vld [vmem:[#allocation16 + $0x1e0c] ss:$16 sps:$4 sm:$0xff]  }
 0x749   :  { %10481 = vmatpush2.bf16.msra.mxu1 %v15922_v46  ;;  %v15988_v46 = vld [vmem:[#allocation16 + $0x1e00] ss:$16 sps:$4 sm:$0xff]  }
 0x74a   :  { %10522 = vmatpush2.bf16.msra.mxu0 %v15925_v48  ;;  %10482 = vmatprep.subr.bf16.mxu1 %v15930_v62  ;;  %v15991_v48 = vld [vmem:[#allocation16 + $0x1e08] ss:$16 sps:$4 sm:$0xff]   ;;  %v15996_v62 = vld [vmem:[#allocation16 + $0x1fe4] ss:$16 sps:$4 sm:$0xff]  }
 0x74b   :  { %10523 = vmatprep.subr.bf16.mxu0 %v15933_v28  ;;  %v15999_v28 = vld [vmem:[#allocation16 + $0x1fec] ss:$16 sps:$4 sm:$0xff]  }
 0x74d   :  { %10483 = vmatpush2.bf16.msra.mxu1 %v15928_v16  ;;  %v15994_v16 = vld [vmem:[#allocation16 + $0x1fe0] ss:$16 sps:$4 sm:$0xff]  }
 0x74e   :  { %10524 = vmatpush2.bf16.msra.mxu0 %v15931_v3  ;;  %10484 = vmatprep.subr.bf16.mxu1 %v15936_v15  ;;  %v15997_v3 = vld [vmem:[#allocation16 + $0x1fe8] ss:$16 sps:$4 sm:$0xff]   ;;  %v16002_v15 = vld [vmem:[#allocation16 + $0x1fc4] ss:$16 sps:$4 sm:$0xff]  }
 0x74f   :  { %10525 = vmatprep.subr.bf16.mxu0 %v15939_v51  ;;  %v16005_v51 = vld [vmem:[#allocation16 + $0x1fcc] ss:$16 sps:$4 sm:$0xff]  }
 0x751   :  { %10485 = vmatpush2.bf16.msra.mxu1 %v15934_v34  ;;  %v16000_v34 = vld [vmem:[#allocation16 + $0x1fc0] ss:$16 sps:$4 sm:$0xff]  }
 0x752   :  { %10526 = vmatpush2.bf16.msra.mxu0 %v15937_v40  ;;  %10486 = vmatprep.subr.bf16.mxu1 %v15942_v20  ;;  %v16003_v40 = vld [vmem:[#allocation16 + $0x1fc8] ss:$16 sps:$4 sm:$0xff]   ;;  %v16008_v20 = vld [vmem:[#allocation16 + $0x1fa4] ss:$16 sps:$4 sm:$0xff]  }
 0x753   :  { %10527 = vmatprep.subr.bf16.mxu0 %v15945_v30  ;;  %v16011_v30 = vld [vmem:[#allocation16 + $0x1fac] ss:$16 sps:$4 sm:$0xff]  }
 0x755   :  { %10487 = vmatpush2.bf16.msra.mxu1 %v15940_v5  ;;  %v16006_v5 = vld [vmem:[#allocation16 + $0x1fa0] ss:$16 sps:$4 sm:$0xff]  }
 0x756   :  { %10528 = vmatpush2.bf16.msra.mxu0 %v15943_v31  ;;  %10943 = vmatprep.subr.bf16.mxu1 %v15948_v43  ;;  %v16014_v31 = vld [vmem:[#allocation16 + $0x1f84] ss:$16 sps:$4 sm:$0xff]   ;;  %v16017_v43 = vld [vmem:[#allocation16 + $0x1f8c] ss:$16 sps:$4 sm:$0xff]  }
 0x757   :  { %10984 = vmatprep.subr.bf16.mxu0 %v15951_v6  ;;  %v16012_v6 = vld [vmem:[#allocation16 + $0x1f80] ss:$16 sps:$4 sm:$0xff]  }
 0x758   :  { %v9029_v18 = vpop.f32.mrf.mxu1  ;;  %10489 = vmatmul.mubr.bf16.vlgmr.msra.gmra.mxu1 %v14009_v50 }
 0x759   :  { %v17500_v10 = vadd.f32 %v9029_v18, %v17486_v56  ;;  %v9070_v53 = vpop.f32.mrf.mxu0  ;;  %10530 = vmatmul.mubr.bf16.vlgmr.msra.gmra.mxu0 %v14009_v50  ;;  %10944 = vmatpush1.bf16.msra.mxu1 %v15946_v7  ;;  %v15963_v56 = vld [vmem:[#allocation16 + $0x1eac] ss:$16 sps:$4 sm:$0xff]   ;;  %v16020_v7 = vld [vmem:[#allocation16 + $0x1f64] ss:$16 sps:$4 sm:$0xff]  }
 0x75a   :  { %v17503_v26 = vadd.f32 %v9070_v53, %v17489_v8  ;;  %10975 = vmatprep.mubr.bf16.mxu1 %v14012_v32  ;;  %10985 = vmatpush1.bf16.msra.mxu0 %v15949_v2  ;;  %v9031_v17 = vpop.f32.mrf.mxu1  ;;  %v15958_v8 = vld [vmem:[#allocation16 + $0x1ea0] ss:$16 sps:$4 sm:$0xff]   ;;  %v16023_v50 = vld [vmem:[#allocation16 + $0x1f6c] ss:$16 sps:$4 sm:$0xff]   ;;  %v16027_v53 = vld [vmem:[#allocation16 + $0x1f48] ss:$16 sps:$4 sm:$0xff]  }
 0x75b   :  { %11016 = vmatprep.mubr.bf16.mxu0 %v14012_v32  ;;  %v17506_v21 = vadd.f32 %v9031_v17, %v17492_v37  ;;  %v9072_v19 = vpop.f32.mrf.mxu0  ;;  %10945 = vmatprep.subr.bf16.mxu1 %v15954_v39  ;;  %v15969_v37 = vld [vmem:[#allocation16 + $0x1e8c] ss:$16 sps:$4 sm:$0xff]   ;;  %v16018_v2 = vld [vmem:[#allocation16 + $0x1f60] ss:$16 sps:$4 sm:$0xff]   ;;  %v16021_v39 = vld [vmem:[#allocation16 + $0x1f68] ss:$16 sps:$4 sm:$0xff]  }
 0x75c   :  { %v17509_v12 = vadd.f32 %v9072_v19, %v17495_v42  ;;  %v9033_v29 = vpop.f32.mrf.mxu1  ;;  %10986 = vmatprep.subr.bf16.mxu0 %v15957_v58  ;;  %v15972_v42 = vld [vmem:[#allocation16 + $0x1e64] ss:$16 sps:$4 sm:$0xff]   ;;  %v16029_v18 = vld [vmem:[#allocation16 + $0x1f4c] ss:$16 sps:$4 sm:$0xff]   ;;  %v16024_v58 = vld [vmem:[#allocation16 + $0x1f40] ss:$16 sps:$4 sm:$0xff]  }
 0x75d   :  { %v9074_v54 = vpop.f32.mrf.mxu0  ;;  %10946 = vmatpush1.bf16.msra.mxu1 %v15952_v45  ;;  %v16026_v32 = vld [vmem:[#allocation16 + $0x1f44] ss:$16 sps:$4 sm:$0xff]   ;;  %v16035_v17 = vld [vmem:[#allocation16 + $0x1f2c] ss:$16 sps:$4 sm:$0xff]   ;;  %v16036_v29 = vld [vmem:[#allocation16 + $0x1f00] ss:$16 sps:$4 sm:$0xff]  }
 0x75e   :  { %10987 = vmatpush1.bf16.msra.mxu0 %v15955_v4  ;;  %v9034_v61 = vpop.f32.mrf.mxu1  ;;  %10947 = vmatprep.subr.bf16.mxu1 %v15960_v14  ;;  %v16032_v45 = vld [vmem:[#allocation16 + $0x1f24] ss:$16 sps:$4 sm:$0xff]   ;;  %v16030_v4 = vld [vmem:[#allocation16 + $0x1f20] ss:$16 sps:$4 sm:$0xff]   ;;  %v16033_v14 = vld [vmem:[#allocation16 + $0x1f28] ss:$16 sps:$4 sm:$0xff]  }
 0x75f   :  { %v9075_v22 = vpop.f32.mrf.mxu0  ;;  %10988 = vmatprep.subr.bf16.mxu0 %v15963_v56  ;;  %v16038_v19 = vld [vmem:[#allocation16 + $0x1f04] ss:$16 sps:$4 sm:$0xff]   ;;  %v16041_v56 = vld [vmem:[#allocation16 + $0x1f0c] ss:$16 sps:$4 sm:$0xff]   ;;  %v3136_v54 = vmax.f32 %v17333_v13, 0.0 }
 0x761   :  { %10948 = vmatpush1.bf16.msra.mxu1 %v15958_v8  ;;  %v16039_v8 = vld [vmem:[#allocation16 + $0x1f08] ss:$16 sps:$4 sm:$0xff]   ;;  %v14011_v61 = vpack.c.bf16 %v3136_v54, %v3136_v54  ;;  %v16108_v54 = vld [vmem:[#allocation19 + $0x180] ss:$16 sps:$4 sm:$0xff]  }
 0x762   :  { %10989 = vmatpush1.bf16.msra.mxu0 %v15961_v59  ;;  %10949 = vmatprep.subr.bf16.mxu1 %v15966_v11 }
 0x763   :  { %10990 = vmatprep.subr.bf16.mxu0 %v15969_v37 }
 0x765   :  { %10950 = vmatpush1.bf16.msra.mxu1 %v15964_v25 }
 0x766   :  { %10991 = vmatpush1.bf16.msra.mxu0 %v15967_v49  ;;  %10951 = vmatprep.subr.bf16.mxu1 %v15972_v42 }
 0x767   :  { %10992 = vmatprep.subr.bf16.mxu0 %v15975_v55 }
 0x769   :  { %10952 = vmatpush1.bf16.msra.mxu1 %v15970_v41 }
 0x76a   :  { %10993 = vmatpush1.bf16.msra.mxu0 %v15973_v0  ;;  %10953 = vmatprep.subr.bf16.mxu1 %v15978_v9 }
 0x76b   :  { %10994 = vmatprep.subr.bf16.mxu0 %v15981_v44  ;;  %v16042_v44 = vld [vmem:[#allocation19 + $0xe0] ss:$16 sps:$4 sm:$0xff]  }
 0x76d   :  { %10954 = vmatpush1.bf16.msra.mxu1 %v15976_v60  ;;  %v16045_v60 = vld [vmem:[#allocation19 + $0x2e0] ss:$16 sps:$4 sm:$0xff]  }
 0x76e   :  { %10995 = vmatpush1.bf16.msra.mxu0 %v15979_v47  ;;  %10955 = vmatprep.subr.bf16.mxu1 %v15984_v24  ;;  %v16047_v47 = vld [vmem:[#allocation19 + $0x2e4] ss:$16 sps:$4 sm:$0xff]  }
 0x76f   :  { %10996 = vmatprep.subr.bf16.mxu0 %v15987_v35  ;;  %v16050_v24 = vld [vmem:[#allocation19 + $0xc4] ss:$16 sps:$4 sm:$0xff]   ;;  %v16048_v35 = vld [vmem:[#allocation19 + $0xc0] ss:$16 sps:$4 sm:$0xff]  }
 0x771   :  { %10956 = vmatpush1.bf16.msra.mxu1 %v15982_v23  ;;  %v16056_v23 = vld [vmem:[#allocation19 + $0xa4] ss:$16 sps:$4 sm:$0xff]  }
 0x772   :  { %10997 = vmatpush1.bf16.msra.mxu0 %v15985_v27  ;;  %10957 = vmatprep.subr.bf16.mxu1 %v15990_v1  ;;  %v16054_v27 = vld [vmem:[#allocation19 + $0xa0] ss:$16 sps:$4 sm:$0xff]  }
 0x773   :  { %10998 = vmatprep.subr.bf16.mxu0 %v15993_v33  ;;  %v16057_v1 = vld [vmem:[#allocation19 + $0x2a0] ss:$16 sps:$4 sm:$0xff]   ;;  %v16062_v33 = vld [vmem:[#allocation19 + $0x84] ss:$16 sps:$4 sm:$0xff]  }
 0x775   :  { %10958 = vmatpush1.bf16.msra.mxu1 %v15988_v46  ;;  %v16065_v46 = vld [vmem:[#allocation19 + $0x284] ss:$16 sps:$4 sm:$0xff]  }
 0x776   :  { %10999 = vmatpush1.bf16.msra.mxu0 %v15991_v48  ;;  %10959 = vmatprep.subr.bf16.mxu1 %v15996_v62  ;;  %v16060_v48 = vld [vmem:[#allocation19 + $0x80] ss:$16 sps:$4 sm:$0xff]  }
 0x777   :  { %11000 = vmatprep.subr.bf16.mxu0 %v15999_v28  ;;  %v16063_v62 = vld [vmem:[#allocation19 + $0x280] ss:$16 sps:$4 sm:$0xff]   ;;  %v16068_v28 = vld [vmem:[#allocation19 + $0x64] ss:$16 sps:$4 sm:$0xff]  }
 0x779   :  { %10960 = vmatpush2.bf16.msra.mxu1 %v15994_v16  ;;  %v16071_v16 = vld [vmem:[#allocation19 + $0x264] ss:$16 sps:$4 sm:$0xff]  }
 0x77a   :  { %11001 = vmatpush2.bf16.msra.mxu0 %v15997_v3  ;;  %10961 = vmatprep.subr.bf16.mxu1 %v16002_v15  ;;  %v16066_v3 = vld [vmem:[#allocation19 + $0x60] ss:$16 sps:$4 sm:$0xff]  }
 0x77b   :  { %11002 = vmatprep.subr.bf16.mxu0 %v16005_v51  ;;  %v16069_v15 = vld [vmem:[#allocation19 + $0x260] ss:$16 sps:$4 sm:$0xff]   ;;  %v16074_v51 = vld [vmem:[#allocation19 + $0x44] ss:$16 sps:$4 sm:$0xff]  }
 0x77d   :  { %10962 = vmatpush2.bf16.msra.mxu1 %v16000_v34  ;;  %v16077_v34 = vld [vmem:[#allocation19 + $0x244] ss:$16 sps:$4 sm:$0xff]  }
 0x77e   :  { %11003 = vmatpush2.bf16.msra.mxu0 %v16003_v40  ;;  %10963 = vmatprep.subr.bf16.mxu1 %v16008_v20  ;;  %v16072_v40 = vld [vmem:[#allocation19 + $0x40] ss:$16 sps:$4 sm:$0xff]  }
 0x77f   :  { %11004 = vmatprep.subr.bf16.mxu0 %v16011_v30  ;;  %v16075_v20 = vld [vmem:[#allocation19 + $0x240] ss:$16 sps:$4 sm:$0xff]   ;;  %v16080_v30 = vld [vmem:[#allocation19 + $0x24] ss:$16 sps:$4 sm:$0xff]  }
 0x781   :  { %10964 = vmatpush2.bf16.msra.mxu1 %v16006_v5  ;;  %v16083_v5 = vld [vmem:[#allocation19 + $0x224] ss:$16 sps:$4 sm:$0xff]  }
 0x782   :  { %11005 = vmatpush2.bf16.msra.mxu0 %v16009_v63  ;;  %10965 = vmatprep.subr.bf16.mxu1 %v16014_v31  ;;  %v16078_v63 = vld [vmem:[#allocation19 + $0x20] ss:$16 sps:$4 sm:$0xff]  }
 0x783   :  { %11006 = vmatprep.subr.bf16.mxu0 %v16017_v43  ;;  %v16081_v31 = vld [vmem:[#allocation19 + $0x220] ss:$16 sps:$4 sm:$0xff]   ;;  %v16086_v43 = vld [vmem:[#allocation19 + $0x4] ss:$16 sps:$4 sm:$0xff]  }
 0x785   :  { %10966 = vmatpush2.bf16.msra.mxu1 %v16012_v6  ;;  %v16089_v6 = vld [vmem:[#allocation19 + $0x204] ss:$16 sps:$4 sm:$0xff]  }
 0x786   :  { %11007 = vmatpush2.bf16.msra.mxu0 %v16015_v36  ;;  %10967 = vmatprep.subr.bf16.mxu1 %v16020_v7  ;;  %v16084_v36 = vld [vmem:[#allocation19] ss:$16 sps:$4 sm:$0xff]  }
 0x787   :  { %11008 = vmatprep.subr.bf16.mxu0 %v16023_v50  ;;  %v16087_v7 = vld [vmem:[#allocation19 + $0x200] ss:$16 sps:$4 sm:$0xff]   ;;  %v16092_v50 = vld [vmem:[#allocation19 + $0x1e4] ss:$16 sps:$4 sm:$0xff]  }
 0x789   :  { %10968 = vmatpush2.bf16.msra.mxu1 %v16018_v2  ;;  %v16095_v2 = vld [vmem:[#allocation19 + $0x3e4] ss:$16 sps:$4 sm:$0xff]  }
 0x78a   :  { %11009 = vmatpush2.bf16.msra.mxu0 %v16021_v39  ;;  %10969 = vmatprep.subr.bf16.mxu1 %v16026_v32  ;;  %v16090_v39 = vld [vmem:[#allocation19 + $0x1e0] ss:$16 sps:$4 sm:$0xff]  }
 0x78b   :  { %11010 = vmatprep.subr.bf16.mxu0 %v16029_v18  ;;  %v16093_v32 = vld [vmem:[#allocation19 + $0x3e0] ss:$16 sps:$4 sm:$0xff]   ;;  %v16098_v18 = vld [vmem:[#allocation19 + $0x1c4] ss:$16 sps:$4 sm:$0xff]  }
 0x78d   :  { %10970 = vmatpush2.bf16.msra.mxu1 %v16024_v58  ;;  %v16101_v58 = vld [vmem:[#allocation19 + $0x3c4] ss:$16 sps:$4 sm:$0xff]  }
 0x78e   :  { %11011 = vmatpush2.bf16.msra.mxu0 %v16027_v53  ;;  %10971 = vmatprep.subr.bf16.mxu1 %v16032_v45  ;;  %v16096_v53 = vld [vmem:[#allocation19 + $0x1c0] ss:$16 sps:$4 sm:$0xff]  }
 0x78f   :  { %11012 = vmatprep.subr.bf16.mxu0 %v16035_v17  ;;  %v16099_v45 = vld [vmem:[#allocation19 + $0x3c0] ss:$16 sps:$4 sm:$0xff]   ;;  %v16104_v17 = vld [vmem:[#allocation19 + $0x1a4] ss:$16 sps:$4 sm:$0xff]  }
 0x791   :  { %10972 = vmatpush2.bf16.msra.mxu1 %v16030_v4  ;;  %v16107_v4 = vld [vmem:[#allocation19 + $0x3a4] ss:$16 sps:$4 sm:$0xff]  }
 0x792   :  { %11013 = vmatpush2.bf16.msra.mxu0 %v16033_v14  ;;  %10973 = vmatprep.subr.bf16.mxu1 %v16038_v19  ;;  %v16102_v14 = vld [vmem:[#allocation19 + $0x1a0] ss:$16 sps:$4 sm:$0xff]  }
 0x793   :  { %11014 = vmatprep.subr.bf16.mxu0 %v16041_v56  ;;  %v16105_v19 = vld [vmem:[#allocation19 + $0x3a0] ss:$16 sps:$4 sm:$0xff]   ;;  %v16110_v56 = vld [vmem:[#allocation19 + $0x184] ss:$16 sps:$4 sm:$0xff]  }
 0x795   :  { %10974 = vmatpush2.bf16.msra.mxu1 %v16036_v29  ;;  %v16113_v29 = vld [vmem:[#allocation19 + $0x384] ss:$16 sps:$4 sm:$0xff]  }
 0x796   :  { %11015 = vmatpush2.bf16.msra.mxu0 %v16039_v8  ;;  %v16111_v8 = vld [vmem:[#allocation19 + $0x380] ss:$16 sps:$4 sm:$0xff]  }
 0x797   :  { %11902 = vmatprep.subr.bf16.mxu0 %v16047_v47 }
 0x798   :  { %v9516_v59 = vpop.f32.mrf.mxu1  ;;  %10976 = vmatmul.mubr.bf16.vlgmr.msra.gmra.mxu1 %v14011_v61 }
 0x799   :  { %v17513_v11 = vadd.f32 %v9516_v59, %v17500_v10  ;;  %v9557_v22 = vpop.f32.mrf.mxu0  ;;  %11017 = vmatmul.mubr.bf16.vlgmr.msra.gmra.mxu0 %v14011_v61  ;;  %v16044_v10 = vld [vmem:[#allocation19 + $0xe4] ss:$16 sps:$4 sm:$0xff]  }
 0x79a   :  { %v17516_v37 = vadd.f32 %v9557_v22, %v17503_v26  ;;  %v9518_v25 = vpop.f32.mrf.mxu1  ;;  %11861 = vmatprep.subr.bf16.mxu1 %v16044_v10  ;;  %v16053_v26 = vld [vmem:[#allocation19 + $0x2c4] ss:$16 sps:$4 sm:$0xff]   ;;  %11903 = vmatpush1.bf16.msra.mxu0 %v16045_v60  ;;  %v16114_v22 = vld [vmem:[#allocation19 + $0x160] ss:$16 sps:$4 sm:$0xff]  }
 0x79b   :  { %v17519_v13 = vadd.f32 %v9518_v25, %v17506_v21  ;;  %v9559_v49 = vpop.f32.mrf.mxu0  ;;  %11862 = vmatpush1.bf16.msra.mxu1 %v16042_v44  ;;  %v16051_v21 = vld [vmem:[#allocation19 + $0x2c0] ss:$16 sps:$4 sm:$0xff]   ;;  %11904 = vmatprep.subr.bf16.mxu0 %v16053_v26  ;;  %v16116_v61 = vld [vmem:[#allocation19 + $0x164] ss:$16 sps:$4 sm:$0xff]  }
 0x79c   :  { %v17522_v42 = vadd.f32 %v9559_v49, %v17509_v12  ;;  %v9520_v55 = vpop.f32.mrf.mxu1  ;;  %11863 = vmatprep.subr.bf16.mxu1 %v16050_v24  ;;  %v16059_v12 = vld [vmem:[#allocation19 + $0x2a4] ss:$16 sps:$4 sm:$0xff]   ;;  %v16117_v25 = vld [vmem:[#allocation19 + $0x360] ss:$16 sps:$4 sm:$0xff]  }
 0x79d   :  { %v9561_v41 = vpop.f32.mrf.mxu0  ;;  %v16119_v59 = vld [vmem:[#allocation19 + $0x364] ss:$16 sps:$4 sm:$0xff]  }
 0x79e   :  { %v9521_v0 = vpop.f32.mrf.mxu1  ;;  %11905 = vmatpush1.bf16.msra.mxu0 %v16051_v21  ;;  %v16122_v49 = vld [vmem:[#allocation19 + $0x144] ss:$16 sps:$4 sm:$0xff]   ;;  %v16120_v41 = vld [vmem:[#allocation19 + $0x140] ss:$16 sps:$4 sm:$0xff]  }
 0x79f   :  { %v9562_v9 = vpop.f32.mrf.mxu0  ;;  %11864 = vmatpush1.bf16.msra.mxu1 %v16048_v35  ;;  %11906 = vmatprep.subr.bf16.mxu0 %v16059_v12  ;;  %v16125_v55 = vld [vmem:[#allocation19 + $0x344] ss:$16 sps:$4 sm:$0xff]   ;;  %v16123_v0 = vld [vmem:[#allocation19 + $0x340] ss:$16 sps:$4 sm:$0xff]  }
 0x7a0   :  { %11865 = vmatprep.subr.bf16.mxu1 %v16056_v23 }
 0x7a2   :  { %11907 = vmatpush1.bf16.msra.mxu0 %v16057_v1  ;;  %v16128_v1 = vld [vmem:[#allocation19 + $0x124] ss:$16 sps:$4 sm:$0xff]  }
 0x7a3   :  { %11866 = vmatpush1.bf16.msra.mxu1 %v16054_v27  ;;  %11908 = vmatprep.subr.bf16.mxu0 %v16065_v46  ;;  %v16126_v46 = vld [vmem:[#allocation19 + $0x120] ss:$16 sps:$4 sm:$0xff]  }
 0x7a4   :  { %11867 = vmatprep.subr.bf16.mxu1 %v16062_v33  ;;  %v16131_v33 = vld [vmem:[#allocation19 + $0x324] ss:$16 sps:$4 sm:$0xff]  }
 0x7a6   :  { %11909 = vmatpush1.bf16.msra.mxu0 %v16063_v62  ;;  %v16135_v62 = vld [vmem:[#allocation19 + $0x300] ss:$16 sps:$4 sm:$0xff]  }
 0x7a7   :  { %11868 = vmatpush1.bf16.msra.mxu1 %v16060_v48  ;;  %11910 = vmatprep.subr.bf16.mxu0 %v16071_v16  ;;  %v16129_v48 = vld [vmem:[#allocation19 + $0x320] ss:$16 sps:$4 sm:$0xff]  }
 0x7a8   :  { %11869 = vmatprep.subr.bf16.mxu1 %v16068_v28  ;;  %v16137_v28 = vld [vmem:[#allocation19 + $0x304] ss:$16 sps:$4 sm:$0xff]  }
 0x7aa   :  { %11911 = vmatpush1.bf16.msra.mxu0 %v16069_v15 }
 0x7ab   :  { %11870 = vmatpush1.bf16.msra.mxu1 %v16066_v3  ;;  %11912 = vmatprep.subr.bf16.mxu0 %v16077_v34 }
 0x7ac   :  { %11871 = vmatprep.subr.bf16.mxu1 %v16074_v51 }
 0x7ae   :  { %11913 = vmatpush1.bf16.msra.mxu0 %v16075_v20 }
 0x7af   :  { %11872 = vmatpush1.bf16.msra.mxu1 %v16072_v40  ;;  %11914 = vmatprep.subr.bf16.mxu0 %v16083_v5 }
 0x7b0   :  { %11873 = vmatprep.subr.bf16.mxu1 %v16080_v30 }
 0x7b2   :  { %11915 = vmatpush1.bf16.msra.mxu0 %v16081_v31  ;;  %v11037_v31 = vld [vmem:[#allocation17] sm:$0xf] }
 0x7b3   :  { %11874 = vmatpush1.bf16.msra.mxu1 %v16078_v63  ;;  %11916 = vmatprep.subr.bf16.mxu0 %v16089_v6  ;;  %v11053_v6 = vsub.s32 3, %v17163_v52 }
 0x7b4   :  { %11875 = vmatprep.subr.bf16.mxu1 %v16086_v43  ;;  %v11049_v43 = vsub.s32 2, %v17163_v52 }
 0x7b6   :  { %11917 = vmatpush1.bf16.msra.mxu0 %v16087_v7 }
 0x7b7   :  { %11876 = vmatpush1.bf16.msra.mxu1 %v16084_v36  ;;  %11918 = vmatprep.subr.bf16.mxu0 %v16095_v2  ;;  %v11042_v36 = vrot.slane %v11037_v31, %v17177_v57 }
 0x7b8   :  { %11877 = vmatprep.subr.bf16.mxu1 %v16092_v50  ;;  %v11050_v50 = vrot.slane %v11037_v31, %v11049_v43 }
 0x7ba   :  { %11919 = vmatpush2.bf16.msra.mxu0 %v16093_v32 }
 0x7bb   :  { %11878 = vmatpush2.bf16.msra.mxu1 %v16090_v39  ;;  %11920 = vmatprep.subr.bf16.mxu0 %v16101_v58 }
 0x7bc   :  { %11879 = vmatprep.subr.bf16.mxu1 %v16098_v18  ;;  %v11046_v18 = vrot.slane %v11037_v31, %v17184_v38 }
 0x7be   :  { %11921 = vmatpush2.bf16.msra.mxu0 %v16099_v45 }
 0x7bf   :  { %11880 = vmatpush2.bf16.msra.mxu1 %v16096_v53  ;;  %11922 = vmatprep.subr.bf16.mxu0 %v16107_v4 }
 0x7c0   :  { %11881 = vmatprep.subr.bf16.mxu1 %v16104_v17  ;;  %v11054_v17 = vrot.slane %v11037_v31, %v11053_v6  ;;  %v16180_v31 = vld [vmem:[#allocation19 + $0x8] ss:$16 sps:$4 sm:$0xff]  }
 0x7c2   :  { %11923 = vmatpush2.bf16.msra.mxu0 %v16105_v19 }
 0x7c3   :  { %11882 = vmatpush2.bf16.msra.mxu1 %v16102_v14  ;;  %11924 = vmatprep.subr.bf16.mxu0 %v16113_v29 }
 0x7c4   :  { %11883 = vmatprep.subr.bf16.mxu1 %v16110_v56 }
 0x7c6   :  { %11925 = vmatpush2.bf16.msra.mxu0 %v16111_v8 }
 0x7c7   :  { %11884 = vmatpush2.bf16.msra.mxu1 %v16108_v54  ;;  %11926 = vmatprep.subr.bf16.mxu0 %v16119_v59 }
 0x7c8   :  { %11885 = vmatprep.subr.bf16.mxu1 %v16116_v61 }
 0x7ca   :  { %11927 = vmatpush2.bf16.msra.mxu0 %v16117_v25 }
 0x7cb   :  { %11886 = vmatpush2.bf16.msra.mxu1 %v16114_v22  ;;  %11928 = vmatprep.subr.bf16.mxu0 %v16125_v55 }
 0x7cc   :  { %11887 = vmatprep.subr.bf16.mxu1 %v16122_v49 }
 0x7ce   :  { %11929 = vmatpush2.bf16.msra.mxu0 %v16123_v0 }
 0x7cf   :  { %11888 = vmatpush2.bf16.msra.mxu1 %v16120_v41  ;;  %11930 = vmatprep.subr.bf16.mxu0 %v16131_v33  ;;  %v16153_v33 = vld [vmem:[#allocation19 + $0x2a8] ss:$16 sps:$4 sm:$0xff]  }
 0x7d0   :  { %11889 = vmatprep.subr.bf16.mxu1 %v16128_v1  ;;  %v16150_v1 = vld [vmem:[#allocation19 + $0xa8] ss:$16 sps:$4 sm:$0xff]  }
 0x7d2   :  { %11931 = vmatpush2.bf16.msra.mxu0 %v16129_v48  ;;  %v16161_v48 = vld [vmem:[#allocation19 + $0x28c] ss:$16 sps:$4 sm:$0xff]  }
 0x7d3   :  { %11890 = vmatpush2.bf16.msra.mxu1 %v16126_v46  ;;  %11932 = vmatprep.subr.bf16.mxu0 %v16137_v28  ;;  %v16158_v46 = vld [vmem:[#allocation19 + $0x8c] ss:$16 sps:$4 sm:$0xff]  }
 0x7d4   :  { %v16167_v28 = vld [vmem:[#allocation19 + $0x26c] ss:$16 sps:$4 sm:$0xff]  }
 0x7d6   :  { %11933 = vmatpush2.bf16.msra.mxu0 %v16135_v62  ;;  %v16164_v62 = vld [vmem:[#allocation19 + $0x6c] ss:$16 sps:$4 sm:$0xff]  }
 0x7d8   :  { %v10003_v9 = vpop.f32.mrf.mxu1 }
 0x7d9   :  { %v10051_v44 = vadd.f32 %v10003_v9, %v17513_v11  ;;  %v10044_v10 = vpop.f32.mrf.mxu0  ;;  %v16132_v11 = vld [vmem:[#allocation19 + $0x100] ss:$16 sps:$4 sm:$0xff]  }
 0x7da   :  { %v10053_v60 = vadd.f32 %v10044_v10, %v17516_v37  ;;  %v10005_v47 = vpop.f32.mrf.mxu1  ;;  %v16134_v37 = vld [vmem:[#allocation19 + $0x104] ss:$16 sps:$4 sm:$0xff]  }
 0x7db   :  { %v10052_v24 = vadd.f32 %v10005_v47, %v17519_v13  ;;  %v10046_v26 = vpop.f32.mrf.mxu0  ;;  %11891 = vmatprep.subr.bf16.mxu1 %v16134_v37  ;;  %v16140_v13 = vld [vmem:[#allocation19 + $0xec] ss:$16 sps:$4 sm:$0xff]   ;;  %v16141_v47 = vld [vmem:[#allocation19 + $0x2e8] ss:$16 sps:$4 sm:$0xff]  }
 0x7dc   :  { %v10054_v35 = vadd.f32 %v10046_v26, %v17522_v42  ;;  %v10007_v21 = vpop.f32.mrf.mxu1  ;;  %v16143_v42 = vld [vmem:[#allocation19 + $0x2ec] ss:$16 sps:$4 sm:$0xff]   ;;  %11892 = vmatpush2.bf16.msra.mxu1 %v16132_v11  ;;  %v16156_v11 = vld [vmem:[#allocation19 + $0x88] ss:$16 sps:$4 sm:$0xff]  }
 0x7dd   :  { %v10048_v23 = vpop.f32.mrf.mxu0  ;;  %11943 = vmatprep.subr.bf16.mxu1 %v16140_v13  ;;  %11984 = vmatprep.subr.bf16.mxu0 %v16143_v42  ;;  %v16146_v26 = vld [vmem:[#allocation19 + $0xcc] ss:$16 sps:$4 sm:$0xff]   ;;  %v16144_v21 = vld [vmem:[#allocation19 + $0xc8] ss:$16 sps:$4 sm:$0xff]  }
 0x7de   :  { %v10008_v12 = vpop.f32.mrf.mxu1  ;;  %v16147_v23 = vld [vmem:[#allocation19 + $0x2c8] ss:$16 sps:$4 sm:$0xff]  }
 0x7df   :  { %v10049_v27 = vpop.f32.mrf.mxu0  ;;  %v16152_v12 = vld [vmem:[#allocation19 + $0xac] ss:$16 sps:$4 sm:$0xff]   ;;  %v16159_v37 = vld [vmem:[#allocation19 + $0x288] ss:$16 sps:$4 sm:$0xff]  }
 0x7e0   :  { %v16155_v27 = vld [vmem:[#allocation19 + $0x2ac] ss:$16 sps:$4 sm:$0xff]   ;;  %v16162_v13 = vld [vmem:[#allocation19 + $0x68] ss:$16 sps:$4 sm:$0xff]  }
 0x7e1   :  { %v16165_v42 = vld [vmem:[#allocation19 + $0x268] ss:$16 sps:$4 sm:$0xff]  }
 0x818   :  { %v10490_v16 = vpop.f32.mrf.mxu1 }
 0x819   :  { %v10538_v3 = vadd.f32 %v10490_v16, %v10051_v44  ;;  %v10531_v15 = vpop.f32.mrf.mxu0  ;;  %v16138_v44 = vld [vmem:[#allocation19 + $0xe8] ss:$16 sps:$4 sm:$0xff]   ;;  %v16170_v16 = vld [vmem:[#allocation19 + $0x4c] ss:$16 sps:$4 sm:$0xff]  }
 0x81a   :  { %v10540_v51 = vadd.f32 %v10531_v15, %v10053_v60  ;;  %v10492_v34 = vpop.f32.mrf.mxu1  ;;  %v16168_v15 = vld [vmem:[#allocation19 + $0x48] ss:$16 sps:$4 sm:$0xff]  }
 0x81b   :  { %v10533_v40 = vpop.f32.mrf.mxu0  ;;  %v10539_v2 = vadd.f32 %v10492_v34, %v10052_v24  ;;  %v16176_v34 = vld [vmem:[#allocation19 + $0x2c] ss:$16 sps:$4 sm:$0xff]  }
 0x81c   :  { %v10494_v20 = vpop.f32.mrf.mxu1  ;;  %v10541_v58 = vadd.f32 %v10533_v40, %v10054_v35  ;;  %v16149_v35 = vld [vmem:[#allocation19 + $0x2cc] ss:$16 sps:$4 sm:$0xff]  }
 0x81d   :  { %v10535_v30 = vpop.f32.mrf.mxu0  ;;  %v16179_v40 = vld [vmem:[#allocation19 + $0x22c] ss:$16 sps:$4 sm:$0xff]   ;;  %v16174_v20 = vld [vmem:[#allocation19 + $0x28] ss:$16 sps:$4 sm:$0xff]  }
 0x81e   :  { %v10495_v5 = vpop.f32.mrf.mxu1  ;;  %v16177_v30 = vld [vmem:[#allocation19 + $0x228] ss:$16 sps:$4 sm:$0xff]  }
 0x81f   :  { %v10536_v63 = vpop.f32.mrf.mxu0  ;;  %v16182_v5 = vld [vmem:[#allocation19 + $0xc] ss:$16 sps:$4 sm:$0xff]  }
 0x820   :  { %v16185_v63 = vld [vmem:[#allocation19 + $0x20c] ss:$16 sps:$4 sm:$0xff]  }
 0x858   :  { %v10977_v7 = vpop.f32.mrf.mxu1 }
 0x859   :  { %v11025_v39 = vadd.f32 %v10977_v7, %v10538_v3  ;;  %v11018_v32 = vpop.f32.mrf.mxu0  ;;  %v16173_v3 = vld [vmem:[#allocation19 + $0x24c] ss:$16 sps:$4 sm:$0xff]  }
 0x85a   :  { %v11027_v53 = vadd.f32 %v11018_v32, %v10540_v51  ;;  %v10979_v45 = vpop.f32.mrf.mxu1  ;;  %v16171_v51 = vld [vmem:[#allocation19 + $0x248] ss:$16 sps:$4 sm:$0xff]   ;;  %v16188_v7 = vld [vmem:[#allocation19 + $0x1ec] ss:$16 sps:$4 sm:$0xff]  }
 0x85b   :  { %v11059_v4 = vadd.f32 %v11042_v36, %v11025_v39  ;;  %v11026_v14 = vadd.f32 %v10979_v45, %v10539_v2  ;;  %v11020_v19 = vpop.f32.mrf.mxu0  ;;  %v16183_v36 = vld [vmem:[#allocation19 + $0x208] ss:$16 sps:$4 sm:$0xff]   ;;  %v16194_v32 = vld [vmem:[#allocation19 + $0x1cc] ss:$16 sps:$4 sm:$0xff]  }
 0x85c   :  { %v11061_v56 = vadd.f32 %v11050_v50, %v11027_v53  ;;  %v11028_v29 = vadd.f32 %v11020_v19, %v10541_v58  ;;  %v10981_v54 = vpop.f32.mrf.mxu1  ;;  %v16191_v50 = vld [vmem:[#allocation19 + $0x3ec] ss:$16 sps:$4 sm:$0xff]   ;;  %v16186_v2 = vld [vmem:[#allocation19 + $0x1e8] ss:$16 sps:$4 sm:$0xff]  }
 0x85d   :  { %v11060_v8 = vadd.f32 %v11046_v18, %v11026_v14  ;;  %v11022_v61 = vpop.f32.mrf.mxu0  ;;  %v11063_v59 = vmax.f32 %v11059_v4, 0.0  ;;  %v16189_v39 = vld [vmem:[#allocation19 + $0x3e8] ss:$16 sps:$4 sm:$0xff]   ;;  %v16197_v18 = vld [vmem:[#allocation19 + $0x3cc] ss:$16 sps:$4 sm:$0xff]  }
 0x85e   :  { %v11062_v22 = vadd.f32 %v11054_v17, %v11028_v29  ;;  %v10982_v25 = vpop.f32.mrf.mxu1  ;;  %v11065_v49 = vmax.f32 %v11061_v56, 0.0  ;;  %v16192_v58 = vld [vmem:[#allocation19 + $0x1c8] ss:$16 sps:$4 sm:$0xff]   ;;  %v16200_v45 = vld [vmem:[#allocation19 + $0x1ac] ss:$16 sps:$4 sm:$0xff]  }
 0x85f   :  { %v11064_v55 = vmax.f32 %v11060_v8, 0.0  ;;  %v11023_v41 = vpop.f32.mrf.mxu0  ;;  %v17536_v10 = vpack.c.bf16 %v11063_v59, %v11063_v59  ;;  %v16195_v53 = vld [vmem:[#allocation19 + $0x3c8] ss:$16 sps:$4 sm:$0xff]   ;;  %v16203_v17 = vld [vmem:[#allocation19 + $0x3ac] ss:$16 sps:$4 sm:$0xff]  }
 0x860   :  { %v11066_v0 = vmax.f32 %v11062_v22, 0.0  ;;  %v17538_v24 = vpack.c.bf16 %v11065_v49, %v11065_v49  ;;  %v16198_v4 = vld [vmem:[#allocation19 + $0x1a8] ss:$16 sps:$4 sm:$0xff]   ;;  %v16206_v19 = vld [vmem:[#allocation19 + $0x18c] ss:$16 sps:$4 sm:$0xff]  }
 0x861   :  { %v11068_v9 = vpack.c.bf16 %v11064_v55, %v11064_v55  ;;  %v16201_v14 = vld [vmem:[#allocation19 + $0x3a8] ss:$16 sps:$4 sm:$0xff]   ;;  %v16209_v56 = vld [vmem:[#allocation19 + $0x38c] ss:$16 sps:$4 sm:$0xff]  }
 0x862   :  { %v11070_v60 = vpack.c.bf16 %v11066_v0, %v11066_v0  ;;  %v16204_v29 = vld [vmem:[#allocation19 + $0x188] ss:$16 sps:$4 sm:$0xff]   ;;  %v16212_v8 = vld [vmem:[#allocation19 + $0x16c] ss:$16 sps:$4 sm:$0xff]  }
 0x863   :  { %11893 = vmatprep.mubr.bf16.mxu1 %v11068_v9  ;;  %v16207_v54 = vld [vmem:[#allocation19 + $0x388] ss:$16 sps:$4 sm:$0xff]   ;;  %v16215_v61 = vld [vmem:[#allocation19 + $0x36c] ss:$16 sps:$4 sm:$0xff]  }
 0x864   :  { %11934 = vmatprep.mubr.bf16.mxu0 %v11070_v60  ;;  %11894 = vmatmul.mubr.bf16.vlgmr.msra.gmra.mxu1 %v17536_v10  ;;  %v16210_v59 = vld [vmem:[#allocation19 + $0x168] ss:$16 sps:$4 sm:$0xff]   ;;  %v16218_v25 = vld [vmem:[#allocation19 + $0x14c] ss:$16 sps:$4 sm:$0xff]  }
 0x865   :  { %11935 = vmatmul.mubr.bf16.vlgmr.msra.gmra.mxu0 %v17538_v24  ;;  %11944 = vmatpush1.bf16.msra.mxu1 %v16138_v44  ;;  %v16213_v22 = vld [vmem:[#allocation19 + $0x368] ss:$16 sps:$4 sm:$0xff]   ;;  %v16221_v49 = vld [vmem:[#allocation19 + $0x34c] ss:$16 sps:$4 sm:$0xff]  }
 0x866   :  { %11985 = vmatpush1.bf16.msra.mxu0 %v16141_v47  ;;  %11975 = vmatprep.mubr.bf16.mxu1 %v11068_v9  ;;  %v16216_v55 = vld [vmem:[#allocation19 + $0x148] ss:$16 sps:$4 sm:$0xff]   ;;  %v16224_v0 = vld [vmem:[#allocation19 + $0x12c] ss:$16 sps:$4 sm:$0xff]  }
 0x867   :  { %12016 = vmatprep.mubr.bf16.mxu0 %v11070_v60  ;;  %11945 = vmatprep.subr.bf16.mxu1 %v16146_v26  ;;  %v16219_v41 = vld [vmem:[#allocation19 + $0x348] ss:$16 sps:$4 sm:$0xff]   ;;  %v16227_v9 = vld [vmem:[#allocation19 + $0x32c] ss:$16 sps:$4 sm:$0xff]  }
 0x868   :  { %11986 = vmatprep.subr.bf16.mxu0 %v16149_v35  ;;  %v16222_v44 = vld [vmem:[#allocation19 + $0x128] ss:$16 sps:$4 sm:$0xff]   ;;  %v16230_v47 = vld [vmem:[#allocation19 + $0x10c] ss:$16 sps:$4 sm:$0xff]  }
 0x869   :  { %11946 = vmatpush1.bf16.msra.mxu1 %v16144_v21  ;;  %v16225_v60 = vld [vmem:[#allocation19 + $0x328] ss:$16 sps:$4 sm:$0xff]   ;;  %v16233_v26 = vld [vmem:[#allocation19 + $0x30c] ss:$16 sps:$4 sm:$0xff]  }
 0x86a   :  { %11987 = vmatpush1.bf16.msra.mxu0 %v16147_v23  ;;  %11947 = vmatprep.subr.bf16.mxu1 %v16152_v12  ;;  %v16228_v35 = vld [vmem:[#allocation19 + $0x108] ss:$16 sps:$4 sm:$0xff]   ;;  %v16234_v23 = vld [vmem:[#allocation22 + $0x78] sm:$0xff]  }
 0x86b   :  { %11988 = vmatprep.subr.bf16.mxu0 %v16155_v27  ;;  %v16231_v21 = vld [vmem:[#allocation19 + $0x308] ss:$16 sps:$4 sm:$0xff]   ;;  %v16235_v12 = vld [vmem:[#allocation22 + $0x38] sm:$0xff]  }
 0x86c   :  { %v16236_v27 = vld [vmem:[#allocation22 + $0x70] sm:$0xff]  }
 0x86d   :  { %11948 = vmatpush1.bf16.msra.mxu1 %v16150_v1  ;;  %v16237_v1 = vld [vmem:[#allocation22 + $0x30] sm:$0xff]  }
 0x86e   :  { %11989 = vmatpush1.bf16.msra.mxu0 %v16153_v33  ;;  %11949 = vmatprep.subr.bf16.mxu1 %v16158_v46  ;;  %v16238_v33 = vld [vmem:[#allocation22 + $0x68] sm:$0xff]  }
 0x86f   :  { %11990 = vmatprep.subr.bf16.mxu0 %v16161_v48  ;;  %v16239_v46 = vld [vmem:[#allocation22 + $0x28] sm:$0xff]   ;;  %v16240_v48 = vld [vmem:[#allocation22 + $0x60] sm:$0xff]  }
 0x871   :  { %11950 = vmatpush1.bf16.msra.mxu1 %v16156_v11  ;;  %v16241_v11 = vld [vmem:[#allocation22 + $0x20] sm:$0xff]  }
 0x872   :  { %11991 = vmatpush1.bf16.msra.mxu0 %v16159_v37  ;;  %11951 = vmatprep.subr.bf16.mxu1 %v16164_v62  ;;  %v16242_v37 = vld [vmem:[#allocation22 + $0x58] sm:$0xff]  }
 0x873   :  { %11992 = vmatprep.subr.bf16.mxu0 %v16167_v28  ;;  %v16243_v62 = vld [vmem:[#allocation22 + $0x18] sm:$0xff]   ;;  %v16244_v28 = vld [vmem:[#allocation22 + $0x50] sm:$0xff]  }
 0x875   :  { %11952 = vmatpush1.bf16.msra.mxu1 %v16162_v13  ;;  %v16247_v13 = vld [vmem:[#allocation22 + $0x8] sm:$0xff]  }
 0x876   :  { %11993 = vmatpush1.bf16.msra.mxu0 %v16165_v42  ;;  %11953 = vmatprep.subr.bf16.mxu1 %v16170_v16  ;;  %v16248_v42 = vld [vmem:[#allocation22 + $0x40] sm:$0xff]  }
 0x877   :  { %11994 = vmatprep.subr.bf16.mxu0 %v16173_v3  ;;  %v16249_v16 = vld [vmem:[#allocation22] sm:$0xff]   ;;  %v16250_v3 = vld [vmem:[#allocation22 + $0xf8] sm:$0xff]  }
 0x879   :  { %11954 = vmatpush1.bf16.msra.mxu1 %v16168_v15  ;;  %v11199_v15 = vld [vmem:[#allocation20] sm:$0xf] }
 0x87a   :  { %11995 = vmatpush1.bf16.msra.mxu0 %v16171_v51  ;;  %11955 = vmatprep.subr.bf16.mxu1 %v16176_v34  ;;  %v11204_v51 = vrot.slane %v11199_v15, %v17177_v57  ;;  %v11208_v34 = vrot.slane %v11199_v15, %v17184_v38  ;;  %v16252_v57 = vld [vmem:[#allocation22 + $0xf0] sm:$0xff]  }
 0x87b   :  { %11996 = vmatprep.subr.bf16.mxu0 %v16179_v40  ;;  %v16253_v38 = vld [vmem:[#allocation22 + $0xb0] sm:$0xff]  }
 0x87d   :  { %11956 = vmatpush1.bf16.msra.mxu1 %v16174_v20 }
 0x87e   :  { %11997 = vmatpush1.bf16.msra.mxu0 %v16177_v30  ;;  %11957 = vmatprep.subr.bf16.mxu1 %v16182_v5 }
 0x87f   :  { %11998 = vmatprep.subr.bf16.mxu0 %v16185_v63 }
 0x881   :  { %11958 = vmatpush1.bf16.msra.mxu1 %v16180_v31 }
 0x882   :  { %11999 = vmatpush1.bf16.msra.mxu0 %v16183_v36  ;;  %11959 = vmatprep.subr.bf16.mxu1 %v16188_v7 }
 0x883   :  { %12000 = vmatprep.subr.bf16.mxu0 %v16191_v50 }
 0x885   :  { %11960 = vmatpush2.bf16.msra.mxu1 %v16186_v2 }
 0x886   :  { %12001 = vmatpush2.bf16.msra.mxu0 %v16189_v39  ;;  %11961 = vmatprep.subr.bf16.mxu1 %v16194_v32 }
 0x887   :  { %12002 = vmatprep.subr.bf16.mxu0 %v16197_v18 }
 0x889   :  { %11962 = vmatpush2.bf16.msra.mxu1 %v16192_v58 }
 0x88a   :  { %12003 = vmatpush2.bf16.msra.mxu0 %v16195_v53  ;;  %11963 = vmatprep.subr.bf16.mxu1 %v16200_v45  ;;  %v16251_v45 = vld [vmem:[#allocation22 + $0xb8] sm:$0xff]  }
 0x88b   :  { %12004 = vmatprep.subr.bf16.mxu0 %v16203_v17 }
 0x88d   :  { %11964 = vmatpush2.bf16.msra.mxu1 %v16198_v4  ;;  %v16254_v4 = vld [vmem:[#allocation22 + $0xe8] sm:$0xff]  }
 0x88e   :  { %12005 = vmatpush2.bf16.msra.mxu0 %v16201_v14  ;;  %11965 = vmatprep.subr.bf16.mxu1 %v16206_v19  ;;  %v16255_v14 = vld [vmem:[#allocation22 + $0xa8] sm:$0xff]   ;;  %v16256_v19 = vld [vmem:[#allocation22 + $0xe0] sm:$0xff]  }
 0x88f   :  { %12006 = vmatprep.subr.bf16.mxu0 %v16209_v56  ;;  %v16257_v56 = vld [vmem:[#allocation22 + $0xa0] sm:$0xff]  }
 0x891   :  { %11966 = vmatpush2.bf16.msra.mxu1 %v16204_v29  ;;  %v16258_v29 = vld [vmem:[#allocation22 + $0xd8] sm:$0xff]  }
 0x892   :  { %12007 = vmatpush2.bf16.msra.mxu0 %v16207_v54  ;;  %11967 = vmatprep.subr.bf16.mxu1 %v16212_v8  ;;  %v16259_v54 = vld [vmem:[#allocation22 + $0x98] sm:$0xff]   ;;  %v16260_v8 = vld [vmem:[#allocation22 + $0xd0] sm:$0xff]  }
 0x893   :  { %12008 = vmatprep.subr.bf16.mxu0 %v16215_v61  ;;  %v16261_v61 = vld [vmem:[#allocation22 + $0x90] sm:$0xff]  }
 0x895   :  { %11968 = vmatpush2.bf16.msra.mxu1 %v16210_v59  ;;  %v16262_v59 = vld [vmem:[#allocation22 + $0xc8] sm:$0xff]  }
 0x896   :  { %12009 = vmatpush2.bf16.msra.mxu0 %v16213_v22  ;;  %11969 = vmatprep.subr.bf16.mxu1 %v16218_v25  ;;  %v16263_v22 = vld [vmem:[#allocation22 + $0x88] sm:$0xff]   ;;  %v16264_v25 = vld [vmem:[#allocation22 + $0xc0] sm:$0xff]  }
 0x897   :  { %12010 = vmatprep.subr.bf16.mxu0 %v16221_v49  ;;  %v16265_v49 = vld [vmem:[#allocation22 + $0x80] sm:$0xff]  }
 0x899   :  { %11970 = vmatpush2.bf16.msra.mxu1 %v16216_v55  ;;  %v11212_v55 = vrot.slane %v11199_v15, %v11049_v43 }
 0x89a   :  { %12011 = vmatpush2.bf16.msra.mxu0 %v16219_v41  ;;  %11971 = vmatprep.subr.bf16.mxu1 %v16224_v0  ;;  %v11216_v41 = vrot.slane %v11199_v15, %v11053_v6 }
 0x89b   :  { %12012 = vmatprep.subr.bf16.mxu0 %v16227_v9 }
 0x89d   :  { %11972 = vmatpush2.bf16.msra.mxu1 %v16222_v44 }
 0x89e   :  { %12013 = vmatpush2.bf16.msra.mxu0 %v16225_v60  ;;  %11973 = vmatprep.subr.bf16.mxu1 %v16230_v47 }
 0x89f   :  { %12014 = vmatprep.subr.bf16.mxu0 %v16233_v26 }
 0x8a1   :  { %11974 = vmatpush2.bf16.msra.mxu1 %v16228_v35 }
 0x8a2   :  { %12015 = vmatpush2.bf16.msra.mxu0 %v16231_v21  ;;  %14083 = vmatprep.subr.bf16.mxu1 %v16234_v23 }
 0x8a4   :  { %11976 = vmatmul.mubr.bf16.vlgmr.msra.gmra.mxu1 %v17536_v10  ;;  %v16245_v10 = vld [vmem:[#allocation22 + $0x10] sm:$0xff]  }
 0x8a5   :  { %12017 = vmatmul.mubr.bf16.vlgmr.msra.gmra.mxu0 %v17538_v24  ;;  %14084 = vmatpush3.bf16.msra.mxu1 %v16235_v12  ;;  %v16246_v24 = vld [vmem:[#allocation22 + $0x48] sm:$0xff]  }
 0x8a6   :  { %14085 = vmatprep.subr.bf16.mxu1 %v16236_v27 }
 0x8a9   :  { %14086 = vmatpush3.bf16.msra.mxu1 %v16237_v1 }
 0x8aa   :  { %14087 = vmatprep.subr.bf16.mxu1 %v16238_v33 }
 0x8ad   :  { %14088 = vmatpush3.bf16.msra.mxu1 %v16239_v46 }
 0x8ae   :  { %14089 = vmatprep.subr.bf16.mxu1 %v16240_v48 }
 0x8b1   :  { %14090 = vmatpush3.bf16.msra.mxu1 %v16241_v11 }
 0x8b2   :  { %14091 = vmatprep.subr.bf16.mxu1 %v16242_v37 }
 0x8b5   :  { %14092 = vmatpush3.bf16.msra.mxu1 %v16243_v62 }
 0x8b6   :  { %14093 = vmatprep.subr.bf16.mxu1 %v16244_v28  ;;  %v13852_v28 = vld [vmem:[#allocation23] ss:$0 sm:$0xff] }
 0x8b9   :  { %14094 = vmatpush3.bf16.msra.mxu1 %v16245_v10 }
 0x8ba   :  { %14095 = vmatprep.subr.bf16.mxu1 %v16246_v24 }
 0x8bd   :  { %14096 = vmatpush3.bf16.msra.mxu1 %v16247_v13 }
 0x8be   :  { %14097 = vmatprep.subr.bf16.mxu1 %v16248_v42 }
 0x8c1   :  { %14098 = vmatpush3.bf16.msra.mxu1 %v16249_v16 }
 0x8c2   :  { %14105 = vmatprep.subr.bf16.mxu1 %v16250_v3 }
 0x924   :  { %v11895_v40 = vpop.f32.mrf.mxu1 }
 0x925   :  { %v11896_v20 = vadd.f32 %v11895_v40, %v11204_v51  ;;  %v11936_v30 = vpop.f32.mrf.mxu0 }
 0x926   :  { %v11897_v5 = vpop.f32.mrf.mxu1 }
 0x927   :  { %v11937_v63 = vadd.f32 %v11936_v30, %v11896_v20  ;;  %v11898_v31 = vadd.f32 %v11897_v5, %v11208_v34  ;;  %v11938_v36 = vpop.f32.mrf.mxu0 }
 0x928   :  { %v11899_v7 = vpop.f32.mrf.mxu1 }
 0x929   :  { %v11939_v50 = vadd.f32 %v11938_v36, %v11898_v31  ;;  %v11940_v2 = vpop.f32.mrf.mxu0  ;;  %v12025_v39 = vmax.f32 %v11937_v63, 0.0 }
 0x92a   :  { %v11900_v32 = vpop.f32.mrf.mxu1 }
 0x92b   :  { %v12026_v18 = vmax.f32 %v11939_v50, 0.0  ;;  %v11941_v58 = vpop.f32.mrf.mxu0  ;;  %v12029_v17 = vpack.c.bf16 %v12025_v39, %v12025_v39 }
 0x92d   :  { %v12030_v53 = vpack.c.bf16 %v12026_v18, %v12026_v18 }
 0x92f   :  { %12328 = vmatprep.mubr.bf16.mxu1 %v12030_v53 }
 0x930   :  { %12329 = vmatmul.mubr.bf16.vlgmr.msra.gmra.mxu1 %v12029_v17 }
 0x931   :  { %14106 = vmatpush3.bf16.msra.mxu1 %v16251_v45 }
 0x932   :  { %14107 = vmatprep.subr.bf16.mxu1 %v16252_v57 }
 0x935   :  { %14108 = vmatpush3.bf16.msra.mxu1 %v16253_v38 }
 0x936   :  { %14109 = vmatprep.subr.bf16.mxu1 %v16254_v4 }
 0x939   :  { %14110 = vmatpush3.bf16.msra.mxu1 %v16255_v14 }
 0x93a   :  { %14111 = vmatprep.subr.bf16.mxu1 %v16256_v19 }
 0x93d   :  { %14112 = vmatpush3.bf16.msra.mxu1 %v16257_v56 }
 0x93e   :  { %14113 = vmatprep.subr.bf16.mxu1 %v16258_v29 }
 0x941   :  { %14114 = vmatpush3.bf16.msra.mxu1 %v16259_v54 }
 0x942   :  { %14115 = vmatprep.subr.bf16.mxu1 %v16260_v8 }
 0x945   :  { %14116 = vmatpush3.bf16.msra.mxu1 %v16261_v61 }
 0x946   :  { %14117 = vmatprep.subr.bf16.mxu1 %v16262_v59 }
 0x949   :  { %14118 = vmatpush3.bf16.msra.mxu1 %v16263_v22 }
 0x94a   :  { %14119 = vmatprep.subr.bf16.mxu1 %v16264_v25 }
 0x94d   :  { %14120 = vmatpush3.bf16.msra.mxu1 %v16265_v49 }
 0x964   :  { %v11977_v0 = vpop.f32.mrf.mxu1 }
 0x965   :  { %v11978_v9 = vadd.f32 %v11977_v0, %v11212_v55  ;;  %v12018_v44 = vpop.f32.mrf.mxu0 }
 0x966   :  { %v11979_v60 = vpop.f32.mrf.mxu1 }
 0x967   :  { %v12019_v47 = vadd.f32 %v12018_v44, %v11978_v9  ;;  %v11980_v26 = vadd.f32 %v11979_v60, %v11216_v41  ;;  %v12020_v35 = vpop.f32.mrf.mxu0 }
 0x968   :  { %v11981_v21 = vpop.f32.mrf.mxu1 }
 0x969   :  { %v12021_v23 = vadd.f32 %v12020_v35, %v11980_v26  ;;  %v12022_v12 = vpop.f32.mrf.mxu0  ;;  %v12027_v27 = vmax.f32 %v12019_v47, 0.0 }
 0x96a   :  { %v11982_v1 = vpop.f32.mrf.mxu1 }
 0x96b   :  { %v12028_v33 = vmax.f32 %v12021_v23, 0.0  ;;  %v12023_v46 = vpop.f32.mrf.mxu0  ;;  %v12031_v11 = vpack.c.bf16 %v12027_v27, %v12027_v27 }
 0x96d   :  { %v12032_v48 = vpack.c.bf16 %v12028_v33, %v12028_v33 }
 0x96f   :  { %12368 = vmatprep.mubr.bf16.mxu1 %v12032_v48 }
 0x970   :  { %12369 = vmatmul.mubr.bf16.vlgmr.msra.gmra.mxu1 %v12031_v11 }
 0x9f0   :  { %v14099_v52 = vpop.f32.mrf.mxu1 }
 0x9f2   :  { %v14100_v43 = vpop.f32.mrf.mxu1 }
 0x9f3   :  { %v14101_v62 = vadd.f32 %v14100_v43, %v14099_v52 }
 0x9f4   :  { %v14102_v6 = vpop.f32.mrf.mxu1 }
 0x9f5   :  { %v12331_v13 = vadd.f32 %v14101_v62, %v13852_v28 }
 0x9f6   :  { %v14103_v37 = vpop.f32.mrf.mxu1 }
 0xa30   :  { %v14121_v10 = vpop.f32.mrf.mxu1 }
 0xa32   :  { %v14122_v24 = vpop.f32.mrf.mxu1 }
 0xa33   :  { %v14123_v42 = vadd.f32 %v14122_v24, %v14121_v10 }
 0xa34   :  { %v14124_v16 = vpop.f32.mrf.mxu1 }
 0xa35   :  { %v12371_v3 = vadd.f32 %v14123_v42, %v12331_v13 }
 0xa36   :  { %v14125_v15 = vpop.f32.mrf.mxu1 }
 0xa37   :  { %12376 = vst [vmem:[%s17566_s13] sm:$0xff] %v12371_v3 }
 0xa38   :  { %12381 = vsyncpa [#allocation7], 1 }
 0xa39   :  { %12382 = vsyncpa [#allocation9], 1 }
 0xa3a   :  { %12383 = vsyncpa [#allocation12], 1 }
 0xa3b   :  { %12384 = vsyncpa [#allocation15], 1 }
 0xa3c   :  { %12385 = vsyncpa [#allocation18], 1 }
 0xa3d   :  { %12386 = vsyncpa [#allocation21], 1 }
 0xa3e   :  { %12387 = vsyncpa [#allocation24], 1 }

</bundles_post_ra>
